<compile_context>
chip_gen: v5e
topology: v5e:2x2
jax: 0.10.0
libtpu: 0.0.40
codegen_flags: <defaults>
</compile_context>

<pallas_src>
import math

import jax
import jax.numpy as jnp
from jax.experimental import pallas as pl
from jax.experimental.pallas import tpu as pltpu


# ---- NPN nonlinearity constants (probit approximation of the sigmoid) --------------
_ZETA_SQ = math.pi / 8.0
_ALPHA = 4.0 - 2.0 * math.sqrt(2.0)
_BETA = -math.log(math.sqrt(2.0) + 1.0)


def _npn_sigmoid(o_m, o_s):
    a_m = jax.nn.sigmoid(o_m * jax.lax.rsqrt(1.0 + _ZETA_SQ * o_s))
    a_s = jax.nn.sigmoid(
        _ALPHA * (o_m + _BETA) * jax.lax.rsqrt(1.0 + _ZETA_SQ * _ALPHA * _ALPHA * o_s)
    ) - a_m * a_m
    return a_m, a_s


def _npn_tanh(o_m, o_s):
    # tanh(x) = 2*sigmoid(2x) - 1, with 2x ~ N(2*o_m, 4*o_s)
    sm = jax.nn.sigmoid(2.0 * o_m * jax.lax.rsqrt(1.0 + 4.0 * _ZETA_SQ * o_s))
    ss = jax.nn.sigmoid(
        _ALPHA * (2.0 * o_m + _BETA)
        * jax.lax.rsqrt(1.0 + 4.0 * _ZETA_SQ * _ALPHA * _ALPHA * o_s)
    ) - sm * sm
    return 2.0 * sm - 1.0, 4.0 * ss


def _ew_prod(o1_m, o1_s, o2_m, o2_s):
    # exact transcription of GaussianNPRN.elemwise_prod; divisions routed to the EUP
    o_m = (o1_s * o2_m + o2_s * o1_m) * pl.reciprocal(o1_m + o1_s, approx=True)
    o_s = o1_s * o2_s * pl.reciprocal(o1_s + o2_s, approx=True)
    return o_m, o_s


# ------------------------------ the Pallas kernel -----------------------------------
# Packed-weight layout (built once in the wrapper; column blocks are [z | r | hp | ip]):
#   w_mean (2H, 4H): rows [x_m | h_m]
#   w_var  (3H, 4H): rows [x_m^2 | h_s | h_m^2]   (shared-LHS variance terms pre-summed)
#   b_gate (2, 4H) : row 0 = mean biases, row 1 = variance biases
#   w_dec  (3H, 2O): rows [hn_m | hn_s | hn_m^2], cols [d_m | d_s]
#   b_dec  (1, 2O)
def _nprn_kernel(emb_ref, h0m_ref, h0s_ref, wmean_ref, wvar_ref, bgate_ref,
                 wdec_ref, bdec_ref, out_ref):
    S, B, E = emb_ref.shape
    H = h0m_ref.shape[1]
    O = bdec_ref.shape[1] // 2

    # loop-invariant loads, hoisted once
    Wm = wmean_ref[...]          # (2H, 4H)
    Wv = wvar_ref[...]           # (3H, 4H)
    Wd = wdec_ref[...]           # (3H, 2O)
    bm = bgate_ref[0:1, :]       # (1, 4H)
    bv = bgate_ref[1:2, :]       # (1, 4H)
    bd = bdec_ref[...]           # (1, 2O)

    h_m = h0m_ref[...]           # (B, H)
    h_s = h0s_ref[...]

    def mm(a, b):
        return jnp.dot(a, b, preferred_element_type=jnp.float32)

    # Fully-unrolled static time loop (S is small); use lax.fori_loop for long S.
    for t in range(S):
        x_m = emb_ref[t]                                      # (B, E); x_s == 0 exactly
        lhs_m = jnp.concatenate([x_m, h_m], axis=-1)          # (B, 2H)
        lhs_v = jnp.concatenate([x_m * x_m, h_s, h_m * h_m], axis=-1)  # (B, 3H)

        om = bm + mm(lhs_m, Wm)                               # (B, 4H) = [z|r|hp|ip] means
        ov = bv + mm(lhs_v, Wv)                               # (B, 4H) = [z|r|hp|ip] variances

        z_m, z_s = _npn_sigmoid(om[:, 0:H], ov[:, 0:H])
        r_m, r_s = _npn_sigmoid(om[:, H:2 * H], ov[:, H:2 * H])
        hp_m, hp_s = om[:, 2 * H:3 * H], ov[:, 2 * H:3 * H]   # h_proj (Ws_h linear layer)
        ip_m, ip_s = om[:, 3 * H:4 * H], ov[:, 3 * H:4 * H]   # in_proj (Ws_in linear layer)

        f_m, f_s = _ew_prod(r_m, r_s, hp_m, hp_s)
        s_m, s_s = _npn_tanh(ip_m + f_m, ip_s + f_s)

        h1_m, h1_s = _ew_prod(z_m, z_s, s_m, s_s)
        h2_m, h2_s = _ew_prod(1.0 - z_m, z_s, h_m, h_s)
        h_m = h1_m + h2_m
        h_s = h1_s + h2_s

        # decoder (NPN linear + sigmoid) applied to every hidden output (seq_labeling)
        dec_lhs = jnp.concatenate([h_m, h_s, h_m * h_m], axis=-1)   # (B, 3H)
        d = bd + mm(dec_lhs, Wd)                                    # (B, 2O)
        o_m, o_s = _npn_sigmoid(d[:, 0:O], d[:, O:2 * O])
        out_ref[t] = jnp.concatenate([o_m, o_s], axis=-1)           # VMEM store only


# ------------------------------ JAX glue / wrapper -----------------------------------
def gaussian_nprn_classifier_fwd(tokens, emb_weight, weights, h0_m, h0_s):
    """tokens (S,B) int32; emb_weight (V,E); weights = list of 24 arrays (same order as
    init_params); hidden (B,H) each.  Returns (out_m, out_s), each (S,B,O)."""
    S, B = tokens.shape
    E = emb_weight.shape[1]
    H = h0_m.shape[1]
    (wzi_m, wzi_s, wzh_m, wzh_s, bz_m, bz_s,
     wri_m, wri_s, wrh_m, wrh_s, br_m, br_s,
     wsi_m, wsi_s, wsh_m, wsh_s, bsi_m, bsi_s, bs_m, bs_s,
     wd_m, wd_s, bd_m, bd_s) = weights
    O = wd_m.shape[1]
    assert E == H, "reference code's h_s @ W_in_s term requires emb_sz == hidden_sz"

    f32 = jnp.float32
    zE = jnp.zeros((E, H), f32)
    zH = jnp.zeros((H, H), f32)
    zO = jnp.zeros((H, O), f32)

    # ---- one-time weight packing (plain JAX; hoists all constant squares/sums) ------
    w_mean = jnp.concatenate([
        jnp.concatenate([wzi_m, wri_m, zE, wsi_m], axis=1),               # x_m rows
        jnp.concatenate([wzh_m, wrh_m, wsh_m, zH], axis=1),               # h_m rows
    ], axis=0)                                                            # (2H, 4H)
    w_var = jnp.concatenate([
        jnp.concatenate([wzi_s, wri_s, zE, wsi_s], axis=1),               # x_m^2 rows
        jnp.concatenate([wzi_s + wzh_m ** 2, wri_s + wrh_m ** 2,
                         wsh_s + wsh_m ** 2, zH], axis=1),                # h_s rows
        jnp.concatenate([wzh_s, wrh_s, wsh_s, zH], axis=1),               # h_m^2 rows
    ], axis=0)                                                            # (3H, 4H)
    b_gate = jnp.concatenate([
        jnp.concatenate([bz_m, br_m, bs_m, bsi_m], axis=1),
        jnp.concatenate([bz_s, br_s, bs_s, bsi_s], axis=1),
    ], axis=0)                                                            # (2, 4H)
    w_dec = jnp.concatenate([
        jnp.concatenate([wd_m, zO], axis=1),                              # hn_m rows
        jnp.concatenate([zO, wd_s + wd_m ** 2], axis=1),                  # hn_s rows
        jnp.concatenate([zO, wd_s], axis=1),                              # hn_m^2 rows
    ], axis=0)                                                            # (3H, 2O)
    b_dec = jnp.concatenate([bd_m, bd_s], axis=1)                         # (1, 2O)

    emb = emb_weight[tokens].astype(f32)          # glue: embedding gather -> (S, B, E)

    vmem_full = pl.BlockSpec(memory_space=pltpu.MemorySpace.VMEM)  # whole array in VMEM

    out = pl.pallas_call(
        _nprn_kernel,
        out_shape=jax.ShapeDtypeStruct((S, B, 2 * O), f32),
        in_specs=[vmem_full] * 8,
        out_specs=vmem_full,
    )(emb, h0_m, h0_s, w_mean, w_var, b_gate, w_dec, b_dec)

    return out[..., :O], out[..., O:]


# ------------------------------ deterministic init -----------------------------------
def init_params(key, emb_sz, hidden_sz, output_sz):
    """Mirrors get_init_W / get_init_b.  pos_variance_transform(log(exp(W_s)-1)) == W_s,
    so we store the already-positive W_s directly (parameter setup = plain JAX)."""
    keys = iter(jax.random.split(key, 16))

    def W(_in, _out):
        scale = math.sqrt(6.0) / math.sqrt(_in + _out)
        w_m = (2.0 * scale * (jax.random.uniform(next(keys), (_in, _out)) - 0.5)
               ).astype(jnp.float32)
        w_s = (1.0 * scale * jax.random.uniform(next(keys), (_in, _out))
               ).astype(jnp.float32)
        return w_m, w_s

    def b(_out):
        b_m = jnp.zeros((1, _out), jnp.float32)
        # pos_variance_transform(p_s) with p_s = exp(-1)
        b_s = jnp.full((1, _out), float(math.log1p(math.exp(math.exp(-1.0)))),
                       jnp.float32)
        return b_m, b_s

    wzi_m, wzi_s = W(emb_sz, hidden_sz)
    wzh_m, wzh_s = W(hidden_sz, hidden_sz)
    bz_m, bz_s = b(hidden_sz)
    wri_m, wri_s = W(emb_sz, hidden_sz)
    wrh_m, wrh_s = W(hidden_sz, hidden_sz)
    br_m, br_s = b(hidden_sz)
    wsi_m, wsi_s = W(emb_sz, hidden_sz)
    wsh_m, wsh_s = W(hidden_sz, hidden_sz)
    bsi_m, bsi_s = b(hidden_sz)
    bs_m, bs_s = b(hidden_sz)
    wd_m, wd_s = W(hidden_sz, output_sz)
    bd_m, bd_s = b(output_sz)

    return [
        wzi_m, wzi_s, wzh_m, wzh_s, bz_m, bz_s,
        wri_m, wri_s, wrh_m, wrh_s, br_m, br_s,
        wsi_m, wsi_s, wsh_m, wsh_s, bsi_m, bsi_s, bs_m, bs_s,
        wd_m, wd_s, bd_m, bd_s,
    ]


if __name__ == "__main__":
    key = jax.random.PRNGKey(0)
    V, E, H, O, S, B = 50, 32, 32, 8, 8, 2   # E must equal H (see note at top)

    k_emb, k_tok, k_w = jax.random.split(key, 3)
    emb_weight = jax.random.normal(k_emb, (V, E), jnp.float32)   # nn.Embedding ~ N(0,1)
    tokens = jax.random.randint(k_tok, (S, B), 0, V, dtype=jnp.int32)
    weights = init_params(k_w, E, H, O)

    # init_hidden(batch) with eps = 0.0
    h0_m = jnp.zeros((B, H), jnp.float32)
    h0_s = jnp.zeros((B, H), jnp.float32)

    out_m, out_s = gaussian_nprn_classifier_fwd(tokens, emb_weight, weights, h0_m, h0_s)
    jax.block_until_ready((out_m, out_s))

    assert out_m.shape == (S, B, O) and out_s.shape == (S, B, O)
    assert bool(jnp.all(jnp.isfinite(out_m))) and bool(jnp.all(jnp.isfinite(out_s)))
    print("KERNEL_OK")
</pallas_src>

<mosaic_0001>
module attributes {stable_mosaic.version = 11 : i64} {
  func.func @_nprn_kernel(%arg0: memref<8x2x32xf32, #tpu.memory_space<vmem>>, %arg1: memref<2x32xf32, #tpu.memory_space<vmem>>, %arg2: memref<2x32xf32, #tpu.memory_space<vmem>>, %arg3: memref<64x128xf32, #tpu.memory_space<vmem>>, %arg4: memref<96x128xf32, #tpu.memory_space<vmem>>, %arg5: memref<2x128xf32, #tpu.memory_space<vmem>>, %arg6: memref<96x16xf32, #tpu.memory_space<vmem>>, %arg7: memref<1x16xf32, #tpu.memory_space<vmem>>, %arg8: memref<8x2x16xf32, #tpu.memory_space<vmem>>) attributes {dimension_semantics = [], scalar_prefetch = 0 : i64, scratch_operands = 0 : i64, tpu.core_type = #tpu.core_type<tc>} {
    %c0 = arith.constant 0 : index
    %c0_0 = arith.constant 0 : index
    %0 = vector.load %arg3[%c0, %c0_0] : memref<64x128xf32, #tpu.memory_space<vmem>>, vector<64x128xf32>
    %c0_1 = arith.constant 0 : index
    %c0_2 = arith.constant 0 : index
    %1 = vector.load %arg4[%c0_1, %c0_2] : memref<96x128xf32, #tpu.memory_space<vmem>>, vector<96x128xf32>
    %c0_3 = arith.constant 0 : index
    %c0_4 = arith.constant 0 : index
    %2 = vector.load %arg6[%c0_3, %c0_4] : memref<96x16xf32, #tpu.memory_space<vmem>>, vector<96x16xf32>
    %c0_5 = arith.constant 0 : index
    %c0_6 = arith.constant 0 : index
    %3 = vector.load %arg5[%c0_5, %c0_6] : memref<2x128xf32, #tpu.memory_space<vmem>>, vector<1x128xf32>
    %c1 = arith.constant 1 : index
    %c0_7 = arith.constant 0 : index
    %4 = vector.load %arg5[%c1, %c0_7] : memref<2x128xf32, #tpu.memory_space<vmem>>, vector<1x128xf32>
    %c0_8 = arith.constant 0 : index
    %c0_9 = arith.constant 0 : index
    %5 = vector.load %arg7[%c0_8, %c0_9] : memref<1x16xf32, #tpu.memory_space<vmem>>, vector<1x16xf32>
    %c0_10 = arith.constant 0 : index
    %c0_11 = arith.constant 0 : index
    %6 = vector.load %arg1[%c0_10, %c0_11] : memref<2x32xf32, #tpu.memory_space<vmem>>, vector<2x32xf32>
    %c0_12 = arith.constant 0 : index
    %c0_13 = arith.constant 0 : index
    %7 = vector.load %arg2[%c0_12, %c0_13] : memref<2x32xf32, #tpu.memory_space<vmem>>, vector<2x32xf32>
    %c0_14 = arith.constant 0 : index
    %c0_15 = arith.constant 0 : index
    %c0_16 = arith.constant 0 : index
    %8 = vector.load %arg0[%c0_14, %c0_15, %c0_16] : memref<8x2x32xf32, #tpu.memory_space<vmem>>, vector<1x2x32xf32>
    %9 = vector.shape_cast %8 : vector<1x2x32xf32> to vector<2x32xf32>
    %10 = tpu.concatenate %9, %6 in 1 : vector<2x32xf32>, vector<2x32xf32> -> vector<2x64xf32>
    %11 = arith.mulf %9, %9 : vector<2x32xf32>
    %12 = arith.mulf %6, %6 : vector<2x32xf32>
    %13 = tpu.concatenate %11, %7, %12 in 1 : vector<2x32xf32>, vector<2x32xf32>, vector<2x32xf32> -> vector<2x96xf32>
    %cst = arith.constant dense<0.000000e+00> : vector<2x128xf32>
    %14 = tpu.matmul %10, %0, %cst {dimension_numbers = #tpu.dot_dimension_numbers<[1], [0], [0], [1], [0, 0, 1, 1], [], []>} : vector<2x64xf32>, vector<64x128xf32>, vector<2x128xf32> -> vector<2x128xf32>
    %15 = vector.broadcast %3 : vector<1x128xf32> to vector<2x128xf32>
    %16 = arith.addf %15, %14 : vector<2x128xf32>
    %cst_17 = arith.constant dense<0.000000e+00> : vector<2x128xf32>
    %17 = tpu.matmul %13, %1, %cst_17 {dimension_numbers = #tpu.dot_dimension_numbers<[1], [0], [0], [1], [0, 0, 1, 1], [], []>} : vector<2x96xf32>, vector<96x128xf32>, vector<2x128xf32> -> vector<2x128xf32>
    %18 = vector.broadcast %4 : vector<1x128xf32> to vector<2x128xf32>
    %19 = arith.addf %18, %17 : vector<2x128xf32>
    %20 = vector.extract_strided_slice %16 {offsets = [0, 0], sizes = [2, 32], strides = [1, 1]} : vector<2x128xf32> to vector<2x32xf32>
    %21 = vector.extract_strided_slice %19 {offsets = [0, 0], sizes = [2, 32], strides = [1, 1]} : vector<2x128xf32> to vector<2x32xf32>
    %cst_18 = arith.constant 0.392699093 : f32
    %22 = vector.broadcast %cst_18 : f32 to vector<2x32xf32>
    %23 = arith.mulf %22, %21 : vector<2x32xf32>
    %cst_19 = arith.constant 1.000000e+00 : f32
    %24 = vector.broadcast %cst_19 : f32 to vector<2x32xf32>
    %25 = arith.addf %24, %23 : vector<2x32xf32>
    %26 = math.rsqrt %25 : vector<2x32xf32>
    %27 = arith.mulf %20, %26 : vector<2x32xf32>
    %28 = arith.negf %27 : vector<2x32xf32>
    %29 = math.exp %28 : vector<2x32xf32>
    %cst_20 = arith.constant 1.000000e+00 : f32
    %30 = vector.broadcast %cst_20 : f32 to vector<2x32xf32>
    %31 = arith.addf %30, %29 : vector<2x32xf32>
    %32 = arith.divf %30, %31 : vector<2x32xf32>
    %cst_21 = arith.constant -0.881373584 : f32
    %33 = vector.broadcast %cst_21 : f32 to vector<2x32xf32>
    %34 = arith.addf %20, %33 : vector<2x32xf32>
    %cst_22 = arith.constant 1.17157292 : f32
    %35 = vector.broadcast %cst_22 : f32 to vector<2x32xf32>
    %36 = arith.mulf %35, %34 : vector<2x32xf32>
    %cst_23 = arith.constant 0.539012074 : f32
    %37 = vector.broadcast %cst_23 : f32 to vector<2x32xf32>
    %38 = arith.mulf %37, %21 : vector<2x32xf32>
    %cst_24 = arith.constant 1.000000e+00 : f32
    %39 = vector.broadcast %cst_24 : f32 to vector<2x32xf32>
    %40 = arith.addf %39, %38 : vector<2x32xf32>
    %41 = math.rsqrt %40 : vector<2x32xf32>
    %42 = arith.mulf %36, %41 : vector<2x32xf32>
    %43 = arith.negf %42 : vector<2x32xf32>
    %44 = math.exp %43 : vector<2x32xf32>
    %cst_25 = arith.constant 1.000000e+00 : f32
    %45 = vector.broadcast %cst_25 : f32 to vector<2x32xf32>
    %46 = arith.addf %45, %44 : vector<2x32xf32>
    %47 = arith.divf %45, %46 : vector<2x32xf32>
    %48 = arith.mulf %32, %32 : vector<2x32xf32>
    %49 = arith.subf %47, %48 : vector<2x32xf32>
    %50 = vector.extract_strided_slice %16 {offsets = [0, 32], sizes = [2, 32], strides = [1, 1]} : vector<2x128xf32> to vector<2x32xf32>
    %51 = vector.extract_strided_slice %19 {offsets = [0, 32], sizes = [2, 32], strides = [1, 1]} : vector<2x128xf32> to vector<2x32xf32>
    %cst_26 = arith.constant 0.392699093 : f32
    %52 = vector.broadcast %cst_26 : f32 to vector<2x32xf32>
    %53 = arith.mulf %52, %51 : vector<2x32xf32>
    %cst_27 = arith.constant 1.000000e+00 : f32
    %54 = vector.broadcast %cst_27 : f32 to vector<2x32xf32>
    %55 = arith.addf %54, %53 : vector<2x32xf32>
    %56 = math.rsqrt %55 : vector<2x32xf32>
    %57 = arith.mulf %50, %56 : vector<2x32xf32>
    %58 = arith.negf %57 : vector<2x32xf32>
    %59 = math.exp %58 : vector<2x32xf32>
    %cst_28 = arith.constant 1.000000e+00 : f32
    %60 = vector.broadcast %cst_28 : f32 to vector<2x32xf32>
    %61 = arith.addf %60, %59 : vector<2x32xf32>
    %62 = arith.divf %60, %61 : vector<2x32xf32>
    %cst_29 = arith.constant -0.881373584 : f32
    %63 = vector.broadcast %cst_29 : f32 to vector<2x32xf32>
    %64 = arith.addf %50, %63 : vector<2x32xf32>
    %cst_30 = arith.constant 1.17157292 : f32
    %65 = vector.broadcast %cst_30 : f32 to vector<2x32xf32>
    %66 = arith.mulf %65, %64 : vector<2x32xf32>
    %cst_31 = arith.constant 0.539012074 : f32
    %67 = vector.broadcast %cst_31 : f32 to vector<2x32xf32>
    %68 = arith.mulf %67, %51 : vector<2x32xf32>
    %cst_32 = arith.constant 1.000000e+00 : f32
    %69 = vector.broadcast %cst_32 : f32 to vector<2x32xf32>
    %70 = arith.addf %69, %68 : vector<2x32xf32>
    %71 = math.rsqrt %70 : vector<2x32xf32>
    %72 = arith.mulf %66, %71 : vector<2x32xf32>
    %73 = arith.negf %72 : vector<2x32xf32>
    %74 = math.exp %73 : vector<2x32xf32>
    %cst_33 = arith.constant 1.000000e+00 : f32
    %75 = vector.broadcast %cst_33 : f32 to vector<2x32xf32>
    %76 = arith.addf %75, %74 : vector<2x32xf32>
    %77 = arith.divf %75, %76 : vector<2x32xf32>
    %78 = arith.mulf %62, %62 : vector<2x32xf32>
    %79 = arith.subf %77, %78 : vector<2x32xf32>
    %80 = vector.extract_strided_slice %16 {offsets = [0, 64], sizes = [2, 32], strides = [1, 1]} : vector<2x128xf32> to vector<2x32xf32>
    %81 = vector.extract_strided_slice %19 {offsets = [0, 64], sizes = [2, 32], strides = [1, 1]} : vector<2x128xf32> to vector<2x32xf32>
    %82 = vector.extract_strided_slice %16 {offsets = [0, 96], sizes = [2, 32], strides = [1, 1]} : vector<2x128xf32> to vector<2x32xf32>
    %83 = vector.extract_strided_slice %19 {offsets = [0, 96], sizes = [2, 32], strides = [1, 1]} : vector<2x128xf32> to vector<2x32xf32>
    %84 = arith.mulf %79, %80 : vector<2x32xf32>
    %85 = arith.mulf %81, %62 : vector<2x32xf32>
    %86 = arith.addf %84, %85 : vector<2x32xf32>
    %87 = arith.addf %62, %79 : vector<2x32xf32>
    %88 = tpu.reciprocal %87 {approx = true} : vector<2x32xf32> -> vector<2x32xf32>
    %89 = arith.mulf %86, %88 : vector<2x32xf32>
    %90 = arith.mulf %79, %81 : vector<2x32xf32>
    %91 = arith.addf %79, %81 : vector<2x32xf32>
    %92 = tpu.reciprocal %91 {approx = true} : vector<2x32xf32> -> vector<2x32xf32>
    %93 = arith.mulf %90, %92 : vector<2x32xf32>
    %94 = arith.addf %82, %89 : vector<2x32xf32>
    %95 = arith.addf %83, %93 : vector<2x32xf32>
    %cst_34 = arith.constant 2.000000e+00 : f32
    %96 = vector.broadcast %cst_34 : f32 to vector<2x32xf32>
    %97 = arith.mulf %96, %94 : vector<2x32xf32>
    %cst_35 = arith.constant 1.57079637 : f32
    %98 = vector.broadcast %cst_35 : f32 to vector<2x32xf32>
    %99 = arith.mulf %98, %95 : vector<2x32xf32>
    %cst_36 = arith.constant 1.000000e+00 : f32
    %100 = vector.broadcast %cst_36 : f32 to vector<2x32xf32>
    %101 = arith.addf %100, %99 : vector<2x32xf32>
    %102 = math.rsqrt %101 : vector<2x32xf32>
    %103 = arith.mulf %97, %102 : vector<2x32xf32>
    %104 = arith.negf %103 : vector<2x32xf32>
    %105 = math.exp %104 : vector<2x32xf32>
    %cst_37 = arith.constant 1.000000e+00 : f32
    %106 = vector.broadcast %cst_37 : f32 to vector<2x32xf32>
    %107 = arith.addf %106, %105 : vector<2x32xf32>
    %108 = arith.divf %106, %107 : vector<2x32xf32>
    %cst_38 = arith.constant 2.000000e+00 : f32
    %109 = vector.broadcast %cst_38 : f32 to vector<2x32xf32>
    %110 = arith.mulf %109, %94 : vector<2x32xf32>
    %cst_39 = arith.constant -0.881373584 : f32
    %111 = vector.broadcast %cst_39 : f32 to vector<2x32xf32>
    %112 = arith.addf %110, %111 : vector<2x32xf32>
    %cst_40 = arith.constant 1.17157292 : f32
    %113 = vector.broadcast %cst_40 : f32 to vector<2x32xf32>
    %114 = arith.mulf %113, %112 : vector<2x32xf32>
    %cst_41 = arith.constant 2.1560483 : f32
    %115 = vector.broadcast %cst_41 : f32 to vector<2x32xf32>
    %116 = arith.mulf %115, %95 : vector<2x32xf32>
    %cst_42 = arith.constant 1.000000e+00 : f32
    %117 = vector.broadcast %cst_42 : f32 to vector<2x32xf32>
    %118 = arith.addf %117, %116 : vector<2x32xf32>
    %119 = math.rsqrt %118 : vector<2x32xf32>
    %120 = arith.mulf %114, %119 : vector<2x32xf32>
    %121 = arith.negf %120 : vector<2x32xf32>
    %122 = math.exp %121 : vector<2x32xf32>
    %cst_43 = arith.constant 1.000000e+00 : f32
    %123 = vector.broadcast %cst_43 : f32 to vector<2x32xf32>
    %124 = arith.addf %123, %122 : vector<2x32xf32>
    %125 = arith.divf %123, %124 : vector<2x32xf32>
    %126 = arith.mulf %108, %108 : vector<2x32xf32>
    %127 = arith.subf %125, %126 : vector<2x32xf32>
    %cst_44 = arith.constant 2.000000e+00 : f32
    %128 = vector.broadcast %cst_44 : f32 to vector<2x32xf32>
    %129 = arith.mulf %128, %108 : vector<2x32xf32>
    %cst_45 = arith.constant 1.000000e+00 : f32
    %130 = vector.broadcast %cst_45 : f32 to vector<2x32xf32>
    %131 = arith.subf %129, %130 : vector<2x32xf32>
    %cst_46 = arith.constant 4.000000e+00 : f32
    %132 = vector.broadcast %cst_46 : f32 to vector<2x32xf32>
    %133 = arith.mulf %132, %127 : vector<2x32xf32>
    %134 = arith.mulf %49, %131 : vector<2x32xf32>
    %135 = arith.mulf %133, %32 : vector<2x32xf32>
    %136 = arith.addf %134, %135 : vector<2x32xf32>
    %137 = arith.addf %32, %49 : vector<2x32xf32>
    %138 = tpu.reciprocal %137 {approx = true} : vector<2x32xf32> -> vector<2x32xf32>
    %139 = arith.mulf %136, %138 : vector<2x32xf32>
    %140 = arith.mulf %49, %133 : vector<2x32xf32>
    %141 = arith.addf %49, %133 : vector<2x32xf32>
    %142 = tpu.reciprocal %141 {approx = true} : vector<2x32xf32> -> vector<2x32xf32>
    %143 = arith.mulf %140, %142 : vector<2x32xf32>
    %cst_47 = arith.constant 1.000000e+00 : f32
    %144 = vector.broadcast %cst_47 : f32 to vector<2x32xf32>
    %145 = arith.subf %144, %32 : vector<2x32xf32>
    %146 = arith.mulf %49, %6 : vector<2x32xf32>
    %147 = arith.mulf %7, %145 : vector<2x32xf32>
    %148 = arith.addf %146, %147 : vector<2x32xf32>
    %149 = arith.addf %145, %49 : vector<2x32xf32>
    %150 = tpu.reciprocal %149 {approx = true} : vector<2x32xf32> -> vector<2x32xf32>
    %151 = arith.mulf %148, %150 : vector<2x32xf32>
    %152 = arith.mulf %49, %7 : vector<2x32xf32>
    %153 = arith.addf %49, %7 : vector<2x32xf32>
    %154 = tpu.reciprocal %153 {approx = true} : vector<2x32xf32> -> vector<2x32xf32>
    %155 = arith.mulf %152, %154 : vector<2x32xf32>
    %156 = arith.addf %139, %151 : vector<2x32xf32>
    %157 = arith.addf %143, %155 : vector<2x32xf32>
    %158 = arith.mulf %156, %156 : vector<2x32xf32>
    %159 = tpu.concatenate %156, %157, %158 in 1 : vector<2x32xf32>, vector<2x32xf32>, vector<2x32xf32> -> vector<2x96xf32>
    %cst_48 = arith.constant dense<0.000000e+00> : vector<2x16xf32>
    %160 = tpu.matmul %159, %2, %cst_48 {dimension_numbers = #tpu.dot_dimension_numbers<[1], [0], [0], [1], [0, 0, 1, 1], [], []>} : vector<2x96xf32>, vector<96x16xf32>, vector<2x16xf32> -> vector<2x16xf32>
    %161 = vector.broadcast %5 : vector<1x16xf32> to vector<2x16xf32>
    %162 = arith.addf %161, %160 : vector<2x16xf32>
    %163 = vector.extract_strided_slice %162 {offsets = [0, 0], sizes = [2, 8], strides = [1, 1]} : vector<2x16xf32> to vector<2x8xf32>
    %164 = vector.extract_strided_slice %162 {offsets = [0, 8], sizes = [2, 8], strides = [1, 1]} : vector<2x16xf32> to vector<2x8xf32>
    %cst_49 = arith.constant 0.392699093 : f32
    %165 = vector.broadcast %cst_49 : f32 to vector<2x8xf32>
    %166 = arith.mulf %165, %164 : vector<2x8xf32>
    %cst_50 = arith.constant 1.000000e+00 : f32
    %167 = vector.broadcast %cst_50 : f32 to vector<2x8xf32>
    %168 = arith.addf %167, %166 : vector<2x8xf32>
    %169 = math.rsqrt %168 : vector<2x8xf32>
    %170 = arith.mulf %163, %169 : vector<2x8xf32>
    %171 = arith.negf %170 : vector<2x8xf32>
    %172 = math.exp %171 : vector<2x8xf32>
    %cst_51 = arith.constant 1.000000e+00 : f32
    %173 = vector.broadcast %cst_51 : f32 to vector<2x8xf32>
    %174 = arith.addf %173, %172 : vector<2x8xf32>
    %175 = arith.divf %173, %174 : vector<2x8xf32>
    %cst_52 = arith.constant -0.881373584 : f32
    %176 = vector.broadcast %cst_52 : f32 to vector<2x8xf32>
    %177 = arith.addf %163, %176 : vector<2x8xf32>
    %cst_53 = arith.constant 1.17157292 : f32
    %178 = vector.broadcast %cst_53 : f32 to vector<2x8xf32>
    %179 = arith.mulf %178, %177 : vector<2x8xf32>
    %cst_54 = arith.constant 0.539012074 : f32
    %180 = vector.broadcast %cst_54 : f32 to vector<2x8xf32>
    %181 = arith.mulf %180, %164 : vector<2x8xf32>
    %cst_55 = arith.constant 1.000000e+00 : f32
    %182 = vector.broadcast %cst_55 : f32 to vector<2x8xf32>
    %183 = arith.addf %182, %181 : vector<2x8xf32>
    %184 = math.rsqrt %183 : vector<2x8xf32>
    %185 = arith.mulf %179, %184 : vector<2x8xf32>
    %186 = arith.negf %185 : vector<2x8xf32>
    %187 = math.exp %186 : vector<2x8xf32>
    %cst_56 = arith.constant 1.000000e+00 : f32
    %188 = vector.broadcast %cst_56 : f32 to vector<2x8xf32>
    %189 = arith.addf %188, %187 : vector<2x8xf32>
    %190 = arith.divf %188, %189 : vector<2x8xf32>
    %191 = arith.mulf %175, %175 : vector<2x8xf32>
    %192 = arith.subf %190, %191 : vector<2x8xf32>
    %193 = tpu.concatenate %175, %192 in 1 : vector<2x8xf32>, vector<2x8xf32> -> vector<2x16xf32>
    %c0_57 = arith.constant 0 : index
    %c0_58 = arith.constant 0 : index
    %c0_59 = arith.constant 0 : index
    %194 = vector.load %arg8[%c0_57, %c0_58, %c0_59] : memref<8x2x16xf32, #tpu.memory_space<vmem>>, vector<1x2x16xf32>
    %195 = vector.shape_cast %194 : vector<1x2x16xf32> to vector<2x16xf32>
    %196 = vector.shape_cast %193 : vector<2x16xf32> to vector<1x2x16xf32>
    tpu.vector_store %arg8[%c0_57, %c0_58, %c0_59], %196 {strides = array<i32>} : memref<8x2x16xf32, #tpu.memory_space<vmem>>, vector<1x2x16xf32>,
    %c1_60 = arith.constant 1 : index
    %c0_61 = arith.constant 0 : index
    %c0_62 = arith.constant 0 : index
    %197 = vector.load %arg0[%c1_60, %c0_61, %c0_62] : memref<8x2x32xf32, #tpu.memory_space<vmem>>, vector<1x2x32xf32>
    %198 = vector.shape_cast %197 : vector<1x2x32xf32> to vector<2x32xf32>
    %199 = tpu.concatenate %198, %156 in 1 : vector<2x32xf32>, vector<2x32xf32> -> vector<2x64xf32>
    %200 = arith.mulf %198, %198 : vector<2x32xf32>
    %201 = arith.mulf %156, %156 : vector<2x32xf32>
    %202 = tpu.concatenate %200, %157, %201 in 1 : vector<2x32xf32>, vector<2x32xf32>, vector<2x32xf32> -> vector<2x96xf32>
    %cst_63 = arith.constant dense<0.000000e+00> : vector<2x128xf32>
    %203 = tpu.matmul %199, %0, %cst_63 {dimension_numbers = #tpu.dot_dimension_numbers<[1], [0], [0], [1], [0, 0, 1, 1], [], []>} : vector<2x64xf32>, vector<64x128xf32>, vector<2x128xf32> -> vector<2x128xf32>
    %204 = vector.broadcast %3 : vector<1x128xf32> to vector<2x128xf32>
    %205 = arith.addf %204, %203 : vector<2x128xf32>
    %cst_64 = arith.constant dense<0.000000e+00> : vector<2x128xf32>
    %206 = tpu.matmul %202, %1, %cst_64 {dimension_numbers = #tpu.dot_dimension_numbers<[1], [0], [0], [1], [0, 0, 1, 1], [], []>} : vector<2x96xf32>, vector<96x128xf32>, vector<2x128xf32> -> vector<2x128xf32>
    %207 = vector.broadcast %4 : vector<1x128xf32> to vector<2x128xf32>
    %208 = arith.addf %207, %206 : vector<2x128xf32>
    %209 = vector.extract_strided_slice %205 {offsets = [0, 0], sizes = [2, 32], strides = [1, 1]} : vector<2x128xf32> to vector<2x32xf32>
    %210 = vector.extract_strided_slice %208 {offsets = [0, 0], sizes = [2, 32], strides = [1, 1]} : vector<2x128xf32> to vector<2x32xf32>
    %cst_65 = arith.constant 0.392699093 : f32
    %211 = vector.broadcast %cst_65 : f32 to vector<2x32xf32>
    %212 = arith.mulf %211, %210 : vector<2x32xf32>
    %cst_66 = arith.constant 1.000000e+00 : f32
    %213 = vector.broadcast %cst_66 : f32 to vector<2x32xf32>
    %214 = arith.addf %213, %212 : vector<2x32xf32>
    %215 = math.rsqrt %214 : vector<2x32xf32>
    %216 = arith.mulf %209, %215 : vector<2x32xf32>
    %217 = arith.negf %216 : vector<2x32xf32>
    %218 = math.exp %217 : vector<2x32xf32>
    %cst_67 = arith.constant 1.000000e+00 : f32
    %219 = vector.broadcast %cst_67 : f32 to vector<2x32xf32>
    %220 = arith.addf %219, %218 : vector<2x32xf32>
    %221 = arith.divf %219, %220 : vector<2x32xf32>
    %cst_68 = arith.constant -0.881373584 : f32
    %222 = vector.broadcast %cst_68 : f32 to vector<2x32xf32>
    %223 = arith.addf %209, %222 : vector<2x32xf32>
    %cst_69 = arith.constant 1.17157292 : f32
    %224 = vector.broadcast %cst_69 : f32 to vector<2x32xf32>
    %225 = arith.mulf %224, %223 : vector<2x32xf32>
    %cst_70 = arith.constant 0.539012074 : f32
    %226 = vector.broadcast %cst_70 : f32 to vector<2x32xf32>
    %227 = arith.mulf %226, %210 : vector<2x32xf32>
    %cst_71 = arith.constant 1.000000e+00 : f32
    %228 = vector.broadcast %cst_71 : f32 to vector<2x32xf32>
    %229 = arith.addf %228, %227 : vector<2x32xf32>
    %230 = math.rsqrt %229 : vector<2x32xf32>
    %231 = arith.mulf %225, %230 : vector<2x32xf32>
    %232 = arith.negf %231 : vector<2x32xf32>
    %233 = math.exp %232 : vector<2x32xf32>
    %cst_72 = arith.constant 1.000000e+00 : f32
    %234 = vector.broadcast %cst_72 : f32 to vector<2x32xf32>
    %235 = arith.addf %234, %233 : vector<2x32xf32>
    %236 = arith.divf %234, %235 : vector<2x32xf32>
    %237 = arith.mulf %221, %221 : vector<2x32xf32>
    %238 = arith.subf %236, %237 : vector<2x32xf32>
    %239 = vector.extract_strided_slice %205 {offsets = [0, 32], sizes = [2, 32], strides = [1, 1]} : vector<2x128xf32> to vector<2x32xf32>
    %240 = vector.extract_strided_slice %208 {offsets = [0, 32], sizes = [2, 32], strides = [1, 1]} : vector<2x128xf32> to vector<2x32xf32>
    %cst_73 = arith.constant 0.392699093 : f32
    %241 = vector.broadcast %cst_73 : f32 to vector<2x32xf32>
    %242 = arith.mulf %241, %240 : vector<2x32xf32>
    %cst_74 = arith.constant 1.000000e+00 : f32
    %243 = vector.broadcast %cst_74 : f32 to vector<2x32xf32>
    %244 = arith.addf %243, %242 : vector<2x32xf32>
    %245 = math.rsqrt %244 : vector<2x32xf32>
    %246 = arith.mulf %239, %245 : vector<2x32xf32>
    %247 = arith.negf %246 : vector<2x32xf32>
    %248 = math.exp %247 : vector<2x32xf32>
    %cst_75 = arith.constant 1.000000e+00 : f32
    %249 = vector.broadcast %cst_75 : f32 to vector<2x32xf32>
    %250 = arith.addf %249, %248 : vector<2x32xf32>
    %251 = arith.divf %249, %250 : vector<2x32xf32>
    %cst_76 = arith.constant -0.881373584 : f32
    %252 = vector.broadcast %cst_76 : f32 to vector<2x32xf32>
    %253 = arith.addf %239, %252 : vector<2x32xf32>
    %cst_77 = arith.constant 1.17157292 : f32
    %254 = vector.broadcast %cst_77 : f32 to vector<2x32xf32>
    %255 = arith.mulf %254, %253 : vector<2x32xf32>
    %cst_78 = arith.constant 0.539012074 : f32
    %256 = vector.broadcast %cst_78 : f32 to vector<2x32xf32>
    %257 = arith.mulf %256, %240 : vector<2x32xf32>
    %cst_79 = arith.constant 1.000000e+00 : f32
    %258 = vector.broadcast %cst_79 : f32 to vector<2x32xf32>
    %259 = arith.addf %258, %257 : vector<2x32xf32>
    %260 = math.rsqrt %259 : vector<2x32xf32>
    %261 = arith.mulf %255, %260 : vector<2x32xf32>
    %262 = arith.negf %261 : vector<2x32xf32>
    %263 = math.exp %262 : vector<2x32xf32>
    %cst_80 = arith.constant 1.000000e+00 : f32
    %264 = vector.broadcast %cst_80 : f32 to vector<2x32xf32>
    %265 = arith.addf %264, %263 : vector<2x32xf32>
    %266 = arith.divf %264, %265 : vector<2x32xf32>
    %267 = arith.mulf %251, %251 : vector<2x32xf32>
    %268 = arith.subf %266, %267 : vector<2x32xf32>
    %269 = vector.extract_strided_slice %205 {offsets = [0, 64], sizes = [2, 32], strides = [1, 1]} : vector<2x128xf32> to vector<2x32xf32>
    %270 = vector.extract_strided_slice %208 {offsets = [0, 64], sizes = [2, 32], strides = [1, 1]} : vector<2x128xf32> to vector<2x32xf32>
    %271 = vector.extract_strided_slice %205 {offsets = [0, 96], sizes = [2, 32], strides = [1, 1]} : vector<2x128xf32> to vector<2x32xf32>
    %272 = vector.extract_strided_slice %208 {offsets = [0, 96], sizes = [2, 32], strides = [1, 1]} : vector<2x128xf32> to vector<2x32xf32>
    %273 = arith.mulf %268, %269 : vector<2x32xf32>
    %274 = arith.mulf %270, %251 : vector<2x32xf32>
    %275 = arith.addf %273, %274 : vector<2x32xf32>
    %276 = arith.addf %251, %268 : vector<2x32xf32>
    %277 = tpu.reciprocal %276 {approx = true} : vector<2x32xf32> -> vector<2x32xf32>
    %278 = arith.mulf %275, %277 : vector<2x32xf32>
    %279 = arith.mulf %268, %270 : vector<2x32xf32>
    %280 = arith.addf %268, %270 : vector<2x32xf32>
    %281 = tpu.reciprocal %280 {approx = true} : vector<2x32xf32> -> vector<2x32xf32>
    %282 = arith.mulf %279, %281 : vector<2x32xf32>
    %283 = arith.addf %271, %278 : vector<2x32xf32>
    %284 = arith.addf %272, %282 : vector<2x32xf32>
    %cst_81 = arith.constant 2.000000e+00 : f32
    %285 = vector.broadcast %cst_81 : f32 to vector<2x32xf32>
    %286 = arith.mulf %285, %283 : vector<2x32xf32>
    %cst_82 = arith.constant 1.57079637 : f32
    %287 = vector.broadcast %cst_82 : f32 to vector<2x32xf32>
    %288 = arith.mulf %287, %284 : vector<2x32xf32>
    %cst_83 = arith.constant 1.000000e+00 : f32
    %289 = vector.broadcast %cst_83 : f32 to vector<2x32xf32>
    %290 = arith.addf %289, %288 : vector<2x32xf32>
    %291 = math.rsqrt %290 : vector<2x32xf32>
    %292 = arith.mulf %286, %291 : vector<2x32xf32>
    %293 = arith.negf %292 : vector<2x32xf32>
    %294 = math.exp %293 : vector<2x32xf32>
    %cst_84 = arith.constant 1.000000e+00 : f32
    %295 = vector.broadcast %cst_84 : f32 to vector<2x32xf32>
    %296 = arith.addf %295, %294 : vector<2x32xf32>
    %297 = arith.divf %295, %296 : vector<2x32xf32>
    %cst_85 = arith.constant 2.000000e+00 : f32
    %298 = vector.broadcast %cst_85 : f32 to vector<2x32xf32>
    %299 = arith.mulf %298, %283 : vector<2x32xf32>
    %cst_86 = arith.constant -0.881373584 : f32
    %300 = vector.broadcast %cst_86 : f32 to vector<2x32xf32>
    %301 = arith.addf %299, %300 : vector<2x32xf32>
    %cst_87 = arith.constant 1.17157292 : f32
    %302 = vector.broadcast %cst_87 : f32 to vector<2x32xf32>
    %303 = arith.mulf %302, %301 : vector<2x32xf32>
    %cst_88 = arith.constant 2.1560483 : f32
    %304 = vector.broadcast %cst_88 : f32 to vector<2x32xf32>
    %305 = arith.mulf %304, %284 : vector<2x32xf32>
    %cst_89 = arith.constant 1.000000e+00 : f32
    %306 = vector.broadcast %cst_89 : f32 to vector<2x32xf32>
    %307 = arith.addf %306, %305 : vector<2x32xf32>
    %308 = math.rsqrt %307 : vector<2x32xf32>
    %309 = arith.mulf %303, %308 : vector<2x32xf32>
    %310 = arith.negf %309 : vector<2x32xf32>
    %311 = math.exp %310 : vector<2x32xf32>
    %cst_90 = arith.constant 1.000000e+00 : f32
    %312 = vector.broadcast %cst_90 : f32 to vector<2x32xf32>
    %313 = arith.addf %312, %311 : vector<2x32xf32>
    %314 = arith.divf %312, %313 : vector<2x32xf32>
    %315 = arith.mulf %297, %297 : vector<2x32xf32>
    %316 = arith.subf %314, %315 : vector<2x32xf32>
    %cst_91 = arith.constant 2.000000e+00 : f32
    %317 = vector.broadcast %cst_91 : f32 to vector<2x32xf32>
    %318 = arith.mulf %317, %297 : vector<2x32xf32>
    %cst_92 = arith.constant 1.000000e+00 : f32
    %319 = vector.broadcast %cst_92 : f32 to vector<2x32xf32>
    %320 = arith.subf %318, %319 : vector<2x32xf32>
    %cst_93 = arith.constant 4.000000e+00 : f32
    %321 = vector.broadcast %cst_93 : f32 to vector<2x32xf32>
    %322 = arith.mulf %321, %316 : vector<2x32xf32>
    %323 = arith.mulf %238, %320 : vector<2x32xf32>
    %324 = arith.mulf %322, %221 : vector<2x32xf32>
    %325 = arith.addf %323, %324 : vector<2x32xf32>
    %326 = arith.addf %221, %238 : vector<2x32xf32>
    %327 = tpu.reciprocal %326 {approx = true} : vector<2x32xf32> -> vector<2x32xf32>
    %328 = arith.mulf %325, %327 : vector<2x32xf32>
    %329 = arith.mulf %238, %322 : vector<2x32xf32>
    %330 = arith.addf %238, %322 : vector<2x32xf32>
    %331 = tpu.reciprocal %330 {approx = true} : vector<2x32xf32> -> vector<2x32xf32>
    %332 = arith.mulf %329, %331 : vector<2x32xf32>
    %cst_94 = arith.constant 1.000000e+00 : f32
    %333 = vector.broadcast %cst_94 : f32 to vector<2x32xf32>
    %334 = arith.subf %333, %221 : vector<2x32xf32>
    %335 = arith.mulf %238, %156 : vector<2x32xf32>
    %336 = arith.mulf %157, %334 : vector<2x32xf32>
    %337 = arith.addf %335, %336 : vector<2x32xf32>
    %338 = arith.addf %334, %238 : vector<2x32xf32>
    %339 = tpu.reciprocal %338 {approx = true} : vector<2x32xf32> -> vector<2x32xf32>
    %340 = arith.mulf %337, %339 : vector<2x32xf32>
    %341 = arith.mulf %238, %157 : vector<2x32xf32>
    %342 = arith.addf %238, %157 : vector<2x32xf32>
    %343 = tpu.reciprocal %342 {approx = true} : vector<2x32xf32> -> vector<2x32xf32>
    %344 = arith.mulf %341, %343 : vector<2x32xf32>
    %345 = arith.addf %328, %340 : vector<2x32xf32>
    %346 = arith.addf %332, %344 : vector<2x32xf32>
    %347 = arith.mulf %345, %345 : vector<2x32xf32>
    %348 = tpu.concatenate %345, %346, %347 in 1 : vector<2x32xf32>, vector<2x32xf32>, vector<2x32xf32> -> vector<2x96xf32>
    %cst_95 = arith.constant dense<0.000000e+00> : vector<2x16xf32>
    %349 = tpu.matmul %348, %2, %cst_95 {dimension_numbers = #tpu.dot_dimension_numbers<[1], [0], [0], [1], [0, 0, 1, 1], [], []>} : vector<2x96xf32>, vector<96x16xf32>, vector<2x16xf32> -> vector<2x16xf32>
    %350 = vector.broadcast %5 : vector<1x16xf32> to vector<2x16xf32>
    %351 = arith.addf %350, %349 : vector<2x16xf32>
    %352 = vector.extract_strided_slice %351 {offsets = [0, 0], sizes = [2, 8], strides = [1, 1]} : vector<2x16xf32> to vector<2x8xf32>
    %353 = vector.extract_strided_slice %351 {offsets = [0, 8], sizes = [2, 8], strides = [1, 1]} : vector<2x16xf32> to vector<2x8xf32>
    %cst_96 = arith.constant 0.392699093 : f32
    %354 = vector.broadcast %cst_96 : f32 to vector<2x8xf32>
    %355 = arith.mulf %354, %353 : vector<2x8xf32>
    %cst_97 = arith.constant 1.000000e+00 : f32
    %356 = vector.broadcast %cst_97 : f32 to vector<2x8xf32>
    %357 = arith.addf %356, %355 : vector<2x8xf32>
    %358 = math.rsqrt %357 : vector<2x8xf32>
    %359 = arith.mulf %352, %358 : vector<2x8xf32>
    %360 = arith.negf %359 : vector<2x8xf32>
    %361 = math.exp %360 : vector<2x8xf32>
    %cst_98 = arith.constant 1.000000e+00 : f32
    %362 = vector.broadcast %cst_98 : f32 to vector<2x8xf32>
    %363 = arith.addf %362, %361 : vector<2x8xf32>
    %364 = arith.divf %362, %363 : vector<2x8xf32>
    %cst_99 = arith.constant -0.881373584 : f32
    %365 = vector.broadcast %cst_99 : f32 to vector<2x8xf32>
    %366 = arith.addf %352, %365 : vector<2x8xf32>
    %cst_100 = arith.constant 1.17157292 : f32
    %367 = vector.broadcast %cst_100 : f32 to vector<2x8xf32>
    %368 = arith.mulf %367, %366 : vector<2x8xf32>
    %cst_101 = arith.constant 0.539012074 : f32
    %369 = vector.broadcast %cst_101 : f32 to vector<2x8xf32>
    %370 = arith.mulf %369, %353 : vector<2x8xf32>
    %cst_102 = arith.constant 1.000000e+00 : f32
    %371 = vector.broadcast %cst_102 : f32 to vector<2x8xf32>
    %372 = arith.addf %371, %370 : vector<2x8xf32>
    %373 = math.rsqrt %372 : vector<2x8xf32>
    %374 = arith.mulf %368, %373 : vector<2x8xf32>
    %375 = arith.negf %374 : vector<2x8xf32>
    %376 = math.exp %375 : vector<2x8xf32>
    %cst_103 = arith.constant 1.000000e+00 : f32
    %377 = vector.broadcast %cst_103 : f32 to vector<2x8xf32>
    %378 = arith.addf %377, %376 : vector<2x8xf32>
    %379 = arith.divf %377, %378 : vector<2x8xf32>
    %380 = arith.mulf %364, %364 : vector<2x8xf32>
    %381 = arith.subf %379, %380 : vector<2x8xf32>
    %382 = tpu.concatenate %364, %381 in 1 : vector<2x8xf32>, vector<2x8xf32> -> vector<2x16xf32>
    %c1_104 = arith.constant 1 : index
    %c0_105 = arith.constant 0 : index
    %c0_106 = arith.constant 0 : index
    %383 = vector.load %arg8[%c1_104, %c0_105, %c0_106] : memref<8x2x16xf32, #tpu.memory_space<vmem>>, vector<1x2x16xf32>
    %384 = vector.shape_cast %383 : vector<1x2x16xf32> to vector<2x16xf32>
    %385 = vector.shape_cast %382 : vector<2x16xf32> to vector<1x2x16xf32>
    tpu.vector_store %arg8[%c1_104, %c0_105, %c0_106], %385 {strides = array<i32>} : memref<8x2x16xf32, #tpu.memory_space<vmem>>, vector<1x2x16xf32>,
    %c2 = arith.constant 2 : index
    %c0_107 = arith.constant 0 : index
    %c0_108 = arith.constant 0 : index
    %386 = vector.load %arg0[%c2, %c0_107, %c0_108] : memref<8x2x32xf32, #tpu.memory_space<vmem>>, vector<1x2x32xf32>
    %387 = vector.shape_cast %386 : vector<1x2x32xf32> to vector<2x32xf32>
    %388 = tpu.concatenate %387, %345 in 1 : vector<2x32xf32>, vector<2x32xf32> -> vector<2x64xf32>
    %389 = arith.mulf %387, %387 : vector<2x32xf32>
    %390 = arith.mulf %345, %345 : vector<2x32xf32>
    %391 = tpu.concatenate %389, %346, %390 in 1 : vector<2x32xf32>, vector<2x32xf32>, vector<2x32xf32> -> vector<2x96xf32>
    %cst_109 = arith.constant dense<0.000000e+00> : vector<2x128xf32>
    %392 = tpu.matmul %388, %0, %cst_109 {dimension_numbers = #tpu.dot_dimension_numbers<[1], [0], [0], [1], [0, 0, 1, 1], [], []>} : vector<2x64xf32>, vector<64x128xf32>, vector<2x128xf32> -> vector<2x128xf32>
    %393 = vector.broadcast %3 : vector<1x128xf32> to vector<2x128xf32>
    %394 = arith.addf %393, %392 : vector<2x128xf32>
    %cst_110 = arith.constant dense<0.000000e+00> : vector<2x128xf32>
    %395 = tpu.matmul %391, %1, %cst_110 {dimension_numbers = #tpu.dot_dimension_numbers<[1], [0], [0], [1], [0, 0, 1, 1], [], []>} : vector<2x96xf32>, vector<96x128xf32>, vector<2x128xf32> -> vector<2x128xf32>
    %396 = vector.broadcast %4 : vector<1x128xf32> to vector<2x128xf32>
    %397 = arith.addf %396, %395 : vector<2x128xf32>
    %398 = vector.extract_strided_slice %394 {offsets = [0, 0], sizes = [2, 32], strides = [1, 1]} : vector<2x128xf32> to vector<2x32xf32>
    %399 = vector.extract_strided_slice %397 {offsets = [0, 0], sizes = [2, 32], strides = [1, 1]} : vector<2x128xf32> to vector<2x32xf32>
    %cst_111 = arith.constant 0.392699093 : f32
    %400 = vector.broadcast %cst_111 : f32 to vector<2x32xf32>
    %401 = arith.mulf %400, %399 : vector<2x32xf32>
    %cst_112 = arith.constant 1.000000e+00 : f32
    %402 = vector.broadcast %cst_112 : f32 to vector<2x32xf32>
    %403 = arith.addf %402, %401 : vector<2x32xf32>
    %404 = math.rsqrt %403 : vector<2x32xf32>
    %405 = arith.mulf %398, %404 : vector<2x32xf32>
    %406 = arith.negf %405 : vector<2x32xf32>
    %407 = math.exp %406 : vector<2x32xf32>
    %cst_113 = arith.constant 1.000000e+00 : f32
    %408 = vector.broadcast %cst_113 : f32 to vector<2x32xf32>
    %409 = arith.addf %408, %407 : vector<2x32xf32>
    %410 = arith.divf %408, %409 : vector<2x32xf32>
    %cst_114 = arith.constant -0.881373584 : f32
    %411 = vector.broadcast %cst_114 : f32 to vector<2x32xf32>
    %412 = arith.addf %398, %411 : vector<2x32xf32>
    %cst_115 = arith.constant 1.17157292 : f32
    %413 = vector.broadcast %cst_115 : f32 to vector<2x32xf32>
    %414 = arith.mulf %413, %412 : vector<2x32xf32>
    %cst_116 = arith.constant 0.539012074 : f32
    %415 = vector.broadcast %cst_116 : f32 to vector<2x32xf32>
    %416 = arith.mulf %415, %399 : vector<2x32xf32>
    %cst_117 = arith.constant 1.000000e+00 : f32
    %417 = vector.broadcast %cst_117 : f32 to vector<2x32xf32>
    %418 = arith.addf %417, %416 : vector<2x32xf32>
    %419 = math.rsqrt %418 : vector<2x32xf32>
    %420 = arith.mulf %414, %419 : vector<2x32xf32>
    %421 = arith.negf %420 : vector<2x32xf32>
    %422 = math.exp %421 : vector<2x32xf32>
    %cst_118 = arith.constant 1.000000e+00 : f32
    %423 = vector.broadcast %cst_118 : f32 to vector<2x32xf32>
    %424 = arith.addf %423, %422 : vector<2x32xf32>
    %425 = arith.divf %423, %424 : vector<2x32xf32>
    %426 = arith.mulf %410, %410 : vector<2x32xf32>
    %427 = arith.subf %425, %426 : vector<2x32xf32>
    %428 = vector.extract_strided_slice %394 {offsets = [0, 32], sizes = [2, 32], strides = [1, 1]} : vector<2x128xf32> to vector<2x32xf32>
    %429 = vector.extract_strided_slice %397 {offsets = [0, 32], sizes = [2, 32], strides = [1, 1]} : vector<2x128xf32> to vector<2x32xf32>
    %cst_119 = arith.constant 0.392699093 : f32
    %430 = vector.broadcast %cst_119 : f32 to vector<2x32xf32>
    %431 = arith.mulf %430, %429 : vector<2x32xf32>
    %cst_120 = arith.constant 1.000000e+00 : f32
    %432 = vector.broadcast %cst_120 : f32 to vector<2x32xf32>
    %433 = arith.addf %432, %431 : vector<2x32xf32>
    %434 = math.rsqrt %433 : vector<2x32xf32>
    %435 = arith.mulf %428, %434 : vector<2x32xf32>
    %436 = arith.negf %435 : vector<2x32xf32>
    %437 = math.exp %436 : vector<2x32xf32>
    %cst_121 = arith.constant 1.000000e+00 : f32
    %438 = vector.broadcast %cst_121 : f32 to vector<2x32xf32>
    %439 = arith.addf %438, %437 : vector<2x32xf32>
    %440 = arith.divf %438, %439 : vector<2x32xf32>
    %cst_122 = arith.constant -0.881373584 : f32
    %441 = vector.broadcast %cst_122 : f32 to vector<2x32xf32>
    %442 = arith.addf %428, %441 : vector<2x32xf32>
    %cst_123 = arith.constant 1.17157292 : f32
    %443 = vector.broadcast %cst_123 : f32 to vector<2x32xf32>
    %444 = arith.mulf %443, %442 : vector<2x32xf32>
    %cst_124 = arith.constant 0.539012074 : f32
    %445 = vector.broadcast %cst_124 : f32 to vector<2x32xf32>
    %446 = arith.mulf %445, %429 : vector<2x32xf32>
    %cst_125 = arith.constant 1.000000e+00 : f32
    %447 = vector.broadcast %cst_125 : f32 to vector<2x32xf32>
    %448 = arith.addf %447, %446 : vector<2x32xf32>
    %449 = math.rsqrt %448 : vector<2x32xf32>
    %450 = arith.mulf %444, %449 : vector<2x32xf32>
    %451 = arith.negf %450 : vector<2x32xf32>
    %452 = math.exp %451 : vector<2x32xf32>
    %cst_126 = arith.constant 1.000000e+00 : f32
    %453 = vector.broadcast %cst_126 : f32 to vector<2x32xf32>
    %454 = arith.addf %453, %452 : vector<2x32xf32>
    %455 = arith.divf %453, %454 : vector<2x32xf32>
    %456 = arith.mulf %440, %440 : vector<2x32xf32>
    %457 = arith.subf %455, %456 : vector<2x32xf32>
    %458 = vector.extract_strided_slice %394 {offsets = [0, 64], sizes = [2, 32], strides = [1, 1]} : vector<2x128xf32> to vector<2x32xf32>
    %459 = vector.extract_strided_slice %397 {offsets = [0, 64], sizes = [2, 32], strides = [1, 1]} : vector<2x128xf32> to vector<2x32xf32>
    %460 = vector.extract_strided_slice %394 {offsets = [0, 96], sizes = [2, 32], strides = [1, 1]} : vector<2x128xf32> to vector<2x32xf32>
    %461 = vector.extract_strided_slice %397 {offsets = [0, 96], sizes = [2, 32], strides = [1, 1]} : vector<2x128xf32> to vector<2x32xf32>
    %462 = arith.mulf %457, %458 : vector<2x32xf32>
    %463 = arith.mulf %459, %440 : vector<2x32xf32>
    %464 = arith.addf %462, %463 : vector<2x32xf32>
    %465 = arith.addf %440, %457 : vector<2x32xf32>
    %466 = tpu.reciprocal %465 {approx = true} : vector<2x32xf32> -> vector<2x32xf32>
    %467 = arith.mulf %464, %466 : vector<2x32xf32>
    %468 = arith.mulf %457, %459 : vector<2x32xf32>
    %469 = arith.addf %457, %459 : vector<2x32xf32>
    %470 = tpu.reciprocal %469 {approx = true} : vector<2x32xf32> -> vector<2x32xf32>
    %471 = arith.mulf %468, %470 : vector<2x32xf32>
    %472 = arith.addf %460, %467 : vector<2x32xf32>
    %473 = arith.addf %461, %471 : vector<2x32xf32>
    %cst_127 = arith.constant 2.000000e+00 : f32
    %474 = vector.broadcast %cst_127 : f32 to vector<2x32xf32>
    %475 = arith.mulf %474, %472 : vector<2x32xf32>
    %cst_128 = arith.constant 1.57079637 : f32
    %476 = vector.broadcast %cst_128 : f32 to vector<2x32xf32>
    %477 = arith.mulf %476, %473 : vector<2x32xf32>
    %cst_129 = arith.constant 1.000000e+00 : f32
    %478 = vector.broadcast %cst_129 : f32 to vector<2x32xf32>
    %479 = arith.addf %478, %477 : vector<2x32xf32>
    %480 = math.rsqrt %479 : vector<2x32xf32>
    %481 = arith.mulf %475, %480 : vector<2x32xf32>
    %482 = arith.negf %481 : vector<2x32xf32>
    %483 = math.exp %482 : vector<2x32xf32>
    %cst_130 = arith.constant 1.000000e+00 : f32
    %484 = vector.broadcast %cst_130 : f32 to vector<2x32xf32>
    %485 = arith.addf %484, %483 : vector<2x32xf32>
    %486 = arith.divf %484, %485 : vector<2x32xf32>
    %cst_131 = arith.constant 2.000000e+00 : f32
    %487 = vector.broadcast %cst_131 : f32 to vector<2x32xf32>
    %488 = arith.mulf %487, %472 : vector<2x32xf32>
    %cst_132 = arith.constant -0.881373584 : f32
    %489 = vector.broadcast %cst_132 : f32 to vector<2x32xf32>
    %490 = arith.addf %488, %489 : vector<2x32xf32>
    %cst_133 = arith.constant 1.17157292 : f32
    %491 = vector.broadcast %cst_133 : f32 to vector<2x32xf32>
    %492 = arith.mulf %491, %490 : vector<2x32xf32>
    %cst_134 = arith.constant 2.1560483 : f32
    %493 = vector.broadcast %cst_134 : f32 to vector<2x32xf32>
    %494 = arith.mulf %493, %473 : vector<2x32xf32>
    %cst_135 = arith.constant 1.000000e+00 : f32
    %495 = vector.broadcast %cst_135 : f32 to vector<2x32xf32>
    %496 = arith.addf %495, %494 : vector<2x32xf32>
    %497 = math.rsqrt %496 : vector<2x32xf32>
    %498 = arith.mulf %492, %497 : vector<2x32xf32>
    %499 = arith.negf %498 : vector<2x32xf32>
    %500 = math.exp %499 : vector<2x32xf32>
    %cst_136 = arith.constant 1.000000e+00 : f32
    %501 = vector.broadcast %cst_136 : f32 to vector<2x32xf32>
    %502 = arith.addf %501, %500 : vector<2x32xf32>
    %503 = arith.divf %501, %502 : vector<2x32xf32>
    %504 = arith.mulf %486, %486 : vector<2x32xf32>
    %505 = arith.subf %503, %504 : vector<2x32xf32>
    %cst_137 = arith.constant 2.000000e+00 : f32
    %506 = vector.broadcast %cst_137 : f32 to vector<2x32xf32>
    %507 = arith.mulf %506, %486 : vector<2x32xf32>
    %cst_138 = arith.constant 1.000000e+00 : f32
    %508 = vector.broadcast %cst_138 : f32 to vector<2x32xf32>
    %509 = arith.subf %507, %508 : vector<2x32xf32>
    %cst_139 = arith.constant 4.000000e+00 : f32
    %510 = vector.broadcast %cst_139 : f32 to vector<2x32xf32>
    %511 = arith.mulf %510, %505 : vector<2x32xf32>
    %512 = arith.mulf %427, %509 : vector<2x32xf32>
    %513 = arith.mulf %511, %410 : vector<2x32xf32>
    %514 = arith.addf %512, %513 : vector<2x32xf32>
    %515 = arith.addf %410, %427 : vector<2x32xf32>
    %516 = tpu.reciprocal %515 {approx = true} : vector<2x32xf32> -> vector<2x32xf32>
    %517 = arith.mulf %514, %516 : vector<2x32xf32>
    %518 = arith.mulf %427, %511 : vector<2x32xf32>
    %519 = arith.addf %427, %511 : vector<2x32xf32>
    %520 = tpu.reciprocal %519 {approx = true} : vector<2x32xf32> -> vector<2x32xf32>
    %521 = arith.mulf %518, %520 : vector<2x32xf32>
    %cst_140 = arith.constant 1.000000e+00 : f32
    %522 = vector.broadcast %cst_140 : f32 to vector<2x32xf32>
    %523 = arith.subf %522, %410 : vector<2x32xf32>
    %524 = arith.mulf %427, %345 : vector<2x32xf32>
    %525 = arith.mulf %346, %523 : vector<2x32xf32>
    %526 = arith.addf %524, %525 : vector<2x32xf32>
    %527 = arith.addf %523, %427 : vector<2x32xf32>
    %528 = tpu.reciprocal %527 {approx = true} : vector<2x32xf32> -> vector<2x32xf32>
    %529 = arith.mulf %526, %528 : vector<2x32xf32>
    %530 = arith.mulf %427, %346 : vector<2x32xf32>
    %531 = arith.addf %427, %346 : vector<2x32xf32>
    %532 = tpu.reciprocal %531 {approx = true} : vector<2x32xf32> -> vector<2x32xf32>
    %533 = arith.mulf %530, %532 : vector<2x32xf32>
    %534 = arith.addf %517, %529 : vector<2x32xf32>
    %535 = arith.addf %521, %533 : vector<2x32xf32>
    %536 = arith.mulf %534, %534 : vector<2x32xf32>
    %537 = tpu.concatenate %534, %535, %536 in 1 : vector<2x32xf32>, vector<2x32xf32>, vector<2x32xf32> -> vector<2x96xf32>
    %cst_141 = arith.constant dense<0.000000e+00> : vector<2x16xf32>
    %538 = tpu.matmul %537, %2, %cst_141 {dimension_numbers = #tpu.dot_dimension_numbers<[1], [0], [0], [1], [0, 0, 1, 1], [], []>} : vector<2x96xf32>, vector<96x16xf32>, vector<2x16xf32> -> vector<2x16xf32>
    %539 = vector.broadcast %5 : vector<1x16xf32> to vector<2x16xf32>
    %540 = arith.addf %539, %538 : vector<2x16xf32>
    %541 = vector.extract_strided_slice %540 {offsets = [0, 0], sizes = [2, 8], strides = [1, 1]} : vector<2x16xf32> to vector<2x8xf32>
    %542 = vector.extract_strided_slice %540 {offsets = [0, 8], sizes = [2, 8], strides = [1, 1]} : vector<2x16xf32> to vector<2x8xf32>
    %cst_142 = arith.constant 0.392699093 : f32
    %543 = vector.broadcast %cst_142 : f32 to vector<2x8xf32>
    %544 = arith.mulf %543, %542 : vector<2x8xf32>
    %cst_143 = arith.constant 1.000000e+00 : f32
    %545 = vector.broadcast %cst_143 : f32 to vector<2x8xf32>
    %546 = arith.addf %545, %544 : vector<2x8xf32>
    %547 = math.rsqrt %546 : vector<2x8xf32>
    %548 = arith.mulf %541, %547 : vector<2x8xf32>
    %549 = arith.negf %548 : vector<2x8xf32>
    %550 = math.exp %549 : vector<2x8xf32>
    %cst_144 = arith.constant 1.000000e+00 : f32
    %551 = vector.broadcast %cst_144 : f32 to vector<2x8xf32>
    %552 = arith.addf %551, %550 : vector<2x8xf32>
    %553 = arith.divf %551, %552 : vector<2x8xf32>
    %cst_145 = arith.constant -0.881373584 : f32
    %554 = vector.broadcast %cst_145 : f32 to vector<2x8xf32>
    %555 = arith.addf %541, %554 : vector<2x8xf32>
    %cst_146 = arith.constant 1.17157292 : f32
    %556 = vector.broadcast %cst_146 : f32 to vector<2x8xf32>
    %557 = arith.mulf %556, %555 : vector<2x8xf32>
    %cst_147 = arith.constant 0.539012074 : f32
    %558 = vector.broadcast %cst_147 : f32 to vector<2x8xf32>
    %559 = arith.mulf %558, %542 : vector<2x8xf32>
    %cst_148 = arith.constant 1.000000e+00 : f32
    %560 = vector.broadcast %cst_148 : f32 to vector<2x8xf32>
    %561 = arith.addf %560, %559 : vector<2x8xf32>
    %562 = math.rsqrt %561 : vector<2x8xf32>
    %563 = arith.mulf %557, %562 : vector<2x8xf32>
    %564 = arith.negf %563 : vector<2x8xf32>
    %565 = math.exp %564 : vector<2x8xf32>
    %cst_149 = arith.constant 1.000000e+00 : f32
    %566 = vector.broadcast %cst_149 : f32 to vector<2x8xf32>
    %567 = arith.addf %566, %565 : vector<2x8xf32>
    %568 = arith.divf %566, %567 : vector<2x8xf32>
    %569 = arith.mulf %553, %553 : vector<2x8xf32>
    %570 = arith.subf %568, %569 : vector<2x8xf32>
    %571 = tpu.concatenate %553, %570 in 1 : vector<2x8xf32>, vector<2x8xf32> -> vector<2x16xf32>
    %c2_150 = arith.constant 2 : index
    %c0_151 = arith.constant 0 : index
    %c0_152 = arith.constant 0 : index
    %572 = vector.load %arg8[%c2_150, %c0_151, %c0_152] : memref<8x2x16xf32, #tpu.memory_space<vmem>>, vector<1x2x16xf32>
    %573 = vector.shape_cast %572 : vector<1x2x16xf32> to vector<2x16xf32>
    %574 = vector.shape_cast %571 : vector<2x16xf32> to vector<1x2x16xf32>
    tpu.vector_store %arg8[%c2_150, %c0_151, %c0_152], %574 {strides = array<i32>} : memref<8x2x16xf32, #tpu.memory_space<vmem>>, vector<1x2x16xf32>,
    %c3 = arith.constant 3 : index
    %c0_153 = arith.constant 0 : index
    %c0_154 = arith.constant 0 : index
    %575 = vector.load %arg0[%c3, %c0_153, %c0_154] : memref<8x2x32xf32, #tpu.memory_space<vmem>>, vector<1x2x32xf32>
    %576 = vector.shape_cast %575 : vector<1x2x32xf32> to vector<2x32xf32>
    %577 = tpu.concatenate %576, %534 in 1 : vector<2x32xf32>, vector<2x32xf32> -> vector<2x64xf32>
    %578 = arith.mulf %576, %576 : vector<2x32xf32>
    %579 = arith.mulf %534, %534 : vector<2x32xf32>
    %580 = tpu.concatenate %578, %535, %579 in 1 : vector<2x32xf32>, vector<2x32xf32>, vector<2x32xf32> -> vector<2x96xf32>
    %cst_155 = arith.constant dense<0.000000e+00> : vector<2x128xf32>
    %581 = tpu.matmul %577, %0, %cst_155 {dimension_numbers = #tpu.dot_dimension_numbers<[1], [0], [0], [1], [0, 0, 1, 1], [], []>} : vector<2x64xf32>, vector<64x128xf32>, vector<2x128xf32> -> vector<2x128xf32>
    %582 = vector.broadcast %3 : vector<1x128xf32> to vector<2x128xf32>
    %583 = arith.addf %582, %581 : vector<2x128xf32>
    %cst_156 = arith.constant dense<0.000000e+00> : vector<2x128xf32>
    %584 = tpu.matmul %580, %1, %cst_156 {dimension_numbers = #tpu.dot_dimension_numbers<[1], [0], [0], [1], [0, 0, 1, 1], [], []>} : vector<2x96xf32>, vector<96x128xf32>, vector<2x128xf32> -> vector<2x128xf32>
    %585 = vector.broadcast %4 : vector<1x128xf32> to vector<2x128xf32>
    %586 = arith.addf %585, %584 : vector<2x128xf32>
    %587 = vector.extract_strided_slice %583 {offsets = [0, 0], sizes = [2, 32], strides = [1, 1]} : vector<2x128xf32> to vector<2x32xf32>
    %588 = vector.extract_strided_slice %586 {offsets = [0, 0], sizes = [2, 32], strides = [1, 1]} : vector<2x128xf32> to vector<2x32xf32>
    %cst_157 = arith.constant 0.392699093 : f32
    %589 = vector.broadcast %cst_157 : f32 to vector<2x32xf32>
    %590 = arith.mulf %589, %588 : vector<2x32xf32>
    %cst_158 = arith.constant 1.000000e+00 : f32
    %591 = vector.broadcast %cst_158 : f32 to vector<2x32xf32>
    %592 = arith.addf %591, %590 : vector<2x32xf32>
    %593 = math.rsqrt %592 : vector<2x32xf32>
    %594 = arith.mulf %587, %593 : vector<2x32xf32>
    %595 = arith.negf %594 : vector<2x32xf32>
    %596 = math.exp %595 : vector<2x32xf32>
    %cst_159 = arith.constant 1.000000e+00 : f32
    %597 = vector.broadcast %cst_159 : f32 to vector<2x32xf32>
    %598 = arith.addf %597, %596 : vector<2x32xf32>
    %599 = arith.divf %597, %598 : vector<2x32xf32>
    %cst_160 = arith.constant -0.881373584 : f32
    %600 = vector.broadcast %cst_160 : f32 to vector<2x32xf32>
    %601 = arith.addf %587, %600 : vector<2x32xf32>
    %cst_161 = arith.constant 1.17157292 : f32
    %602 = vector.broadcast %cst_161 : f32 to vector<2x32xf32>
    %603 = arith.mulf %602, %601 : vector<2x32xf32>
    %cst_162 = arith.constant 0.539012074 : f32
    %604 = vector.broadcast %cst_162 : f32 to vector<2x32xf32>
    %605 = arith.mulf %604, %588 : vector<2x32xf32>
    %cst_163 = arith.constant 1.000000e+00 : f32
    %606 = vector.broadcast %cst_163 : f32 to vector<2x32xf32>
    %607 = arith.addf %606, %605 : vector<2x32xf32>
    %608 = math.rsqrt %607 : vector<2x32xf32>
    %609 = arith.mulf %603, %608 : vector<2x32xf32>
    %610 = arith.negf %609 : vector<2x32xf32>
    %611 = math.exp %610 : vector<2x32xf32>
    %cst_164 = arith.constant 1.000000e+00 : f32
    %612 = vector.broadcast %cst_164 : f32 to vector<2x32xf32>
    %613 = arith.addf %612, %611 : vector<2x32xf32>
    %614 = arith.divf %612, %613 : vector<2x32xf32>
    %615 = arith.mulf %599, %599 : vector<2x32xf32>
    %616 = arith.subf %614, %615 : vector<2x32xf32>
    %617 = vector.extract_strided_slice %583 {offsets = [0, 32], sizes = [2, 32], strides = [1, 1]} : vector<2x128xf32> to vector<2x32xf32>
    %618 = vector.extract_strided_slice %586 {offsets = [0, 32], sizes = [2, 32], strides = [1, 1]} : vector<2x128xf32> to vector<2x32xf32>
    %cst_165 = arith.constant 0.392699093 : f32
    %619 = vector.broadcast %cst_165 : f32 to vector<2x32xf32>
    %620 = arith.mulf %619, %618 : vector<2x32xf32>
    %cst_166 = arith.constant 1.000000e+00 : f32
    %621 = vector.broadcast %cst_166 : f32 to vector<2x32xf32>
    %622 = arith.addf %621, %620 : vector<2x32xf32>
    %623 = math.rsqrt %622 : vector<2x32xf32>
    %624 = arith.mulf %617, %623 : vector<2x32xf32>
    %625 = arith.negf %624 : vector<2x32xf32>
    %626 = math.exp %625 : vector<2x32xf32>
    %cst_167 = arith.constant 1.000000e+00 : f32
    %627 = vector.broadcast %cst_167 : f32 to vector<2x32xf32>
    %628 = arith.addf %627, %626 : vector<2x32xf32>
    %629 = arith.divf %627, %628 : vector<2x32xf32>
    %cst_168 = arith.constant -0.881373584 : f32
    %630 = vector.broadcast %cst_168 : f32 to vector<2x32xf32>
    %631 = arith.addf %617, %630 : vector<2x32xf32>
    %cst_169 = arith.constant 1.17157292 : f32
    %632 = vector.broadcast %cst_169 : f32 to vector<2x32xf32>
    %633 = arith.mulf %632, %631 : vector<2x32xf32>
    %cst_170 = arith.constant 0.539012074 : f32
    %634 = vector.broadcast %cst_170 : f32 to vector<2x32xf32>
    %635 = arith.mulf %634, %618 : vector<2x32xf32>
    %cst_171 = arith.constant 1.000000e+00 : f32
    %636 = vector.broadcast %cst_171 : f32 to vector<2x32xf32>
    %637 = arith.addf %636, %635 : vector<2x32xf32>
    %638 = math.rsqrt %637 : vector<2x32xf32>
    %639 = arith.mulf %633, %638 : vector<2x32xf32>
    %640 = arith.negf %639 : vector<2x32xf32>
    %641 = math.exp %640 : vector<2x32xf32>
    %cst_172 = arith.constant 1.000000e+00 : f32
    %642 = vector.broadcast %cst_172 : f32 to vector<2x32xf32>
    %643 = arith.addf %642, %641 : vector<2x32xf32>
    %644 = arith.divf %642, %643 : vector<2x32xf32>
    %645 = arith.mulf %629, %629 : vector<2x32xf32>
    %646 = arith.subf %644, %645 : vector<2x32xf32>
    %647 = vector.extract_strided_slice %583 {offsets = [0, 64], sizes = [2, 32], strides = [1, 1]} : vector<2x128xf32> to vector<2x32xf32>
    %648 = vector.extract_strided_slice %586 {offsets = [0, 64], sizes = [2, 32], strides = [1, 1]} : vector<2x128xf32> to vector<2x32xf32>
    %649 = vector.extract_strided_slice %583 {offsets = [0, 96], sizes = [2, 32], strides = [1, 1]} : vector<2x128xf32> to vector<2x32xf32>
    %650 = vector.extract_strided_slice %586 {offsets = [0, 96], sizes = [2, 32], strides = [1, 1]} : vector<2x128xf32> to vector<2x32xf32>
    %651 = arith.mulf %646, %647 : vector<2x32xf32>
    %652 = arith.mulf %648, %629 : vector<2x32xf32>
    %653 = arith.addf %651, %652 : vector<2x32xf32>
    %654 = arith.addf %629, %646 : vector<2x32xf32>
    %655 = tpu.reciprocal %654 {approx = true} : vector<2x32xf32> -> vector<2x32xf32>
    %656 = arith.mulf %653, %655 : vector<2x32xf32>
    %657 = arith.mulf %646, %648 : vector<2x32xf32>
    %658 = arith.addf %646, %648 : vector<2x32xf32>
    %659 = tpu.reciprocal %658 {approx = true} : vector<2x32xf32> -> vector<2x32xf32>
    %660 = arith.mulf %657, %659 : vector<2x32xf32>
    %661 = arith.addf %649, %656 : vector<2x32xf32>
    %662 = arith.addf %650, %660 : vector<2x32xf32>
    %cst_173 = arith.constant 2.000000e+00 : f32
    %663 = vector.broadcast %cst_173 : f32 to vector<2x32xf32>
    %664 = arith.mulf %663, %661 : vector<2x32xf32>
    %cst_174 = arith.constant 1.57079637 : f32
    %665 = vector.broadcast %cst_174 : f32 to vector<2x32xf32>
    %666 = arith.mulf %665, %662 : vector<2x32xf32>
    %cst_175 = arith.constant 1.000000e+00 : f32
    %667 = vector.broadcast %cst_175 : f32 to vector<2x32xf32>
    %668 = arith.addf %667, %666 : vector<2x32xf32>
    %669 = math.rsqrt %668 : vector<2x32xf32>
    %670 = arith.mulf %664, %669 : vector<2x32xf32>
    %671 = arith.negf %670 : vector<2x32xf32>
    %672 = math.exp %671 : vector<2x32xf32>
    %cst_176 = arith.constant 1.000000e+00 : f32
    %673 = vector.broadcast %cst_176 : f32 to vector<2x32xf32>
    %674 = arith.addf %673, %672 : vector<2x32xf32>
    %675 = arith.divf %673, %674 : vector<2x32xf32>
    %cst_177 = arith.constant 2.000000e+00 : f32
    %676 = vector.broadcast %cst_177 : f32 to vector<2x32xf32>
    %677 = arith.mulf %676, %661 : vector<2x32xf32>
    %cst_178 = arith.constant -0.881373584 : f32
    %678 = vector.broadcast %cst_178 : f32 to vector<2x32xf32>
    %679 = arith.addf %677, %678 : vector<2x32xf32>
    %cst_179 = arith.constant 1.17157292 : f32
    %680 = vector.broadcast %cst_179 : f32 to vector<2x32xf32>
    %681 = arith.mulf %680, %679 : vector<2x32xf32>
    %cst_180 = arith.constant 2.1560483 : f32
    %682 = vector.broadcast %cst_180 : f32 to vector<2x32xf32>
    %683 = arith.mulf %682, %662 : vector<2x32xf32>
    %cst_181 = arith.constant 1.000000e+00 : f32
    %684 = vector.broadcast %cst_181 : f32 to vector<2x32xf32>
    %685 = arith.addf %684, %683 : vector<2x32xf32>
    %686 = math.rsqrt %685 : vector<2x32xf32>
    %687 = arith.mulf %681, %686 : vector<2x32xf32>
    %688 = arith.negf %687 : vector<2x32xf32>
    %689 = math.exp %688 : vector<2x32xf32>
    %cst_182 = arith.constant 1.000000e+00 : f32
    %690 = vector.broadcast %cst_182 : f32 to vector<2x32xf32>
    %691 = arith.addf %690, %689 : vector<2x32xf32>
    %692 = arith.divf %690, %691 : vector<2x32xf32>
    %693 = arith.mulf %675, %675 : vector<2x32xf32>
    %694 = arith.subf %692, %693 : vector<2x32xf32>
    %cst_183 = arith.constant 2.000000e+00 : f32
    %695 = vector.broadcast %cst_183 : f32 to vector<2x32xf32>
    %696 = arith.mulf %695, %675 : vector<2x32xf32>
    %cst_184 = arith.constant 1.000000e+00 : f32
    %697 = vector.broadcast %cst_184 : f32 to vector<2x32xf32>
    %698 = arith.subf %696, %697 : vector<2x32xf32>
    %cst_185 = arith.constant 4.000000e+00 : f32
    %699 = vector.broadcast %cst_185 : f32 to vector<2x32xf32>
    %700 = arith.mulf %699, %694 : vector<2x32xf32>
    %701 = arith.mulf %616, %698 : vector<2x32xf32>
    %702 = arith.mulf %700, %599 : vector<2x32xf32>
    %703 = arith.addf %701, %702 : vector<2x32xf32>
    %704 = arith.addf %599, %616 : vector<2x32xf32>
    %705 = tpu.reciprocal %704 {approx = true} : vector<2x32xf32> -> vector<2x32xf32>
    %706 = arith.mulf %703, %705 : vector<2x32xf32>
    %707 = arith.mulf %616, %700 : vector<2x32xf32>
    %708 = arith.addf %616, %700 : vector<2x32xf32>
    %709 = tpu.reciprocal %708 {approx = true} : vector<2x32xf32> -> vector<2x32xf32>
    %710 = arith.mulf %707, %709 : vector<2x32xf32>
    %cst_186 = arith.constant 1.000000e+00 : f32
    %711 = vector.broadcast %cst_186 : f32 to vector<2x32xf32>
    %712 = arith.subf %711, %599 : vector<2x32xf32>
    %713 = arith.mulf %616, %534 : vector<2x32xf32>
    %714 = arith.mulf %535, %712 : vector<2x32xf32>
    %715 = arith.addf %713, %714 : vector<2x32xf32>
    %716 = arith.addf %712, %616 : vector<2x32xf32>
    %717 = tpu.reciprocal %716 {approx = true} : vector<2x32xf32> -> vector<2x32xf32>
    %718 = arith.mulf %715, %717 : vector<2x32xf32>
    %719 = arith.mulf %616, %535 : vector<2x32xf32>
    %720 = arith.addf %616, %535 : vector<2x32xf32>
    %721 = tpu.reciprocal %720 {approx = true} : vector<2x32xf32> -> vector<2x32xf32>
    %722 = arith.mulf %719, %721 : vector<2x32xf32>
    %723 = arith.addf %706, %718 : vector<2x32xf32>
    %724 = arith.addf %710, %722 : vector<2x32xf32>
    %725 = arith.mulf %723, %723 : vector<2x32xf32>
    %726 = tpu.concatenate %723, %724, %725 in 1 : vector<2x32xf32>, vector<2x32xf32>, vector<2x32xf32> -> vector<2x96xf32>
    %cst_187 = arith.constant dense<0.000000e+00> : vector<2x16xf32>
    %727 = tpu.matmul %726, %2, %cst_187 {dimension_numbers = #tpu.dot_dimension_numbers<[1], [0], [0], [1], [0, 0, 1, 1], [], []>} : vector<2x96xf32>, vector<96x16xf32>, vector<2x16xf32> -> vector<2x16xf32>
    %728 = vector.broadcast %5 : vector<1x16xf32> to vector<2x16xf32>
    %729 = arith.addf %728, %727 : vector<2x16xf32>
    %730 = vector.extract_strided_slice %729 {offsets = [0, 0], sizes = [2, 8], strides = [1, 1]} : vector<2x16xf32> to vector<2x8xf32>
    %731 = vector.extract_strided_slice %729 {offsets = [0, 8], sizes = [2, 8], strides = [1, 1]} : vector<2x16xf32> to vector<2x8xf32>
    %cst_188 = arith.constant 0.392699093 : f32
    %732 = vector.broadcast %cst_188 : f32 to vector<2x8xf32>
    %733 = arith.mulf %732, %731 : vector<2x8xf32>
    %cst_189 = arith.constant 1.000000e+00 : f32
    %734 = vector.broadcast %cst_189 : f32 to vector<2x8xf32>
    %735 = arith.addf %734, %733 : vector<2x8xf32>
    %736 = math.rsqrt %735 : vector<2x8xf32>
    %737 = arith.mulf %730, %736 : vector<2x8xf32>
    %738 = arith.negf %737 : vector<2x8xf32>
    %739 = math.exp %738 : vector<2x8xf32>
    %cst_190 = arith.constant 1.000000e+00 : f32
    %740 = vector.broadcast %cst_190 : f32 to vector<2x8xf32>
    %741 = arith.addf %740, %739 : vector<2x8xf32>
    %742 = arith.divf %740, %741 : vector<2x8xf32>
    %cst_191 = arith.constant -0.881373584 : f32
    %743 = vector.broadcast %cst_191 : f32 to vector<2x8xf32>
    %744 = arith.addf %730, %743 : vector<2x8xf32>
    %cst_192 = arith.constant 1.17157292 : f32
    %745 = vector.broadcast %cst_192 : f32 to vector<2x8xf32>
    %746 = arith.mulf %745, %744 : vector<2x8xf32>
    %cst_193 = arith.constant 0.539012074 : f32
    %747 = vector.broadcast %cst_193 : f32 to vector<2x8xf32>
    %748 = arith.mulf %747, %731 : vector<2x8xf32>
    %cst_194 = arith.constant 1.000000e+00 : f32
    %749 = vector.broadcast %cst_194 : f32 to vector<2x8xf32>
    %750 = arith.addf %749, %748 : vector<2x8xf32>
    %751 = math.rsqrt %750 : vector<2x8xf32>
    %752 = arith.mulf %746, %751 : vector<2x8xf32>
    %753 = arith.negf %752 : vector<2x8xf32>
    %754 = math.exp %753 : vector<2x8xf32>
    %cst_195 = arith.constant 1.000000e+00 : f32
    %755 = vector.broadcast %cst_195 : f32 to vector<2x8xf32>
    %756 = arith.addf %755, %754 : vector<2x8xf32>
    %757 = arith.divf %755, %756 : vector<2x8xf32>
    %758 = arith.mulf %742, %742 : vector<2x8xf32>
    %759 = arith.subf %757, %758 : vector<2x8xf32>
    %760 = tpu.concatenate %742, %759 in 1 : vector<2x8xf32>, vector<2x8xf32> -> vector<2x16xf32>
    %c3_196 = arith.constant 3 : index
    %c0_197 = arith.constant 0 : index
    %c0_198 = arith.constant 0 : index
    %761 = vector.load %arg8[%c3_196, %c0_197, %c0_198] : memref<8x2x16xf32, #tpu.memory_space<vmem>>, vector<1x2x16xf32>
    %762 = vector.shape_cast %761 : vector<1x2x16xf32> to vector<2x16xf32>
    %763 = vector.shape_cast %760 : vector<2x16xf32> to vector<1x2x16xf32>
    tpu.vector_store %arg8[%c3_196, %c0_197, %c0_198], %763 {strides = array<i32>} : memref<8x2x16xf32, #tpu.memory_space<vmem>>, vector<1x2x16xf32>,
    %c4 = arith.constant 4 : index
    %c0_199 = arith.constant 0 : index
    %c0_200 = arith.constant 0 : index
    %764 = vector.load %arg0[%c4, %c0_199, %c0_200] : memref<8x2x32xf32, #tpu.memory_space<vmem>>, vector<1x2x32xf32>
    %765 = vector.shape_cast %764 : vector<1x2x32xf32> to vector<2x32xf32>
    %766 = tpu.concatenate %765, %723 in 1 : vector<2x32xf32>, vector<2x32xf32> -> vector<2x64xf32>
    %767 = arith.mulf %765, %765 : vector<2x32xf32>
    %768 = arith.mulf %723, %723 : vector<2x32xf32>
    %769 = tpu.concatenate %767, %724, %768 in 1 : vector<2x32xf32>, vector<2x32xf32>, vector<2x32xf32> -> vector<2x96xf32>
    %cst_201 = arith.constant dense<0.000000e+00> : vector<2x128xf32>
    %770 = tpu.matmul %766, %0, %cst_201 {dimension_numbers = #tpu.dot_dimension_numbers<[1], [0], [0], [1], [0, 0, 1, 1], [], []>} : vector<2x64xf32>, vector<64x128xf32>, vector<2x128xf32> -> vector<2x128xf32>
    %771 = vector.broadcast %3 : vector<1x128xf32> to vector<2x128xf32>
    %772 = arith.addf %771, %770 : vector<2x128xf32>
    %cst_202 = arith.constant dense<0.000000e+00> : vector<2x128xf32>
    %773 = tpu.matmul %769, %1, %cst_202 {dimension_numbers = #tpu.dot_dimension_numbers<[1], [0], [0], [1], [0, 0, 1, 1], [], []>} : vector<2x96xf32>, vector<96x128xf32>, vector<2x128xf32> -> vector<2x128xf32>
    %774 = vector.broadcast %4 : vector<1x128xf32> to vector<2x128xf32>
    %775 = arith.addf %774, %773 : vector<2x128xf32>
    %776 = vector.extract_strided_slice %772 {offsets = [0, 0], sizes = [2, 32], strides = [1, 1]} : vector<2x128xf32> to vector<2x32xf32>
    %777 = vector.extract_strided_slice %775 {offsets = [0, 0], sizes = [2, 32], strides = [1, 1]} : vector<2x128xf32> to vector<2x32xf32>
    %cst_203 = arith.constant 0.392699093 : f32
    %778 = vector.broadcast %cst_203 : f32 to vector<2x32xf32>
    %779 = arith.mulf %778, %777 : vector<2x32xf32>
    %cst_204 = arith.constant 1.000000e+00 : f32
    %780 = vector.broadcast %cst_204 : f32 to vector<2x32xf32>
    %781 = arith.addf %780, %779 : vector<2x32xf32>
    %782 = math.rsqrt %781 : vector<2x32xf32>
    %783 = arith.mulf %776, %782 : vector<2x32xf32>
    %784 = arith.negf %783 : vector<2x32xf32>
    %785 = math.exp %784 : vector<2x32xf32>
    %cst_205 = arith.constant 1.000000e+00 : f32
    %786 = vector.broadcast %cst_205 : f32 to vector<2x32xf32>
    %787 = arith.addf %786, %785 : vector<2x32xf32>
    %788 = arith.divf %786, %787 : vector<2x32xf32>
    %cst_206 = arith.constant -0.881373584 : f32
    %789 = vector.broadcast %cst_206 : f32 to vector<2x32xf32>
    %790 = arith.addf %776, %789 : vector<2x32xf32>
    %cst_207 = arith.constant 1.17157292 : f32
    %791 = vector.broadcast %cst_207 : f32 to vector<2x32xf32>
    %792 = arith.mulf %791, %790 : vector<2x32xf32>
    %cst_208 = arith.constant 0.539012074 : f32
    %793 = vector.broadcast %cst_208 : f32 to vector<2x32xf32>
    %794 = arith.mulf %793, %777 : vector<2x32xf32>
    %cst_209 = arith.constant 1.000000e+00 : f32
    %795 = vector.broadcast %cst_209 : f32 to vector<2x32xf32>
    %796 = arith.addf %795, %794 : vector<2x32xf32>
    %797 = math.rsqrt %796 : vector<2x32xf32>
    %798 = arith.mulf %792, %797 : vector<2x32xf32>
    %799 = arith.negf %798 : vector<2x32xf32>
    %800 = math.exp %799 : vector<2x32xf32>
    %cst_210 = arith.constant 1.000000e+00 : f32
    %801 = vector.broadcast %cst_210 : f32 to vector<2x32xf32>
    %802 = arith.addf %801, %800 : vector<2x32xf32>
    %803 = arith.divf %801, %802 : vector<2x32xf32>
    %804 = arith.mulf %788, %788 : vector<2x32xf32>
    %805 = arith.subf %803, %804 : vector<2x32xf32>
    %806 = vector.extract_strided_slice %772 {offsets = [0, 32], sizes = [2, 32], strides = [1, 1]} : vector<2x128xf32> to vector<2x32xf32>
    %807 = vector.extract_strided_slice %775 {offsets = [0, 32], sizes = [2, 32], strides = [1, 1]} : vector<2x128xf32> to vector<2x32xf32>
    %cst_211 = arith.constant 0.392699093 : f32
    %808 = vector.broadcast %cst_211 : f32 to vector<2x32xf32>
    %809 = arith.mulf %808, %807 : vector<2x32xf32>
    %cst_212 = arith.constant 1.000000e+00 : f32
    %810 = vector.broadcast %cst_212 : f32 to vector<2x32xf32>
    %811 = arith.addf %810, %809 : vector<2x32xf32>
    %812 = math.rsqrt %811 : vector<2x32xf32>
    %813 = arith.mulf %806, %812 : vector<2x32xf32>
    %814 = arith.negf %813 : vector<2x32xf32>
    %815 = math.exp %814 : vector<2x32xf32>
    %cst_213 = arith.constant 1.000000e+00 : f32
    %816 = vector.broadcast %cst_213 : f32 to vector<2x32xf32>
    %817 = arith.addf %816, %815 : vector<2x32xf32>
    %818 = arith.divf %816, %817 : vector<2x32xf32>
    %cst_214 = arith.constant -0.881373584 : f32
    %819 = vector.broadcast %cst_214 : f32 to vector<2x32xf32>
    %820 = arith.addf %806, %819 : vector<2x32xf32>
    %cst_215 = arith.constant 1.17157292 : f32
    %821 = vector.broadcast %cst_215 : f32 to vector<2x32xf32>
    %822 = arith.mulf %821, %820 : vector<2x32xf32>
    %cst_216 = arith.constant 0.539012074 : f32
    %823 = vector.broadcast %cst_216 : f32 to vector<2x32xf32>
    %824 = arith.mulf %823, %807 : vector<2x32xf32>
    %cst_217 = arith.constant 1.000000e+00 : f32
    %825 = vector.broadcast %cst_217 : f32 to vector<2x32xf32>
    %826 = arith.addf %825, %824 : vector<2x32xf32>
    %827 = math.rsqrt %826 : vector<2x32xf32>
    %828 = arith.mulf %822, %827 : vector<2x32xf32>
    %829 = arith.negf %828 : vector<2x32xf32>
    %830 = math.exp %829 : vector<2x32xf32>
    %cst_218 = arith.constant 1.000000e+00 : f32
    %831 = vector.broadcast %cst_218 : f32 to vector<2x32xf32>
    %832 = arith.addf %831, %830 : vector<2x32xf32>
    %833 = arith.divf %831, %832 : vector<2x32xf32>
    %834 = arith.mulf %818, %818 : vector<2x32xf32>
    %835 = arith.subf %833, %834 : vector<2x32xf32>
    %836 = vector.extract_strided_slice %772 {offsets = [0, 64], sizes = [2, 32], strides = [1, 1]} : vector<2x128xf32> to vector<2x32xf32>
    %837 = vector.extract_strided_slice %775 {offsets = [0, 64], sizes = [2, 32], strides = [1, 1]} : vector<2x128xf32> to vector<2x32xf32>
    %838 = vector.extract_strided_slice %772 {offsets = [0, 96], sizes = [2, 32], strides = [1, 1]} : vector<2x128xf32> to vector<2x32xf32>
    %839 = vector.extract_strided_slice %775 {offsets = [0, 96], sizes = [2, 32], strides = [1, 1]} : vector<2x128xf32> to vector<2x32xf32>
    %840 = arith.mulf %835, %836 : vector<2x32xf32>
    %841 = arith.mulf %837, %818 : vector<2x32xf32>
    %842 = arith.addf %840, %841 : vector<2x32xf32>
    %843 = arith.addf %818, %835 : vector<2x32xf32>
    %844 = tpu.reciprocal %843 {approx = true} : vector<2x32xf32> -> vector<2x32xf32>
    %845 = arith.mulf %842, %844 : vector<2x32xf32>
    %846 = arith.mulf %835, %837 : vector<2x32xf32>
    %847 = arith.addf %835, %837 : vector<2x32xf32>
    %848 = tpu.reciprocal %847 {approx = true} : vector<2x32xf32> -> vector<2x32xf32>
    %849 = arith.mulf %846, %848 : vector<2x32xf32>
    %850 = arith.addf %838, %845 : vector<2x32xf32>
    %851 = arith.addf %839, %849 : vector<2x32xf32>
    %cst_219 = arith.constant 2.000000e+00 : f32
    %852 = vector.broadcast %cst_219 : f32 to vector<2x32xf32>
    %853 = arith.mulf %852, %850 : vector<2x32xf32>
    %cst_220 = arith.constant 1.57079637 : f32
    %854 = vector.broadcast %cst_220 : f32 to vector<2x32xf32>
    %855 = arith.mulf %854, %851 : vector<2x32xf32>
    %cst_221 = arith.constant 1.000000e+00 : f32
    %856 = vector.broadcast %cst_221 : f32 to vector<2x32xf32>
    %857 = arith.addf %856, %855 : vector<2x32xf32>
    %858 = math.rsqrt %857 : vector<2x32xf32>
    %859 = arith.mulf %853, %858 : vector<2x32xf32>
    %860 = arith.negf %859 : vector<2x32xf32>
    %861 = math.exp %860 : vector<2x32xf32>
    %cst_222 = arith.constant 1.000000e+00 : f32
    %862 = vector.broadcast %cst_222 : f32 to vector<2x32xf32>
    %863 = arith.addf %862, %861 : vector<2x32xf32>
    %864 = arith.divf %862, %863 : vector<2x32xf32>
    %cst_223 = arith.constant 2.000000e+00 : f32
    %865 = vector.broadcast %cst_223 : f32 to vector<2x32xf32>
    %866 = arith.mulf %865, %850 : vector<2x32xf32>
    %cst_224 = arith.constant -0.881373584 : f32
    %867 = vector.broadcast %cst_224 : f32 to vector<2x32xf32>
    %868 = arith.addf %866, %867 : vector<2x32xf32>
    %cst_225 = arith.constant 1.17157292 : f32
    %869 = vector.broadcast %cst_225 : f32 to vector<2x32xf32>
    %870 = arith.mulf %869, %868 : vector<2x32xf32>
    %cst_226 = arith.constant 2.1560483 : f32
    %871 = vector.broadcast %cst_226 : f32 to vector<2x32xf32>
    %872 = arith.mulf %871, %851 : vector<2x32xf32>
    %cst_227 = arith.constant 1.000000e+00 : f32
    %873 = vector.broadcast %cst_227 : f32 to vector<2x32xf32>
    %874 = arith.addf %873, %872 : vector<2x32xf32>
    %875 = math.rsqrt %874 : vector<2x32xf32>
    %876 = arith.mulf %870, %875 : vector<2x32xf32>
    %877 = arith.negf %876 : vector<2x32xf32>
    %878 = math.exp %877 : vector<2x32xf32>
    %cst_228 = arith.constant 1.000000e+00 : f32
    %879 = vector.broadcast %cst_228 : f32 to vector<2x32xf32>
    %880 = arith.addf %879, %878 : vector<2x32xf32>
    %881 = arith.divf %879, %880 : vector<2x32xf32>
    %882 = arith.mulf %864, %864 : vector<2x32xf32>
    %883 = arith.subf %881, %882 : vector<2x32xf32>
    %cst_229 = arith.constant 2.000000e+00 : f32
    %884 = vector.broadcast %cst_229 : f32 to vector<2x32xf32>
    %885 = arith.mulf %884, %864 : vector<2x32xf32>
    %cst_230 = arith.constant 1.000000e+00 : f32
    %886 = vector.broadcast %cst_230 : f32 to vector<2x32xf32>
    %887 = arith.subf %885, %886 : vector<2x32xf32>
    %cst_231 = arith.constant 4.000000e+00 : f32
    %888 = vector.broadcast %cst_231 : f32 to vector<2x32xf32>
    %889 = arith.mulf %888, %883 : vector<2x32xf32>
    %890 = arith.mulf %805, %887 : vector<2x32xf32>
    %891 = arith.mulf %889, %788 : vector<2x32xf32>
    %892 = arith.addf %890, %891 : vector<2x32xf32>
    %893 = arith.addf %788, %805 : vector<2x32xf32>
    %894 = tpu.reciprocal %893 {approx = true} : vector<2x32xf32> -> vector<2x32xf32>
    %895 = arith.mulf %892, %894 : vector<2x32xf32>
    %896 = arith.mulf %805, %889 : vector<2x32xf32>
    %897 = arith.addf %805, %889 : vector<2x32xf32>
    %898 = tpu.reciprocal %897 {approx = true} : vector<2x32xf32> -> vector<2x32xf32>
    %899 = arith.mulf %896, %898 : vector<2x32xf32>
    %cst_232 = arith.constant 1.000000e+00 : f32
    %900 = vector.broadcast %cst_232 : f32 to vector<2x32xf32>
    %901 = arith.subf %900, %788 : vector<2x32xf32>
    %902 = arith.mulf %805, %723 : vector<2x32xf32>
    %903 = arith.mulf %724, %901 : vector<2x32xf32>
    %904 = arith.addf %902, %903 : vector<2x32xf32>
    %905 = arith.addf %901, %805 : vector<2x32xf32>
    %906 = tpu.reciprocal %905 {approx = true} : vector<2x32xf32> -> vector<2x32xf32>
    %907 = arith.mulf %904, %906 : vector<2x32xf32>
    %908 = arith.mulf %805, %724 : vector<2x32xf32>
    %909 = arith.addf %805, %724 : vector<2x32xf32>
    %910 = tpu.reciprocal %909 {approx = true} : vector<2x32xf32> -> vector<2x32xf32>
    %911 = arith.mulf %908, %910 : vector<2x32xf32>
    %912 = arith.addf %895, %907 : vector<2x32xf32>
    %913 = arith.addf %899, %911 : vector<2x32xf32>
    %914 = arith.mulf %912, %912 : vector<2x32xf32>
    %915 = tpu.concatenate %912, %913, %914 in 1 : vector<2x32xf32>, vector<2x32xf32>, vector<2x32xf32> -> vector<2x96xf32>
    %cst_233 = arith.constant dense<0.000000e+00> : vector<2x16xf32>
    %916 = tpu.matmul %915, %2, %cst_233 {dimension_numbers = #tpu.dot_dimension_numbers<[1], [0], [0], [1], [0, 0, 1, 1], [], []>} : vector<2x96xf32>, vector<96x16xf32>, vector<2x16xf32> -> vector<2x16xf32>
    %917 = vector.broadcast %5 : vector<1x16xf32> to vector<2x16xf32>
    %918 = arith.addf %917, %916 : vector<2x16xf32>
    %919 = vector.extract_strided_slice %918 {offsets = [0, 0], sizes = [2, 8], strides = [1, 1]} : vector<2x16xf32> to vector<2x8xf32>
    %920 = vector.extract_strided_slice %918 {offsets = [0, 8], sizes = [2, 8], strides = [1, 1]} : vector<2x16xf32> to vector<2x8xf32>
    %cst_234 = arith.constant 0.392699093 : f32
    %921 = vector.broadcast %cst_234 : f32 to vector<2x8xf32>
    %922 = arith.mulf %921, %920 : vector<2x8xf32>
    %cst_235 = arith.constant 1.000000e+00 : f32
    %923 = vector.broadcast %cst_235 : f32 to vector<2x8xf32>
    %924 = arith.addf %923, %922 : vector<2x8xf32>
    %925 = math.rsqrt %924 : vector<2x8xf32>
    %926 = arith.mulf %919, %925 : vector<2x8xf32>
    %927 = arith.negf %926 : vector<2x8xf32>
    %928 = math.exp %927 : vector<2x8xf32>
    %cst_236 = arith.constant 1.000000e+00 : f32
    %929 = vector.broadcast %cst_236 : f32 to vector<2x8xf32>
    %930 = arith.addf %929, %928 : vector<2x8xf32>
    %931 = arith.divf %929, %930 : vector<2x8xf32>
    %cst_237 = arith.constant -0.881373584 : f32
    %932 = vector.broadcast %cst_237 : f32 to vector<2x8xf32>
    %933 = arith.addf %919, %932 : vector<2x8xf32>
    %cst_238 = arith.constant 1.17157292 : f32
    %934 = vector.broadcast %cst_238 : f32 to vector<2x8xf32>
    %935 = arith.mulf %934, %933 : vector<2x8xf32>
    %cst_239 = arith.constant 0.539012074 : f32
    %936 = vector.broadcast %cst_239 : f32 to vector<2x8xf32>
    %937 = arith.mulf %936, %920 : vector<2x8xf32>
    %cst_240 = arith.constant 1.000000e+00 : f32
    %938 = vector.broadcast %cst_240 : f32 to vector<2x8xf32>
    %939 = arith.addf %938, %937 : vector<2x8xf32>
    %940 = math.rsqrt %939 : vector<2x8xf32>
    %941 = arith.mulf %935, %940 : vector<2x8xf32>
    %942 = arith.negf %941 : vector<2x8xf32>
    %943 = math.exp %942 : vector<2x8xf32>
    %cst_241 = arith.constant 1.000000e+00 : f32
    %944 = vector.broadcast %cst_241 : f32 to vector<2x8xf32>
    %945 = arith.addf %944, %943 : vector<2x8xf32>
    %946 = arith.divf %944, %945 : vector<2x8xf32>
    %947 = arith.mulf %931, %931 : vector<2x8xf32>
    %948 = arith.subf %946, %947 : vector<2x8xf32>
    %949 = tpu.concatenate %931, %948 in 1 : vector<2x8xf32>, vector<2x8xf32> -> vector<2x16xf32>
    %c4_242 = arith.constant 4 : index
    %c0_243 = arith.constant 0 : index
    %c0_244 = arith.constant 0 : index
    %950 = vector.load %arg8[%c4_242, %c0_243, %c0_244] : memref<8x2x16xf32, #tpu.memory_space<vmem>>, vector<1x2x16xf32>
    %951 = vector.shape_cast %950 : vector<1x2x16xf32> to vector<2x16xf32>
    %952 = vector.shape_cast %949 : vector<2x16xf32> to vector<1x2x16xf32>
    tpu.vector_store %arg8[%c4_242, %c0_243, %c0_244], %952 {strides = array<i32>} : memref<8x2x16xf32, #tpu.memory_space<vmem>>, vector<1x2x16xf32>,
    %c5 = arith.constant 5 : index
    %c0_245 = arith.constant 0 : index
    %c0_246 = arith.constant 0 : index
    %953 = vector.load %arg0[%c5, %c0_245, %c0_246] : memref<8x2x32xf32, #tpu.memory_space<vmem>>, vector<1x2x32xf32>
    %954 = vector.shape_cast %953 : vector<1x2x32xf32> to vector<2x32xf32>
    %955 = tpu.concatenate %954, %912 in 1 : vector<2x32xf32>, vector<2x32xf32> -> vector<2x64xf32>
    %956 = arith.mulf %954, %954 : vector<2x32xf32>
    %957 = arith.mulf %912, %912 : vector<2x32xf32>
    %958 = tpu.concatenate %956, %913, %957 in 1 : vector<2x32xf32>, vector<2x32xf32>, vector<2x32xf32> -> vector<2x96xf32>
    %cst_247 = arith.constant dense<0.000000e+00> : vector<2x128xf32>
    %959 = tpu.matmul %955, %0, %cst_247 {dimension_numbers = #tpu.dot_dimension_numbers<[1], [0], [0], [1], [0, 0, 1, 1], [], []>} : vector<2x64xf32>, vector<64x128xf32>, vector<2x128xf32> -> vector<2x128xf32>
    %960 = vector.broadcast %3 : vector<1x128xf32> to vector<2x128xf32>
    %961 = arith.addf %960, %959 : vector<2x128xf32>
    %cst_248 = arith.constant dense<0.000000e+00> : vector<2x128xf32>
    %962 = tpu.matmul %958, %1, %cst_248 {dimension_numbers = #tpu.dot_dimension_numbers<[1], [0], [0], [1], [0, 0, 1, 1], [], []>} : vector<2x96xf32>, vector<96x128xf32>, vector<2x128xf32> -> vector<2x128xf32>
    %963 = vector.broadcast %4 : vector<1x128xf32> to vector<2x128xf32>
    %964 = arith.addf %963, %962 : vector<2x128xf32>
    %965 = vector.extract_strided_slice %961 {offsets = [0, 0], sizes = [2, 32], strides = [1, 1]} : vector<2x128xf32> to vector<2x32xf32>
    %966 = vector.extract_strided_slice %964 {offsets = [0, 0], sizes = [2, 32], strides = [1, 1]} : vector<2x128xf32> to vector<2x32xf32>
    %cst_249 = arith.constant 0.392699093 : f32
    %967 = vector.broadcast %cst_249 : f32 to vector<2x32xf32>
    %968 = arith.mulf %967, %966 : vector<2x32xf32>
    %cst_250 = arith.constant 1.000000e+00 : f32
    %969 = vector.broadcast %cst_250 : f32 to vector<2x32xf32>
    %970 = arith.addf %969, %968 : vector<2x32xf32>
    %971 = math.rsqrt %970 : vector<2x32xf32>
    %972 = arith.mulf %965, %971 : vector<2x32xf32>
    %973 = arith.negf %972 : vector<2x32xf32>
    %974 = math.exp %973 : vector<2x32xf32>
    %cst_251 = arith.constant 1.000000e+00 : f32
    %975 = vector.broadcast %cst_251 : f32 to vector<2x32xf32>
    %976 = arith.addf %975, %974 : vector<2x32xf32>
    %977 = arith.divf %975, %976 : vector<2x32xf32>
    %cst_252 = arith.constant -0.881373584 : f32
    %978 = vector.broadcast %cst_252 : f32 to vector<2x32xf32>
    %979 = arith.addf %965, %978 : vector<2x32xf32>
    %cst_253 = arith.constant 1.17157292 : f32
    %980 = vector.broadcast %cst_253 : f32 to vector<2x32xf32>
    %981 = arith.mulf %980, %979 : vector<2x32xf32>
    %cst_254 = arith.constant 0.539012074 : f32
    %982 = vector.broadcast %cst_254 : f32 to vector<2x32xf32>
    %983 = arith.mulf %982, %966 : vector<2x32xf32>
    %cst_255 = arith.constant 1.000000e+00 : f32
    %984 = vector.broadcast %cst_255 : f32 to vector<2x32xf32>
    %985 = arith.addf %984, %983 : vector<2x32xf32>
    %986 = math.rsqrt %985 : vector<2x32xf32>
    %987 = arith.mulf %981, %986 : vector<2x32xf32>
    %988 = arith.negf %987 : vector<2x32xf32>
    %989 = math.exp %988 : vector<2x32xf32>
    %cst_256 = arith.constant 1.000000e+00 : f32
    %990 = vector.broadcast %cst_256 : f32 to vector<2x32xf32>
    %991 = arith.addf %990, %989 : vector<2x32xf32>
    %992 = arith.divf %990, %991 : vector<2x32xf32>
    %993 = arith.mulf %977, %977 : vector<2x32xf32>
    %994 = arith.subf %992, %993 : vector<2x32xf32>
    %995 = vector.extract_strided_slice %961 {offsets = [0, 32], sizes = [2, 32], strides = [1, 1]} : vector<2x128xf32> to vector<2x32xf32>
    %996 = vector.extract_strided_slice %964 {offsets = [0, 32], sizes = [2, 32], strides = [1, 1]} : vector<2x128xf32> to vector<2x32xf32>
    %cst_257 = arith.constant 0.392699093 : f32
    %997 = vector.broadcast %cst_257 : f32 to vector<2x32xf32>
    %998 = arith.mulf %997, %996 : vector<2x32xf32>
    %cst_258 = arith.constant 1.000000e+00 : f32
    %999 = vector.broadcast %cst_258 : f32 to vector<2x32xf32>
    %1000 = arith.addf %999, %998 : vector<2x32xf32>
    %1001 = math.rsqrt %1000 : vector<2x32xf32>
    %1002 = arith.mulf %995, %1001 : vector<2x32xf32>
    %1003 = arith.negf %1002 : vector<2x32xf32>
    %1004 = math.exp %1003 : vector<2x32xf32>
    %cst_259 = arith.constant 1.000000e+00 : f32
    %1005 = vector.broadcast %cst_259 : f32 to vector<2x32xf32>
    %1006 = arith.addf %1005, %1004 : vector<2x32xf32>
    %1007 = arith.divf %1005, %1006 : vector<2x32xf32>
    %cst_260 = arith.constant -0.881373584 : f32
    %1008 = vector.broadcast %cst_260 : f32 to vector<2x32xf32>
    %1009 = arith.addf %995, %1008 : vector<2x32xf32>
    %cst_261 = arith.constant 1.17157292 : f32
    %1010 = vector.broadcast %cst_261 : f32 to vector<2x32xf32>
    %1011 = arith.mulf %1010, %1009 : vector<2x32xf32>
    %cst_262 = arith.constant 0.539012074 : f32
    %1012 = vector.broadcast %cst_262 : f32 to vector<2x32xf32>
    %1013 = arith.mulf %1012, %996 : vector<2x32xf32>
    %cst_263 = arith.constant 1.000000e+00 : f32
    %1014 = vector.broadcast %cst_263 : f32 to vector<2x32xf32>
    %1015 = arith.addf %1014, %1013 : vector<2x32xf32>
    %1016 = math.rsqrt %1015 : vector<2x32xf32>
    %1017 = arith.mulf %1011, %1016 : vector<2x32xf32>
    %1018 = arith.negf %1017 : vector<2x32xf32>
    %1019 = math.exp %1018 : vector<2x32xf32>
    %cst_264 = arith.constant 1.000000e+00 : f32
    %1020 = vector.broadcast %cst_264 : f32 to vector<2x32xf32>
    %1021 = arith.addf %1020, %1019 : vector<2x32xf32>
    %1022 = arith.divf %1020, %1021 : vector<2x32xf32>
    %1023 = arith.mulf %1007, %1007 : vector<2x32xf32>
    %1024 = arith.subf %1022, %1023 : vector<2x32xf32>
    %1025 = vector.extract_strided_slice %961 {offsets = [0, 64], sizes = [2, 32], strides = [1, 1]} : vector<2x128xf32> to vector<2x32xf32>
    %1026 = vector.extract_strided_slice %964 {offsets = [0, 64], sizes = [2, 32], strides = [1, 1]} : vector<2x128xf32> to vector<2x32xf32>
    %1027 = vector.extract_strided_slice %961 {offsets = [0, 96], sizes = [2, 32], strides = [1, 1]} : vector<2x128xf32> to vector<2x32xf32>
    %1028 = vector.extract_strided_slice %964 {offsets = [0, 96], sizes = [2, 32], strides = [1, 1]} : vector<2x128xf32> to vector<2x32xf32>
    %1029 = arith.mulf %1024, %1025 : vector<2x32xf32>
    %1030 = arith.mulf %1026, %1007 : vector<2x32xf32>
    %1031 = arith.addf %1029, %1030 : vector<2x32xf32>
    %1032 = arith.addf %1007, %1024 : vector<2x32xf32>
    %1033 = tpu.reciprocal %1032 {approx = true} : vector<2x32xf32> -> vector<2x32xf32>
    %1034 = arith.mulf %1031, %1033 : vector<2x32xf32>
    %1035 = arith.mulf %1024, %1026 : vector<2x32xf32>
    %1036 = arith.addf %1024, %1026 : vector<2x32xf32>
    %1037 = tpu.reciprocal %1036 {approx = true} : vector<2x32xf32> -> vector<2x32xf32>
    %1038 = arith.mulf %1035, %1037 : vector<2x32xf32>
    %1039 = arith.addf %1027, %1034 : vector<2x32xf32>
    %1040 = arith.addf %1028, %1038 : vector<2x32xf32>
    %cst_265 = arith.constant 2.000000e+00 : f32
    %1041 = vector.broadcast %cst_265 : f32 to vector<2x32xf32>
    %1042 = arith.mulf %1041, %1039 : vector<2x32xf32>
    %cst_266 = arith.constant 1.57079637 : f32
    %1043 = vector.broadcast %cst_266 : f32 to vector<2x32xf32>
    %1044 = arith.mulf %1043, %1040 : vector<2x32xf32>
    %cst_267 = arith.constant 1.000000e+00 : f32
    %1045 = vector.broadcast %cst_267 : f32 to vector<2x32xf32>
    %1046 = arith.addf %1045, %1044 : vector<2x32xf32>
    %1047 = math.rsqrt %1046 : vector<2x32xf32>
    %1048 = arith.mulf %1042, %1047 : vector<2x32xf32>
    %1049 = arith.negf %1048 : vector<2x32xf32>
    %1050 = math.exp %1049 : vector<2x32xf32>
    %cst_268 = arith.constant 1.000000e+00 : f32
    %1051 = vector.broadcast %cst_268 : f32 to vector<2x32xf32>
    %1052 = arith.addf %1051, %1050 : vector<2x32xf32>
    %1053 = arith.divf %1051, %1052 : vector<2x32xf32>
    %cst_269 = arith.constant 2.000000e+00 : f32
    %1054 = vector.broadcast %cst_269 : f32 to vector<2x32xf32>
    %1055 = arith.mulf %1054, %1039 : vector<2x32xf32>
    %cst_270 = arith.constant -0.881373584 : f32
    %1056 = vector.broadcast %cst_270 : f32 to vector<2x32xf32>
    %1057 = arith.addf %1055, %1056 : vector<2x32xf32>
    %cst_271 = arith.constant 1.17157292 : f32
    %1058 = vector.broadcast %cst_271 : f32 to vector<2x32xf32>
    %1059 = arith.mulf %1058, %1057 : vector<2x32xf32>
    %cst_272 = arith.constant 2.1560483 : f32
    %1060 = vector.broadcast %cst_272 : f32 to vector<2x32xf32>
    %1061 = arith.mulf %1060, %1040 : vector<2x32xf32>
    %cst_273 = arith.constant 1.000000e+00 : f32
    %1062 = vector.broadcast %cst_273 : f32 to vector<2x32xf32>
    %1063 = arith.addf %1062, %1061 : vector<2x32xf32>
    %1064 = math.rsqrt %1063 : vector<2x32xf32>
    %1065 = arith.mulf %1059, %1064 : vector<2x32xf32>
    %1066 = arith.negf %1065 : vector<2x32xf32>
    %1067 = math.exp %1066 : vector<2x32xf32>
    %cst_274 = arith.constant 1.000000e+00 : f32
    %1068 = vector.broadcast %cst_274 : f32 to vector<2x32xf32>
    %1069 = arith.addf %1068, %1067 : vector<2x32xf32>
    %1070 = arith.divf %1068, %1069 : vector<2x32xf32>
    %1071 = arith.mulf %1053, %1053 : vector<2x32xf32>
    %1072 = arith.subf %1070, %1071 : vector<2x32xf32>
    %cst_275 = arith.constant 2.000000e+00 : f32
    %1073 = vector.broadcast %cst_275 : f32 to vector<2x32xf32>
    %1074 = arith.mulf %1073, %1053 : vector<2x32xf32>
    %cst_276 = arith.constant 1.000000e+00 : f32
    %1075 = vector.broadcast %cst_276 : f32 to vector<2x32xf32>
    %1076 = arith.subf %1074, %1075 : vector<2x32xf32>
    %cst_277 = arith.constant 4.000000e+00 : f32
    %1077 = vector.broadcast %cst_277 : f32 to vector<2x32xf32>
    %1078 = arith.mulf %1077, %1072 : vector<2x32xf32>
    %1079 = arith.mulf %994, %1076 : vector<2x32xf32>
    %1080 = arith.mulf %1078, %977 : vector<2x32xf32>
    %1081 = arith.addf %1079, %1080 : vector<2x32xf32>
    %1082 = arith.addf %977, %994 : vector<2x32xf32>
    %1083 = tpu.reciprocal %1082 {approx = true} : vector<2x32xf32> -> vector<2x32xf32>
    %1084 = arith.mulf %1081, %1083 : vector<2x32xf32>
    %1085 = arith.mulf %994, %1078 : vector<2x32xf32>
    %1086 = arith.addf %994, %1078 : vector<2x32xf32>
    %1087 = tpu.reciprocal %1086 {approx = true} : vector<2x32xf32> -> vector<2x32xf32>
    %1088 = arith.mulf %1085, %1087 : vector<2x32xf32>
    %cst_278 = arith.constant 1.000000e+00 : f32
    %1089 = vector.broadcast %cst_278 : f32 to vector<2x32xf32>
    %1090 = arith.subf %1089, %977 : vector<2x32xf32>
    %1091 = arith.mulf %994, %912 : vector<2x32xf32>
    %1092 = arith.mulf %913, %1090 : vector<2x32xf32>
    %1093 = arith.addf %1091, %1092 : vector<2x32xf32>
    %1094 = arith.addf %1090, %994 : vector<2x32xf32>
    %1095 = tpu.reciprocal %1094 {approx = true} : vector<2x32xf32> -> vector<2x32xf32>
    %1096 = arith.mulf %1093, %1095 : vector<2x32xf32>
    %1097 = arith.mulf %994, %913 : vector<2x32xf32>
    %1098 = arith.addf %994, %913 : vector<2x32xf32>
    %1099 = tpu.reciprocal %1098 {approx = true} : vector<2x32xf32> -> vector<2x32xf32>
    %1100 = arith.mulf %1097, %1099 : vector<2x32xf32>
    %1101 = arith.addf %1084, %1096 : vector<2x32xf32>
    %1102 = arith.addf %1088, %1100 : vector<2x32xf32>
    %1103 = arith.mulf %1101, %1101 : vector<2x32xf32>
    %1104 = tpu.concatenate %1101, %1102, %1103 in 1 : vector<2x32xf32>, vector<2x32xf32>, vector<2x32xf32> -> vector<2x96xf32>
    %cst_279 = arith.constant dense<0.000000e+00> : vector<2x16xf32>
    %1105 = tpu.matmul %1104, %2, %cst_279 {dimension_numbers = #tpu.dot_dimension_numbers<[1], [0], [0], [1], [0, 0, 1, 1], [], []>} : vector<2x96xf32>, vector<96x16xf32>, vector<2x16xf32> -> vector<2x16xf32>
    %1106 = vector.broadcast %5 : vector<1x16xf32> to vector<2x16xf32>
    %1107 = arith.addf %1106, %1105 : vector<2x16xf32>
    %1108 = vector.extract_strided_slice %1107 {offsets = [0, 0], sizes = [2, 8], strides = [1, 1]} : vector<2x16xf32> to vector<2x8xf32>
    %1109 = vector.extract_strided_slice %1107 {offsets = [0, 8], sizes = [2, 8], strides = [1, 1]} : vector<2x16xf32> to vector<2x8xf32>
    %cst_280 = arith.constant 0.392699093 : f32
    %1110 = vector.broadcast %cst_280 : f32 to vector<2x8xf32>
    %1111 = arith.mulf %1110, %1109 : vector<2x8xf32>
    %cst_281 = arith.constant 1.000000e+00 : f32
    %1112 = vector.broadcast %cst_281 : f32 to vector<2x8xf32>
    %1113 = arith.addf %1112, %1111 : vector<2x8xf32>
    %1114 = math.rsqrt %1113 : vector<2x8xf32>
    %1115 = arith.mulf %1108, %1114 : vector<2x8xf32>
    %1116 = arith.negf %1115 : vector<2x8xf32>
    %1117 = math.exp %1116 : vector<2x8xf32>
    %cst_282 = arith.constant 1.000000e+00 : f32
    %1118 = vector.broadcast %cst_282 : f32 to vector<2x8xf32>
    %1119 = arith.addf %1118, %1117 : vector<2x8xf32>
    %1120 = arith.divf %1118, %1119 : vector<2x8xf32>
    %cst_283 = arith.constant -0.881373584 : f32
    %1121 = vector.broadcast %cst_283 : f32 to vector<2x8xf32>
    %1122 = arith.addf %1108, %1121 : vector<2x8xf32>
    %cst_284 = arith.constant 1.17157292 : f32
    %1123 = vector.broadcast %cst_284 : f32 to vector<2x8xf32>
    %1124 = arith.mulf %1123, %1122 : vector<2x8xf32>
    %cst_285 = arith.constant 0.539012074 : f32
    %1125 = vector.broadcast %cst_285 : f32 to vector<2x8xf32>
    %1126 = arith.mulf %1125, %1109 : vector<2x8xf32>
    %cst_286 = arith.constant 1.000000e+00 : f32
    %1127 = vector.broadcast %cst_286 : f32 to vector<2x8xf32>
    %1128 = arith.addf %1127, %1126 : vector<2x8xf32>
    %1129 = math.rsqrt %1128 : vector<2x8xf32>
    %1130 = arith.mulf %1124, %1129 : vector<2x8xf32>
    %1131 = arith.negf %1130 : vector<2x8xf32>
    %1132 = math.exp %1131 : vector<2x8xf32>
    %cst_287 = arith.constant 1.000000e+00 : f32
    %1133 = vector.broadcast %cst_287 : f32 to vector<2x8xf32>
    %1134 = arith.addf %1133, %1132 : vector<2x8xf32>
    %1135 = arith.divf %1133, %1134 : vector<2x8xf32>
    %1136 = arith.mulf %1120, %1120 : vector<2x8xf32>
    %1137 = arith.subf %1135, %1136 : vector<2x8xf32>
    %1138 = tpu.concatenate %1120, %1137 in 1 : vector<2x8xf32>, vector<2x8xf32> -> vector<2x16xf32>
    %c5_288 = arith.constant 5 : index
    %c0_289 = arith.constant 0 : index
    %c0_290 = arith.constant 0 : index
    %1139 = vector.load %arg8[%c5_288, %c0_289, %c0_290] : memref<8x2x16xf32, #tpu.memory_space<vmem>>, vector<1x2x16xf32>
    %1140 = vector.shape_cast %1139 : vector<1x2x16xf32> to vector<2x16xf32>
    %1141 = vector.shape_cast %1138 : vector<2x16xf32> to vector<1x2x16xf32>
    tpu.vector_store %arg8[%c5_288, %c0_289, %c0_290], %1141 {strides = array<i32>} : memref<8x2x16xf32, #tpu.memory_space<vmem>>, vector<1x2x16xf32>,
    %c6 = arith.constant 6 : index
    %c0_291 = arith.constant 0 : index
    %c0_292 = arith.constant 0 : index
    %1142 = vector.load %arg0[%c6, %c0_291, %c0_292] : memref<8x2x32xf32, #tpu.memory_space<vmem>>, vector<1x2x32xf32>
    %1143 = vector.shape_cast %1142 : vector<1x2x32xf32> to vector<2x32xf32>
    %1144 = tpu.concatenate %1143, %1101 in 1 : vector<2x32xf32>, vector<2x32xf32> -> vector<2x64xf32>
    %1145 = arith.mulf %1143, %1143 : vector<2x32xf32>
    %1146 = arith.mulf %1101, %1101 : vector<2x32xf32>
    %1147 = tpu.concatenate %1145, %1102, %1146 in 1 : vector<2x32xf32>, vector<2x32xf32>, vector<2x32xf32> -> vector<2x96xf32>
    %cst_293 = arith.constant dense<0.000000e+00> : vector<2x128xf32>
    %1148 = tpu.matmul %1144, %0, %cst_293 {dimension_numbers = #tpu.dot_dimension_numbers<[1], [0], [0], [1], [0, 0, 1, 1], [], []>} : vector<2x64xf32>, vector<64x128xf32>, vector<2x128xf32> -> vector<2x128xf32>
    %1149 = vector.broadcast %3 : vector<1x128xf32> to vector<2x128xf32>
    %1150 = arith.addf %1149, %1148 : vector<2x128xf32>
    %cst_294 = arith.constant dense<0.000000e+00> : vector<2x128xf32>
    %1151 = tpu.matmul %1147, %1, %cst_294 {dimension_numbers = #tpu.dot_dimension_numbers<[1], [0], [0], [1], [0, 0, 1, 1], [], []>} : vector<2x96xf32>, vector<96x128xf32>, vector<2x128xf32> -> vector<2x128xf32>
    %1152 = vector.broadcast %4 : vector<1x128xf32> to vector<2x128xf32>
    %1153 = arith.addf %1152, %1151 : vector<2x128xf32>
    %1154 = vector.extract_strided_slice %1150 {offsets = [0, 0], sizes = [2, 32], strides = [1, 1]} : vector<2x128xf32> to vector<2x32xf32>
    %1155 = vector.extract_strided_slice %1153 {offsets = [0, 0], sizes = [2, 32], strides = [1, 1]} : vector<2x128xf32> to vector<2x32xf32>
    %cst_295 = arith.constant 0.392699093 : f32
    %1156 = vector.broadcast %cst_295 : f32 to vector<2x32xf32>
    %1157 = arith.mulf %1156, %1155 : vector<2x32xf32>
    %cst_296 = arith.constant 1.000000e+00 : f32
    %1158 = vector.broadcast %cst_296 : f32 to vector<2x32xf32>
    %1159 = arith.addf %1158, %1157 : vector<2x32xf32>
    %1160 = math.rsqrt %1159 : vector<2x32xf32>
    %1161 = arith.mulf %1154, %1160 : vector<2x32xf32>
    %1162 = arith.negf %1161 : vector<2x32xf32>
    %1163 = math.exp %1162 : vector<2x32xf32>
    %cst_297 = arith.constant 1.000000e+00 : f32
    %1164 = vector.broadcast %cst_297 : f32 to vector<2x32xf32>
    %1165 = arith.addf %1164, %1163 : vector<2x32xf32>
    %1166 = arith.divf %1164, %1165 : vector<2x32xf32>
    %cst_298 = arith.constant -0.881373584 : f32
    %1167 = vector.broadcast %cst_298 : f32 to vector<2x32xf32>
    %1168 = arith.addf %1154, %1167 : vector<2x32xf32>
    %cst_299 = arith.constant 1.17157292 : f32
    %1169 = vector.broadcast %cst_299 : f32 to vector<2x32xf32>
    %1170 = arith.mulf %1169, %1168 : vector<2x32xf32>
    %cst_300 = arith.constant 0.539012074 : f32
    %1171 = vector.broadcast %cst_300 : f32 to vector<2x32xf32>
    %1172 = arith.mulf %1171, %1155 : vector<2x32xf32>
    %cst_301 = arith.constant 1.000000e+00 : f32
    %1173 = vector.broadcast %cst_301 : f32 to vector<2x32xf32>
    %1174 = arith.addf %1173, %1172 : vector<2x32xf32>
    %1175 = math.rsqrt %1174 : vector<2x32xf32>
    %1176 = arith.mulf %1170, %1175 : vector<2x32xf32>
    %1177 = arith.negf %1176 : vector<2x32xf32>
    %1178 = math.exp %1177 : vector<2x32xf32>
    %cst_302 = arith.constant 1.000000e+00 : f32
    %1179 = vector.broadcast %cst_302 : f32 to vector<2x32xf32>
    %1180 = arith.addf %1179, %1178 : vector<2x32xf32>
    %1181 = arith.divf %1179, %1180 : vector<2x32xf32>
    %1182 = arith.mulf %1166, %1166 : vector<2x32xf32>
    %1183 = arith.subf %1181, %1182 : vector<2x32xf32>
    %1184 = vector.extract_strided_slice %1150 {offsets = [0, 32], sizes = [2, 32], strides = [1, 1]} : vector<2x128xf32> to vector<2x32xf32>
    %1185 = vector.extract_strided_slice %1153 {offsets = [0, 32], sizes = [2, 32], strides = [1, 1]} : vector<2x128xf32> to vector<2x32xf32>
    %cst_303 = arith.constant 0.392699093 : f32
    %1186 = vector.broadcast %cst_303 : f32 to vector<2x32xf32>
    %1187 = arith.mulf %1186, %1185 : vector<2x32xf32>
    %cst_304 = arith.constant 1.000000e+00 : f32
    %1188 = vector.broadcast %cst_304 : f32 to vector<2x32xf32>
    %1189 = arith.addf %1188, %1187 : vector<2x32xf32>
    %1190 = math.rsqrt %1189 : vector<2x32xf32>
    %1191 = arith.mulf %1184, %1190 : vector<2x32xf32>
    %1192 = arith.negf %1191 : vector<2x32xf32>
    %1193 = math.exp %1192 : vector<2x32xf32>
    %cst_305 = arith.constant 1.000000e+00 : f32
    %1194 = vector.broadcast %cst_305 : f32 to vector<2x32xf32>
    %1195 = arith.addf %1194, %1193 : vector<2x32xf32>
    %1196 = arith.divf %1194, %1195 : vector<2x32xf32>
    %cst_306 = arith.constant -0.881373584 : f32
    %1197 = vector.broadcast %cst_306 : f32 to vector<2x32xf32>
    %1198 = arith.addf %1184, %1197 : vector<2x32xf32>
    %cst_307 = arith.constant 1.17157292 : f32
    %1199 = vector.broadcast %cst_307 : f32 to vector<2x32xf32>
    %1200 = arith.mulf %1199, %1198 : vector<2x32xf32>
    %cst_308 = arith.constant 0.539012074 : f32
    %1201 = vector.broadcast %cst_308 : f32 to vector<2x32xf32>
    %1202 = arith.mulf %1201, %1185 : vector<2x32xf32>
    %cst_309 = arith.constant 1.000000e+00 : f32
    %1203 = vector.broadcast %cst_309 : f32 to vector<2x32xf32>
    %1204 = arith.addf %1203, %1202 : vector<2x32xf32>
    %1205 = math.rsqrt %1204 : vector<2x32xf32>
    %1206 = arith.mulf %1200, %1205 : vector<2x32xf32>
    %1207 = arith.negf %1206 : vector<2x32xf32>
    %1208 = math.exp %1207 : vector<2x32xf32>
    %cst_310 = arith.constant 1.000000e+00 : f32
    %1209 = vector.broadcast %cst_310 : f32 to vector<2x32xf32>
    %1210 = arith.addf %1209, %1208 : vector<2x32xf32>
    %1211 = arith.divf %1209, %1210 : vector<2x32xf32>
    %1212 = arith.mulf %1196, %1196 : vector<2x32xf32>
    %1213 = arith.subf %1211, %1212 : vector<2x32xf32>
    %1214 = vector.extract_strided_slice %1150 {offsets = [0, 64], sizes = [2, 32], strides = [1, 1]} : vector<2x128xf32> to vector<2x32xf32>
    %1215 = vector.extract_strided_slice %1153 {offsets = [0, 64], sizes = [2, 32], strides = [1, 1]} : vector<2x128xf32> to vector<2x32xf32>
    %1216 = vector.extract_strided_slice %1150 {offsets = [0, 96], sizes = [2, 32], strides = [1, 1]} : vector<2x128xf32> to vector<2x32xf32>
    %1217 = vector.extract_strided_slice %1153 {offsets = [0, 96], sizes = [2, 32], strides = [1, 1]} : vector<2x128xf32> to vector<2x32xf32>
    %1218 = arith.mulf %1213, %1214 : vector<2x32xf32>
    %1219 = arith.mulf %1215, %1196 : vector<2x32xf32>
    %1220 = arith.addf %1218, %1219 : vector<2x32xf32>
    %1221 = arith.addf %1196, %1213 : vector<2x32xf32>
    %1222 = tpu.reciprocal %1221 {approx = true} : vector<2x32xf32> -> vector<2x32xf32>
    %1223 = arith.mulf %1220, %1222 : vector<2x32xf32>
    %1224 = arith.mulf %1213, %1215 : vector<2x32xf32>
    %1225 = arith.addf %1213, %1215 : vector<2x32xf32>
    %1226 = tpu.reciprocal %1225 {approx = true} : vector<2x32xf32> -> vector<2x32xf32>
    %1227 = arith.mulf %1224, %1226 : vector<2x32xf32>
    %1228 = arith.addf %1216, %1223 : vector<2x32xf32>
    %1229 = arith.addf %1217, %1227 : vector<2x32xf32>
    %cst_311 = arith.constant 2.000000e+00 : f32
    %1230 = vector.broadcast %cst_311 : f32 to vector<2x32xf32>
    %1231 = arith.mulf %1230, %1228 : vector<2x32xf32>
    %cst_312 = arith.constant 1.57079637 : f32
    %1232 = vector.broadcast %cst_312 : f32 to vector<2x32xf32>
    %1233 = arith.mulf %1232, %1229 : vector<2x32xf32>
    %cst_313 = arith.constant 1.000000e+00 : f32
    %1234 = vector.broadcast %cst_313 : f32 to vector<2x32xf32>
    %1235 = arith.addf %1234, %1233 : vector<2x32xf32>
    %1236 = math.rsqrt %1235 : vector<2x32xf32>
    %1237 = arith.mulf %1231, %1236 : vector<2x32xf32>
    %1238 = arith.negf %1237 : vector<2x32xf32>
    %1239 = math.exp %1238 : vector<2x32xf32>
    %cst_314 = arith.constant 1.000000e+00 : f32
    %1240 = vector.broadcast %cst_314 : f32 to vector<2x32xf32>
    %1241 = arith.addf %1240, %1239 : vector<2x32xf32>
    %1242 = arith.divf %1240, %1241 : vector<2x32xf32>
    %cst_315 = arith.constant 2.000000e+00 : f32
    %1243 = vector.broadcast %cst_315 : f32 to vector<2x32xf32>
    %1244 = arith.mulf %1243, %1228 : vector<2x32xf32>
    %cst_316 = arith.constant -0.881373584 : f32
    %1245 = vector.broadcast %cst_316 : f32 to vector<2x32xf32>
    %1246 = arith.addf %1244, %1245 : vector<2x32xf32>
    %cst_317 = arith.constant 1.17157292 : f32
    %1247 = vector.broadcast %cst_317 : f32 to vector<2x32xf32>
    %1248 = arith.mulf %1247, %1246 : vector<2x32xf32>
    %cst_318 = arith.constant 2.1560483 : f32
    %1249 = vector.broadcast %cst_318 : f32 to vector<2x32xf32>
    %1250 = arith.mulf %1249, %1229 : vector<2x32xf32>
    %cst_319 = arith.constant 1.000000e+00 : f32
    %1251 = vector.broadcast %cst_319 : f32 to vector<2x32xf32>
    %1252 = arith.addf %1251, %1250 : vector<2x32xf32>
    %1253 = math.rsqrt %1252 : vector<2x32xf32>
    %1254 = arith.mulf %1248, %1253 : vector<2x32xf32>
    %1255 = arith.negf %1254 : vector<2x32xf32>
    %1256 = math.exp %1255 : vector<2x32xf32>
    %cst_320 = arith.constant 1.000000e+00 : f32
    %1257 = vector.broadcast %cst_320 : f32 to vector<2x32xf32>
    %1258 = arith.addf %1257, %1256 : vector<2x32xf32>
    %1259 = arith.divf %1257, %1258 : vector<2x32xf32>
    %1260 = arith.mulf %1242, %1242 : vector<2x32xf32>
    %1261 = arith.subf %1259, %1260 : vector<2x32xf32>
    %cst_321 = arith.constant 2.000000e+00 : f32
    %1262 = vector.broadcast %cst_321 : f32 to vector<2x32xf32>
    %1263 = arith.mulf %1262, %1242 : vector<2x32xf32>
    %cst_322 = arith.constant 1.000000e+00 : f32
    %1264 = vector.broadcast %cst_322 : f32 to vector<2x32xf32>
    %1265 = arith.subf %1263, %1264 : vector<2x32xf32>
    %cst_323 = arith.constant 4.000000e+00 : f32
    %1266 = vector.broadcast %cst_323 : f32 to vector<2x32xf32>
    %1267 = arith.mulf %1266, %1261 : vector<2x32xf32>
    %1268 = arith.mulf %1183, %1265 : vector<2x32xf32>
    %1269 = arith.mulf %1267, %1166 : vector<2x32xf32>
    %1270 = arith.addf %1268, %1269 : vector<2x32xf32>
    %1271 = arith.addf %1166, %1183 : vector<2x32xf32>
    %1272 = tpu.reciprocal %1271 {approx = true} : vector<2x32xf32> -> vector<2x32xf32>
    %1273 = arith.mulf %1270, %1272 : vector<2x32xf32>
    %1274 = arith.mulf %1183, %1267 : vector<2x32xf32>
    %1275 = arith.addf %1183, %1267 : vector<2x32xf32>
    %1276 = tpu.reciprocal %1275 {approx = true} : vector<2x32xf32> -> vector<2x32xf32>
    %1277 = arith.mulf %1274, %1276 : vector<2x32xf32>
    %cst_324 = arith.constant 1.000000e+00 : f32
    %1278 = vector.broadcast %cst_324 : f32 to vector<2x32xf32>
    %1279 = arith.subf %1278, %1166 : vector<2x32xf32>
    %1280 = arith.mulf %1183, %1101 : vector<2x32xf32>
    %1281 = arith.mulf %1102, %1279 : vector<2x32xf32>
    %1282 = arith.addf %1280, %1281 : vector<2x32xf32>
    %1283 = arith.addf %1279, %1183 : vector<2x32xf32>
    %1284 = tpu.reciprocal %1283 {approx = true} : vector<2x32xf32> -> vector<2x32xf32>
    %1285 = arith.mulf %1282, %1284 : vector<2x32xf32>
    %1286 = arith.mulf %1183, %1102 : vector<2x32xf32>
    %1287 = arith.addf %1183, %1102 : vector<2x32xf32>
    %1288 = tpu.reciprocal %1287 {approx = true} : vector<2x32xf32> -> vector<2x32xf32>
    %1289 = arith.mulf %1286, %1288 : vector<2x32xf32>
    %1290 = arith.addf %1273, %1285 : vector<2x32xf32>
    %1291 = arith.addf %1277, %1289 : vector<2x32xf32>
    %1292 = arith.mulf %1290, %1290 : vector<2x32xf32>
    %1293 = tpu.concatenate %1290, %1291, %1292 in 1 : vector<2x32xf32>, vector<2x32xf32>, vector<2x32xf32> -> vector<2x96xf32>
    %cst_325 = arith.constant dense<0.000000e+00> : vector<2x16xf32>
    %1294 = tpu.matmul %1293, %2, %cst_325 {dimension_numbers = #tpu.dot_dimension_numbers<[1], [0], [0], [1], [0, 0, 1, 1], [], []>} : vector<2x96xf32>, vector<96x16xf32>, vector<2x16xf32> -> vector<2x16xf32>
    %1295 = vector.broadcast %5 : vector<1x16xf32> to vector<2x16xf32>
    %1296 = arith.addf %1295, %1294 : vector<2x16xf32>
    %1297 = vector.extract_strided_slice %1296 {offsets = [0, 0], sizes = [2, 8], strides = [1, 1]} : vector<2x16xf32> to vector<2x8xf32>
    %1298 = vector.extract_strided_slice %1296 {offsets = [0, 8], sizes = [2, 8], strides = [1, 1]} : vector<2x16xf32> to vector<2x8xf32>
    %cst_326 = arith.constant 0.392699093 : f32
    %1299 = vector.broadcast %cst_326 : f32 to vector<2x8xf32>
    %1300 = arith.mulf %1299, %1298 : vector<2x8xf32>
    %cst_327 = arith.constant 1.000000e+00 : f32
    %1301 = vector.broadcast %cst_327 : f32 to vector<2x8xf32>
    %1302 = arith.addf %1301, %1300 : vector<2x8xf32>
    %1303 = math.rsqrt %1302 : vector<2x8xf32>
    %1304 = arith.mulf %1297, %1303 : vector<2x8xf32>
    %1305 = arith.negf %1304 : vector<2x8xf32>
    %1306 = math.exp %1305 : vector<2x8xf32>
    %cst_328 = arith.constant 1.000000e+00 : f32
    %1307 = vector.broadcast %cst_328 : f32 to vector<2x8xf32>
    %1308 = arith.addf %1307, %1306 : vector<2x8xf32>
    %1309 = arith.divf %1307, %1308 : vector<2x8xf32>
    %cst_329 = arith.constant -0.881373584 : f32
    %1310 = vector.broadcast %cst_329 : f32 to vector<2x8xf32>
    %1311 = arith.addf %1297, %1310 : vector<2x8xf32>
    %cst_330 = arith.constant 1.17157292 : f32
    %1312 = vector.broadcast %cst_330 : f32 to vector<2x8xf32>
    %1313 = arith.mulf %1312, %1311 : vector<2x8xf32>
    %cst_331 = arith.constant 0.539012074 : f32
    %1314 = vector.broadcast %cst_331 : f32 to vector<2x8xf32>
    %1315 = arith.mulf %1314, %1298 : vector<2x8xf32>
    %cst_332 = arith.constant 1.000000e+00 : f32
    %1316 = vector.broadcast %cst_332 : f32 to vector<2x8xf32>
    %1317 = arith.addf %1316, %1315 : vector<2x8xf32>
    %1318 = math.rsqrt %1317 : vector<2x8xf32>
    %1319 = arith.mulf %1313, %1318 : vector<2x8xf32>
    %1320 = arith.negf %1319 : vector<2x8xf32>
    %1321 = math.exp %1320 : vector<2x8xf32>
    %cst_333 = arith.constant 1.000000e+00 : f32
    %1322 = vector.broadcast %cst_333 : f32 to vector<2x8xf32>
    %1323 = arith.addf %1322, %1321 : vector<2x8xf32>
    %1324 = arith.divf %1322, %1323 : vector<2x8xf32>
    %1325 = arith.mulf %1309, %1309 : vector<2x8xf32>
    %1326 = arith.subf %1324, %1325 : vector<2x8xf32>
    %1327 = tpu.concatenate %1309, %1326 in 1 : vector<2x8xf32>, vector<2x8xf32> -> vector<2x16xf32>
    %c6_334 = arith.constant 6 : index
    %c0_335 = arith.constant 0 : index
    %c0_336 = arith.constant 0 : index
    %1328 = vector.load %arg8[%c6_334, %c0_335, %c0_336] : memref<8x2x16xf32, #tpu.memory_space<vmem>>, vector<1x2x16xf32>
    %1329 = vector.shape_cast %1328 : vector<1x2x16xf32> to vector<2x16xf32>
    %1330 = vector.shape_cast %1327 : vector<2x16xf32> to vector<1x2x16xf32>
    tpu.vector_store %arg8[%c6_334, %c0_335, %c0_336], %1330 {strides = array<i32>} : memref<8x2x16xf32, #tpu.memory_space<vmem>>, vector<1x2x16xf32>,
    %c7 = arith.constant 7 : index
    %c0_337 = arith.constant 0 : index
    %c0_338 = arith.constant 0 : index
    %1331 = vector.load %arg0[%c7, %c0_337, %c0_338] : memref<8x2x32xf32, #tpu.memory_space<vmem>>, vector<1x2x32xf32>
    %1332 = vector.shape_cast %1331 : vector<1x2x32xf32> to vector<2x32xf32>
    %1333 = tpu.concatenate %1332, %1290 in 1 : vector<2x32xf32>, vector<2x32xf32> -> vector<2x64xf32>
    %1334 = arith.mulf %1332, %1332 : vector<2x32xf32>
    %1335 = arith.mulf %1290, %1290 : vector<2x32xf32>
    %1336 = tpu.concatenate %1334, %1291, %1335 in 1 : vector<2x32xf32>, vector<2x32xf32>, vector<2x32xf32> -> vector<2x96xf32>
    %cst_339 = arith.constant dense<0.000000e+00> : vector<2x128xf32>
    %1337 = tpu.matmul %1333, %0, %cst_339 {dimension_numbers = #tpu.dot_dimension_numbers<[1], [0], [0], [1], [0, 0, 1, 1], [], []>} : vector<2x64xf32>, vector<64x128xf32>, vector<2x128xf32> -> vector<2x128xf32>
    %1338 = vector.broadcast %3 : vector<1x128xf32> to vector<2x128xf32>
    %1339 = arith.addf %1338, %1337 : vector<2x128xf32>
    %cst_340 = arith.constant dense<0.000000e+00> : vector<2x128xf32>
    %1340 = tpu.matmul %1336, %1, %cst_340 {dimension_numbers = #tpu.dot_dimension_numbers<[1], [0], [0], [1], [0, 0, 1, 1], [], []>} : vector<2x96xf32>, vector<96x128xf32>, vector<2x128xf32> -> vector<2x128xf32>
    %1341 = vector.broadcast %4 : vector<1x128xf32> to vector<2x128xf32>
    %1342 = arith.addf %1341, %1340 : vector<2x128xf32>
    %1343 = vector.extract_strided_slice %1339 {offsets = [0, 0], sizes = [2, 32], strides = [1, 1]} : vector<2x128xf32> to vector<2x32xf32>
    %1344 = vector.extract_strided_slice %1342 {offsets = [0, 0], sizes = [2, 32], strides = [1, 1]} : vector<2x128xf32> to vector<2x32xf32>
    %cst_341 = arith.constant 0.392699093 : f32
    %1345 = vector.broadcast %cst_341 : f32 to vector<2x32xf32>
    %1346 = arith.mulf %1345, %1344 : vector<2x32xf32>
    %cst_342 = arith.constant 1.000000e+00 : f32
    %1347 = vector.broadcast %cst_342 : f32 to vector<2x32xf32>
    %1348 = arith.addf %1347, %1346 : vector<2x32xf32>
    %1349 = math.rsqrt %1348 : vector<2x32xf32>
    %1350 = arith.mulf %1343, %1349 : vector<2x32xf32>
    %1351 = arith.negf %1350 : vector<2x32xf32>
    %1352 = math.exp %1351 : vector<2x32xf32>
    %cst_343 = arith.constant 1.000000e+00 : f32
    %1353 = vector.broadcast %cst_343 : f32 to vector<2x32xf32>
    %1354 = arith.addf %1353, %1352 : vector<2x32xf32>
    %1355 = arith.divf %1353, %1354 : vector<2x32xf32>
    %cst_344 = arith.constant -0.881373584 : f32
    %1356 = vector.broadcast %cst_344 : f32 to vector<2x32xf32>
    %1357 = arith.addf %1343, %1356 : vector<2x32xf32>
    %cst_345 = arith.constant 1.17157292 : f32
    %1358 = vector.broadcast %cst_345 : f32 to vector<2x32xf32>
    %1359 = arith.mulf %1358, %1357 : vector<2x32xf32>
    %cst_346 = arith.constant 0.539012074 : f32
    %1360 = vector.broadcast %cst_346 : f32 to vector<2x32xf32>
    %1361 = arith.mulf %1360, %1344 : vector<2x32xf32>
    %cst_347 = arith.constant 1.000000e+00 : f32
    %1362 = vector.broadcast %cst_347 : f32 to vector<2x32xf32>
    %1363 = arith.addf %1362, %1361 : vector<2x32xf32>
    %1364 = math.rsqrt %1363 : vector<2x32xf32>
    %1365 = arith.mulf %1359, %1364 : vector<2x32xf32>
    %1366 = arith.negf %1365 : vector<2x32xf32>
    %1367 = math.exp %1366 : vector<2x32xf32>
    %cst_348 = arith.constant 1.000000e+00 : f32
    %1368 = vector.broadcast %cst_348 : f32 to vector<2x32xf32>
    %1369 = arith.addf %1368, %1367 : vector<2x32xf32>
    %1370 = arith.divf %1368, %1369 : vector<2x32xf32>
    %1371 = arith.mulf %1355, %1355 : vector<2x32xf32>
    %1372 = arith.subf %1370, %1371 : vector<2x32xf32>
    %1373 = vector.extract_strided_slice %1339 {offsets = [0, 32], sizes = [2, 32], strides = [1, 1]} : vector<2x128xf32> to vector<2x32xf32>
    %1374 = vector.extract_strided_slice %1342 {offsets = [0, 32], sizes = [2, 32], strides = [1, 1]} : vector<2x128xf32> to vector<2x32xf32>
    %cst_349 = arith.constant 0.392699093 : f32
    %1375 = vector.broadcast %cst_349 : f32 to vector<2x32xf32>
    %1376 = arith.mulf %1375, %1374 : vector<2x32xf32>
    %cst_350 = arith.constant 1.000000e+00 : f32
    %1377 = vector.broadcast %cst_350 : f32 to vector<2x32xf32>
    %1378 = arith.addf %1377, %1376 : vector<2x32xf32>
    %1379 = math.rsqrt %1378 : vector<2x32xf32>
    %1380 = arith.mulf %1373, %1379 : vector<2x32xf32>
    %1381 = arith.negf %1380 : vector<2x32xf32>
    %1382 = math.exp %1381 : vector<2x32xf32>
    %cst_351 = arith.constant 1.000000e+00 : f32
    %1383 = vector.broadcast %cst_351 : f32 to vector<2x32xf32>
    %1384 = arith.addf %1383, %1382 : vector<2x32xf32>
    %1385 = arith.divf %1383, %1384 : vector<2x32xf32>
    %cst_352 = arith.constant -0.881373584 : f32
    %1386 = vector.broadcast %cst_352 : f32 to vector<2x32xf32>
    %1387 = arith.addf %1373, %1386 : vector<2x32xf32>
    %cst_353 = arith.constant 1.17157292 : f32
    %1388 = vector.broadcast %cst_353 : f32 to vector<2x32xf32>
    %1389 = arith.mulf %1388, %1387 : vector<2x32xf32>
    %cst_354 = arith.constant 0.539012074 : f32
    %1390 = vector.broadcast %cst_354 : f32 to vector<2x32xf32>
    %1391 = arith.mulf %1390, %1374 : vector<2x32xf32>
    %cst_355 = arith.constant 1.000000e+00 : f32
    %1392 = vector.broadcast %cst_355 : f32 to vector<2x32xf32>
    %1393 = arith.addf %1392, %1391 : vector<2x32xf32>
    %1394 = math.rsqrt %1393 : vector<2x32xf32>
    %1395 = arith.mulf %1389, %1394 : vector<2x32xf32>
    %1396 = arith.negf %1395 : vector<2x32xf32>
    %1397 = math.exp %1396 : vector<2x32xf32>
    %cst_356 = arith.constant 1.000000e+00 : f32
    %1398 = vector.broadcast %cst_356 : f32 to vector<2x32xf32>
    %1399 = arith.addf %1398, %1397 : vector<2x32xf32>
    %1400 = arith.divf %1398, %1399 : vector<2x32xf32>
    %1401 = arith.mulf %1385, %1385 : vector<2x32xf32>
    %1402 = arith.subf %1400, %1401 : vector<2x32xf32>
    %1403 = vector.extract_strided_slice %1339 {offsets = [0, 64], sizes = [2, 32], strides = [1, 1]} : vector<2x128xf32> to vector<2x32xf32>
    %1404 = vector.extract_strided_slice %1342 {offsets = [0, 64], sizes = [2, 32], strides = [1, 1]} : vector<2x128xf32> to vector<2x32xf32>
    %1405 = vector.extract_strided_slice %1339 {offsets = [0, 96], sizes = [2, 32], strides = [1, 1]} : vector<2x128xf32> to vector<2x32xf32>
    %1406 = vector.extract_strided_slice %1342 {offsets = [0, 96], sizes = [2, 32], strides = [1, 1]} : vector<2x128xf32> to vector<2x32xf32>
    %1407 = arith.mulf %1402, %1403 : vector<2x32xf32>
    %1408 = arith.mulf %1404, %1385 : vector<2x32xf32>
    %1409 = arith.addf %1407, %1408 : vector<2x32xf32>
    %1410 = arith.addf %1385, %1402 : vector<2x32xf32>
    %1411 = tpu.reciprocal %1410 {approx = true} : vector<2x32xf32> -> vector<2x32xf32>
    %1412 = arith.mulf %1409, %1411 : vector<2x32xf32>
    %1413 = arith.mulf %1402, %1404 : vector<2x32xf32>
    %1414 = arith.addf %1402, %1404 : vector<2x32xf32>
    %1415 = tpu.reciprocal %1414 {approx = true} : vector<2x32xf32> -> vector<2x32xf32>
    %1416 = arith.mulf %1413, %1415 : vector<2x32xf32>
    %1417 = arith.addf %1405, %1412 : vector<2x32xf32>
    %1418 = arith.addf %1406, %1416 : vector<2x32xf32>
    %cst_357 = arith.constant 2.000000e+00 : f32
    %1419 = vector.broadcast %cst_357 : f32 to vector<2x32xf32>
    %1420 = arith.mulf %1419, %1417 : vector<2x32xf32>
    %cst_358 = arith.constant 1.57079637 : f32
    %1421 = vector.broadcast %cst_358 : f32 to vector<2x32xf32>
    %1422 = arith.mulf %1421, %1418 : vector<2x32xf32>
    %cst_359 = arith.constant 1.000000e+00 : f32
    %1423 = vector.broadcast %cst_359 : f32 to vector<2x32xf32>
    %1424 = arith.addf %1423, %1422 : vector<2x32xf32>
    %1425 = math.rsqrt %1424 : vector<2x32xf32>
    %1426 = arith.mulf %1420, %1425 : vector<2x32xf32>
    %1427 = arith.negf %1426 : vector<2x32xf32>
    %1428 = math.exp %1427 : vector<2x32xf32>
    %cst_360 = arith.constant 1.000000e+00 : f32
    %1429 = vector.broadcast %cst_360 : f32 to vector<2x32xf32>
    %1430 = arith.addf %1429, %1428 : vector<2x32xf32>
    %1431 = arith.divf %1429, %1430 : vector<2x32xf32>
    %cst_361 = arith.constant 2.000000e+00 : f32
    %1432 = vector.broadcast %cst_361 : f32 to vector<2x32xf32>
    %1433 = arith.mulf %1432, %1417 : vector<2x32xf32>
    %cst_362 = arith.constant -0.881373584 : f32
    %1434 = vector.broadcast %cst_362 : f32 to vector<2x32xf32>
    %1435 = arith.addf %1433, %1434 : vector<2x32xf32>
    %cst_363 = arith.constant 1.17157292 : f32
    %1436 = vector.broadcast %cst_363 : f32 to vector<2x32xf32>
    %1437 = arith.mulf %1436, %1435 : vector<2x32xf32>
    %cst_364 = arith.constant 2.1560483 : f32
    %1438 = vector.broadcast %cst_364 : f32 to vector<2x32xf32>
    %1439 = arith.mulf %1438, %1418 : vector<2x32xf32>
    %cst_365 = arith.constant 1.000000e+00 : f32
    %1440 = vector.broadcast %cst_365 : f32 to vector<2x32xf32>
    %1441 = arith.addf %1440, %1439 : vector<2x32xf32>
    %1442 = math.rsqrt %1441 : vector<2x32xf32>
    %1443 = arith.mulf %1437, %1442 : vector<2x32xf32>
    %1444 = arith.negf %1443 : vector<2x32xf32>
    %1445 = math.exp %1444 : vector<2x32xf32>
    %cst_366 = arith.constant 1.000000e+00 : f32
    %1446 = vector.broadcast %cst_366 : f32 to vector<2x32xf32>
    %1447 = arith.addf %1446, %1445 : vector<2x32xf32>
    %1448 = arith.divf %1446, %1447 : vector<2x32xf32>
    %1449 = arith.mulf %1431, %1431 : vector<2x32xf32>
    %1450 = arith.subf %1448, %1449 : vector<2x32xf32>
    %cst_367 = arith.constant 2.000000e+00 : f32
    %1451 = vector.broadcast %cst_367 : f32 to vector<2x32xf32>
    %1452 = arith.mulf %1451, %1431 : vector<2x32xf32>
    %cst_368 = arith.constant 1.000000e+00 : f32
    %1453 = vector.broadcast %cst_368 : f32 to vector<2x32xf32>
    %1454 = arith.subf %1452, %1453 : vector<2x32xf32>
    %cst_369 = arith.constant 4.000000e+00 : f32
    %1455 = vector.broadcast %cst_369 : f32 to vector<2x32xf32>
    %1456 = arith.mulf %1455, %1450 : vector<2x32xf32>
    %1457 = arith.mulf %1372, %1454 : vector<2x32xf32>
    %1458 = arith.mulf %1456, %1355 : vector<2x32xf32>
    %1459 = arith.addf %1457, %1458 : vector<2x32xf32>
    %1460 = arith.addf %1355, %1372 : vector<2x32xf32>
    %1461 = tpu.reciprocal %1460 {approx = true} : vector<2x32xf32> -> vector<2x32xf32>
    %1462 = arith.mulf %1459, %1461 : vector<2x32xf32>
    %1463 = arith.mulf %1372, %1456 : vector<2x32xf32>
    %1464 = arith.addf %1372, %1456 : vector<2x32xf32>
    %1465 = tpu.reciprocal %1464 {approx = true} : vector<2x32xf32> -> vector<2x32xf32>
    %1466 = arith.mulf %1463, %1465 : vector<2x32xf32>
    %cst_370 = arith.constant 1.000000e+00 : f32
    %1467 = vector.broadcast %cst_370 : f32 to vector<2x32xf32>
    %1468 = arith.subf %1467, %1355 : vector<2x32xf32>
    %1469 = arith.mulf %1372, %1290 : vector<2x32xf32>
    %1470 = arith.mulf %1291, %1468 : vector<2x32xf32>
    %1471 = arith.addf %1469, %1470 : vector<2x32xf32>
    %1472 = arith.addf %1468, %1372 : vector<2x32xf32>
    %1473 = tpu.reciprocal %1472 {approx = true} : vector<2x32xf32> -> vector<2x32xf32>
    %1474 = arith.mulf %1471, %1473 : vector<2x32xf32>
    %1475 = arith.mulf %1372, %1291 : vector<2x32xf32>
    %1476 = arith.addf %1372, %1291 : vector<2x32xf32>
    %1477 = tpu.reciprocal %1476 {approx = true} : vector<2x32xf32> -> vector<2x32xf32>
    %1478 = arith.mulf %1475, %1477 : vector<2x32xf32>
    %1479 = arith.addf %1462, %1474 : vector<2x32xf32>
    %1480 = arith.addf %1466, %1478 : vector<2x32xf32>
    %1481 = arith.mulf %1479, %1479 : vector<2x32xf32>
    %1482 = tpu.concatenate %1479, %1480, %1481 in 1 : vector<2x32xf32>, vector<2x32xf32>, vector<2x32xf32> -> vector<2x96xf32>
    %cst_371 = arith.constant dense<0.000000e+00> : vector<2x16xf32>
    %1483 = tpu.matmul %1482, %2, %cst_371 {dimension_numbers = #tpu.dot_dimension_numbers<[1], [0], [0], [1], [0, 0, 1, 1], [], []>} : vector<2x96xf32>, vector<96x16xf32>, vector<2x16xf32> -> vector<2x16xf32>
    %1484 = vector.broadcast %5 : vector<1x16xf32> to vector<2x16xf32>
    %1485 = arith.addf %1484, %1483 : vector<2x16xf32>
    %1486 = vector.extract_strided_slice %1485 {offsets = [0, 0], sizes = [2, 8], strides = [1, 1]} : vector<2x16xf32> to vector<2x8xf32>
    %1487 = vector.extract_strided_slice %1485 {offsets = [0, 8], sizes = [2, 8], strides = [1, 1]} : vector<2x16xf32> to vector<2x8xf32>
    %cst_372 = arith.constant 0.392699093 : f32
    %1488 = vector.broadcast %cst_372 : f32 to vector<2x8xf32>
    %1489 = arith.mulf %1488, %1487 : vector<2x8xf32>
    %cst_373 = arith.constant 1.000000e+00 : f32
    %1490 = vector.broadcast %cst_373 : f32 to vector<2x8xf32>
    %1491 = arith.addf %1490, %1489 : vector<2x8xf32>
    %1492 = math.rsqrt %1491 : vector<2x8xf32>
    %1493 = arith.mulf %1486, %1492 : vector<2x8xf32>
    %1494 = arith.negf %1493 : vector<2x8xf32>
    %1495 = math.exp %1494 : vector<2x8xf32>
    %cst_374 = arith.constant 1.000000e+00 : f32
    %1496 = vector.broadcast %cst_374 : f32 to vector<2x8xf32>
    %1497 = arith.addf %1496, %1495 : vector<2x8xf32>
    %1498 = arith.divf %1496, %1497 : vector<2x8xf32>
    %cst_375 = arith.constant -0.881373584 : f32
    %1499 = vector.broadcast %cst_375 : f32 to vector<2x8xf32>
    %1500 = arith.addf %1486, %1499 : vector<2x8xf32>
    %cst_376 = arith.constant 1.17157292 : f32
    %1501 = vector.broadcast %cst_376 : f32 to vector<2x8xf32>
    %1502 = arith.mulf %1501, %1500 : vector<2x8xf32>
    %cst_377 = arith.constant 0.539012074 : f32
    %1503 = vector.broadcast %cst_377 : f32 to vector<2x8xf32>
    %1504 = arith.mulf %1503, %1487 : vector<2x8xf32>
    %cst_378 = arith.constant 1.000000e+00 : f32
    %1505 = vector.broadcast %cst_378 : f32 to vector<2x8xf32>
    %1506 = arith.addf %1505, %1504 : vector<2x8xf32>
    %1507 = math.rsqrt %1506 : vector<2x8xf32>
    %1508 = arith.mulf %1502, %1507 : vector<2x8xf32>
    %1509 = arith.negf %1508 : vector<2x8xf32>
    %1510 = math.exp %1509 : vector<2x8xf32>
    %cst_379 = arith.constant 1.000000e+00 : f32
    %1511 = vector.broadcast %cst_379 : f32 to vector<2x8xf32>
    %1512 = arith.addf %1511, %1510 : vector<2x8xf32>
    %1513 = arith.divf %1511, %1512 : vector<2x8xf32>
    %1514 = arith.mulf %1498, %1498 : vector<2x8xf32>
    %1515 = arith.subf %1513, %1514 : vector<2x8xf32>
    %1516 = tpu.concatenate %1498, %1515 in 1 : vector<2x8xf32>, vector<2x8xf32> -> vector<2x16xf32>
    %c7_380 = arith.constant 7 : index
    %c0_381 = arith.constant 0 : index
    %c0_382 = arith.constant 0 : index
    %1517 = vector.load %arg8[%c7_380, %c0_381, %c0_382] : memref<8x2x16xf32, #tpu.memory_space<vmem>>, vector<1x2x16xf32>
    %1518 = vector.shape_cast %1517 : vector<1x2x16xf32> to vector<2x16xf32>
    %1519 = vector.shape_cast %1516 : vector<2x16xf32> to vector<1x2x16xf32>
    tpu.vector_store %arg8[%c7_380, %c0_381, %c0_382], %1519 {strides = array<i32>} : memref<8x2x16xf32, #tpu.memory_space<vmem>>, vector<1x2x16xf32>,
    return
  }
}

</mosaic_0001>

<bundles_post_ra>
// kernel: tpu_custom_call.1
= control target key start
LH: loop header
LB: loop body
LE: loop exit
PB: predicated region body
PF: predicated region fallthrough
CT: control target
= control target key end

     0   :  { %13 = vsyncpa [#allocation3], 0  ;;  %s5495_s0 = inlined_call_operand.vmem [shape: f32[8,2,32], index: 0, kind: input, shape index: {}]   ;;  %s5496_s1 = inlined_call_operand.vmem [shape: f32[2,32], index: 1, kind: input, shape index: {}]   ;;  %s5497_s2 = inlined_call_operand.hbm [shape: f32[2,32], index: 2, kind: input, shape index: {}]   ;;  %s5498_s3 = inlined_call_operand.hbm [shape: f32[64,128], index: 3, kind: input, shape index: {}]   ;;  %s5499_s4 = inlined_call_operand.vmem [shape: f32[96,128], index: 4, kind: input, shape index: {}]   ;;  %s5500_s5 = inlined_call_operand.hbm [shape: f32[2,128], index: 5, kind: input, shape index: {}]   ;;  %s5501_s6 = inlined_call_operand.vmem [shape: f32[96,16], index: 6, kind: input, shape index: {}]   ;;  %s5502_s7 = inlined_call_operand.vmem [shape: f32[1,16], index: 7, kind: input, shape index: {}]   ;;  %s5503_s8 = inlined_call_operand.hbm [shape: f32[8,2,16], index: 8, kind: output, shape index: {}]  }
   0x1   :  { %14 = vsyncpa [#allocation6], 0  ;;  %s35_s29 = sshll.u32 %s5498_s3, 4  ;;  %s36_s29 = int_to_ptr.hbm [resolvable:$true] %s35_s29 }
   0x2   :  { %15 = vsyncpa [#allocation4], 0  ;;  %s3880_s30 = smov [#allocation5]   ;;  %s25_s12 = sshll.u32 %s5497_s2, 4  ;;  %s26_s12 = int_to_ptr.hbm [resolvable:$true] %s25_s12 }
   0x3   :  { %s37_s9 = sshll.u32 %s3880_s30, 4  ;;  %s3881_s13 = smov 128   ;;  %s38_s9 = int_to_ptr.vmem [resolvable:$true] %s37_s9 }
   0x4   :  { %s3882_s14 = smov 8   ;;  %s3883_s15 = smov [#allocation2]  }
   0x5   :  { %43 = dma.hbm_to_vmem [thread:$0]  %s36_s29, 1024, %s38_s9, [#allocation6], %s3881_s13, %s3881_s13, %s3882_s14  }
   0x6   :  { %s27_s16 = sshll.u32 %s3883_s15, 4  ;;  %s51_s3 = sshll.u32 %s5500_s5, 4  ;;  %s28_s16 = int_to_ptr.vmem [resolvable:$true] %s27_s16  ;;  %s52_s3 = int_to_ptr.hbm [resolvable:$true] %s51_s3 }
   0x7   :  { %30 = dma.hbm_to_vmem [thread:$0]  %s26_s12, 32, %s28_s16, [#allocation3]  }
   0x8   :  { %s3884_s19 = smov [#allocation7]  }
   0x9   :  { %s53_s20 = sshll.u32 %s3884_s19, 4  ;;  %s54_s20 = int_to_ptr.vmem [resolvable:$true] %s53_s20 }
   0xa   :  { %56 = dma.hbm_to_vmem [thread:$0]  %s52_s3, 32, %s54_s20, [#allocation6]  }
   0xb   :  { %3874 = dma.done.wait [#allocation3], 32  }
   0xc   :  { %3875 = vsyncadd [#allocation3], 4294967264 }
   0xd   :  { %3876 = dma.done.wait [#allocation6], 1056  }
   0xe   :  { %3877 = vsyncadd [#allocation6], 4294966240  ;;  %v3946_v0 = vld [vmem:[#allocation2] sm:$0x3]  ;;  %v3956_v2 = vld [vmem:[%s5499_s4 + $0x58] sm:$0xff]  ;;  %s3885_s23 = smov 32  }
   0xf   :  { %v3951_v1 = vld [vmem:[%s5496_s1] sm:$0x3]  ;;  %120 = vrot.lane.b32.xlu0 %v3946_v0, %s3885_s23  ;;  %v3965_v3 = vld [vmem:[%s5499_s4 + $0x50] sm:$0xff]  ;;  %163 = vmatpush.msra.mxu1 %v3956_v2  ;;  %v3971_v4 = vld [vmem:[%s5499_s4 + $0x48] sm:$0xff]  ;;  %s3886_s9 = smov 64   ;;  %vm115_vm0 = vcmask 261120  }
  0x10   :  { %112 = vrot.lane.b32.xlu1 %v3951_v1, %s3885_s23  ;;  %v118_v5 = vmul.f32 %v3951_v1, %v3951_v1  ;;  %v3979_v6 = vld [vmem:[%s5499_s4 + $0x40] sm:$0xff]  ;;  %v3985_v7 = vld [vmem:[%s5499_s4 + $0x38] sm:$0xff]  ;;  %v3992_v8 = vld [vmem:[%s5499_s4 + $0x30] sm:$0xff]  ;;  %vm128_vm1 = vcmask 523264   ;;  %vm155_vm2 = vcmask 785408   ;;  %s3887_s25 = smov 96  }
  0x11   :  { %164 = vmatpush.msra.mxu1 %v3965_v3  ;;  %v3998_v9 = vld [vmem:[%s5499_s4 + $0x28] sm:$0xff]  ;;  %v4005_v10 = vld [vmem:[%s5499_s4 + $0x20] sm:$0xff]  ;;  %v4013_v12 = vld [vmem:[%s5499_s4 + $0x18] sm:$0xff]  ;;  %s3237_s1 = sshll.u32 %s5503_s8, 4  ;;  %s3890_s26 = smov 2   ;;  %s3238_s1 = int_to_ptr.hbm [resolvable:$true] %s3237_s1 }
  0x12   :  { %v4008_v11 = vld [vmem:[#allocation5 + $0x38] sm:$0xff]  ;;  %v4015_v13 = vld [vmem:[#allocation5 + $0x30] sm:$0xff]  ;;  %v78_v15 = vld [vmem:[#allocation5 + $0x28] sm:$0xff] }
  0x13   :  { %165 = vmatpush.msra.mxu1 %v3971_v4  ;;  %141 = vmatpush.msra.mxu0 %v4008_v11  ;;  %v4021_v14 = vld [vmem:[%s5499_s4 + $0x10] sm:$0xff]  ;;  %v4029_v16 = vld [vmem:[%s5499_s4 + $0x8] sm:$0xff]  ;;  %v4037_v18 = vld [vmem:[%s5499_s4] sm:$0xff] }
  0x14   :  { %536 = vmatpush.msra.mxu3 %v4008_v11  ;;  %v77_v17 = vld [vmem:[#allocation5 + $0x20] sm:$0xff]  ;;  %v76_v19 = vld [vmem:[#allocation5 + $0x18] sm:$0xff]  ;;  %v75_v20 = vld [vmem:[#allocation5 + $0x10] sm:$0xff] }
  0x15   :  { %166 = vmatpush.msra.mxu1 %v3979_v6  ;;  %142 = vmatpush.msra.mxu0 %v4015_v13  ;;  %v74_v21 = vld [vmem:[#allocation5 + $0x8] sm:$0xff]  ;;  %v73_v22 = vld [vmem:[#allocation5] sm:$0xff]  ;;  %v110_v23 = vld [vmem:[%s5495_s0] sm:$0x3] }
  0x16   :  { %537 = vmatpush.msra.mxu3 %v4015_v13  ;;  %v117_v27 = vmul.f32 %v110_v23, %v110_v23  ;;  %v4064_v31 = vld [vmem:[#allocation7 + $0x1] ss:$0 sm:$0xff]  ;;  %v4073_v36 = vld [vmem:[#allocation7] ss:$0 sm:$0xff] }
  0x17   :  { %124 = vrot.lane.b32.xlu0 %v118_v5, %s3886_s9  ;;  %167 = vmatpush.msra.mxu1 %v3985_v7 }
  0x18   :  { %143 = vmatpush.msra.mxu0 %v78_v15  ;;  %538 = vmatpush.msra.mxu3 %v78_v15 }
  0x19   :  { %168 = vmatpush.msra.mxu1 %v3992_v8 }
  0x1a   :  { %144 = vmatpush.msra.mxu0 %v77_v17  ;;  %539 = vmatpush.msra.mxu3 %v77_v17 }
  0x1b   :  { %169 = vmatpush.msra.mxu1 %v3998_v9 }
  0x1c   :  { %145 = vmatpush.msra.mxu0 %v76_v19  ;;  %540 = vmatpush.msra.mxu3 %v76_v19 }
  0x1d   :  { %170 = vmatpush.msra.mxu1 %v4005_v10 }
  0x1e   :  { %146 = vmatpush.msra.mxu0 %v75_v20  ;;  %541 = vmatpush.msra.mxu3 %v75_v20 }
  0x1f   :  { %171 = vmatpush.msra.mxu1 %v4013_v12 }
  0x20   :  { %147 = vmatpush.msra.mxu0 %v74_v21  ;;  %542 = vmatpush.msra.mxu3 %v74_v21 }
  0x21   :  { %172 = vmatpush.msra.mxu1 %v4021_v14 }
  0x22   :  { %148 = vmatpush.msra.mxu0 %v73_v22  ;;  %543 = vmatpush.msra.mxu3 %v73_v22 }
  0x23   :  { %173 = vmatpush.msra.mxu1 %v4029_v16 }
  0x24   :  { %556 = vmatpush.msrb.mxu0 %v3956_v2 }
  0x25   :  { %174 = vmatpush.msra.mxu1 %v4037_v18 }
  0x26   :  { %557 = vmatpush.msrb.mxu0 %v3965_v3 }
  0x27   :  { %924 = vmatpush.msrb.mxu1 %v4008_v11 }
  0x28   :  { %558 = vmatpush.msrb.mxu0 %v3971_v4 }
  0x29   :  { %925 = vmatpush.msrb.mxu1 %v4015_v13 }
  0x2a   :  { %559 = vmatpush.msrb.mxu0 %v3979_v6 }
  0x2b   :  { %926 = vmatpush.msrb.mxu1 %v78_v15 }
  0x2c   :  { %560 = vmatpush.msrb.mxu0 %v3985_v7 }
  0x2d   :  { %927 = vmatpush.msrb.mxu1 %v77_v17 }
  0x2e   :  { %561 = vmatpush.msrb.mxu0 %v3992_v8 }
  0x2f   :  { %928 = vmatpush.msrb.mxu1 %v76_v19 }
  0x30   :  { %562 = vmatpush.msrb.mxu0 %v3998_v9 }
  0x31   :  { %929 = vmatpush.msrb.mxu1 %v75_v20 }
  0x32   :  { %563 = vmatpush.msrb.mxu0 %v4005_v10 }
  0x33   :  { %930 = vmatpush.msrb.mxu1 %v74_v21 }
  0x34   :  { %564 = vmatpush.msrb.mxu0 %v4013_v12 }
  0x35   :  { %931 = vmatpush.msrb.mxu1 %v73_v22 }
  0x36   :  { %565 = vmatpush.msrb.mxu0 %v4021_v14 }
  0x38   :  { %566 = vmatpush.msrb.mxu0 %v4029_v16 }
  0x3a   :  { %567 = vmatpush.msrb.mxu0 %v4037_v18 }
  0x81   :  { %v121_v24 = vpop.permute.xlu0 %120 }
  0x82   :  { %v113_v25 = vpop.permute.xlu1 %112  ;;  %v127_v28 = vsel %vm115_vm0, %v117_v27, %v121_v24 }
  0x83   :  { %v116_v26 = vsel %vm115_vm0, %v110_v23, %v113_v25 }
  0x84   :  { %3251 = vmatmul.msk.f32.vlgmr.msra.gmra.mxu0 %vm128_vm1, %v116_v26 }
  0x89   :  { %v125_v29 = vpop.permute.xlu0 %124 }
  0x8a   :  { %v129_v30 = vsel %vm128_vm1, %v127_v28, %v125_v29 }
  0x8b   :  { %3252 = vmatmul.msk.f32.vlgmr.msra.gmra.mxu1 %vm155_vm2, %v129_v30 }
  0x8c   :  { %1312 = vmatpush.msra.mxu1 %v4008_v11 }
  0x8e   :  { %1313 = vmatpush.msra.mxu1 %v4015_v13 }
  0x90   :  { %1314 = vmatpush.msra.mxu1 %v78_v15 }
  0x92   :  { %1315 = vmatpush.msra.mxu1 %v77_v17 }
  0x94   :  { %1316 = vmatpush.msra.mxu1 %v76_v19 }
  0x96   :  { %1317 = vmatpush.msra.mxu1 %v75_v20 }
  0x98   :  { %1318 = vmatpush.msra.mxu1 %v74_v21 }
  0x9a   :  { %1319 = vmatpush.msra.mxu1 %v73_v22 }
 0x101   :  { %v150_v37 = vpop.f32.mrf.mxu0 }
 0x102   :  { %v4076_v40 = vadd.f32 %v4073_v36, %v150_v37 }
 0x104   :  { %v213_v55 = vadd.f32 -0.8813736, %v4076_v40 }
 0x106   :  { %v214_v59 = vmul.f32 1.1715729, %v213_v55 }
 0x108   :  { %v176_v32 = vpop.f32.mrf.mxu1 }
 0x109   :  { %v4067_v33 = vadd.f32 %v4064_v31, %v176_v32 }
 0x10b   :  { %v181_v34 = vmul.f32 0.3926991, %v4067_v33  ;;  %v215_v35 = vmul.f32 0.5390121, %v4067_v33  ;;  %268 = vrot.lane.b32.xlu2 %v4067_v33, %s3887_s25 }
 0x10d   :  { %v182_v38 = vadd.f32 1.0, %v181_v34  ;;  %v216_v39 = vadd.f32 1.0, %v215_v35 }
 0x10f   :  { %3352 = vrsqrt.f32 %v182_v38  ;;  %vm189_vm4 = vweird.f32 %v182_v38  ;;  %vm223_vm7 = vweird.f32 %v216_v39 }
 0x110   :  { %3354 = vrsqrt.f32 %v216_v39 }
 0x113   :  { %250 = vrot.lane.b32.xlu2 %v4076_v40, %s3887_s25 }
 0x115   :  { %v3353_v41 = vpop.eup %3352 }
 0x116   :  { %v184_v42 = vmul.f32 %v3353_v41, %v182_v38  ;;  %v3355_v43 = vpop.eup %3354  ;;  %vm190_vm3 = vweird.f32 %v3353_v41 }
 0x117   :  { %v218_v46 = vmul.f32 %v3355_v43, %v216_v39  ;;  %vm191_vm5 = vmor %vm189_vm4, %vm190_vm3  ;;  %vm224_vm6 = vweird.f32 %v3355_v43 }
 0x118   :  { %v185_v44 = vmul.f32 %v3353_v41, %v184_v42  ;;  %vm225_vm8 = vmor %vm223_vm7, %vm224_vm6 }
 0x119   :  { %v219_v49 = vmul.f32 %v3355_v43, %v218_v46 }
 0x11a   :  { %v186_v45 = vmul.f32 0.5, %v185_v44 }
 0x11b   :  { %v220_v53 = vmul.f32 0.5, %v219_v49 }
 0x11c   :  { %v187_v47 = vsub.f32 1.5, %v186_v45 }
 0x11d   :  { %v221_v54 = vsub.f32 1.5, %v220_v53 }
 0x11e   :  { %v188_v48 = vmul.f32 %v3353_v41, %v187_v47 }
 0x11f   :  { %v222_v57 = vmul.f32 %v3355_v43, %v221_v54 }
 0x120   :  { %v192_v50 = vsel %vm191_vm5, %v3353_v41, %v188_v48 }
 0x121   :  { %v193_v51 = vmul.f32 %v192_v50, %v4076_v40  ;;  %v226_v60 = vsel %vm225_vm8, %v3355_v43, %v222_v57 }
 0x122   :  { %v227_v61 = vmul.f32 %v226_v60, %v214_v59 }
 0x123   :  { %v3253_v52 = vmul.f32 -1.442695, %v193_v51 }
 0x124   :  { %v3254_v5 = vmul.f32 -1.442695, %v227_v61 }
 0x125   :  { %3356 = vpow2.f32 %v3253_v52 }
 0x12b   :  { %v3357_v56 = vpop.eup %3356 }
 0x12c   :  { %v197_v58 = vadd.f32 1.0, %v3357_v56 }
 0x12e   :  { %3358 = vrcp.f32 %v197_v58  ;;  %v209_v13 = vand.u32 2147483648, %v197_v58  ;;  %v207_v17 = vand.u32 2147483647, %v197_v58  ;;  %vm203_vm10 = vweird.f32 %v197_v58 }
 0x12f   :  { %3360 = vpow2.f32 %v3254_v5 }
 0x130   :  { %v210_v20 = vor.u32 1.1754944e-38, %v209_v13  ;;  %vm208_vm12 = vcmp.eq.f32.partialorder %v207_v17, 8.507059e+37 }
 0x134   :  { %v3359_v62 = vpop.eup %3358 }
 0x135   :  { %v199_v63 = vmul.f32 %v3359_v62, %v197_v58  ;;  %vm204_vm9 = vweird.f32 %v3359_v62  ;;  %v3361_v23 = vpop.eup %3360 }
 0x136   :  { %vm205_vm11 = vmor %vm203_vm10, %vm204_vm9  ;;  %v231_v24 = vadd.f32 1.0, %v3361_v23 }
 0x137   :  { %v200_v11 = vsub.f32 1.0, %v199_v63 }
 0x138   :  { %3362 = vrcp.f32 %v231_v24  ;;  %v243_v30 = vand.u32 2147483648, %v231_v24  ;;  %vm237_vm14 = vweird.f32 %v231_v24  ;;  %v241_v32 = vand.u32 2147483647, %v231_v24 }
 0x139   :  { %v201_v15 = vmul.f32 %v3359_v62, %v200_v11 }
 0x13a   :  { %v244_v37 = vor.u32 1.1754944e-38, %v243_v30  ;;  %vm242_vm3 = vcmp.eq.f32.partialorder %v241_v32, 8.507059e+37 }
 0x13b   :  { %v202_v19 = vadd.f32 %v3359_v62, %v201_v15 }
 0x13d   :  { %v206_v21 = vsel %vm205_vm11, %v3359_v62, %v202_v19 }
 0x13e   :  { %v4082_v22 = vsel %vm208_vm12, %v210_v20, %v206_v21  ;;  %v3363_v25 = vpop.eup %3362 }
 0x13f   :  { %255 = vrot.lane.b32.xlu1 %v4082_v22, %s3885_s23  ;;  %v233_v26 = vmul.f32 %v3363_v25, %v231_v24  ;;  %vm238_vm13 = vweird.f32 %v3363_v25  ;;  %v247_v35 = vmul.f32 %v4082_v22, %v4082_v22 }
 0x140   :  { %vm239_vm15 = vmor %vm237_vm14, %vm238_vm13 }
 0x141   :  { %v234_v27 = vsub.f32 1.0, %v233_v26 }
 0x143   :  { %v235_v28 = vmul.f32 %v3363_v25, %v234_v27 }
 0x145   :  { %v236_v29 = vadd.f32 %v3363_v25, %v235_v28 }
 0x147   :  { %v240_v34 = vsel %vm239_vm15, %v3363_v25, %v236_v29 }
 0x148   :  { %v245_v38 = vsel %vm242_vm3, %v244_v37, %v240_v34 }
 0x149   :  { %v4088_v39 = vsub.f32 %v245_v38, %v247_v35 }
 0x14b   :  { %v264_v48 = vadd.f32 %v4088_v39, %v4082_v22 }
 0x165   :  { %v269_v41 = vpop.permute.xlu2 %268 }
 0x166   :  { %v272_v42 = vadd.f32 %v269_v41, %v4088_v39  ;;  %v271_v43 = vmul.f32 %v269_v41, %v4088_v39 }
 0x168   :  { %3364 = vrcp.f32 %v272_v42 }
 0x169   :  { %3366 = vrcp.f32 %v264_v48 }
 0x16d   :  { %v251_v49 = vpop.permute.xlu2 %250 }
 0x16e   :  { %v3365_v44 = vpop.eup %3364  ;;  %v253_v50 = vmul.f32 %v251_v49, %v4088_v39 }
 0x16f   :  { %v274_v45 = vmul.f32 %v3365_v44, %v271_v43  ;;  %v4100_v53 = vpop.eup %3366 }
 0x171   :  { %281 = vrot.lane.b32.xlu1 %v274_v45, %s3886_s9 }
 0x1b1   :  { %v256_v46 = vpop.permute.xlu1 %255 }
 0x1b2   :  { %v258_v47 = vmul.f32 %v256_v46, %v4067_v33 }
 0x1b4   :  { %260 = vrot.lane.b32.xlu0 %v258_v47, %s3887_s25 }
 0x1bc   :  { %362 = vrot.lane.b32.xlu0 %v4082_v22, %s3887_s25 }
 0x1e3   :  { %v282_v55 = vpop.permute.xlu1 %281 }
 0x1e4   :  { %v284_v56 = vadd.f32 %v282_v55, %v4067_v33 }
 0x1e6   :  { %v286_v57 = vmul.f32 1.5707964, %v284_v56  ;;  %v320_v59 = vmul.f32 2.1560483, %v284_v56 }
 0x1e8   :  { %v287_v58 = vadd.f32 1.0, %v286_v57  ;;  %v321_v60 = vadd.f32 1.0, %v320_v59 }
 0x1ea   :  { %3368 = vrsqrt.f32 %v287_v58  ;;  %vm294_vm5 = vweird.f32 %v287_v58  ;;  %vm328_vm8 = vweird.f32 %v321_v60 }
 0x1eb   :  { %3370 = vrsqrt.f32 %v321_v60 }
 0x1f0   :  { %v3369_v61 = vpop.eup %3368 }
 0x1f1   :  { %v289_v62 = vmul.f32 %v3369_v61, %v287_v58  ;;  %v3371_v63 = vpop.eup %3370  ;;  %vm295_vm4 = vweird.f32 %v3369_v61 }
 0x1f2   :  { %v323_v11 = vmul.f32 %v3371_v63, %v321_v60  ;;  %vm296_vm6 = vmor %vm294_vm5, %vm295_vm4  ;;  %vm329_vm7 = vweird.f32 %v3371_v63 }
 0x1f3   :  { %v290_v5 = vmul.f32 %v3369_v61, %v289_v62  ;;  %vm330_vm9 = vmor %vm328_vm8, %vm329_vm7 }
 0x1f4   :  { %v324_v15 = vmul.f32 %v3371_v63, %v323_v11 }
 0x1f5   :  { %v291_v13 = vmul.f32 0.5, %v290_v5 }
 0x1f6   :  { %v325_v17 = vmul.f32 0.5, %v324_v15 }
 0x1f7   :  { %v292_v19 = vsub.f32 1.5, %v291_v13 }
 0x1f8   :  { %v326_v20 = vsub.f32 1.5, %v325_v17 }
 0x1f9   :  { %v293_v21 = vmul.f32 %v3369_v61, %v292_v19 }
 0x1fa   :  { %v327_v26 = vmul.f32 %v3371_v63, %v326_v20  ;;  %v380_v20 = vsub.f32 1.0, %v4082_v22 }
 0x1fb   :  { %v297_v25 = vsel %vm296_vm6, %v3369_v61, %v293_v21 }
 0x1fc   :  { %v331_v32 = vsel %vm330_vm9, %v3371_v63, %v327_v26  ;;  %v384_v21 = vadd.f32 %v380_v20, %v4088_v39 }
 0x226   :  { %v261_v51 = vpop.permute.xlu0 %260 }
 0x227   :  { %v263_v52 = vadd.f32 %v261_v51, %v253_v50 }
 0x229   :  { %v266_v54 = vmul.f32 %v4100_v53, %v263_v52 }
 0x22b   :  { %276 = vrot.lane.b32.xlu2 %v266_v54, %s3886_s9 }
 0x22e   :  { %v363_v17 = vpop.permute.xlu0 %362 }
 0x285   :  { %v277_v23 = vpop.permute.xlu2 %276 }
 0x286   :  { %v279_v33 = vadd.f32 %v277_v23, %v4076_v40  ;;  %v388_v23 = vadd.f32 %v4088_v39, %v3946_v0 }
 0x288   :  { %v285_v24 = vmul.f32 2.0, %v279_v33 }
 0x28a   :  { %v298_v27 = vmul.f32 %v297_v25, %v285_v24  ;;  %v318_v28 = vadd.f32 -0.8813736, %v285_v24  ;;  %v381_v24 = vmul.f32 %v4088_v39, %v3951_v1  ;;  %v387_v1 = vmul.f32 %v4088_v39, %v3946_v0 }
 0x28c   :  { %v3255_v29 = vmul.f32 -1.442695, %v298_v27  ;;  %v319_v30 = vmul.f32 1.1715729, %v318_v28  ;;  %v382_v28 = vmul.f32 %v380_v20, %v3946_v0  ;;  %v4136_v0 = vld [vmem:[%s5501_s6 + $0x58] sm:$0xff] }
 0x28d   :  { %411 = vmatpush.msra.mxu2 %v4136_v0  ;;  %803 = vmatpush.msrb.mxu3 %v4136_v0 }
 0x28e   :  { %3372 = vpow2.f32 %v3255_v29  ;;  %v332_v34 = vmul.f32 %v331_v32, %v319_v30  ;;  %v383_v30 = vadd.f32 %v382_v28, %v381_v24  ;;  %1191 = vmatpush.msra.mxu0 %v4136_v0 }
 0x290   :  { %v3256_v35 = vmul.f32 -1.442695, %v332_v34 }
 0x292   :  { %3374 = vpow2.f32 %v3256_v35 }
 0x294   :  { %v3373_v37 = vpop.eup %3372 }
 0x295   :  { %v302_v38 = vadd.f32 1.0, %v3373_v37 }
 0x297   :  { %3376 = vrcp.f32 %v302_v38  ;;  %v312_v46 = vand.u32 2147483647, %v302_v38  ;;  %v314_v47 = vand.u32 2147483648, %v302_v38  ;;  %vm308_vm11 = vweird.f32 %v302_v38 }
 0x298   :  { %v3375_v40 = vpop.eup %3374 }
 0x299   :  { %v336_v41 = vadd.f32 1.0, %v3375_v40  ;;  %vm313_vm13 = vcmp.eq.f32.partialorder %v312_v46, 8.507059e+37  ;;  %v315_v52 = vor.u32 1.1754944e-38, %v314_v47  ;;  %v4156_v46 = vld [vmem:[%s5501_s6 + $0x40] sm:$0xff]  ;;  %v4164_v47 = vld [vmem:[%s5501_s6 + $0x38] sm:$0xff] }
 0x29b   :  { %3378 = vrcp.f32 %v336_v41  ;;  %v348_v54 = vand.u32 2147483648, %v336_v41  ;;  %v346_v57 = vand.u32 2147483647, %v336_v41  ;;  %vm342_vm15 = vweird.f32 %v336_v41 }
 0x29c   :  { %3380 = vrcp.f32 %v384_v21 }
 0x29d   :  { %v3377_v42 = vpop.eup %3376  ;;  %v349_v61 = vor.u32 1.1754944e-38, %v348_v54  ;;  %vm347_vm4 = vcmp.eq.f32.partialorder %v346_v57, 8.507059e+37  ;;  %3382 = vrcp.f32 %v388_v23  ;;  %v4212_v54 = vld [vmem:[%s5501_s6 + $0x8] sm:$0xff] }
 0x29e   :  { %v304_v43 = vmul.f32 %v3377_v42, %v302_v38  ;;  %vm309_vm10 = vweird.f32 %v3377_v42 }
 0x29f   :  { %vm310_vm12 = vmor %vm308_vm11, %vm309_vm10 }
 0x2a0   :  { %v305_v44 = vsub.f32 1.0, %v304_v43 }
 0x2a1   :  { %v3379_v45 = vpop.eup %3378 }
 0x2a2   :  { %v306_v48 = vmul.f32 %v3377_v42, %v305_v44  ;;  %v338_v49 = vmul.f32 %v3379_v45, %v336_v41  ;;  %vm343_vm14 = vweird.f32 %v3379_v45  ;;  %v3381_v29 = vpop.eup %3380 }
 0x2a3   :  { %vm344_vm3 = vmor %vm342_vm15, %vm343_vm14  ;;  %v386_v34 = vmul.f32 %v3381_v29, %v383_v30  ;;  %v3383_v37 = vpop.eup %3382 }
 0x2a4   :  { %v307_v50 = vadd.f32 %v3377_v42, %v306_v48  ;;  %v339_v51 = vsub.f32 1.0, %v338_v49  ;;  %v390_v43 = vmul.f32 %v3383_v37, %v387_v1  ;;  %v4172_v48 = vld [vmem:[%s5501_s6 + $0x30] sm:$0xff]  ;;  %v4180_v49 = vld [vmem:[%s5501_s6 + $0x28] sm:$0xff] }
 0x2a6   :  { %v311_v55 = vsel %vm310_vm12, %v3377_v42, %v307_v50  ;;  %v340_v56 = vmul.f32 %v3379_v45, %v339_v51  ;;  %v4188_v50 = vld [vmem:[%s5501_s6 + $0x20] sm:$0xff]  ;;  %v4200_v51 = vld [vmem:[%s5501_s6 + $0x18] sm:$0xff] }
 0x2a7   :  { %v316_v58 = vsel %vm313_vm13, %v315_v52, %v311_v55  ;;  %v4207_v52 = vld [vmem:[%s5501_s6 + $0x10] sm:$0xff]  ;;  %v4223_v55 = vld [vmem:[%s5501_s6] sm:$0xff] }
 0x2a8   :  { %v354_v59 = vmul.f32 2.0, %v316_v58  ;;  %v341_v60 = vadd.f32 %v3379_v45, %v340_v56  ;;  %v352_v5 = vmul.f32 %v316_v58, %v316_v58  ;;  %v3261_v56 = vld [vmem:[%s5495_s0 + $0x2] sm:$0x3] }
 0x2aa   :  { %v3257_v62 = vadd.f32 -1.0, %v354_v59  ;;  %v345_v63 = vsel %vm344_vm3, %v3379_v45, %v341_v60  ;;  %v4148_v45 = vld [vmem:[%s5501_s6 + $0x48] sm:$0xff]  ;;  %v522_v59 = vmul.f32 %v3261_v56, %v3261_v56 }
 0x2ab   :  { %v350_v11 = vsel %vm347_vm4, %v349_v61, %v345_v63 }
 0x2ac   :  { %358 = vrot.lane.b32.xlu2 %v3257_v62, %s3885_s23  ;;  %v353_v13 = vsub.f32 %v350_v11, %v352_v5 }
 0x2ae   :  { %v356_v15 = vmul.f32 4.0, %v353_v13 }
 0x2b0   :  { %373 = vrot.lane.b32.xlu1 %v356_v15, %s3885_s23  ;;  %v365_v19 = vmul.f32 %v363_v17, %v356_v15 }
 0x2b2   :  { %367 = vrot.lane.b32.xlu0 %v365_v19, %s3885_s23 }
 0x306   :  { %v359_v33 = vpop.permute.xlu2 %358 }
 0x307   :  { %v361_v26 = vmul.f32 %v359_v33, %v4088_v39 }
 0x322   :  { %v374_v25 = vpop.permute.xlu1 %373 }
 0x323   :  { %v377_v27 = vadd.f32 %v374_v25, %v4088_v39  ;;  %v376_v40 = vmul.f32 %v374_v25, %v4088_v39  ;;  %v4141_v39 = vld [vmem:[%s5501_s6 + $0x50] sm:$0xff] }
 0x324   :  { %v368_v22 = vpop.permute.xlu0 %367  ;;  %412 = vmatpush.msra.mxu2 %v4141_v39  ;;  %804 = vmatpush.msrb.mxu3 %v4141_v39 }
 0x325   :  { %3384 = vrcp.f32 %v377_v27  ;;  %v370_v32 = vadd.f32 %v368_v22, %v361_v26  ;;  %1192 = vmatpush.msra.mxu0 %v4141_v39 }
 0x326   :  { %413 = vmatpush.msra.mxu2 %v4148_v45  ;;  %805 = vmatpush.msrb.mxu3 %v4148_v45 }
 0x327   :  { %v371_v35 = vmul.f32 %v4100_v53, %v370_v32  ;;  %1193 = vmatpush.msra.mxu0 %v4148_v45 }
 0x328   :  { %414 = vmatpush.msra.mxu2 %v4156_v46  ;;  %806 = vmatpush.msrb.mxu3 %v4156_v46 }
 0x329   :  { %v4119_v38 = vadd.f32 %v386_v34, %v371_v35  ;;  %1194 = vmatpush.msra.mxu0 %v4156_v46 }
 0x32a   :  { %415 = vmatpush.msra.mxu2 %v4164_v47  ;;  %807 = vmatpush.msrb.mxu3 %v4164_v47 }
 0x32b   :  { %v3385_v41 = vpop.eup %3384  ;;  %518 = vrot.lane.b32.xlu0 %v4119_v38, %s3885_s23  ;;  %v393_v42 = vmul.f32 %v4119_v38, %v4119_v38  ;;  %1195 = vmatpush.msra.mxu0 %v4164_v47 }
 0x32c   :  { %v379_v44 = vmul.f32 %v3385_v41, %v376_v40  ;;  %416 = vmatpush.msra.mxu2 %v4172_v48  ;;  %808 = vmatpush.msrb.mxu3 %v4172_v48 }
 0x32d   :  { %399 = vrot.lane.b32.xlu2 %v393_v42, %s3886_s9  ;;  %1196 = vmatpush.msra.mxu0 %v4172_v48 }
 0x32e   :  { %v4129_v53 = vadd.f32 %v390_v43, %v379_v44  ;;  %417 = vmatpush.msra.mxu2 %v4180_v49  ;;  %809 = vmatpush.msrb.mxu3 %v4180_v49 }
 0x32f   :  { %1197 = vmatpush.msra.mxu0 %v4180_v49 }
 0x330   :  { %395 = vrot.lane.b32.xlu1 %v4129_v53, %s3885_s23  ;;  %418 = vmatpush.msra.mxu2 %v4188_v50 }
 0x331   :  { %810 = vmatpush.msrb.mxu3 %v4188_v50  ;;  %1198 = vmatpush.msra.mxu0 %v4188_v50 }
 0x332   :  { %419 = vmatpush.msra.mxu2 %v4200_v51 }
 0x333   :  { %811 = vmatpush.msrb.mxu3 %v4200_v51  ;;  %1199 = vmatpush.msra.mxu0 %v4200_v51 }
 0x334   :  { %420 = vmatpush.msra.mxu2 %v4207_v52 }
 0x335   :  { %812 = vmatpush.msrb.mxu3 %v4207_v52  ;;  %1200 = vmatpush.msra.mxu0 %v4207_v52 }
 0x336   :  { %421 = vmatpush.msra.mxu2 %v4212_v54 }
 0x337   :  { %813 = vmatpush.msrb.mxu3 %v4212_v54  ;;  %1201 = vmatpush.msra.mxu0 %v4212_v54 }
 0x338   :  { %422 = vmatpush.msra.mxu2 %v4223_v55 }
 0x339   :  { %814 = vmatpush.msrb.mxu3 %v4223_v55  ;;  %1202 = vmatpush.msra.mxu0 %v4223_v55 }
 0x33a   :  { %944 = vmatpush.msrb.mxu2 %v3956_v2 }
 0x33c   :  { %945 = vmatpush.msrb.mxu2 %v3965_v3 }
 0x33e   :  { %946 = vmatpush.msrb.mxu2 %v3971_v4 }
 0x340   :  { %947 = vmatpush.msrb.mxu2 %v3979_v6 }
 0x342   :  { %948 = vmatpush.msrb.mxu2 %v3985_v7 }
 0x344   :  { %949 = vmatpush.msrb.mxu2 %v3992_v8 }
 0x346   :  { %950 = vmatpush.msrb.mxu2 %v3998_v9 }
 0x348   :  { %951 = vmatpush.msrb.mxu2 %v4005_v10 }
 0x34a   :  { %952 = vmatpush.msrb.mxu2 %v4013_v12 }
 0x34c   :  { %953 = vmatpush.msrb.mxu2 %v4021_v14 }
 0x34e   :  { %954 = vmatpush.msrb.mxu2 %v4029_v16 }
 0x350   :  { %955 = vmatpush.msrb.mxu2 %v4037_v18 }
 0x387   :  { %v400_v61 = vpop.permute.xlu2 %399 }
 0x39d   :  { %v519_v57 = vpop.permute.xlu0 %518 }
 0x39e   :  { %v521_v58 = vsel %vm115_vm0, %v3261_v56, %v519_v57 }
 0x39f   :  { %3262 = vmatmul.msk.f32.vlgmr.msra.gmra.mxu3 %vm128_vm1, %v521_v58 }
 0x3a0   :  { %1332 = vmatpush.msra.mxu3 %v3956_v2 }
 0x3a2   :  { %v396_v60 = vpop.permute.xlu1 %395  ;;  %1333 = vmatpush.msra.mxu3 %v3965_v3 }
 0x3a3   :  { %v402_v62 = vsel %vm115_vm0, %v4119_v38, %v396_v60  ;;  %v523_v63 = vsel %vm115_vm0, %v522_v59, %v396_v60 }
 0x3a4   :  { %v403_v5 = vsel %vm128_vm1, %v402_v62, %v400_v61  ;;  %v524_v11 = vsel %vm128_vm1, %v523_v63, %v400_v61  ;;  %1334 = vmatpush.msra.mxu3 %v3971_v4 }
 0x3a5   :  { %3258 = vmatmul.msk.f32.vlgmr.msra.gmra.mxu2 %vm155_vm2, %v403_v5  ;;  %3263 = vmatmul.msk.f32.vlgmr.msrb.gmra.mxu0 %vm155_vm2, %v524_v11 }
 0x3a6   :  { %1335 = vmatpush.msra.mxu3 %v3979_v6  ;;  %1579 = vmatpush.msra.mxu2 %v4136_v0 }
 0x3a7   :  { %1720 = vmatpush.msrb.mxu0 %v3956_v2 }
 0x3a8   :  { %1336 = vmatpush.msra.mxu3 %v3985_v7  ;;  %1580 = vmatpush.msra.mxu2 %v4141_v39 }
 0x3a9   :  { %1721 = vmatpush.msrb.mxu0 %v3965_v3 }
 0x3aa   :  { %1337 = vmatpush.msra.mxu3 %v3992_v8  ;;  %1581 = vmatpush.msra.mxu2 %v4148_v45 }
 0x3ab   :  { %1722 = vmatpush.msrb.mxu0 %v3971_v4 }
 0x3ac   :  { %1338 = vmatpush.msra.mxu3 %v3998_v9  ;;  %1582 = vmatpush.msra.mxu2 %v4156_v46 }
 0x3ad   :  { %1723 = vmatpush.msrb.mxu0 %v3979_v6 }
 0x3ae   :  { %1339 = vmatpush.msra.mxu3 %v4005_v10  ;;  %1583 = vmatpush.msra.mxu2 %v4164_v47 }
 0x3af   :  { %1724 = vmatpush.msrb.mxu0 %v3985_v7 }
 0x3b0   :  { %1340 = vmatpush.msra.mxu3 %v4013_v12  ;;  %1584 = vmatpush.msra.mxu2 %v4172_v48 }
 0x3b1   :  { %1725 = vmatpush.msrb.mxu0 %v3992_v8 }
 0x3b2   :  { %1341 = vmatpush.msra.mxu3 %v4021_v14  ;;  %1585 = vmatpush.msra.mxu2 %v4180_v49 }
 0x3b3   :  { %1726 = vmatpush.msrb.mxu0 %v3998_v9 }
 0x3b4   :  { %1342 = vmatpush.msra.mxu3 %v4029_v16  ;;  %1586 = vmatpush.msra.mxu2 %v4188_v50 }
 0x3b5   :  { %1727 = vmatpush.msrb.mxu0 %v4005_v10 }
 0x3b6   :  { %1343 = vmatpush.msra.mxu3 %v4037_v18  ;;  %1587 = vmatpush.msra.mxu2 %v4200_v51 }
 0x3b7   :  { %1728 = vmatpush.msrb.mxu0 %v4013_v12 }
 0x3b8   :  { %1588 = vmatpush.msra.mxu2 %v4207_v52 }
 0x3b9   :  { %1729 = vmatpush.msrb.mxu0 %v4021_v14 }
 0x3ba   :  { %1589 = vmatpush.msra.mxu2 %v4212_v54 }
 0x3bb   :  { %1730 = vmatpush.msrb.mxu0 %v4029_v16 }
 0x3bc   :  { %1590 = vmatpush.msra.mxu2 %v4223_v55 }
 0x3bd   :  { %1731 = vmatpush.msrb.mxu0 %v4037_v18 }
 0x422   :  { %v545_v2 = vpop.f32.mrf.mxu3  ;;  %v569_v3 = vpop.f32.mrf.mxu0 }
 0x423   :  { %v4290_v4 = vadd.f32 %v4073_v36, %v545_v2  ;;  %v4293_v6 = vadd.f32 %v4064_v31, %v569_v3 }
 0x425   :  { %v573_v7 = vmul.f32 0.3926991, %v4293_v6  ;;  %v607_v8 = vmul.f32 0.5390121, %v4293_v6  ;;  %642 = vrot.lane.b32.xlu0 %v4290_v4, %s3887_s25  ;;  %660 = vrot.lane.b32.xlu2 %v4293_v6, %s3887_s25  ;;  %v605_v26 = vadd.f32 -0.8813736, %v4290_v4 }
 0x427   :  { %v574_v9 = vadd.f32 1.0, %v573_v7  ;;  %v608_v10 = vadd.f32 1.0, %v607_v8  ;;  %v606_v29 = vmul.f32 1.1715729, %v605_v26 }
 0x429   :  { %3386 = vrsqrt.f32 %v574_v9  ;;  %vm581_vm6 = vweird.f32 %v574_v9  ;;  %vm615_vm9 = vweird.f32 %v608_v10 }
 0x42a   :  { %3388 = vrsqrt.f32 %v608_v10 }
 0x42f   :  { %v3387_v12 = vpop.eup %3386 }
 0x430   :  { %v576_v14 = vmul.f32 %v3387_v12, %v574_v9  ;;  %v3389_v16 = vpop.eup %3388  ;;  %vm582_vm5 = vweird.f32 %v3387_v12 }
 0x431   :  { %v610_v36 = vmul.f32 %v3389_v16, %v608_v10  ;;  %vm583_vm7 = vmor %vm581_vm6, %vm582_vm5  ;;  %vm616_vm8 = vweird.f32 %v3389_v16 }
 0x432   :  { %v577_v18 = vmul.f32 %v3387_v12, %v576_v14  ;;  %vm617_vm10 = vmor %vm615_vm9, %vm616_vm8 }
 0x433   :  { %v611_v17 = vmul.f32 %v3389_v16, %v610_v36 }
 0x434   :  { %v578_v31 = vmul.f32 0.5, %v577_v18 }
 0x435   :  { %v612_v23 = vmul.f32 0.5, %v611_v17 }
 0x436   :  { %v579_v13 = vsub.f32 1.5, %v578_v31 }
 0x437   :  { %v613_v33 = vsub.f32 1.5, %v612_v23 }
 0x438   :  { %v580_v15 = vmul.f32 %v3387_v12, %v579_v13 }
 0x439   :  { %v614_v25 = vmul.f32 %v3389_v16, %v613_v33 }
 0x43a   :  { %v584_v19 = vsel %vm583_vm7, %v3387_v12, %v580_v15 }
 0x43b   :  { %v585_v20 = vmul.f32 %v584_v19, %v4290_v4  ;;  %v618_v28 = vsel %vm617_vm10, %v3389_v16, %v614_v25 }
 0x43c   :  { %v619_v22 = vmul.f32 %v618_v28, %v606_v29 }
 0x43d   :  { %v3264_v21 = vmul.f32 -1.442695, %v585_v20 }
 0x43e   :  { %v3265_v34 = vmul.f32 -1.442695, %v619_v22 }
 0x43f   :  { %3390 = vpow2.f32 %v3264_v21 }
 0x445   :  { %v3391_v24 = vpop.eup %3390 }
 0x446   :  { %v589_v27 = vadd.f32 1.0, %v3391_v24 }
 0x448   :  { %3392 = vrcp.f32 %v589_v27  ;;  %v601_v37 = vand.u32 2147483648, %v589_v27  ;;  %v599_v40 = vand.u32 2147483647, %v589_v27  ;;  %vm595_vm12 = vweird.f32 %v589_v27 }
 0x449   :  { %3394 = vpow2.f32 %v3265_v34 }
 0x44a   :  { %v602_v42 = vor.u32 1.1754944e-38, %v601_v37  ;;  %vm600_vm14 = vcmp.eq.f32.partialorder %v599_v40, 8.507059e+37 }
 0x44e   :  { %v3393_v30 = vpop.eup %3392 }
 0x44f   :  { %v591_v32 = vmul.f32 %v3393_v30, %v589_v27  ;;  %vm596_vm11 = vweird.f32 %v3393_v30  ;;  %v3395_v56 = vpop.eup %3394 }
 0x450   :  { %vm597_vm13 = vmor %vm595_vm12, %vm596_vm11  ;;  %v623_v57 = vadd.f32 1.0, %v3395_v56 }
 0x451   :  { %v592_v35 = vsub.f32 1.0, %v591_v32 }
 0x452   :  { %3396 = vrcp.f32 %v623_v57  ;;  %v635_v63 = vand.u32 2147483648, %v623_v57  ;;  %vm629_vm3 = vweird.f32 %v623_v57  ;;  %v633_v5 = vand.u32 2147483647, %v623_v57 }
 0x453   :  { %v593_v1 = vmul.f32 %v3393_v30, %v592_v35 }
 0x454   :  { %v636_v3 = vor.u32 1.1754944e-38, %v635_v63  ;;  %vm634_vm5 = vcmp.eq.f32.partialorder %v633_v5, 8.507059e+37 }
 0x455   :  { %v594_v41 = vadd.f32 %v3393_v30, %v593_v1 }
 0x457   :  { %v598_v43 = vsel %vm597_vm13, %v3393_v30, %v594_v41 }
 0x458   :  { %v4303_v44 = vsel %vm600_vm14, %v602_v42, %v598_v43  ;;  %v3397_v58 = vpop.eup %3396 }
 0x459   :  { %647 = vrot.lane.b32.xlu1 %v4303_v44, %s3885_s23  ;;  %v625_v59 = vmul.f32 %v3397_v58, %v623_v57  ;;  %vm630_vm15 = vweird.f32 %v3397_v58  ;;  %v639_v2 = vmul.f32 %v4303_v44, %v4303_v44 }
 0x45a   :  { %vm631_vm4 = vmor %vm629_vm3, %vm630_vm15 }
 0x45b   :  { %v626_v60 = vsub.f32 1.0, %v625_v59 }
 0x45d   :  { %v627_v61 = vmul.f32 %v3397_v58, %v626_v60 }
 0x45f   :  { %v628_v62 = vadd.f32 %v3397_v58, %v627_v61 }
 0x461   :  { %v632_v11 = vsel %vm631_vm4, %v3397_v58, %v628_v62 }
 0x462   :  { %v637_v7 = vsel %vm634_vm5, %v636_v3, %v632_v11 }
 0x463   :  { %v4309_v8 = vsub.f32 %v637_v7, %v639_v2 }
 0x465   :  { %v656_v36 = vadd.f32 %v4309_v8, %v4303_v44 }
 0x47f   :  { %v661_v9 = vpop.permute.xlu2 %660 }
 0x480   :  { %v664_v10 = vadd.f32 %v661_v9, %v4309_v8  ;;  %v663_v12 = vmul.f32 %v661_v9, %v4309_v8 }
 0x482   :  { %3398 = vrcp.f32 %v664_v10 }
 0x483   :  { %3400 = vrcp.f32 %v656_v36 }
 0x488   :  { %v3399_v14 = vpop.eup %3398 }
 0x489   :  { %v666_v16 = vmul.f32 %v3399_v14, %v663_v12  ;;  %v4321_v20 = vpop.eup %3400 }
 0x48b   :  { %673 = vrot.lane.b32.xlu2 %v666_v16, %s3886_s9 }
 0x497   :  { %v643_v13 = vpop.permute.xlu0 %642 }
 0x498   :  { %v645_v15 = vmul.f32 %v643_v13, %v4309_v8 }
 0x4cb   :  { %v648_v18 = vpop.permute.xlu1 %647 }
 0x4cc   :  { %v650_v31 = vmul.f32 %v648_v18, %v4293_v6 }
 0x4ce   :  { %652 = vrot.lane.b32.xlu1 %v650_v31, %s3887_s25 }
 0x4d6   :  { %754 = vrot.lane.b32.xlu1 %v4303_v44, %s3887_s25 }
 0x4e5   :  { %v674_v23 = vpop.permute.xlu2 %673 }
 0x4e6   :  { %v676_v33 = vadd.f32 %v674_v23, %v4293_v6 }
 0x4e8   :  { %v678_v24 = vmul.f32 1.5707964, %v676_v33  ;;  %v712_v26 = vmul.f32 2.1560483, %v676_v33 }
 0x4ea   :  { %v679_v25 = vadd.f32 1.0, %v678_v24  ;;  %v713_v27 = vadd.f32 1.0, %v712_v26 }
 0x4ec   :  { %3402 = vrsqrt.f32 %v679_v25  ;;  %vm686_vm7 = vweird.f32 %v679_v25  ;;  %vm720_vm10 = vweird.f32 %v713_v27 }
 0x4ed   :  { %3404 = vrsqrt.f32 %v713_v27 }
 0x4f2   :  { %v3403_v28 = vpop.eup %3402 }
 0x4f3   :  { %v681_v29 = vmul.f32 %v3403_v28, %v679_v25  ;;  %v3405_v22 = vpop.eup %3404  ;;  %vm687_vm6 = vweird.f32 %v3403_v28 }
 0x4f4   :  { %v715_v32 = vmul.f32 %v3405_v22, %v713_v27  ;;  %vm688_vm8 = vmor %vm686_vm7, %vm687_vm6  ;;  %vm721_vm9 = vweird.f32 %v3405_v22 }
 0x4f5   :  { %v682_v30 = vmul.f32 %v3403_v28, %v681_v29  ;;  %vm722_vm11 = vmor %vm720_vm10, %vm721_vm9 }
 0x4f6   :  { %v716_v35 = vmul.f32 %v3405_v22, %v715_v32 }
 0x4f7   :  { %v683_v34 = vmul.f32 0.5, %v682_v30 }
 0x4f8   :  { %v717_v37 = vmul.f32 0.5, %v716_v35 }
 0x4f9   :  { %v684_v1 = vsub.f32 1.5, %v683_v34 }
 0x4fa   :  { %v718_v40 = vsub.f32 1.5, %v717_v37  ;;  %v780_v37 = vadd.f32 %v4309_v8, %v4129_v53 }
 0x4fb   :  { %v685_v41 = vmul.f32 %v3403_v28, %v684_v1 }
 0x4fc   :  { %v719_v57 = vmul.f32 %v3405_v22, %v718_v40 }
 0x4fd   :  { %v689_v56 = vsel %vm688_vm8, %v3403_v28, %v685_v41 }
 0x4fe   :  { %v723_v62 = vsel %vm722_vm11, %v3405_v22, %v719_v57 }
 0x540   :  { %v653_v17 = vpop.permute.xlu1 %652 }
 0x541   :  { %v655_v19 = vadd.f32 %v653_v17, %v645_v15 }
 0x543   :  { %v658_v21 = vmul.f32 %v4321_v20, %v655_v19 }
 0x545   :  { %668 = vrot.lane.b32.xlu0 %v658_v21, %s3886_s9 }
 0x548   :  { %v755_v34 = vpop.permute.xlu1 %754 }
 0x5b7   :  { %v669_v42 = vpop.permute.xlu0 %668 }
 0x5b8   :  { %v671_v6 = vadd.f32 %v669_v42, %v4290_v4  ;;  %v779_v42 = vmul.f32 %v4309_v8, %v4129_v53 }
 0x5ba   :  { %v677_v43 = vmul.f32 2.0, %v671_v6 }
 0x5bc   :  { %v690_v58 = vmul.f32 %v689_v56, %v677_v43  ;;  %v710_v59 = vadd.f32 -0.8813736, %v677_v43 }
 0x5be   :  { %v3266_v60 = vmul.f32 -1.442695, %v690_v58  ;;  %v711_v61 = vmul.f32 1.1715729, %v710_v59  ;;  %v772_v59 = vsub.f32 1.0, %v4303_v44 }
 0x5c0   :  { %3406 = vpow2.f32 %v3266_v60  ;;  %v724_v63 = vmul.f32 %v723_v62, %v711_v61  ;;  %v776_v60 = vadd.f32 %v772_v59, %v4309_v8  ;;  %v773_v62 = vmul.f32 %v4309_v8, %v4119_v38  ;;  %v3272_v38 = vld [vmem:[%s5495_s0 + $0x4] sm:$0x3] }
 0x5c2   :  { %v3267_v5 = vmul.f32 -1.442695, %v724_v63 }
 0x5c4   :  { %3408 = vpow2.f32 %v3267_v5  ;;  %v774_v5 = vmul.f32 %v772_v59, %v4129_v53  ;;  %v910_v53 = vmul.f32 %v3272_v38, %v3272_v38 }
 0x5c6   :  { %v3407_v11 = vpop.eup %3406 }
 0x5c7   :  { %v694_v2 = vadd.f32 1.0, %v3407_v11 }
 0x5c9   :  { %3410 = vrcp.f32 %v694_v2  ;;  %v704_v14 = vand.u32 2147483647, %v694_v2  ;;  %v706_v16 = vand.u32 2147483648, %v694_v2  ;;  %vm700_vm13 = vweird.f32 %v694_v2 }
 0x5ca   :  { %v3409_v4 = vpop.eup %3408 }
 0x5cb   :  { %v728_v3 = vadd.f32 1.0, %v3409_v4  ;;  %vm705_vm15 = vcmp.eq.f32.partialorder %v704_v14, 8.507059e+37  ;;  %v707_v15 = vor.u32 1.1754944e-38, %v706_v16  ;;  %v775_v4 = vadd.f32 %v774_v5, %v773_v62 }
 0x5cd   :  { %3412 = vrcp.f32 %v728_v3  ;;  %v740_v17 = vand.u32 2147483648, %v728_v3  ;;  %v738_v23 = vand.u32 2147483647, %v728_v3  ;;  %vm734_vm4 = vweird.f32 %v728_v3 }
 0x5ce   :  { %3414 = vrcp.f32 %v780_v37 }
 0x5cf   :  { %v3411_v7 = vpop.eup %3410  ;;  %v741_v26 = vor.u32 1.1754944e-38, %v740_v17  ;;  %vm739_vm6 = vcmp.eq.f32.partialorder %v738_v23, 8.507059e+37  ;;  %v4376_v17 = vld [vmem:[%s5499_s4 + $0x58] sm:$0xff]  ;;  %v4396_v23 = vld [vmem:[%s5499_s4 + $0x48] sm:$0xff] }
 0x5d0   :  { %v696_v9 = vmul.f32 %v3411_v7, %v694_v2  ;;  %vm701_vm12 = vweird.f32 %v3411_v7 }
 0x5d1   :  { %vm702_vm14 = vmor %vm700_vm13, %vm701_vm12 }
 0x5d2   :  { %v697_v10 = vsub.f32 1.0, %v696_v9 }
 0x5d3   :  { %v3413_v12 = vpop.eup %3412 }
 0x5d4   :  { %v698_v18 = vmul.f32 %v3411_v7, %v697_v10  ;;  %v730_v31 = vmul.f32 %v3413_v12, %v728_v3  ;;  %vm735_vm3 = vweird.f32 %v3413_v12  ;;  %v3415_v41 = vpop.eup %3414 }
 0x5d5   :  { %vm736_vm5 = vmor %vm734_vm4, %vm735_vm3  ;;  %v782_v56 = vmul.f32 %v3415_v41, %v779_v42 }
 0x5d6   :  { %v699_v36 = vadd.f32 %v3411_v7, %v698_v18  ;;  %v731_v13 = vsub.f32 1.0, %v730_v31 }
 0x5d8   :  { %v703_v19 = vsel %vm702_vm14, %v3411_v7, %v699_v36  ;;  %v732_v21 = vmul.f32 %v3413_v12, %v731_v13  ;;  %v4364_v13 = vld [vmem:[#allocation5 + $0x38] sm:$0xff] }
 0x5d9   :  { %v708_v33 = vsel %vm705_vm15, %v707_v15, %v703_v19  ;;  %v4369_v15 = vld [vmem:[#allocation5 + $0x30] sm:$0xff]  ;;  %v4379_v19 = vld [vmem:[#allocation5 + $0x28] sm:$0xff] }
 0x5da   :  { %v746_v24 = vmul.f32 2.0, %v708_v33  ;;  %v733_v25 = vadd.f32 %v3413_v12, %v732_v21  ;;  %v744_v29 = vmul.f32 %v708_v33, %v708_v33  ;;  %v4386_v21 = vld [vmem:[%s5499_s4 + $0x50] sm:$0xff]  ;;  %v4406_v33 = vld [vmem:[%s5499_s4 + $0x40] sm:$0xff] }
 0x5dc   :  { %v3268_v27 = vadd.f32 -1.0, %v746_v24  ;;  %v737_v28 = vsel %vm736_vm5, %v3413_v12, %v733_v25  ;;  %v4416_v24 = vld [vmem:[%s5499_s4 + $0x38] sm:$0xff]  ;;  %v4426_v25 = vld [vmem:[%s5499_s4 + $0x30] sm:$0xff] }
 0x5dd   :  { %v742_v22 = vsel %vm739_vm6, %v741_v26, %v737_v28  ;;  %v4436_v26 = vld [vmem:[%s5499_s4 + $0x28] sm:$0xff] }
 0x5de   :  { %750 = vrot.lane.b32.xlu0 %v3268_v27, %s3885_s23  ;;  %v745_v30 = vsub.f32 %v742_v22, %v744_v29  ;;  %v4474_v27 = vpop.f32.mrf.mxu2 }
 0x5e0   :  { %v748_v32 = vmul.f32 4.0, %v745_v30 }
 0x5e2   :  { %765 = vrot.lane.b32.xlu2 %v748_v32, %s3885_s23  ;;  %v757_v35 = vmul.f32 %v755_v34, %v748_v32 }
 0x5e4   :  { %759 = vrot.lane.b32.xlu1 %v757_v35, %s3885_s23 }
 0x63c   :  { %v766_v1 = vpop.permute.xlu2 %765 }
 0x63d   :  { %v769_v40 = vadd.f32 %v766_v1, %v4309_v8  ;;  %v768_v6 = vmul.f32 %v766_v1, %v4309_v8 }
 0x63f   :  { %3416 = vrcp.f32 %v769_v40 }
 0x640   :  { %3418 = vrcp.f32 %v776_v60 }
 0x645   :  { %v3417_v43 = vpop.eup %3416 }
 0x646   :  { %v771_v57 = vmul.f32 %v3417_v43, %v768_v6  ;;  %v3419_v11 = vpop.eup %3418 }
 0x647   :  { %v778_v7 = vmul.f32 %v3419_v11, %v775_v4 }
 0x648   :  { %v4336_v58 = vadd.f32 %v782_v56, %v771_v57 }
 0x64a   :  { %787 = vrot.lane.b32.xlu2 %v4336_v58, %s3885_s23 }
 0x650   :  { %v751_v61 = vpop.permute.xlu0 %750 }
 0x651   :  { %v753_v63 = vmul.f32 %v751_v61, %v4309_v8 }
 0x656   :  { %v760_v2 = vpop.permute.xlu1 %759 }
 0x657   :  { %v762_v3 = vadd.f32 %v760_v2, %v753_v63 }
 0x659   :  { %v763_v44 = vmul.f32 %v4321_v20, %v762_v3 }
 0x65b   :  { %v4347_v9 = vadd.f32 %v778_v7, %v763_v44 }
 0x65d   :  { %906 = vrot.lane.b32.xlu1 %v4347_v9, %s3885_s23  ;;  %v785_v10 = vmul.f32 %v4347_v9, %v4347_v9 }
 0x65f   :  { %791 = vrot.lane.b32.xlu0 %v785_v10, %s3886_s9 }
 0x6a4   :  { %v788_v8 = vpop.permute.xlu2 %787 }
 0x6a5   :  { %v794_v20 = vsel %vm115_vm0, %v4347_v9, %v788_v8  ;;  %v911_v16 = vsel %vm115_vm0, %v910_v53, %v788_v8 }
 0x6cf   :  { %v907_v12 = vpop.permute.xlu1 %906 }
 0x6d0   :  { %v909_v14 = vsel %vm115_vm0, %v3272_v38, %v907_v12 }
 0x6d1   :  { %3273 = vmatmul.msk.f32.vlgmr.msrb.gmra.mxu1 %vm128_vm1, %v909_v14  ;;  %v792_v18 = vpop.permute.xlu0 %791 }
 0x6d2   :  { %v795_v31 = vsel %vm128_vm1, %v794_v20, %v792_v18  ;;  %v912_v36 = vsel %vm128_vm1, %v911_v16, %v792_v18  ;;  %1700 = vmatpush.msrb.mxu1 %v4364_v13 }
 0x6d3   :  { %3269 = vmatmul.msk.f32.vlgmr.msrb.gmra.mxu3 %vm155_vm2, %v795_v31  ;;  %3274 = vmatmul.msk.f32.vlgmr.msrb.gmra.mxu2 %vm155_vm2, %v912_v36 }
 0x6d4   :  { %1701 = vmatpush.msrb.mxu1 %v4369_v15  ;;  %1967 = vmatpush.msrb.mxu3 %v4136_v0  ;;  %v4389_v0 = vld [vmem:[#allocation5 + $0x20] sm:$0xff] }
 0x6d5   :  { %2108 = vmatpush.msrb.mxu2 %v4376_v17 }
 0x6d6   :  { %1702 = vmatpush.msrb.mxu1 %v4379_v19  ;;  %1968 = vmatpush.msrb.mxu3 %v4141_v39  ;;  %v4399_v39 = vld [vmem:[#allocation5 + $0x18] sm:$0xff] }
 0x6d7   :  { %2109 = vmatpush.msrb.mxu2 %v4386_v21 }
 0x6d8   :  { %1703 = vmatpush.msrb.mxu1 %v4389_v0  ;;  %1969 = vmatpush.msrb.mxu3 %v4148_v45  ;;  %v4409_v45 = vld [vmem:[#allocation5 + $0x10] sm:$0xff] }
 0x6d9   :  { %2110 = vmatpush.msrb.mxu2 %v4396_v23 }
 0x6da   :  { %1704 = vmatpush.msrb.mxu1 %v4399_v39  ;;  %1970 = vmatpush.msrb.mxu3 %v4156_v46  ;;  %v4419_v46 = vld [vmem:[#allocation5 + $0x8] sm:$0xff] }
 0x6db   :  { %2111 = vmatpush.msrb.mxu2 %v4406_v33 }
 0x6dc   :  { %1705 = vmatpush.msrb.mxu1 %v4409_v45  ;;  %1971 = vmatpush.msrb.mxu3 %v4164_v47  ;;  %v4429_v47 = vld [vmem:[#allocation5] sm:$0xff] }
 0x6dd   :  { %2112 = vmatpush.msrb.mxu2 %v4416_v24 }
 0x6de   :  { %1706 = vmatpush.msrb.mxu1 %v4419_v46  ;;  %1972 = vmatpush.msrb.mxu3 %v4172_v48  ;;  %v4443_v48 = vld [vmem:[%s5499_s4 + $0x20] sm:$0xff] }
 0x6df   :  { %2113 = vmatpush.msrb.mxu2 %v4426_v25 }
 0x6e0   :  { %1707 = vmatpush.msrb.mxu1 %v4429_v47  ;;  %1973 = vmatpush.msrb.mxu3 %v4180_v49  ;;  %v4450_v49 = vld [vmem:[%s5499_s4 + $0x18] sm:$0xff] }
 0x6e1   :  { %2114 = vmatpush.msrb.mxu2 %v4436_v26 }
 0x6e2   :  { %1974 = vmatpush.msrb.mxu3 %v4188_v50  ;;  %v4457_v50 = vld [vmem:[%s5499_s4 + $0x10] sm:$0xff] }
 0x6e3   :  { %2115 = vmatpush.msrb.mxu2 %v4443_v48 }
 0x6e4   :  { %1975 = vmatpush.msrb.mxu3 %v4200_v51  ;;  %v4464_v51 = vld [vmem:[%s5499_s4 + $0x8] sm:$0xff] }
 0x6e5   :  { %2116 = vmatpush.msrb.mxu2 %v4450_v49 }
 0x6e6   :  { %1976 = vmatpush.msrb.mxu3 %v4207_v52  ;;  %v4471_v52 = vld [vmem:[%s5499_s4] sm:$0xff] }
 0x6e7   :  { %2117 = vmatpush.msrb.mxu2 %v4457_v50 }
 0x6e8   :  { %1977 = vmatpush.msrb.mxu3 %v4212_v54  ;;  %v4476_v54 = vld [vmem:[#allocation7] ss:$0 sm:$0xff] }
 0x6e9   :  { %2118 = vmatpush.msrb.mxu2 %v4464_v51 }
 0x6ea   :  { %1978 = vmatpush.msrb.mxu3 %v4223_v55  ;;  %v4483_v55 = vld [vmem:[#allocation7 + $0x1] ss:$0 sm:$0xff] }
 0x6eb   :  { %2119 = vmatpush.msrb.mxu2 %v4471_v52 }
 0x74e   :  { %v933_v28 = vpop.f32.mrf.mxu1 }
 0x74f   :  { %v4479_v29 = vadd.f32 %v4476_v54, %v933_v28 }
 0x751   :  { %1030 = vrot.lane.b32.xlu1 %v4479_v29, %s3887_s25  ;;  %v993_v16 = vadd.f32 -0.8813736, %v4479_v29 }
 0x753   :  { %v994_v31 = vmul.f32 1.1715729, %v993_v16 }
 0x756   :  { %v957_v22 = vpop.f32.mrf.mxu2 }
 0x757   :  { %v4486_v30 = vadd.f32 %v4483_v55, %v957_v22 }
 0x759   :  { %v961_v32 = vmul.f32 0.3926991, %v4486_v30  ;;  %1048 = vrot.lane.b32.xlu0 %v4486_v30, %s3887_s25  ;;  %v995_v43 = vmul.f32 0.5390121, %v4486_v30 }
 0x75b   :  { %v962_v34 = vadd.f32 1.0, %v961_v32  ;;  %v996_v59 = vadd.f32 1.0, %v995_v43 }
 0x75d   :  { %3420 = vrsqrt.f32 %v962_v34  ;;  %vm969_vm8 = vweird.f32 %v962_v34  ;;  %vm1003_vm15 = vweird.f32 %v996_v59 }
 0x763   :  { %v3421_v35 = vpop.eup %3420 }
 0x764   :  { %v964_v37 = vmul.f32 %v3421_v35, %v962_v34  ;;  %vm970_vm7 = vweird.f32 %v3421_v35 }
 0x765   :  { %vm971_vm9 = vmor %vm969_vm8, %vm970_vm7 }
 0x766   :  { %v965_v1 = vmul.f32 %v3421_v35, %v964_v37 }
 0x768   :  { %v966_v40 = vmul.f32 0.5, %v965_v1 }
 0x76a   :  { %v967_v41 = vsub.f32 1.5, %v966_v40 }
 0x76c   :  { %v968_v42 = vmul.f32 %v3421_v35, %v967_v41 }
 0x76e   :  { %v972_v6 = vsel %vm971_vm9, %v3421_v35, %v968_v42 }
 0x76f   :  { %v973_v56 = vmul.f32 %v972_v6, %v4479_v29 }
 0x771   :  { %v3275_v57 = vmul.f32 -1.442695, %v973_v56 }
 0x773   :  { %3422 = vpow2.f32 %v3275_v57 }
 0x774   :  { %3424 = vrsqrt.f32 %v996_v59 }
 0x779   :  { %v3423_v60 = vpop.eup %3422 }
 0x77a   :  { %v977_v61 = vadd.f32 1.0, %v3423_v60  ;;  %v3425_v62 = vpop.eup %3424 }
 0x77b   :  { %v998_v63 = vmul.f32 %v3425_v62, %v996_v59  ;;  %vm1004_vm14 = vweird.f32 %v3425_v62 }
 0x77c   :  { %3426 = vrcp.f32 %v977_v61  ;;  %v989_v3 = vand.u32 2147483648, %v977_v61  ;;  %v987_v10 = vand.u32 2147483647, %v977_v61  ;;  %vm983_vm11 = vweird.f32 %v977_v61  ;;  %vm1005_vm3 = vmor %vm1003_vm15, %vm1004_vm14 }
 0x77d   :  { %v999_v11 = vmul.f32 %v3425_v62, %v998_v63 }
 0x77e   :  { %v990_v53 = vor.u32 1.1754944e-38, %v989_v3  ;;  %vm988_vm13 = vcmp.eq.f32.partialorder %v987_v10, 8.507059e+37 }
 0x77f   :  { %v1000_v7 = vmul.f32 0.5, %v999_v11 }
 0x781   :  { %v1001_v8 = vsub.f32 1.5, %v1000_v7 }
 0x782   :  { %v3427_v5 = vpop.eup %3426 }
 0x783   :  { %v979_v2 = vmul.f32 %v3427_v5, %v977_v61  ;;  %vm984_vm10 = vweird.f32 %v3427_v5  ;;  %v1002_v20 = vmul.f32 %v3425_v62, %v1001_v8 }
 0x784   :  { %vm985_vm12 = vmor %vm983_vm11, %vm984_vm10 }
 0x785   :  { %v980_v4 = vsub.f32 1.0, %v979_v2  ;;  %v1006_v18 = vsel %vm1005_vm3, %v3425_v62, %v1002_v20 }
 0x786   :  { %v1007_v36 = vmul.f32 %v1006_v18, %v994_v31 }
 0x787   :  { %v981_v44 = vmul.f32 %v3427_v5, %v980_v4 }
 0x788   :  { %v3276_v28 = vmul.f32 -1.442695, %v1007_v36 }
 0x789   :  { %v982_v38 = vadd.f32 %v3427_v5, %v981_v44 }
 0x78a   :  { %3428 = vpow2.f32 %v3276_v28 }
 0x78b   :  { %v986_v12 = vsel %vm985_vm12, %v3427_v5, %v982_v38 }
 0x78c   :  { %v4493_v14 = vsel %vm988_vm13, %v990_v53, %v986_v12 }
 0x78d   :  { %1035 = vrot.lane.b32.xlu2 %v4493_v14, %s3885_s23  ;;  %v1027_v43 = vmul.f32 %v4493_v14, %v4493_v14 }
 0x790   :  { %v3429_v22 = vpop.eup %3428 }
 0x791   :  { %v1011_v32 = vadd.f32 1.0, %v3429_v22 }
 0x793   :  { %3430 = vrcp.f32 %v1011_v32  ;;  %v1023_v41 = vand.u32 2147483648, %v1011_v32  ;;  %vm1017_vm5 = vweird.f32 %v1011_v32  ;;  %v1021_v42 = vand.u32 2147483647, %v1011_v32 }
 0x795   :  { %v1024_v56 = vor.u32 1.1754944e-38, %v1023_v41  ;;  %vm1022_vm7 = vcmp.eq.f32.partialorder %v1021_v42, 8.507059e+37 }
 0x799   :  { %v3431_v34 = vpop.eup %3430 }
 0x79a   :  { %v1013_v35 = vmul.f32 %v3431_v34, %v1011_v32  ;;  %vm1018_vm4 = vweird.f32 %v3431_v34 }
 0x79b   :  { %vm1019_vm6 = vmor %vm1017_vm5, %vm1018_vm4 }
 0x79c   :  { %v1014_v37 = vsub.f32 1.0, %v1013_v35 }
 0x79e   :  { %v1015_v1 = vmul.f32 %v3431_v34, %v1014_v37 }
 0x7a0   :  { %v1016_v40 = vadd.f32 %v3431_v34, %v1015_v1 }
 0x7a2   :  { %v1020_v6 = vsel %vm1019_vm6, %v3431_v34, %v1016_v40 }
 0x7a3   :  { %v1025_v57 = vsel %vm1022_vm7, %v1024_v56, %v1020_v6 }
 0x7a4   :  { %v4500_v59 = vsub.f32 %v1025_v57, %v1027_v43 }
 0x7a6   :  { %v1044_v4 = vadd.f32 %v4500_v59, %v4493_v14 }
 0x7c3   :  { %v1031_v3 = vpop.permute.xlu1 %1030 }
 0x7c4   :  { %v1033_v7 = vmul.f32 %v1031_v3, %v4500_v59 }
 0x7cb   :  { %v1049_v60 = vpop.permute.xlu0 %1048 }
 0x7cc   :  { %v1052_v61 = vadd.f32 %v1049_v60, %v4500_v59  ;;  %v1051_v62 = vmul.f32 %v1049_v60, %v4500_v59 }
 0x7ce   :  { %3432 = vrcp.f32 %v1052_v61 }
 0x7cf   :  { %3434 = vrcp.f32 %v1044_v4 }
 0x7d4   :  { %v3433_v63 = vpop.eup %3432 }
 0x7d5   :  { %v1054_v5 = vmul.f32 %v3433_v63, %v1051_v62  ;;  %v4512_v38 = vpop.eup %3434 }
 0x7d7   :  { %1061 = vrot.lane.b32.xlu0 %v1054_v5, %s3886_s9 }
 0x7e7   :  { %v1036_v11 = vpop.permute.xlu2 %1035 }
 0x7e8   :  { %v1038_v2 = vmul.f32 %v1036_v11, %v4486_v30 }
 0x7ea   :  { %1040 = vrot.lane.b32.xlu2 %v1038_v2, %s3887_s25 }
 0x7f2   :  { %1142 = vrot.lane.b32.xlu2 %v4493_v14, %s3887_s25 }
 0x844   :  { %v1041_v44 = vpop.permute.xlu2 %1040 }
 0x845   :  { %v1043_v10 = vadd.f32 %v1041_v44, %v1033_v7 }
 0x847   :  { %v1046_v53 = vmul.f32 %v4512_v38, %v1043_v10 }
 0x849   :  { %1056 = vrot.lane.b32.xlu1 %v1046_v53, %s3886_s9  ;;  %v1062_v8 = vpop.permute.xlu0 %1061 }
 0x84a   :  { %v1064_v12 = vadd.f32 %v1062_v8, %v4486_v30 }
 0x84c   :  { %v1066_v20 = vmul.f32 1.5707964, %v1064_v12  ;;  %v1100_v18 = vmul.f32 2.1560483, %v1064_v12 }
 0x84e   :  { %v1067_v16 = vadd.f32 1.0, %v1066_v20  ;;  %v1101_v31 = vadd.f32 1.0, %v1100_v18 }
 0x850   :  { %3436 = vrsqrt.f32 %v1067_v16  ;;  %vm1074_vm9 = vweird.f32 %v1067_v16  ;;  %vm1108_vm12 = vweird.f32 %v1101_v31 }
 0x851   :  { %3438 = vrsqrt.f32 %v1101_v31 }
 0x856   :  { %v3437_v36 = vpop.eup %3436 }
 0x857   :  { %v1069_v28 = vmul.f32 %v3437_v36, %v1067_v16  ;;  %v3439_v22 = vpop.eup %3438  ;;  %vm1075_vm8 = vweird.f32 %v3437_v36 }
 0x858   :  { %v1103_v34 = vmul.f32 %v3439_v22, %v1101_v31  ;;  %vm1076_vm10 = vmor %vm1074_vm9, %vm1075_vm8  ;;  %vm1109_vm11 = vweird.f32 %v3439_v22 }
 0x859   :  { %v1070_v32 = vmul.f32 %v3437_v36, %v1069_v28  ;;  %vm1110_vm13 = vmor %vm1108_vm12, %vm1109_vm11 }
 0x85a   :  { %v1104_v37 = vmul.f32 %v3439_v22, %v1103_v34 }
 0x85b   :  { %v1071_v35 = vmul.f32 0.5, %v1070_v32 }
 0x85c   :  { %v1105_v1 = vmul.f32 0.5, %v1104_v37 }
 0x85d   :  { %v1072_v40 = vsub.f32 1.5, %v1071_v35 }
 0x85e   :  { %v1106_v41 = vsub.f32 1.5, %v1105_v1 }
 0x85f   :  { %v1073_v42 = vmul.f32 %v3437_v36, %v1072_v40 }
 0x860   :  { %v1107_v57 = vmul.f32 %v3439_v22, %v1106_v41 }
 0x861   :  { %v1077_v56 = vsel %vm1076_vm10, %v3437_v36, %v1073_v42 }
 0x862   :  { %v1111_v5 = vsel %vm1110_vm13, %v3439_v22, %v1107_v57 }
 0x8bb   :  { %v1057_v6 = vpop.permute.xlu1 %1056 }
 0x8bc   :  { %v1059_v30 = vadd.f32 %v1057_v6, %v4479_v29 }
 0x8be   :  { %v1065_v43 = vmul.f32 2.0, %v1059_v30 }
 0x8c0   :  { %v1078_v60 = vmul.f32 %v1077_v56, %v1065_v43  ;;  %v1098_v61 = vadd.f32 -0.8813736, %v1065_v43 }
 0x8c2   :  { %v3277_v62 = vmul.f32 -1.442695, %v1078_v60  ;;  %v1099_v63 = vmul.f32 1.1715729, %v1098_v61  ;;  %v1143_v60 = vpop.permute.xlu2 %1142 }
 0x8c4   :  { %3440 = vpow2.f32 %v3277_v62  ;;  %v1112_v11 = vmul.f32 %v1111_v5, %v1099_v63  ;;  %v1160_v62 = vsub.f32 1.0, %v4493_v14  ;;  %v1161_v5 = vmul.f32 %v4500_v59, %v4347_v9 }
 0x8c6   :  { %v3278_v2 = vmul.f32 -1.442695, %v1112_v11  ;;  %v1164_v63 = vadd.f32 %v1160_v62, %v4500_v59 }
 0x8c8   :  { %3442 = vpow2.f32 %v3278_v2  ;;  %v1162_v2 = vmul.f32 %v1160_v62, %v4336_v58 }
 0x8ca   :  { %v3441_v4 = vpop.eup %3440 }
 0x8cb   :  { %v1082_v3 = vadd.f32 1.0, %v3441_v4 }
 0x8cd   :  { %3444 = vrcp.f32 %v1082_v3  ;;  %v1092_v12 = vand.u32 2147483647, %v1082_v3  ;;  %v1094_v20 = vand.u32 2147483648, %v1082_v3  ;;  %vm1088_vm15 = vweird.f32 %v1082_v3 }
 0x8ce   :  { %v3443_v29 = vpop.eup %3442 }
 0x8cf   :  { %v1116_v7 = vadd.f32 1.0, %v3443_v29  ;;  %vm1093_vm4 = vcmp.eq.f32.partialorder %v1092_v12, 8.507059e+37  ;;  %v1095_v28 = vor.u32 1.1754944e-38, %v1094_v20 }
 0x8d1   :  { %3446 = vrcp.f32 %v1116_v7  ;;  %v1128_v22 = vand.u32 2147483648, %v1116_v7  ;;  %v1126_v35 = vand.u32 2147483647, %v1116_v7  ;;  %vm1122_vm6 = vweird.f32 %v1116_v7 }
 0x8d2   :  { %3448 = vrcp.f32 %v1164_v63 }
 0x8d3   :  { %v3445_v44 = vpop.eup %3444  ;;  %v1129_v41 = vor.u32 1.1754944e-38, %v1128_v22  ;;  %vm1127_vm8 = vcmp.eq.f32.partialorder %v1126_v35, 8.507059e+37 }
 0x8d4   :  { %v1084_v10 = vmul.f32 %v3445_v44, %v1082_v3  ;;  %vm1089_vm14 = vweird.f32 %v3445_v44  ;;  %v1168_v3 = vadd.f32 %v4500_v59, %v4336_v58 }
 0x8d5   :  { %vm1090_vm3 = vmor %vm1088_vm15, %vm1089_vm14 }
 0x8d6   :  { %v1085_v53 = vsub.f32 1.0, %v1084_v10  ;;  %3450 = vrcp.f32 %v1168_v3 }
 0x8d7   :  { %v3447_v8 = vpop.eup %3446 }
 0x8d8   :  { %v1086_v16 = vmul.f32 %v3445_v44, %v1085_v53  ;;  %v1118_v18 = vmul.f32 %v3447_v8, %v1116_v7  ;;  %vm1123_vm5 = vweird.f32 %v3447_v8  ;;  %v3449_v29 = vpop.eup %3448 }
 0x8d9   :  { %vm1124_vm7 = vmor %vm1122_vm6, %vm1123_vm5 }
 0x8da   :  { %v1087_v31 = vadd.f32 %v3445_v44, %v1086_v16  ;;  %v1119_v36 = vsub.f32 1.0, %v1118_v18  ;;  %v1167_v18 = vmul.f32 %v4500_v59, %v4336_v58 }
 0x8dc   :  { %v1091_v32 = vsel %vm1090_vm3, %v3445_v44, %v1087_v31  ;;  %v1120_v34 = vmul.f32 %v3447_v8, %v1119_v36  ;;  %v1163_v44 = vadd.f32 %v1162_v2, %v1161_v5  ;;  %v3451_v16 = vpop.eup %3450 }
 0x8dd   :  { %v1096_v37 = vsel %vm1093_vm4, %v1095_v28, %v1091_v32  ;;  %v1170_v36 = vmul.f32 %v3451_v16, %v1167_v18  ;;  %v3283_v32 = vld [vmem:[%s5495_s0 + $0x6] sm:$0x3] }
 0x8de   :  { %v1134_v1 = vmul.f32 2.0, %v1096_v37  ;;  %v1121_v40 = vadd.f32 %v3447_v8, %v1120_v34  ;;  %v1132_v30 = vmul.f32 %v1096_v37, %v1096_v37  ;;  %v1166_v14 = vmul.f32 %v3449_v29, %v1163_v44 }
 0x8df   :  { %v1298_v58 = vmul.f32 %v3283_v32, %v3283_v32 }
 0x8e0   :  { %v3279_v42 = vadd.f32 -1.0, %v1134_v1  ;;  %v1125_v6 = vsel %vm1124_vm7, %v3447_v8, %v1121_v40 }
 0x8e1   :  { %v1130_v43 = vsel %vm1127_vm8, %v1129_v41, %v1125_v6  ;;  %v4568_v6 = vld [vmem:[%s5501_s6 + $0x58] sm:$0xff] }
 0x8e2   :  { %1138 = vrot.lane.b32.xlu1 %v3279_v42, %s3885_s23  ;;  %v1133_v56 = vsub.f32 %v1130_v43, %v1132_v30  ;;  %v4575_v30 = vld [vmem:[%s5501_s6 + $0x50] sm:$0xff]  ;;  %v4582_v43 = vld [vmem:[%s5501_s6 + $0x48] sm:$0xff] }
 0x8e4   :  { %v1136_v57 = vmul.f32 4.0, %v1133_v56 }
 0x8e6   :  { %1153 = vrot.lane.b32.xlu0 %v1136_v57, %s3885_s23  ;;  %v1145_v61 = vmul.f32 %v1143_v60, %v1136_v57  ;;  %v4654_v57 = vpop.f32.mrf.mxu3 }
 0x8e8   :  { %1147 = vrot.lane.b32.xlu2 %v1145_v61, %s3885_s23 }
 0x942   :  { %v1148_v7 = vpop.permute.xlu2 %1147 }
 0x954   :  { %v1139_v11 = vpop.permute.xlu1 %1138 }
 0x955   :  { %v1141_v4 = vmul.f32 %v1139_v11, %v4500_v59 }
 0x957   :  { %v1150_v10 = vadd.f32 %v1148_v7, %v1141_v4 }
 0x958   :  { %v1154_v53 = vpop.permute.xlu0 %1153 }
 0x959   :  { %v1151_v8 = vmul.f32 %v4512_v38, %v1150_v10  ;;  %v1157_v12 = vadd.f32 %v1154_v53, %v4500_v59  ;;  %v1156_v38 = vmul.f32 %v1154_v53, %v4500_v59 }
 0x95b   :  { %v4531_v9 = vadd.f32 %v1166_v14, %v1151_v8  ;;  %3452 = vrcp.f32 %v1157_v12 }
 0x95d   :  { %1294 = vrot.lane.b32.xlu2 %v4531_v9, %s3885_s23  ;;  %v1173_v20 = vmul.f32 %v4531_v9, %v4531_v9 }
 0x95f   :  { %1179 = vrot.lane.b32.xlu1 %v1173_v20, %s3886_s9 }
 0x961   :  { %v3453_v31 = vpop.eup %3452 }
 0x962   :  { %v1159_v28 = vmul.f32 %v3453_v31, %v1156_v38 }
 0x964   :  { %v4541_v22 = vadd.f32 %v1170_v36, %v1159_v28 }
 0x966   :  { %1175 = vrot.lane.b32.xlu0 %v4541_v22, %s3885_s23 }
 0x9b7   :  { %v1295_v34 = vpop.permute.xlu2 %1294 }
 0x9b8   :  { %v1297_v35 = vsel %vm115_vm0, %v3283_v32, %v1295_v34 }
 0x9b9   :  { %3284 = vmatmul.msk.f32.vlgmr.msra.gmra.mxu1 %vm128_vm1, %v1297_v35 }
 0x9ba   :  { %2088 = vmatpush.msra.mxu1 %v4364_v13 }
 0x9bc   :  { %2089 = vmatpush.msra.mxu1 %v4369_v15 }
 0x9be   :  { %2090 = vmatpush.msra.mxu1 %v4379_v19 }
 0x9c0   :  { %2091 = vmatpush.msra.mxu1 %v4389_v0 }
 0x9c2   :  { %2092 = vmatpush.msra.mxu1 %v4399_v39 }
 0x9c4   :  { %2093 = vmatpush.msra.mxu1 %v4409_v45 }
 0x9c6   :  { %2094 = vmatpush.msra.mxu1 %v4419_v46 }
 0x9c8   :  { %2095 = vmatpush.msra.mxu1 %v4429_v47 }
 0x9d1   :  { %v1180_v37 = vpop.permute.xlu1 %1179 }
 0x9d8   :  { %v1176_v59 = vpop.permute.xlu0 %1175 }
 0x9d9   :  { %v1182_v1 = vsel %vm115_vm0, %v4531_v9, %v1176_v59  ;;  %v1299_v40 = vsel %vm115_vm0, %v1298_v58, %v1176_v59 }
 0x9da   :  { %v1183_v41 = vsel %vm128_vm1, %v1182_v1, %v1180_v37  ;;  %v1300_v42 = vsel %vm128_vm1, %v1299_v40, %v1180_v37 }
 0x9db   :  { %3280 = vmatmul.msk.f32.vlgmr.msra.gmra.mxu0 %vm155_vm2, %v1183_v41  ;;  %3285 = vmatmul.msk.f32.vlgmr.msra.gmra.mxu3 %vm155_vm2, %v1300_v42 }
 0x9dc   :  { %2355 = vmatpush.msra.mxu0 %v4568_v6  ;;  %2496 = vmatpush.msra.mxu3 %v4376_v17  ;;  %v4589_v17 = vld [vmem:[%s5501_s6 + $0x40] sm:$0xff] }
 0x9de   :  { %2356 = vmatpush.msra.mxu0 %v4575_v30  ;;  %2497 = vmatpush.msra.mxu3 %v4386_v21  ;;  %v4596_v21 = vld [vmem:[%s5501_s6 + $0x38] sm:$0xff] }
 0x9e0   :  { %2357 = vmatpush.msra.mxu0 %v4582_v43  ;;  %2498 = vmatpush.msra.mxu3 %v4396_v23  ;;  %v4603_v23 = vld [vmem:[%s5501_s6 + $0x30] sm:$0xff] }
 0x9e2   :  { %2358 = vmatpush.msra.mxu0 %v4589_v17  ;;  %2499 = vmatpush.msra.mxu3 %v4406_v33  ;;  %v4610_v33 = vld [vmem:[%s5501_s6 + $0x28] sm:$0xff] }
 0x9e4   :  { %2359 = vmatpush.msra.mxu0 %v4596_v21  ;;  %2500 = vmatpush.msra.mxu3 %v4416_v24  ;;  %v4617_v24 = vld [vmem:[%s5501_s6 + $0x20] sm:$0xff] }
 0x9e6   :  { %2360 = vmatpush.msra.mxu0 %v4603_v23  ;;  %2501 = vmatpush.msra.mxu3 %v4426_v25  ;;  %v4624_v25 = vld [vmem:[%s5501_s6 + $0x18] sm:$0xff] }
 0x9e8   :  { %2361 = vmatpush.msra.mxu0 %v4610_v33  ;;  %2502 = vmatpush.msra.mxu3 %v4436_v26  ;;  %v4631_v26 = vld [vmem:[%s5501_s6 + $0x10] sm:$0xff] }
 0x9ea   :  { %2362 = vmatpush.msra.mxu0 %v4617_v24  ;;  %2503 = vmatpush.msra.mxu3 %v4443_v48  ;;  %v4638_v48 = vld [vmem:[%s5501_s6 + $0x8] sm:$0xff] }
 0x9ec   :  { %2363 = vmatpush.msra.mxu0 %v4624_v25  ;;  %2504 = vmatpush.msra.mxu3 %v4450_v49  ;;  %v4645_v49 = vld [vmem:[%s5501_s6] sm:$0xff] }
 0x9ee   :  { %2364 = vmatpush.msra.mxu0 %v4631_v26  ;;  %2505 = vmatpush.msra.mxu3 %v4457_v50 }
 0x9f0   :  { %2365 = vmatpush.msra.mxu0 %v4638_v48  ;;  %2506 = vmatpush.msra.mxu3 %v4464_v51 }
 0x9f2   :  { %2366 = vmatpush.msra.mxu0 %v4645_v49  ;;  %2507 = vmatpush.msra.mxu3 %v4471_v52 }
 0xa36   :  { %v1321_v56 = vpop.f32.mrf.mxu1 }
 0xa37   :  { %v4650_v50 = vadd.f32 %v4476_v54, %v1321_v56 }
 0xa39   :  { %1418 = vrot.lane.b32.xlu2 %v4650_v50, %s3887_s25  ;;  %v1381_v37 = vadd.f32 -0.8813736, %v4650_v50 }
 0xa3b   :  { %v1382_v40 = vmul.f32 1.1715729, %v1381_v37 }
 0xa5e   :  { %v1345_v60 = vpop.f32.mrf.mxu3 }
 0xa5f   :  { %v4657_v51 = vadd.f32 %v4483_v55, %v1345_v60 }
 0xa61   :  { %v1349_v61 = vmul.f32 0.3926991, %v4657_v51  ;;  %1436 = vrot.lane.b32.xlu1 %v4657_v51, %s3887_s25  ;;  %v1383_v3 = vmul.f32 0.5390121, %v4657_v51 }
 0xa63   :  { %v1350_v62 = vadd.f32 1.0, %v1349_v61  ;;  %v1384_v7 = vadd.f32 1.0, %v1383_v3 }
 0xa65   :  { %3454 = vrsqrt.f32 %v1350_v62  ;;  %vm1357_vm10 = vweird.f32 %v1350_v62  ;;  %vm1391_vm4 = vweird.f32 %v1384_v7 }
 0xa6b   :  { %v3455_v52 = vpop.eup %3454 }
 0xa6c   :  { %v1352_v63 = vmul.f32 %v3455_v52, %v1350_v62  ;;  %vm1358_vm9 = vweird.f32 %v3455_v52 }
 0xa6d   :  { %vm1359_vm11 = vmor %vm1357_vm10, %vm1358_vm9 }
 0xa6e   :  { %v1353_v54 = vmul.f32 %v3455_v52, %v1352_v63 }
 0xa70   :  { %v1354_v5 = vmul.f32 0.5, %v1353_v54 }
 0xa72   :  { %v1355_v11 = vsub.f32 1.5, %v1354_v5 }
 0xa74   :  { %v1356_v2 = vmul.f32 %v3455_v52, %v1355_v11 }
 0xa76   :  { %v1360_v4 = vsel %vm1359_vm11, %v3455_v52, %v1356_v2 }
 0xa77   :  { %v1361_v55 = vmul.f32 %v1360_v4, %v4650_v50 }
 0xa79   :  { %v3286_v29 = vmul.f32 -1.442695, %v1361_v55 }
 0xa7b   :  { %3456 = vpow2.f32 %v3286_v29 }
 0xa7c   :  { %3458 = vrsqrt.f32 %v1384_v7 }
 0xa81   :  { %v3457_v44 = vpop.eup %3456 }
 0xa82   :  { %v1365_v10 = vadd.f32 1.0, %v3457_v44  ;;  %v3459_v53 = vpop.eup %3458 }
 0xa83   :  { %v1386_v14 = vmul.f32 %v3459_v53, %v1384_v7  ;;  %vm1392_vm3 = vweird.f32 %v3459_v53 }
 0xa84   :  { %3460 = vrcp.f32 %v1365_v10  ;;  %v1377_v18 = vand.u32 2147483648, %v1365_v10  ;;  %v1375_v31 = vand.u32 2147483647, %v1365_v10  ;;  %vm1371_vm13 = vweird.f32 %v1365_v10  ;;  %vm1393_vm5 = vmor %vm1391_vm4, %vm1392_vm3 }
 0xa85   :  { %v1387_v16 = vmul.f32 %v3459_v53, %v1386_v14 }
 0xa86   :  { %v1378_v32 = vor.u32 1.1754944e-38, %v1377_v18  ;;  %vm1376_vm15 = vcmp.eq.f32.partialorder %v1375_v31, 8.507059e+37 }
 0xa87   :  { %v1388_v28 = vmul.f32 0.5, %v1387_v16 }
 0xa89   :  { %v1389_v58 = vsub.f32 1.5, %v1388_v28 }
 0xa8a   :  { %v3461_v8 = vpop.eup %3460 }
 0xa8b   :  { %v1367_v12 = vmul.f32 %v3461_v8, %v1365_v10  ;;  %vm1372_vm12 = vweird.f32 %v3461_v8  ;;  %v1390_v59 = vmul.f32 %v3459_v53, %v1389_v58 }
 0xa8c   :  { %vm1373_vm14 = vmor %vm1371_vm13, %vm1372_vm12 }
 0xa8d   :  { %v1368_v20 = vsub.f32 1.0, %v1367_v12  ;;  %v1394_v1 = vsel %vm1393_vm5, %v3459_v53, %v1390_v59 }
 0xa8e   :  { %v1395_v41 = vmul.f32 %v1394_v1, %v1382_v40 }
 0xa8f   :  { %v1369_v38 = vmul.f32 %v3461_v8, %v1368_v20 }
 0xa90   :  { %v3287_v42 = vmul.f32 -1.442695, %v1395_v41 }
 0xa91   :  { %v1370_v36 = vadd.f32 %v3461_v8, %v1369_v38 }
 0xa92   :  { %3462 = vpow2.f32 %v3287_v42 }
 0xa93   :  { %v1374_v34 = vsel %vm1373_vm14, %v3461_v8, %v1370_v36  ;;  %v1419_v16 = vpop.permute.xlu2 %1418 }
 0xa94   :  { %v4664_v35 = vsel %vm1376_vm15, %v1378_v32, %v1374_v34 }
 0xa95   :  { %1423 = vrot.lane.b32.xlu0 %v4664_v35, %s3885_s23  ;;  %v1415_v4 = vmul.f32 %v4664_v35, %v4664_v35 }
 0xa98   :  { %v3463_v56 = vpop.eup %3462 }
 0xa99   :  { %v1399_v60 = vadd.f32 1.0, %v3463_v56 }
 0xa9b   :  { %3464 = vrcp.f32 %v1399_v60  ;;  %v1411_v5 = vand.u32 2147483648, %v1399_v60  ;;  %vm1405_vm7 = vweird.f32 %v1399_v60  ;;  %v1409_v11 = vand.u32 2147483647, %v1399_v60 }
 0xa9d   :  { %v1412_v55 = vor.u32 1.1754944e-38, %v1411_v5  ;;  %vm1410_vm9 = vcmp.eq.f32.partialorder %v1409_v11, 8.507059e+37 }
 0xaa1   :  { %v3465_v61 = vpop.eup %3464 }
 0xaa2   :  { %v1401_v62 = vmul.f32 %v3465_v61, %v1399_v60  ;;  %vm1406_vm6 = vweird.f32 %v3465_v61 }
 0xaa3   :  { %vm1407_vm8 = vmor %vm1405_vm7, %vm1406_vm6 }
 0xaa4   :  { %v1402_v52 = vsub.f32 1.0, %v1401_v62 }
 0xaa6   :  { %v1403_v63 = vmul.f32 %v3465_v61, %v1402_v52 }
 0xaa8   :  { %v1404_v54 = vadd.f32 %v3465_v61, %v1403_v63 }
 0xaaa   :  { %v1408_v2 = vsel %vm1407_vm8, %v3465_v61, %v1404_v54 }
 0xaab   :  { %v1413_v3 = vsel %vm1410_vm9, %v1412_v55, %v1408_v2 }
 0xaac   :  { %v4671_v29 = vsub.f32 %v1413_v3, %v1415_v4 }
 0xaae   :  { %v1432_v20 = vadd.f32 %v4671_v29, %v4664_v35  ;;  %v1421_v18 = vmul.f32 %v1419_v16, %v4671_v29 }
 0xad3   :  { %v1437_v7 = vpop.permute.xlu1 %1436 }
 0xad4   :  { %v1440_v44 = vadd.f32 %v1437_v7, %v4671_v29  ;;  %v1439_v10 = vmul.f32 %v1437_v7, %v4671_v29 }
 0xad6   :  { %3466 = vrcp.f32 %v1440_v44 }
 0xad7   :  { %3468 = vrcp.f32 %v1432_v20 }
 0xadc   :  { %v3467_v53 = vpop.eup %3466 }
 0xadd   :  { %v1442_v14 = vmul.f32 %v3467_v53, %v1439_v10  ;;  %v4683_v36 = vpop.eup %3468 }
 0xadf   :  { %1449 = vrot.lane.b32.xlu1 %v1442_v14, %s3886_s9 }
 0xb07   :  { %v1424_v8 = vpop.permute.xlu0 %1423 }
 0xb08   :  { %v1426_v12 = vmul.f32 %v1424_v8, %v4657_v51 }
 0xb0a   :  { %1428 = vrot.lane.b32.xlu0 %v1426_v12, %s3887_s25 }
 0xb12   :  { %1530 = vrot.lane.b32.xlu0 %v4664_v35, %s3887_s25 }
 0xb51   :  { %v1450_v32 = vpop.permute.xlu1 %1449 }
 0xb52   :  { %v1452_v34 = vadd.f32 %v1450_v32, %v4657_v51 }
 0xb54   :  { %v1454_v58 = vmul.f32 1.5707964, %v1452_v34  ;;  %v1488_v37 = vmul.f32 2.1560483, %v1452_v34 }
 0xb56   :  { %v1455_v59 = vadd.f32 1.0, %v1454_v58  ;;  %v1489_v1 = vadd.f32 1.0, %v1488_v37 }
 0xb58   :  { %3470 = vrsqrt.f32 %v1455_v59  ;;  %vm1462_vm11 = vweird.f32 %v1455_v59  ;;  %vm1496_vm14 = vweird.f32 %v1489_v1 }
 0xb59   :  { %3472 = vrsqrt.f32 %v1489_v1 }
 0xb5e   :  { %v3471_v40 = vpop.eup %3470 }
 0xb5f   :  { %v1457_v41 = vmul.f32 %v3471_v40, %v1455_v59  ;;  %v3473_v42 = vpop.eup %3472  ;;  %vm1463_vm10 = vweird.f32 %v3471_v40 }
 0xb60   :  { %v1491_v60 = vmul.f32 %v3473_v42, %v1489_v1  ;;  %vm1464_vm12 = vmor %vm1462_vm11, %vm1463_vm10  ;;  %vm1497_vm13 = vweird.f32 %v3473_v42 }
 0xb61   :  { %v1458_v56 = vmul.f32 %v3471_v40, %v1457_v41  ;;  %vm1498_vm15 = vmor %vm1496_vm14, %vm1497_vm13 }
 0xb62   :  { %v1492_v62 = vmul.f32 %v3473_v42, %v1491_v60 }
 0xb63   :  { %v1459_v61 = vmul.f32 0.5, %v1458_v56 }
 0xb64   :  { %v1493_v52 = vmul.f32 0.5, %v1492_v62 }
 0xb65   :  { %v1460_v63 = vsub.f32 1.5, %v1459_v61 }
 0xb66   :  { %v1494_v54 = vsub.f32 1.5, %v1493_v52 }
 0xb67   :  { %v1461_v5 = vmul.f32 %v3471_v40, %v1460_v63 }
 0xb68   :  { %v1495_v55 = vmul.f32 %v3473_v42, %v1494_v54 }
 0xb69   :  { %v1465_v4 = vsel %vm1464_vm12, %v3471_v40, %v1461_v5 }
 0xb6a   :  { %v1499_v53 = vsel %vm1498_vm15, %v3473_v42, %v1495_v55 }
 0xb7c   :  { %v1429_v38 = vpop.permute.xlu0 %1428 }
 0xb7d   :  { %v1431_v31 = vadd.f32 %v1429_v38, %v1421_v18 }
 0xb7f   :  { %v1434_v28 = vmul.f32 %v4683_v36, %v1431_v31 }
 0xb81   :  { %1444 = vrot.lane.b32.xlu2 %v1434_v28, %s3886_s9 }
 0xb84   :  { %v1531_v55 = vpop.permute.xlu0 %1530 }
 0xbdb   :  { %v1445_v11 = vpop.permute.xlu2 %1444 }
 0xbdc   :  { %v1447_v51 = vadd.f32 %v1445_v11, %v4650_v50 }
 0xbde   :  { %v1453_v2 = vmul.f32 2.0, %v1447_v51 }
 0xbe0   :  { %v1466_v3 = vmul.f32 %v1465_v4, %v1453_v2  ;;  %v1486_v7 = vadd.f32 -0.8813736, %v1453_v2 }
 0xbe2   :  { %v3288_v44 = vmul.f32 -1.442695, %v1466_v3  ;;  %v1487_v10 = vmul.f32 1.1715729, %v1486_v7  ;;  %v1548_v7 = vsub.f32 1.0, %v4664_v35 }
 0xbe4   :  { %3474 = vpow2.f32 %v3288_v44  ;;  %v1500_v14 = vmul.f32 %v1499_v53, %v1487_v10  ;;  %v1552_v44 = vadd.f32 %v1548_v7, %v4671_v29  ;;  %v1556_v10 = vadd.f32 %v4671_v29, %v4541_v22 }
 0xbe6   :  { %v3289_v8 = vmul.f32 -1.442695, %v1500_v14  ;;  %v1549_v14 = vmul.f32 %v4671_v29, %v4531_v9  ;;  %v1555_v9 = vmul.f32 %v4671_v29, %v4541_v22 }
 0xbe8   :  { %3476 = vpow2.f32 %v3289_v8 }
 0xbea   :  { %v3475_v12 = vpop.eup %3474 }
 0xbeb   :  { %v1470_v20 = vadd.f32 1.0, %v3475_v12 }
 0xbed   :  { %3478 = vrcp.f32 %v1470_v20  ;;  %v1480_v32 = vand.u32 2147483647, %v1470_v20  ;;  %v1482_v34 = vand.u32 2147483648, %v1470_v20  ;;  %vm1476_vm4 = vweird.f32 %v1470_v20 }
 0xbee   :  { %v3477_v50 = vpop.eup %3476 }
 0xbef   :  { %v1504_v16 = vadd.f32 1.0, %v3477_v50  ;;  %vm1481_vm6 = vcmp.eq.f32.partialorder %v1480_v32, 8.507059e+37  ;;  %v1483_v40 = vor.u32 1.1754944e-38, %v1482_v34  ;;  %v1550_v50 = vmul.f32 %v1548_v7, %v4541_v22  ;;  %v3294_v22 = vld [vmem:[%s5495_s0 + $0x8] sm:$0x3] }
 0xbf1   :  { %3480 = vrcp.f32 %v1504_v16  ;;  %v1516_v41 = vand.u32 2147483648, %v1504_v16  ;;  %v1514_v60 = vand.u32 2147483647, %v1504_v16  ;;  %vm1510_vm8 = vweird.f32 %v1504_v16 }
 0xbf2   :  { %3482 = vrcp.f32 %v1552_v44  ;;  %v4793_v44 = vld [vmem:[#allocation7 + $0x1] ss:$0 sm:$0xff] }
 0xbf3   :  { %v3479_v18 = vpop.eup %3478  ;;  %v1517_v63 = vor.u32 1.1754944e-38, %v1516_v41  ;;  %vm1515_vm10 = vcmp.eq.f32.partialorder %v1514_v60, 8.507059e+37  ;;  %3484 = vrcp.f32 %v1556_v10 }
 0xbf4   :  { %v1472_v38 = vmul.f32 %v3479_v18, %v1470_v20  ;;  %vm1477_vm3 = vweird.f32 %v3479_v18 }
 0xbf5   :  { %vm1478_vm5 = vmor %vm1476_vm4, %vm1477_vm3 }
 0xbf6   :  { %v1473_v31 = vsub.f32 1.0, %v1472_v38 }
 0xbf7   :  { %v3481_v28 = vpop.eup %3480 }
 0xbf8   :  { %v1474_v58 = vmul.f32 %v3479_v18, %v1473_v31  ;;  %v1506_v59 = vmul.f32 %v3481_v28, %v1504_v16  ;;  %vm1511_vm7 = vweird.f32 %v3481_v28  ;;  %v3483_v16 = vpop.eup %3482 }
 0xbf9   :  { %vm1512_vm9 = vmor %vm1510_vm8, %vm1511_vm7  ;;  %v3485_v32 = vpop.eup %3484 }
 0xbfa   :  { %v1475_v37 = vadd.f32 %v3479_v18, %v1474_v58  ;;  %v1507_v1 = vsub.f32 1.0, %v1506_v59 }
 0xbfc   :  { %v1479_v42 = vsel %vm1478_vm5, %v3479_v18, %v1475_v37  ;;  %v1508_v56 = vmul.f32 %v3481_v28, %v1507_v1  ;;  %v1551_v18 = vadd.f32 %v1550_v50, %v1549_v14  ;;  %v1558_v1 = vmul.f32 %v3485_v32, %v1555_v9 }
 0xbfd   :  { %v1484_v61 = vsel %vm1481_vm6, %v1483_v40, %v1479_v42  ;;  %v1686_v42 = vmul.f32 %v3294_v22, %v3294_v22 }
 0xbfe   :  { %v1522_v62 = vmul.f32 2.0, %v1484_v61  ;;  %v1509_v52 = vadd.f32 %v3481_v28, %v1508_v56  ;;  %v1520_v11 = vmul.f32 %v1484_v61, %v1484_v61  ;;  %v1554_v31 = vmul.f32 %v3483_v16, %v1551_v18 }
 0xc00   :  { %v3290_v54 = vadd.f32 -1.0, %v1522_v62  ;;  %v1513_v5 = vsel %vm1512_vm9, %v3481_v28, %v1509_v52 }
 0xc01   :  { %v1518_v51 = vsel %vm1515_vm10, %v1517_v63, %v1513_v5  ;;  %v3763_v5 = vld [vmem:[%s5499_s4 + $0x10] sm:$0xff] }
 0xc02   :  { %1526 = vrot.lane.b32.xlu2 %v3290_v54, %s3885_s23  ;;  %v1521_v2 = vsub.f32 %v1518_v51, %v1520_v11  ;;  %v3762_v54 = vld [vmem:[%s5499_s4 + $0x18] sm:$0xff]  ;;  %v3764_v11 = vld [vmem:[%s5499_s4 + $0x8] sm:$0xff]  ;;  %v3765_v51 = vld [vmem:[%s5499_s4] sm:$0xff] }
 0xc04   :  { %v1524_v4 = vmul.f32 4.0, %v1521_v2  ;;  %v4784_v2 = vpop.f32.mrf.mxu0 }
 0xc06   :  { %1541 = vrot.lane.b32.xlu1 %v1524_v4, %s3885_s23  ;;  %v1533_v3 = vmul.f32 %v1531_v55, %v1524_v4  ;;  %v4786_v55 = vld [vmem:[#allocation7] ss:$0 sm:$0xff] }
 0xc08   :  { %1535 = vrot.lane.b32.xlu0 %v1533_v3, %s3885_s23 }
 0xc5c   :  { %v1527_v53 = vpop.permute.xlu2 %1526 }
 0xc5d   :  { %v1529_v12 = vmul.f32 %v1527_v53, %v4671_v29 }
 0xc78   :  { %v1542_v8 = vpop.permute.xlu1 %1541 }
 0xc79   :  { %v1545_v20 = vadd.f32 %v1542_v8, %v4671_v29  ;;  %v1544_v58 = vmul.f32 %v1542_v8, %v4671_v29 }
 0xc7a   :  { %v1536_v35 = vpop.permute.xlu0 %1535 }
 0xc7b   :  { %3486 = vrcp.f32 %v1545_v20  ;;  %v1538_v38 = vadd.f32 %v1536_v35, %v1529_v12 }
 0xc7d   :  { %v1539_v28 = vmul.f32 %v4683_v36, %v1538_v38 }
 0xc7f   :  { %v4702_v34 = vadd.f32 %v1554_v31, %v1539_v28 }
 0xc81   :  { %v3487_v59 = vpop.eup %3486  ;;  %1682 = vrot.lane.b32.xlu0 %v4702_v34, %s3885_s23  ;;  %v1561_v37 = vmul.f32 %v4702_v34, %v4702_v34 }
 0xc82   :  { %v1547_v40 = vmul.f32 %v3487_v59, %v1544_v58 }
 0xc83   :  { %1567 = vrot.lane.b32.xlu2 %v1561_v37, %s3886_s9 }
 0xc84   :  { %v4712_v36 = vadd.f32 %v1558_v1, %v1547_v40 }
 0xc86   :  { %1563 = vrot.lane.b32.xlu1 %v4712_v36, %s3885_s23 }
 0xcdd   :  { %v1568_v60 = vpop.permute.xlu2 %1567 }
 0xcf3   :  { %v1683_v29 = vpop.permute.xlu0 %1682 }
 0xcf4   :  { %v1685_v41 = vsel %vm115_vm0, %v3294_v22, %v1683_v29 }
 0xcf5   :  { %3295 = vmatmul.msk.f32.vlgmr.msrb.gmra.mxu1 %vm128_vm1, %v1685_v41 }
 0xcf6   :  { %2476 = vmatpush.msrb.mxu1 %v4364_v13  ;;  %v3754_v13 = vld [vmem:[%s5499_s4 + $0x58] sm:$0xff] }
 0xcf8   :  { %v1564_v56 = vpop.permute.xlu1 %1563  ;;  %2477 = vmatpush.msrb.mxu1 %v4369_v15  ;;  %v3755_v15 = vld [vmem:[%s5499_s4 + $0x50] sm:$0xff] }
 0xcf9   :  { %v1570_v61 = vsel %vm115_vm0, %v4702_v34, %v1564_v56  ;;  %v1687_v62 = vsel %vm115_vm0, %v1686_v42, %v1564_v56 }
 0xcfa   :  { %v1571_v52 = vsel %vm128_vm1, %v1570_v61, %v1568_v60  ;;  %v1688_v63 = vsel %vm128_vm1, %v1687_v62, %v1568_v60  ;;  %2478 = vmatpush.msrb.mxu1 %v4379_v19  ;;  %v3756_v19 = vld [vmem:[%s5499_s4 + $0x48] sm:$0xff] }
 0xcfb   :  { %3291 = vmatmul.msk.f32.vlgmr.msra.gmra.mxu2 %vm155_vm2, %v1571_v52  ;;  %3296 = vmatmul.msk.f32.vlgmr.msrb.gmra.mxu0 %vm155_vm2, %v1688_v63 }
 0xcfc   :  { %2479 = vmatpush.msrb.mxu1 %v4389_v0  ;;  %2743 = vmatpush.msra.mxu2 %v4568_v6  ;;  %v3757_v0 = vld [vmem:[%s5499_s4 + $0x40] sm:$0xff] }
 0xcfd   :  { %2884 = vmatpush.msrb.mxu0 %v3754_v13 }
 0xcfe   :  { %2480 = vmatpush.msrb.mxu1 %v4399_v39  ;;  %2744 = vmatpush.msra.mxu2 %v4575_v30  ;;  %v3758_v39 = vld [vmem:[%s5499_s4 + $0x38] sm:$0xff] }
 0xcff   :  { %2885 = vmatpush.msrb.mxu0 %v3755_v15 }
 0xd00   :  { %2481 = vmatpush.msrb.mxu1 %v4409_v45  ;;  %2745 = vmatpush.msra.mxu2 %v4582_v43  ;;  %v3759_v45 = vld [vmem:[%s5499_s4 + $0x30] sm:$0xff] }
 0xd01   :  { %2886 = vmatpush.msrb.mxu0 %v3756_v19 }
 0xd02   :  { %2482 = vmatpush.msrb.mxu1 %v4419_v46  ;;  %2746 = vmatpush.msra.mxu2 %v4589_v17  ;;  %v3760_v46 = vld [vmem:[%s5499_s4 + $0x28] sm:$0xff] }
 0xd03   :  { %2887 = vmatpush.msrb.mxu0 %v3757_v0 }
 0xd04   :  { %2483 = vmatpush.msrb.mxu1 %v4429_v47  ;;  %2747 = vmatpush.msra.mxu2 %v4596_v21  ;;  %v3761_v47 = vld [vmem:[%s5499_s4 + $0x20] sm:$0xff] }
 0xd05   :  { %2888 = vmatpush.msrb.mxu0 %v3758_v39 }
 0xd06   :  { %2748 = vmatpush.msra.mxu2 %v4603_v23 }
 0xd07   :  { %2889 = vmatpush.msrb.mxu0 %v3759_v45 }
 0xd08   :  { %2749 = vmatpush.msra.mxu2 %v4610_v33 }
 0xd09   :  { %2890 = vmatpush.msrb.mxu0 %v3760_v46 }
 0xd0a   :  { %2750 = vmatpush.msra.mxu2 %v4617_v24 }
 0xd0b   :  { %2891 = vmatpush.msrb.mxu0 %v3761_v47 }
 0xd0c   :  { %2751 = vmatpush.msra.mxu2 %v4624_v25 }
 0xd0d   :  { %2892 = vmatpush.msrb.mxu0 %v3762_v54 }
 0xd0e   :  { %2752 = vmatpush.msra.mxu2 %v4631_v26 }
 0xd0f   :  { %2893 = vmatpush.msrb.mxu0 %v3763_v5 }
 0xd10   :  { %2753 = vmatpush.msra.mxu2 %v4638_v48 }
 0xd11   :  { %2894 = vmatpush.msrb.mxu0 %v3764_v11 }
 0xd12   :  { %2754 = vmatpush.msra.mxu2 %v4645_v49 }
 0xd13   :  { %2895 = vmatpush.msrb.mxu0 %v3765_v51 }
 0xd72   :  { %v1709_v4 = vpop.f32.mrf.mxu1 }
 0xd73   :  { %v4789_v3 = vadd.f32 %v4786_v55, %v1709_v4 }
 0xd75   :  { %1806 = vrot.lane.b32.xlu0 %v4789_v3, %s3887_s25  ;;  %v1769_v29 = vadd.f32 -0.8813736, %v4789_v3 }
 0xd77   :  { %v1770_v56 = vmul.f32 1.1715729, %v1769_v29 }
 0xd78   :  { %v1733_v7 = vpop.f32.mrf.mxu0 }
 0xd79   :  { %v4796_v10 = vadd.f32 %v4793_v44, %v1733_v7 }
 0xd7b   :  { %v1737_v53 = vmul.f32 0.3926991, %v4796_v10  ;;  %v1771_v14 = vmul.f32 0.5390121, %v4796_v10  ;;  %1824 = vrot.lane.b32.xlu2 %v4796_v10, %s3887_s25 }
 0xd7d   :  { %v1738_v8 = vadd.f32 1.0, %v1737_v53  ;;  %v1772_v12 = vadd.f32 1.0, %v1771_v14 }
 0xd7f   :  { %3488 = vrsqrt.f32 %v1738_v8  ;;  %vm1745_vm12 = vweird.f32 %v1738_v8  ;;  %vm1779_vm15 = vweird.f32 %v1772_v12 }
 0xd80   :  { %3490 = vrsqrt.f32 %v1772_v12 }
 0xd85   :  { %v3489_v20 = vpop.eup %3488 }
 0xd86   :  { %v1740_v50 = vmul.f32 %v3489_v20, %v1738_v8  ;;  %v3491_v16 = vpop.eup %3490  ;;  %vm1746_vm11 = vweird.f32 %v3489_v20 }
 0xd87   :  { %v1774_v38 = vmul.f32 %v3491_v16, %v1772_v12  ;;  %vm1747_vm13 = vmor %vm1745_vm12, %vm1746_vm11  ;;  %vm1780_vm14 = vweird.f32 %v3491_v16 }
 0xd88   :  { %v1741_v35 = vmul.f32 %v3489_v20, %v1740_v50  ;;  %vm1781_vm3 = vmor %vm1779_vm15, %vm1780_vm14 }
 0xd89   :  { %v1775_v32 = vmul.f32 %v3491_v16, %v1774_v38 }
 0xd8a   :  { %v1742_v18 = vmul.f32 0.5, %v1741_v35 }
 0xd8b   :  { %v1776_v37 = vmul.f32 0.5, %v1775_v32 }
 0xd8c   :  { %v1743_v31 = vsub.f32 1.5, %v1742_v18 }
 0xd8d   :  { %v1777_v1 = vsub.f32 1.5, %v1776_v37 }
 0xd8e   :  { %v1744_v28 = vmul.f32 %v3489_v20, %v1743_v31 }
 0xd8f   :  { %v1778_v22 = vmul.f32 %v3491_v16, %v1777_v1 }
 0xd90   :  { %v1748_v9 = vsel %vm1747_vm13, %v3489_v20, %v1744_v28 }
 0xd91   :  { %v1749_v58 = vmul.f32 %v1748_v9, %v4789_v3  ;;  %v1782_v42 = vsel %vm1781_vm3, %v3491_v16, %v1778_v22 }
 0xd92   :  { %v1783_v60 = vmul.f32 %v1782_v42, %v1770_v56 }
 0xd93   :  { %v3297_v59 = vmul.f32 -1.442695, %v1749_v58 }
 0xd94   :  { %v3298_v52 = vmul.f32 -1.442695, %v1783_v60 }
 0xd95   :  { %3492 = vpow2.f32 %v3297_v59 }
 0xd9b   :  { %v3493_v40 = vpop.eup %3492 }
 0xd9c   :  { %v1753_v41 = vadd.f32 1.0, %v3493_v40 }
 0xd9e   :  { %3494 = vrcp.f32 %v1753_v41  ;;  %v1765_v13 = vand.u32 2147483648, %v1753_v41  ;;  %v1763_v19 = vand.u32 2147483647, %v1753_v41  ;;  %vm1759_vm5 = vweird.f32 %v1753_v41 }
 0xd9f   :  { %3496 = vpow2.f32 %v3298_v52 }
 0xda0   :  { %v1766_v39 = vor.u32 1.1754944e-38, %v1765_v13  ;;  %vm1764_vm7 = vcmp.eq.f32.partialorder %v1763_v19, 8.507059e+37 }
 0xda4   :  { %v3495_v61 = vpop.eup %3494 }
 0xda5   :  { %v1755_v62 = vmul.f32 %v3495_v61, %v1753_v41  ;;  %vm1760_vm4 = vweird.f32 %v3495_v61  ;;  %v3497_v47 = vpop.eup %3496 }
 0xda6   :  { %vm1761_vm6 = vmor %vm1759_vm5, %vm1760_vm4  ;;  %v1787_v54 = vadd.f32 1.0, %v3497_v47 }
 0xda7   :  { %v1756_v63 = vsub.f32 1.0, %v1755_v62 }
 0xda8   :  { %3498 = vrcp.f32 %v1787_v54  ;;  %v1799_v53 = vand.u32 2147483648, %v1787_v54  ;;  %vm1793_vm9 = vweird.f32 %v1787_v54  ;;  %v1797_v14 = vand.u32 2147483647, %v1787_v54 }
 0xda9   :  { %v1757_v15 = vmul.f32 %v3495_v61, %v1756_v63 }
 0xdaa   :  { %v1800_v20 = vor.u32 1.1754944e-38, %v1799_v53  ;;  %vm1798_vm11 = vcmp.eq.f32.partialorder %v1797_v14, 8.507059e+37 }
 0xdab   :  { %v1758_v0 = vadd.f32 %v3495_v61, %v1757_v15 }
 0xdad   :  { %v1762_v45 = vsel %vm1761_vm6, %v3495_v61, %v1758_v0 }
 0xdae   :  { %v4804_v46 = vsel %vm1764_vm7, %v1766_v39, %v1762_v45  ;;  %v3499_v5 = vpop.eup %3498 }
 0xdaf   :  { %1811 = vrot.lane.b32.xlu1 %v4804_v46, %s3885_s23  ;;  %v1789_v11 = vmul.f32 %v3499_v5, %v1787_v54  ;;  %vm1794_vm8 = vweird.f32 %v3499_v5  ;;  %v1803_v12 = vmul.f32 %v4804_v46, %v4804_v46 }
 0xdb0   :  { %vm1795_vm10 = vmor %vm1793_vm9, %vm1794_vm8 }
 0xdb1   :  { %v1790_v51 = vsub.f32 1.0, %v1789_v11 }
 0xdb3   :  { %v1791_v4 = vmul.f32 %v3499_v5, %v1790_v51 }
 0xdb5   :  { %v1792_v7 = vadd.f32 %v3499_v5, %v1791_v4 }
 0xdb7   :  { %v1796_v8 = vsel %vm1795_vm10, %v3499_v5, %v1792_v7 }
 0xdb8   :  { %v1801_v50 = vsel %vm1798_vm11, %v1800_v20, %v1796_v8 }
 0xdb9   :  { %v4810_v16 = vsub.f32 %v1801_v50, %v1803_v12 }
 0xdbb   :  { %v1820_v58 = vadd.f32 %v4810_v16, %v4804_v46 }
 0xdd5   :  { %v1825_v35 = vpop.permute.xlu2 %1824 }
 0xdd6   :  { %v1828_v18 = vadd.f32 %v1825_v35, %v4810_v16  ;;  %v1827_v38 = vmul.f32 %v1825_v35, %v4810_v16 }
 0xdd8   :  { %3500 = vrcp.f32 %v1828_v18 }
 0xdd9   :  { %3502 = vrcp.f32 %v1820_v58 }
 0xdde   :  { %v3501_v31 = vpop.eup %3500 }
 0xddf   :  { %v1830_v28 = vmul.f32 %v3501_v31, %v1827_v38  ;;  %v4822_v22 = vpop.eup %3502 }
 0xde1   :  { %1837 = vrot.lane.b32.xlu2 %v1830_v28, %s3886_s9 }
 0xde7   :  { %v1807_v59 = vpop.permute.xlu0 %1806 }
 0xde8   :  { %v1809_v37 = vmul.f32 %v1807_v59, %v4810_v16 }
 0xe21   :  { %v1812_v32 = vpop.permute.xlu1 %1811 }
 0xe22   :  { %v1814_v9 = vmul.f32 %v1812_v32, %v4796_v10 }
 0xe24   :  { %1816 = vrot.lane.b32.xlu1 %v1814_v9, %s3887_s25 }
 0xe2c   :  { %1918 = vrot.lane.b32.xlu1 %v4804_v46, %s3887_s25 }
 0xe3b   :  { %v1838_v41 = vpop.permute.xlu2 %1837 }
 0xe3c   :  { %v1840_v42 = vadd.f32 %v1838_v41, %v4796_v10 }
 0xe3e   :  { %v1842_v56 = vmul.f32 1.5707964, %v1840_v42  ;;  %v1876_v61 = vmul.f32 2.1560483, %v1840_v42 }
 0xe40   :  { %v1843_v60 = vadd.f32 1.0, %v1842_v56  ;;  %v1877_v62 = vadd.f32 1.0, %v1876_v61 }
 0xe42   :  { %3504 = vrsqrt.f32 %v1843_v60  ;;  %vm1850_vm13 = vweird.f32 %v1843_v60  ;;  %vm1884_vm3 = vweird.f32 %v1877_v62 }
 0xe43   :  { %3506 = vrsqrt.f32 %v1877_v62 }
 0xe48   :  { %v3505_v52 = vpop.eup %3504 }
 0xe49   :  { %v1845_v63 = vmul.f32 %v3505_v52, %v1843_v60  ;;  %v3507_v13 = vpop.eup %3506  ;;  %vm1851_vm12 = vweird.f32 %v3505_v52 }
 0xe4a   :  { %v1879_v19 = vmul.f32 %v3507_v13, %v1877_v62  ;;  %vm1852_vm14 = vmor %vm1850_vm13, %vm1851_vm12  ;;  %vm1885_vm15 = vweird.f32 %v3507_v13 }
 0xe4b   :  { %v1846_v15 = vmul.f32 %v3505_v52, %v1845_v63  ;;  %vm1886_vm4 = vmor %vm1884_vm3, %vm1885_vm15 }
 0xe4c   :  { %v1880_v39 = vmul.f32 %v3507_v13, %v1879_v19 }
 0xe4d   :  { %v1847_v0 = vmul.f32 0.5, %v1846_v15 }
 0xe4e   :  { %v1881_v45 = vmul.f32 0.5, %v1880_v39 }
 0xe4f   :  { %v1848_v47 = vsub.f32 1.5, %v1847_v0 }
 0xe50   :  { %v1882_v54 = vsub.f32 1.5, %v1881_v45 }
 0xe51   :  { %v1849_v5 = vmul.f32 %v3505_v52, %v1848_v47 }
 0xe52   :  { %v1883_v7 = vmul.f32 %v3507_v13, %v1882_v54 }
 0xe53   :  { %v1853_v4 = vsel %vm1852_vm14, %v3505_v52, %v1849_v5 }
 0xe54   :  { %v1887_v20 = vsel %vm1886_vm4, %v3507_v13, %v1883_v7 }
 0xe96   :  { %v1817_v1 = vpop.permute.xlu1 %1816 }
 0xe97   :  { %v1819_v40 = vadd.f32 %v1817_v1, %v1809_v37 }
 0xe99   :  { %v1822_v29 = vmul.f32 %v4822_v22, %v1819_v40 }
 0xe9b   :  { %1832 = vrot.lane.b32.xlu0 %v1822_v29, %s3886_s9 }
 0xe9e   :  { %v1919_v5 = vpop.permute.xlu1 %1918 }
 0xf0d   :  { %v1833_v11 = vpop.permute.xlu0 %1832 }
 0xf0e   :  { %v1835_v10 = vadd.f32 %v1833_v11, %v4789_v3 }
 0xf10   :  { %v1841_v51 = vmul.f32 2.0, %v1835_v10  ;;  %v1944_v10 = vadd.f32 %v4810_v16, %v4712_v36 }
 0xf12   :  { %v1854_v53 = vmul.f32 %v1853_v4, %v1841_v51  ;;  %v1874_v14 = vadd.f32 -0.8813736, %v1841_v51 }
 0xf14   :  { %v3299_v8 = vmul.f32 -1.442695, %v1854_v53  ;;  %v1875_v12 = vmul.f32 1.1715729, %v1874_v14  ;;  %v1943_v53 = vmul.f32 %v4810_v16, %v4712_v36 }
 0xf16   :  { %3508 = vpow2.f32 %v3299_v8  ;;  %v1888_v50 = vmul.f32 %v1887_v20, %v1875_v12 }
 0xf18   :  { %v3300_v35 = vmul.f32 -1.442695, %v1888_v50 }
 0xf1a   :  { %3510 = vpow2.f32 %v3300_v35  ;;  %v1936_v35 = vsub.f32 1.0, %v4804_v46 }
 0xf1c   :  { %v3509_v18 = vpop.eup %3508 }
 0xf1d   :  { %v1858_v38 = vadd.f32 1.0, %v3509_v18  ;;  %v1940_v18 = vadd.f32 %v1936_v35, %v4810_v16 }
 0xf1f   :  { %3512 = vrcp.f32 %v1858_v38  ;;  %v1868_v59 = vand.u32 2147483647, %v1858_v38  ;;  %v1870_v37 = vand.u32 2147483648, %v1858_v38  ;;  %vm1864_vm6 = vweird.f32 %v1858_v38 }
 0xf20   :  { %v3511_v3 = vpop.eup %3510 }
 0xf21   :  { %v1892_v31 = vadd.f32 1.0, %v3511_v3  ;;  %vm1869_vm8 = vcmp.eq.f32.partialorder %v1868_v59, 8.507059e+37  ;;  %v1871_v42 = vor.u32 1.1754944e-38, %v1870_v37  ;;  %v1937_v3 = vmul.f32 %v4810_v16, %v4702_v34  ;;  %v3305_v34 = vld [vmem:[%s5495_s0 + $0xa] sm:$0x3] }
 0xf23   :  { %3514 = vrcp.f32 %v1892_v31  ;;  %v1904_v56 = vand.u32 2147483648, %v1892_v31  ;;  %v1902_v62 = vand.u32 2147483647, %v1892_v31  ;;  %vm1898_vm10 = vweird.f32 %v1892_v31 }
 0xf24   :  { %3516 = vrcp.f32 %v1944_v10 }
 0xf25   :  { %v3513_v28 = vpop.eup %3512  ;;  %v1905_v15 = vor.u32 1.1754944e-38, %v1904_v56  ;;  %vm1903_vm12 = vcmp.eq.f32.partialorder %v1902_v62, 8.507059e+37  ;;  %v3768_v62 = vld [vmem:[#allocation5 + $0x38] sm:$0xff] }
 0xf26   :  { %v1860_v32 = vmul.f32 %v3513_v28, %v1858_v38  ;;  %vm1865_vm5 = vweird.f32 %v3513_v28 }
 0xf27   :  { %vm1866_vm7 = vmor %vm1864_vm6, %vm1865_vm5 }
 0xf28   :  { %v1861_v9 = vsub.f32 1.0, %v1860_v32 }
 0xf29   :  { %v3515_v58 = vpop.eup %3514 }
 0xf2a   :  { %v1862_v1 = vmul.f32 %v3513_v28, %v1861_v9  ;;  %v1894_v40 = vmul.f32 %v3515_v58, %v1892_v31  ;;  %vm1899_vm9 = vweird.f32 %v3515_v58  ;;  %v3517_v7 = vpop.eup %3516 }
 0xf2b   :  { %vm1900_vm11 = vmor %vm1898_vm10, %vm1899_vm9  ;;  %v1946_v12 = vmul.f32 %v3517_v7, %v1943_v53 }
 0xf2c   :  { %v1863_v29 = vadd.f32 %v3513_v28, %v1862_v1  ;;  %v1895_v41 = vsub.f32 1.0, %v1894_v40 }
 0xf2e   :  { %v1867_v60 = vsel %vm1866_vm7, %v3513_v28, %v1863_v29  ;;  %v1896_v61 = vmul.f32 %v3515_v58, %v1895_v41  ;;  %v1938_v28 = vmul.f32 %v1936_v35, %v4712_v36  ;;  %v2074_v36 = vmul.f32 %v3305_v34, %v3305_v34 }
 0xf2f   :  { %v1872_v52 = vsel %vm1869_vm8, %v1871_v42, %v1867_v60 }
 0xf30   :  { %v1910_v63 = vmul.f32 2.0, %v1872_v52  ;;  %v1897_v13 = vadd.f32 %v3515_v58, %v1896_v61  ;;  %v1908_v39 = vmul.f32 %v1872_v52, %v1872_v52  ;;  %v3769_v52 = vld [vmem:[#allocation5 + $0x30] sm:$0xff] }
 0xf32   :  { %v3301_v19 = vadd.f32 -1.0, %v1910_v63  ;;  %v1901_v0 = vsel %vm1900_vm11, %v3515_v58, %v1897_v13  ;;  %v1939_v58 = vadd.f32 %v1938_v28, %v1937_v3  ;;  %v3770_v63 = vld [vmem:[#allocation5 + $0x28] sm:$0xff]  ;;  %v3771_v13 = vld [vmem:[#allocation5 + $0x20] sm:$0xff] }
 0xf33   :  { %v1906_v45 = vsel %vm1903_vm12, %v1905_v15, %v1901_v0  ;;  %v3772_v15 = vld [vmem:[#allocation5 + $0x18] sm:$0xff]  ;;  %v3774_v0 = vld [vmem:[#allocation5 + $0x8] sm:$0xff] }
 0xf34   :  { %1914 = vrot.lane.b32.xlu0 %v3301_v19, %s3885_s23  ;;  %v1909_v47 = vsub.f32 %v1906_v45, %v1908_v39  ;;  %v3773_v19 = vld [vmem:[#allocation5 + $0x10] sm:$0xff] }
 0xf36   :  { %v1912_v54 = vmul.f32 4.0, %v1909_v47 }
 0xf38   :  { %1929 = vrot.lane.b32.xlu2 %v1912_v54, %s3885_s23  ;;  %v1921_v11 = vmul.f32 %v1919_v5, %v1912_v54 }
 0xf3a   :  { %1923 = vrot.lane.b32.xlu1 %v1921_v11, %s3885_s23 }
 0xf92   :  { %v1930_v51 = vpop.permute.xlu2 %1929 }
 0xf93   :  { %v1933_v4 = vadd.f32 %v1930_v51, %v4810_v16  ;;  %v1932_v14 = vmul.f32 %v1930_v51, %v4810_v16 }
 0xf95   :  { %3518 = vrcp.f32 %v1933_v4 }
 0xf96   :  { %3520 = vrcp.f32 %v1940_v18 }
 0xf9b   :  { %v3519_v8 = vpop.eup %3518 }
 0xf9c   :  { %v1935_v20 = vmul.f32 %v3519_v8, %v1932_v14  ;;  %v3521_v32 = vpop.eup %3520 }
 0xf9d   :  { %v1942_v37 = vmul.f32 %v3521_v32, %v1939_v58 }
 0xf9e   :  { %v4837_v50 = vadd.f32 %v1946_v12, %v1935_v20 }
 0xfa0   :  { %1951 = vrot.lane.b32.xlu2 %v4837_v50, %s3885_s23 }
 0xfa6   :  { %v1915_v38 = vpop.permute.xlu0 %1914 }
 0xfa7   :  { %v1917_v31 = vmul.f32 %v1915_v38, %v4810_v16 }
 0xfac   :  { %v1924_v9 = vpop.permute.xlu1 %1923 }
 0xfad   :  { %v1926_v59 = vadd.f32 %v1924_v9, %v1917_v31 }
 0xfaf   :  { %v1927_v46 = vmul.f32 %v4822_v22, %v1926_v59 }
 0xfb1   :  { %v4848_v1 = vadd.f32 %v1942_v37, %v1927_v46 }
 0xfb3   :  { %2070 = vrot.lane.b32.xlu1 %v4848_v1, %s3885_s23  ;;  %v1949_v40 = vmul.f32 %v4848_v1, %v4848_v1 }
 0xfb5   :  { %1955 = vrot.lane.b32.xlu0 %v1949_v40, %s3886_s9 }
 0xffa   :  { %v1952_v16 = vpop.permute.xlu2 %1951 }
 0xffb   :  { %v1958_v22 = vsel %vm115_vm0, %v4848_v1, %v1952_v16  ;;  %v2075_v42 = vsel %vm115_vm0, %v2074_v36, %v1952_v16 }
0x1025   :  { %v2071_v29 = vpop.permute.xlu1 %2070 }
0x1026   :  { %v2073_v41 = vsel %vm115_vm0, %v3305_v34, %v2071_v29 }
0x1027   :  { %3306 = vmatmul.msk.f32.vlgmr.msra.gmra.mxu1 %vm128_vm1, %v2073_v41  ;;  %v1956_v56 = vpop.permute.xlu0 %1955 }
0x1028   :  { %v1959_v60 = vsel %vm128_vm1, %v1958_v22, %v1956_v56  ;;  %v2076_v61 = vsel %vm128_vm1, %v2075_v42, %v1956_v56  ;;  %2864 = vmatpush.msra.mxu1 %v3768_v62 }
0x1029   :  { %3302 = vmatmul.msk.f32.vlgmr.msrb.gmra.mxu3 %vm155_vm2, %v1959_v60  ;;  %3307 = vmatmul.msk.f32.vlgmr.msrb.gmra.mxu2 %vm155_vm2, %v2076_v61 }
0x102a   :  { %2865 = vmatpush.msra.mxu1 %v3769_v52  ;;  %3131 = vmatpush.msrb.mxu3 %v4568_v6  ;;  %v3775_v6 = vld [vmem:[#allocation5] sm:$0xff] }
0x102c   :  { %2866 = vmatpush.msra.mxu1 %v3770_v63  ;;  %3132 = vmatpush.msrb.mxu3 %v4575_v30  ;;  %v4879_v30 = vpop.f32.mrf.mxu2 }
0x102e   :  { %2867 = vmatpush.msra.mxu1 %v3771_v13  ;;  %3133 = vmatpush.msrb.mxu3 %v4582_v43 }
0x1030   :  { %2868 = vmatpush.msra.mxu1 %v3772_v15  ;;  %3134 = vmatpush.msrb.mxu3 %v4589_v17 }
0x1032   :  { %2869 = vmatpush.msra.mxu1 %v3773_v19  ;;  %3135 = vmatpush.msrb.mxu3 %v4596_v21 }
0x1034   :  { %2870 = vmatpush.msra.mxu1 %v3774_v0  ;;  %3136 = vmatpush.msrb.mxu3 %v4603_v23 }
0x1036   :  { %2871 = vmatpush.msra.mxu1 %v3775_v6  ;;  %3137 = vmatpush.msrb.mxu3 %v4610_v33 }
0x1038   :  { %3138 = vmatpush.msrb.mxu3 %v4617_v24 }
0x103a   :  { %3139 = vmatpush.msrb.mxu3 %v4624_v25 }
0x103c   :  { %3140 = vmatpush.msrb.mxu3 %v4631_v26 }
0x103e   :  { %3141 = vmatpush.msrb.mxu3 %v4638_v48 }
0x1040   :  { %3142 = vmatpush.msrb.mxu3 %v4645_v49 }
0x10a4   :  { %v2097_v43 = vpop.f32.mrf.mxu1 }
0x10a5   :  { %v4882_v17 = vadd.f32 %v4786_v55, %v2097_v43 }
0x10a7   :  { %2194 = vrot.lane.b32.xlu1 %v4882_v17, %s3887_s25  ;;  %v2157_v37 = vadd.f32 -0.8813736, %v4882_v17 }
0x10a9   :  { %v2158_v40 = vmul.f32 1.1715729, %v2157_v37 }
0x10ac   :  { %v2121_v21 = vpop.f32.mrf.mxu2 }
0x10ad   :  { %v4887_v23 = vadd.f32 %v4793_v44, %v2121_v21 }
0x10af   :  { %v2125_v33 = vmul.f32 0.3926991, %v4887_v23  ;;  %2212 = vrot.lane.b32.xlu0 %v4887_v23, %s3887_s25  ;;  %v2159_v54 = vmul.f32 0.5390121, %v4887_v23 }
0x10b1   :  { %v2126_v24 = vadd.f32 1.0, %v2125_v33  ;;  %v2160_v10 = vadd.f32 1.0, %v2159_v54 }
0x10b3   :  { %3522 = vrsqrt.f32 %v2126_v24  ;;  %vm2133_vm14 = vweird.f32 %v2126_v24  ;;  %vm2167_vm8 = vweird.f32 %v2160_v10 }
0x10b9   :  { %v3523_v25 = vpop.eup %3522 }
0x10ba   :  { %v2128_v26 = vmul.f32 %v3523_v25, %v2126_v24  ;;  %vm2134_vm13 = vweird.f32 %v3523_v25 }
0x10bb   :  { %vm2135_vm15 = vmor %vm2133_vm14, %vm2134_vm13 }
0x10bc   :  { %v2129_v48 = vmul.f32 %v3523_v25, %v2128_v26 }
0x10be   :  { %v2130_v49 = vmul.f32 0.5, %v2129_v48 }
0x10c0   :  { %v2131_v39 = vsub.f32 1.5, %v2130_v49 }
0x10c2   :  { %v2132_v45 = vmul.f32 %v3523_v25, %v2131_v39 }
0x10c4   :  { %v2136_v47 = vsel %vm2135_vm15, %v3523_v25, %v2132_v45 }
0x10c5   :  { %v2137_v5 = vmul.f32 %v2136_v47, %v4882_v17 }
0x10c7   :  { %v3308_v11 = vmul.f32 -1.442695, %v2137_v5 }
0x10c9   :  { %3524 = vpow2.f32 %v3308_v11 }
0x10ca   :  { %3526 = vrsqrt.f32 %v2160_v10 }
0x10cf   :  { %v3525_v51 = vpop.eup %3524 }
0x10d0   :  { %v2141_v4 = vadd.f32 1.0, %v3525_v51  ;;  %v3527_v7 = vpop.eup %3526 }
0x10d1   :  { %v2162_v53 = vmul.f32 %v3527_v7, %v2160_v10  ;;  %vm2168_vm7 = vweird.f32 %v3527_v7 }
0x10d2   :  { %3528 = vrcp.f32 %v2141_v4  ;;  %v2153_v35 = vand.u32 2147483648, %v2141_v4  ;;  %v2151_v3 = vand.u32 2147483647, %v2141_v4  ;;  %vm2147_vm4 = vweird.f32 %v2141_v4  ;;  %vm2169_vm9 = vmor %vm2167_vm8, %vm2168_vm7 }
0x10d3   :  { %v2163_v8 = vmul.f32 %v3527_v7, %v2162_v53 }
0x10d4   :  { %v2154_v28 = vor.u32 1.1754944e-38, %v2153_v35  ;;  %vm2152_vm6 = vcmp.eq.f32.partialorder %v2151_v3, 8.507059e+37 }
0x10d5   :  { %v2164_v18 = vmul.f32 0.5, %v2163_v8 }
0x10d7   :  { %v2165_v32 = vsub.f32 1.5, %v2164_v18 }
0x10d8   :  { %v3529_v14 = vpop.eup %3528 }
0x10d9   :  { %v2143_v12 = vmul.f32 %v3529_v14, %v2141_v4  ;;  %vm2148_vm3 = vweird.f32 %v3529_v14  ;;  %v2166_v59 = vmul.f32 %v3527_v7, %v2165_v32 }
0x10da   :  { %vm2149_vm5 = vmor %vm2147_vm4, %vm2148_vm3 }
0x10db   :  { %v2144_v20 = vsub.f32 1.0, %v2143_v12  ;;  %v2170_v46 = vsel %vm2169_vm9, %v3527_v7, %v2166_v59 }
0x10dc   :  { %v2171_v34 = vmul.f32 %v2170_v46, %v2158_v40 }
0x10dd   :  { %v2145_v38 = vmul.f32 %v3529_v14, %v2144_v20 }
0x10de   :  { %v3309_v36 = vmul.f32 -1.442695, %v2171_v34 }
0x10df   :  { %v2146_v31 = vadd.f32 %v3529_v14, %v2145_v38 }
0x10e0   :  { %3530 = vpow2.f32 %v3309_v36 }
0x10e1   :  { %v2150_v9 = vsel %vm2149_vm5, %v3529_v14, %v2146_v31 }
0x10e2   :  { %v4894_v58 = vsel %vm2152_vm6, %v2154_v28, %v2150_v9 }
0x10e3   :  { %2199 = vrot.lane.b32.xlu2 %v4894_v58, %s3885_s23  ;;  %v2191_v63 = vmul.f32 %v4894_v58, %v4894_v58 }
0x10e6   :  { %v3531_v16 = vpop.eup %3530 }
0x10e7   :  { %v2175_v29 = vadd.f32 1.0, %v3531_v16 }
0x10e9   :  { %3532 = vrcp.f32 %v2175_v29  ;;  %v2187_v61 = vand.u32 2147483648, %v2175_v29  ;;  %vm2181_vm11 = vweird.f32 %v2175_v29  ;;  %v2185_v62 = vand.u32 2147483647, %v2175_v29 }
0x10eb   :  { %v2188_v13 = vor.u32 1.1754944e-38, %v2187_v61  ;;  %vm2186_vm13 = vcmp.eq.f32.partialorder %v2185_v62, 8.507059e+37 }
0x10ef   :  { %v3533_v41 = vpop.eup %3532 }
0x10f0   :  { %v2177_v22 = vmul.f32 %v3533_v41, %v2175_v29  ;;  %vm2182_vm10 = vweird.f32 %v3533_v41 }
0x10f1   :  { %vm2183_vm12 = vmor %vm2181_vm11, %vm2182_vm10 }
0x10f2   :  { %v2178_v42 = vsub.f32 1.0, %v2177_v22 }
0x10f4   :  { %v2179_v56 = vmul.f32 %v3533_v41, %v2178_v42 }
0x10f6   :  { %v2180_v60 = vadd.f32 %v3533_v41, %v2179_v56 }
0x10f8   :  { %v2184_v52 = vsel %vm2183_vm12, %v3533_v41, %v2180_v60 }
0x10f9   :  { %v2189_v15 = vsel %vm2186_vm13, %v2188_v13, %v2184_v52 }
0x10fa   :  { %v4901_v19 = vsub.f32 %v2189_v15, %v2191_v63 }
0x10fc   :  { %v2208_v26 = vadd.f32 %v4901_v19, %v4894_v58 }
0x1119   :  { %v2195_v48 = vpop.permute.xlu1 %2194 }
0x111a   :  { %v2197_v49 = vmul.f32 %v2195_v48, %v4901_v19 }
0x1121   :  { %v2213_v0 = vpop.permute.xlu0 %2212 }
0x1122   :  { %v2216_v6 = vadd.f32 %v2213_v0, %v4901_v19  ;;  %v2215_v43 = vmul.f32 %v2213_v0, %v4901_v19 }
0x1124   :  { %3534 = vrcp.f32 %v2216_v6 }
0x1125   :  { %3536 = vrcp.f32 %v2208_v26 }
0x112a   :  { %v3535_v21 = vpop.eup %3534 }
0x112b   :  { %v2218_v33 = vmul.f32 %v3535_v21, %v2215_v43  ;;  %v4913_v47 = vpop.eup %3536 }
0x112d   :  { %2225 = vrot.lane.b32.xlu0 %v2218_v33, %s3886_s9 }
0x113d   :  { %v2200_v24 = vpop.permute.xlu2 %2199 }
0x113e   :  { %v2202_v25 = vmul.f32 %v2200_v24, %v4887_v23 }
0x1140   :  { %2204 = vrot.lane.b32.xlu2 %v2202_v25, %s3887_s25 }
0x1148   :  { %2306 = vrot.lane.b32.xlu2 %v4894_v58, %s3887_s25 }
0x119a   :  { %v2205_v39 = vpop.permute.xlu2 %2204 }
0x119b   :  { %v2207_v45 = vadd.f32 %v2205_v39, %v2197_v49 }
0x119d   :  { %v2210_v54 = vmul.f32 %v4913_v47, %v2207_v45 }
0x119f   :  { %2220 = vrot.lane.b32.xlu1 %v2210_v54, %s3886_s9  ;;  %v2226_v5 = vpop.permute.xlu0 %2225 }
0x11a0   :  { %v2228_v11 = vadd.f32 %v2226_v5, %v4887_v23 }
0x11a2   :  { %v2230_v10 = vmul.f32 1.5707964, %v2228_v11  ;;  %v2264_v4 = vmul.f32 2.1560483, %v2228_v11 }
0x11a4   :  { %v2231_v51 = vadd.f32 1.0, %v2230_v10  ;;  %v2265_v7 = vadd.f32 1.0, %v2264_v4 }
0x11a6   :  { %3538 = vrsqrt.f32 %v2231_v51  ;;  %vm2238_vm15 = vweird.f32 %v2231_v51  ;;  %vm2272_vm5 = vweird.f32 %v2265_v7 }
0x11a7   :  { %3540 = vrsqrt.f32 %v2265_v7 }
0x11ac   :  { %v3539_v53 = vpop.eup %3538 }
0x11ad   :  { %v2233_v14 = vmul.f32 %v3539_v53, %v2231_v51  ;;  %v3541_v8 = vpop.eup %3540  ;;  %vm2239_vm14 = vweird.f32 %v3539_v53 }
0x11ae   :  { %v2267_v20 = vmul.f32 %v3541_v8, %v2265_v7  ;;  %vm2240_vm3 = vmor %vm2238_vm15, %vm2239_vm14  ;;  %vm2273_vm4 = vweird.f32 %v3541_v8  ;;  %v2307_v7 = vpop.permute.xlu2 %2306 }
0x11af   :  { %v2234_v12 = vmul.f32 %v3539_v53, %v2233_v14  ;;  %vm2274_vm6 = vmor %vm2272_vm5, %vm2273_vm4  ;;  %v2324_v14 = vsub.f32 1.0, %v4894_v58 }
0x11b0   :  { %v2268_v18 = vmul.f32 %v3541_v8, %v2267_v20 }
0x11b1   :  { %v2235_v35 = vmul.f32 0.5, %v2234_v12  ;;  %v2325_v12 = vmul.f32 %v4901_v19, %v4848_v1 }
0x11b2   :  { %v2269_v38 = vmul.f32 0.5, %v2268_v18 }
0x11b3   :  { %v2236_v3 = vsub.f32 1.5, %v2235_v35  ;;  %v2326_v35 = vmul.f32 %v2324_v14, %v4837_v50 }
0x11b4   :  { %v2270_v31 = vsub.f32 1.5, %v2269_v38  ;;  %v2332_v38 = vadd.f32 %v4901_v19, %v4837_v50 }
0x11b5   :  { %v2237_v28 = vmul.f32 %v3539_v53, %v2236_v3 }
0x11b6   :  { %v2271_v37 = vmul.f32 %v3541_v8, %v2270_v31 }
0x11b7   :  { %v2241_v59 = vsel %vm2240_vm3, %v3539_v53, %v2237_v28  ;;  %v2327_v28 = vadd.f32 %v2326_v35, %v2325_v12 }
0x11b8   :  { %v2275_v16 = vsel %vm2274_vm6, %v3541_v8, %v2271_v37  ;;  %v2328_v8 = vadd.f32 %v2324_v14, %v4901_v19 }
0x1211   :  { %v2221_v32 = vpop.permute.xlu1 %2220 }
0x1212   :  { %v2223_v23 = vadd.f32 %v2221_v32, %v4882_v17 }
0x1214   :  { %v2229_v9 = vmul.f32 2.0, %v2223_v23 }
0x1216   :  { %v2242_v46 = vmul.f32 %v2241_v59, %v2229_v9  ;;  %v2262_v40 = vadd.f32 -0.8813736, %v2229_v9 }
0x1218   :  { %v3310_v34 = vmul.f32 -1.442695, %v2242_v46  ;;  %v2263_v36 = vmul.f32 1.1715729, %v2262_v40  ;;  %v2331_v40 = vmul.f32 %v4901_v19, %v4837_v50 }
0x121a   :  { %3542 = vpow2.f32 %v3310_v34  ;;  %v2276_v29 = vmul.f32 %v2275_v16, %v2263_v36 }
0x121c   :  { %v3311_v41 = vmul.f32 -1.442695, %v2276_v29 }
0x121e   :  { %3544 = vpow2.f32 %v3311_v41  ;;  %v3316_v41 = vld [vmem:[%s5495_s0 + $0xc] sm:$0x3] }
0x121f   :  { %v2462_v50 = vmul.f32 %v3316_v41, %v3316_v41 }
0x1220   :  { %v3543_v22 = vpop.eup %3542 }
0x1221   :  { %v2246_v42 = vadd.f32 1.0, %v3543_v22 }
0x1223   :  { %3546 = vrcp.f32 %v2246_v42  ;;  %v2256_v63 = vand.u32 2147483647, %v2246_v42  ;;  %v2258_v13 = vand.u32 2147483648, %v2246_v42  ;;  %vm2252_vm8 = vweird.f32 %v2246_v42 }
0x1224   :  { %v3545_v17 = vpop.eup %3544 }
0x1225   :  { %v2280_v56 = vadd.f32 1.0, %v3545_v17  ;;  %vm2257_vm10 = vcmp.eq.f32.partialorder %v2256_v63, 8.507059e+37  ;;  %v2259_v21 = vor.u32 1.1754944e-38, %v2258_v13  ;;  %v4963_v13 = vpop.f32.mrf.mxu3 }
0x1227   :  { %3548 = vrcp.f32 %v2280_v56  ;;  %v2292_v33 = vand.u32 2147483648, %v2280_v56  ;;  %v2290_v26 = vand.u32 2147483647, %v2280_v56  ;;  %vm2286_vm12 = vweird.f32 %v2280_v56 }
0x1228   :  { %3550 = vrcp.f32 %v2328_v8 }
0x1229   :  { %v3547_v60 = vpop.eup %3546  ;;  %v2293_v45 = vor.u32 1.1754944e-38, %v2292_v33  ;;  %vm2291_vm14 = vcmp.eq.f32.partialorder %v2290_v26, 8.507059e+37  ;;  %3552 = vrcp.f32 %v2332_v38 }
0x122a   :  { %v2248_v61 = vmul.f32 %v3547_v60, %v2246_v42  ;;  %vm2253_vm7 = vweird.f32 %v3547_v60 }
0x122b   :  { %vm2254_vm9 = vmor %vm2252_vm8, %vm2253_vm7 }
0x122c   :  { %v2249_v62 = vsub.f32 1.0, %v2248_v61 }
0x122d   :  { %v3549_v52 = vpop.eup %3548 }
0x122e   :  { %v2250_v15 = vmul.f32 %v3547_v60, %v2249_v62  ;;  %v2282_v0 = vmul.f32 %v3549_v52, %v2280_v56  ;;  %vm2287_vm11 = vweird.f32 %v3549_v52  ;;  %v3551_v3 = vpop.eup %3550 }
0x122f   :  { %vm2288_vm13 = vmor %vm2286_vm12, %vm2287_vm11  ;;  %v2330_v58 = vmul.f32 %v3551_v3, %v2327_v28  ;;  %v3553_v46 = vpop.eup %3552 }
0x1230   :  { %v2251_v6 = vadd.f32 %v3547_v60, %v2250_v15  ;;  %v2283_v43 = vsub.f32 1.0, %v2282_v0  ;;  %v2334_v36 = vmul.f32 %v3553_v46, %v2331_v40 }
0x1232   :  { %v2255_v24 = vsel %vm2254_vm9, %v3547_v60, %v2251_v6  ;;  %v2284_v25 = vmul.f32 %v3549_v52, %v2283_v43 }
0x1233   :  { %v2260_v48 = vsel %vm2257_vm10, %v2259_v21, %v2255_v24 }
0x1234   :  { %v2298_v49 = vmul.f32 2.0, %v2260_v48  ;;  %v2285_v39 = vadd.f32 %v3549_v52, %v2284_v25  ;;  %v2296_v11 = vmul.f32 %v2260_v48, %v2260_v48 }
0x1236   :  { %v3312_v54 = vadd.f32 -1.0, %v2298_v49  ;;  %v2289_v5 = vsel %vm2288_vm13, %v3549_v52, %v2285_v39 }
0x1237   :  { %v2294_v10 = vsel %vm2291_vm14, %v2293_v45, %v2289_v5 }
0x1238   :  { %2302 = vrot.lane.b32.xlu1 %v3312_v54, %s3885_s23  ;;  %v2297_v51 = vsub.f32 %v2294_v10, %v2296_v11 }
0x123a   :  { %v2300_v4 = vmul.f32 4.0, %v2297_v51 }
0x123c   :  { %2317 = vrot.lane.b32.xlu0 %v2300_v4, %s3885_s23  ;;  %v2309_v53 = vmul.f32 %v2307_v7, %v2300_v4 }
0x123e   :  { %2311 = vrot.lane.b32.xlu2 %v2309_v53, %s3885_s23 }
0x1298   :  { %v2312_v31 = vpop.permute.xlu2 %2311 }
0x12aa   :  { %v2303_v20 = vpop.permute.xlu1 %2302 }
0x12ab   :  { %v2305_v18 = vmul.f32 %v2303_v20, %v4901_v19 }
0x12ad   :  { %v2314_v32 = vadd.f32 %v2312_v31, %v2305_v18 }
0x12ae   :  { %v2318_v23 = vpop.permute.xlu0 %2317 }
0x12af   :  { %v2315_v9 = vmul.f32 %v4913_v47, %v2314_v32  ;;  %v2321_v59 = vadd.f32 %v2318_v23, %v4901_v19  ;;  %v2320_v47 = vmul.f32 %v2318_v23, %v4901_v19 }
0x12b1   :  { %v4932_v1 = vadd.f32 %v2330_v58, %v2315_v9  ;;  %3554 = vrcp.f32 %v2321_v59 }
0x12b3   :  { %2458 = vrot.lane.b32.xlu2 %v4932_v1, %s3885_s23  ;;  %v2337_v37 = vmul.f32 %v4932_v1, %v4932_v1 }
0x12b5   :  { %2343 = vrot.lane.b32.xlu1 %v2337_v37, %s3886_s9 }
0x12b7   :  { %v3555_v34 = vpop.eup %3554 }
0x12b8   :  { %v2323_v16 = vmul.f32 %v3555_v34, %v2320_v47 }
0x12ba   :  { %v4942_v29 = vadd.f32 %v2334_v36, %v2323_v16 }
0x12bc   :  { %2339 = vrot.lane.b32.xlu0 %v4942_v29, %s3885_s23 }
0x130d   :  { %v2459_v22 = vpop.permute.xlu2 %2458 }
0x130e   :  { %v2461_v42 = vsel %vm115_vm0, %v3316_v41, %v2459_v22 }
0x130f   :  { %3317 = vmatmul.msk.f32.vlgmr.msrb.gmra.mxu1 %vm128_vm1, %v2461_v42 }
0x1327   :  { %v2344_v19 = vpop.permute.xlu1 %2343 }
0x132e   :  { %v2340_v17 = vpop.permute.xlu0 %2339 }
0x132f   :  { %v2346_v56 = vsel %vm115_vm0, %v4932_v1, %v2340_v17  ;;  %v2463_v60 = vsel %vm115_vm0, %v2462_v50, %v2340_v17 }
0x1330   :  { %v2347_v61 = vsel %vm128_vm1, %v2346_v56, %v2344_v19  ;;  %v2464_v62 = vsel %vm128_vm1, %v2463_v60, %v2344_v19 }
0x1331   :  { %3313 = vmatmul.msk.f32.vlgmr.msra.gmra.mxu0 %vm155_vm2, %v2347_v61  ;;  %3318 = vmatmul.msk.f32.vlgmr.msra.gmra.mxu3 %vm155_vm2, %v2464_v62 }
0x138c   :  { %v2485_v52 = vpop.f32.mrf.mxu1 }
0x138d   :  { %v4959_v63 = vadd.f32 %v4786_v55, %v2485_v52 }
0x138f   :  { %2582 = vrot.lane.b32.xlu2 %v4959_v63, %s3887_s25  ;;  %v2545_v32 = vadd.f32 -0.8813736, %v4959_v63 }
0x1391   :  { %v2546_v58 = vmul.f32 1.1715729, %v2545_v32 }
0x13b4   :  { %v2509_v15 = vpop.f32.mrf.mxu3 }
0x13b5   :  { %v4966_v0 = vadd.f32 %v4793_v44, %v2509_v15 }
0x13b7   :  { %v2513_v6 = vmul.f32 0.3926991, %v4966_v0  ;;  %2600 = vrot.lane.b32.xlu1 %v4966_v0, %s3887_s25  ;;  %v2547_v49 = vmul.f32 0.5390121, %v4966_v0 }
0x13b9   :  { %v2514_v43 = vadd.f32 1.0, %v2513_v6  ;;  %v2548_v45 = vadd.f32 1.0, %v2547_v49 }
0x13bb   :  { %3556 = vrsqrt.f32 %v2514_v43  ;;  %vm2521_vm3 = vweird.f32 %v2514_v43  ;;  %vm2555_vm10 = vweird.f32 %v2548_v45 }
0x13c1   :  { %v3557_v21 = vpop.eup %3556 }
0x13c2   :  { %v2516_v33 = vmul.f32 %v3557_v21, %v2514_v43  ;;  %vm2522_vm15 = vweird.f32 %v3557_v21 }
0x13c3   :  { %vm2523_vm4 = vmor %vm2521_vm3, %vm2522_vm15 }
0x13c4   :  { %v2517_v55 = vmul.f32 %v3557_v21, %v2516_v33 }
0x13c6   :  { %v2518_v24 = vmul.f32 0.5, %v2517_v55 }
0x13c8   :  { %v2519_v25 = vsub.f32 1.5, %v2518_v24 }
0x13ca   :  { %v2520_v26 = vmul.f32 %v3557_v21, %v2519_v25 }
0x13cc   :  { %v2524_v48 = vsel %vm2523_vm4, %v3557_v21, %v2520_v26 }
0x13cd   :  { %v2525_v44 = vmul.f32 %v2524_v48, %v4959_v63 }
0x13cf   :  { %v3319_v39 = vmul.f32 -1.442695, %v2525_v44 }
0x13d1   :  { %3558 = vpow2.f32 %v3319_v39 }
0x13d2   :  { %3560 = vrsqrt.f32 %v2548_v45 }
0x13d7   :  { %v3559_v54 = vpop.eup %3558 }
0x13d8   :  { %v2529_v5 = vadd.f32 1.0, %v3559_v54  ;;  %v3561_v11 = vpop.eup %3560 }
0x13d9   :  { %v2550_v10 = vmul.f32 %v3561_v11, %v2548_v45  ;;  %vm2556_vm9 = vweird.f32 %v3561_v11 }
0x13da   :  { %3562 = vrcp.f32 %v2529_v5  ;;  %v2541_v14 = vand.u32 2147483648, %v2529_v5  ;;  %v2539_v12 = vand.u32 2147483647, %v2529_v5  ;;  %vm2535_vm6 = vweird.f32 %v2529_v5  ;;  %vm2557_vm11 = vmor %vm2555_vm10, %vm2556_vm9 }
0x13db   :  { %v2551_v53 = vmul.f32 %v3561_v11, %v2550_v10 }
0x13dc   :  { %v2542_v18 = vor.u32 1.1754944e-38, %v2541_v14  ;;  %vm2540_vm8 = vcmp.eq.f32.partialorder %v2539_v12, 8.507059e+37 }
0x13dd   :  { %v2552_v35 = vmul.f32 0.5, %v2551_v53 }
0x13df   :  { %v2553_v31 = vsub.f32 1.5, %v2552_v35 }
0x13e0   :  { %v3563_v51 = vpop.eup %3562 }
0x13e1   :  { %v2531_v4 = vmul.f32 %v3563_v51, %v2529_v5  ;;  %vm2536_vm5 = vweird.f32 %v3563_v51  ;;  %v2554_v28 = vmul.f32 %v3561_v11, %v2553_v31 }
0x13e2   :  { %vm2537_vm7 = vmor %vm2535_vm6, %vm2536_vm5 }
0x13e3   :  { %v2532_v7 = vsub.f32 1.0, %v2531_v4  ;;  %v2558_v23 = vsel %vm2557_vm11, %v3561_v11, %v2554_v28 }
0x13e4   :  { %v2559_v9 = vmul.f32 %v2558_v23, %v2546_v58 }
0x13e5   :  { %v2533_v8 = vmul.f32 %v3563_v51, %v2532_v7 }
0x13e6   :  { %v3320_v59 = vmul.f32 -1.442695, %v2559_v9 }
0x13e7   :  { %v2534_v20 = vadd.f32 %v3563_v51, %v2533_v8 }
0x13e8   :  { %3564 = vpow2.f32 %v3320_v59 }
0x13e9   :  { %v2538_v38 = vsel %vm2537_vm7, %v3563_v51, %v2534_v20  ;;  %v2583_v33 = vpop.permute.xlu2 %2582 }
0x13ea   :  { %v4973_v3 = vsel %vm2540_vm8, %v2542_v18, %v2538_v38 }
0x13eb   :  { %2587 = vrot.lane.b32.xlu0 %v4973_v3, %s3885_s23  ;;  %v2579_v50 = vmul.f32 %v4973_v3, %v4973_v3 }
0x13ee   :  { %v3565_v37 = vpop.eup %3564 }
0x13ef   :  { %v2563_v46 = vadd.f32 1.0, %v3565_v37 }
0x13f1   :  { %3566 = vrcp.f32 %v2563_v46  ;;  %v2575_v41 = vand.u32 2147483648, %v2563_v46  ;;  %vm2569_vm13 = vweird.f32 %v2563_v46  ;;  %v2573_v22 = vand.u32 2147483647, %v2563_v46 }
0x13f3   :  { %v2576_v17 = vor.u32 1.1754944e-38, %v2575_v41  ;;  %vm2574_vm15 = vcmp.eq.f32.partialorder %v2573_v22, 8.507059e+37 }
0x13f7   :  { %v3567_v40 = vpop.eup %3566 }
0x13f8   :  { %v2565_v47 = vmul.f32 %v3567_v40, %v2563_v46  ;;  %vm2570_vm12 = vweird.f32 %v3567_v40 }
0x13f9   :  { %vm2571_vm14 = vmor %vm2569_vm13, %vm2570_vm12 }
0x13fa   :  { %v2566_v34 = vsub.f32 1.0, %v2565_v47 }
0x13fc   :  { %v2567_v36 = vmul.f32 %v3567_v40, %v2566_v34 }
0x13fe   :  { %v2568_v16 = vadd.f32 %v3567_v40, %v2567_v36 }
0x1400   :  { %v2572_v42 = vsel %vm2571_vm14, %v3567_v40, %v2568_v16 }
0x1401   :  { %v2577_v19 = vsel %vm2574_vm15, %v2576_v17, %v2572_v42 }
0x1402   :  { %v4980_v56 = vsub.f32 %v2577_v19, %v2579_v50 }
0x1404   :  { %v2596_v21 = vadd.f32 %v4980_v56, %v4973_v3  ;;  %v2585_v55 = vmul.f32 %v2583_v33, %v4980_v56 }
0x1429   :  { %v2601_v60 = vpop.permute.xlu1 %2600 }
0x142a   :  { %v2604_v61 = vadd.f32 %v2601_v60, %v4980_v56  ;;  %v2603_v62 = vmul.f32 %v2601_v60, %v4980_v56 }
0x142c   :  { %3568 = vrcp.f32 %v2604_v61 }
0x142d   :  { %3570 = vrcp.f32 %v2596_v21 }
0x1432   :  { %v3569_v52 = vpop.eup %3568 }
0x1433   :  { %v2606_v15 = vmul.f32 %v3569_v52, %v2603_v62  ;;  %v4992_v26 = vpop.eup %3570 }
0x1435   :  { %2613 = vrot.lane.b32.xlu1 %v2606_v15, %s3886_s9 }
0x145d   :  { %v2588_v6 = vpop.permute.xlu0 %2587 }
0x145e   :  { %v2590_v43 = vmul.f32 %v2588_v6, %v4966_v0 }
0x1460   :  { %2592 = vrot.lane.b32.xlu0 %v2590_v43, %s3887_s25 }
0x1468   :  { %2694 = vrot.lane.b32.xlu0 %v4973_v3, %s3887_s25 }
0x14a7   :  { %v2614_v44 = vpop.permute.xlu1 %2613 }
0x14a8   :  { %v2616_v49 = vadd.f32 %v2614_v44, %v4966_v0 }
0x14aa   :  { %v2618_v39 = vmul.f32 1.5707964, %v2616_v49  ;;  %v2652_v54 = vmul.f32 2.1560483, %v2616_v49 }
0x14ac   :  { %v2619_v45 = vadd.f32 1.0, %v2618_v39  ;;  %v2653_v5 = vadd.f32 1.0, %v2652_v54 }
0x14ae   :  { %3572 = vrsqrt.f32 %v2619_v45  ;;  %vm2626_vm4 = vweird.f32 %v2619_v45  ;;  %vm2660_vm7 = vweird.f32 %v2653_v5 }
0x14af   :  { %3574 = vrsqrt.f32 %v2653_v5 }
0x14b4   :  { %v3573_v11 = vpop.eup %3572 }
0x14b5   :  { %v2621_v10 = vmul.f32 %v3573_v11, %v2619_v45  ;;  %v3575_v51 = vpop.eup %3574  ;;  %vm2627_vm3 = vweird.f32 %v3573_v11 }
0x14b6   :  { %v2655_v7 = vmul.f32 %v3575_v51, %v2653_v5  ;;  %vm2628_vm5 = vmor %vm2626_vm4, %vm2627_vm3  ;;  %vm2661_vm6 = vweird.f32 %v3575_v51 }
0x14b7   :  { %v2622_v4 = vmul.f32 %v3573_v11, %v2621_v10  ;;  %vm2662_vm8 = vmor %vm2660_vm7, %vm2661_vm6 }
0x14b8   :  { %v2656_v14 = vmul.f32 %v3575_v51, %v2655_v7  ;;  %v2713_v7 = vmul.f32 %v4980_v56, %v4932_v1  ;;  %v2719_v1 = vmul.f32 %v4980_v56, %v4942_v29 }
0x14b9   :  { %v2623_v53 = vmul.f32 0.5, %v2622_v4 }
0x14ba   :  { %v2657_v8 = vmul.f32 0.5, %v2656_v14 }
0x14bb   :  { %v2624_v12 = vsub.f32 1.5, %v2623_v53 }
0x14bc   :  { %v2658_v20 = vsub.f32 1.5, %v2657_v8 }
0x14bd   :  { %v2625_v35 = vmul.f32 %v3573_v11, %v2624_v12 }
0x14be   :  { %v2659_v28 = vmul.f32 %v3575_v51, %v2658_v20 }
0x14bf   :  { %v2629_v31 = vsel %vm2628_vm5, %v3573_v11, %v2625_v35  ;;  %v2712_v11 = vsub.f32 1.0, %v4973_v3 }
0x14c0   :  { %v2663_v59 = vsel %vm2662_vm8, %v3575_v51, %v2659_v28  ;;  %v2720_v51 = vadd.f32 %v4980_v56, %v4942_v29 }
0x14c1   :  { %v2716_v10 = vadd.f32 %v2712_v11, %v4980_v56  ;;  %v2714_v12 = vmul.f32 %v2712_v11, %v4942_v29  ;;  %v3327_v29 = vld [vmem:[%s5495_s0 + $0xe] sm:$0x3] }
0x14c3   :  { %v2715_v35 = vadd.f32 %v2714_v12, %v2713_v7 }
0x14d2   :  { %v2593_v24 = vpop.permute.xlu0 %2592 }
0x14d3   :  { %v2595_v25 = vadd.f32 %v2593_v24, %v2585_v55 }
0x14d5   :  { %v2598_v48 = vmul.f32 %v4992_v26, %v2595_v25 }
0x14d7   :  { %2608 = vrot.lane.b32.xlu2 %v2598_v48, %s3886_s9 }
0x14da   :  { %v2695_v54 = vpop.permute.xlu0 %2694 }
0x1531   :  { %v2609_v18 = vpop.permute.xlu2 %2608 }
0x1532   :  { %v2611_v0 = vadd.f32 %v2609_v18, %v4959_v63 }
0x1534   :  { %v2617_v38 = vmul.f32 2.0, %v2611_v0 }
0x1536   :  { %v2630_v32 = vmul.f32 %v2629_v31, %v2617_v38  ;;  %v2650_v23 = vadd.f32 -0.8813736, %v2617_v38 }
0x1538   :  { %v3321_v58 = vmul.f32 -1.442695, %v2630_v32  ;;  %v2651_v9 = vmul.f32 1.1715729, %v2650_v23 }
0x153a   :  { %3576 = vpow2.f32 %v3321_v58  ;;  %v2664_v37 = vmul.f32 %v2663_v59, %v2651_v9 }
0x153c   :  { %v3322_v46 = vmul.f32 -1.442695, %v2664_v37 }
0x153e   :  { %3578 = vpow2.f32 %v3322_v46  ;;  %v2850_v46 = vmul.f32 %v3327_v29, %v3327_v29 }
0x1540   :  { %v3577_v40 = vpop.eup %3576 }
0x1541   :  { %v2634_v47 = vadd.f32 1.0, %v3577_v40 }
0x1543   :  { %3580 = vrcp.f32 %v2634_v47  ;;  %v2644_v42 = vand.u32 2147483647, %v2634_v47  ;;  %v2646_v50 = vand.u32 2147483648, %v2634_v47  ;;  %vm2640_vm10 = vweird.f32 %v2634_v47 }
0x1544   :  { %v3579_v63 = vpop.eup %3578 }
0x1545   :  { %v2668_v34 = vadd.f32 1.0, %v3579_v63  ;;  %vm2645_vm12 = vcmp.eq.f32.partialorder %v2644_v42, 8.507059e+37  ;;  %v2647_v62 = vor.u32 1.1754944e-38, %v2646_v50  ;;  %v3776_v42 = vld [vmem:[#allocation7] ss:$0 sm:$0xff] }
0x1547   :  { %3582 = vrcp.f32 %v2668_v34  ;;  %v2680_v52 = vand.u32 2147483648, %v2668_v34  ;;  %v2678_v43 = vand.u32 2147483647, %v2668_v34  ;;  %vm2674_vm14 = vweird.f32 %v2668_v34 }
0x1548   :  { %3584 = vrcp.f32 %v2716_v10 }
0x1549   :  { %v3581_v36 = vpop.eup %3580  ;;  %v2681_v24 = vor.u32 1.1754944e-38, %v2680_v52  ;;  %vm2679_vm3 = vcmp.eq.f32.partialorder %v2678_v43, 8.507059e+37  ;;  %3586 = vrcp.f32 %v2720_v51 }
0x154a   :  { %v2636_v16 = vmul.f32 %v3581_v36, %v2634_v47  ;;  %vm2641_vm9 = vweird.f32 %v3581_v36 }
0x154b   :  { %vm2642_vm11 = vmor %vm2640_vm10, %vm2641_vm9 }
0x154c   :  { %v2637_v41 = vsub.f32 1.0, %v2636_v16 }
0x154d   :  { %v3583_v22 = vpop.eup %3582 }
0x154e   :  { %v2638_v17 = vmul.f32 %v3581_v36, %v2637_v41  ;;  %v2670_v19 = vmul.f32 %v3583_v22, %v2668_v34  ;;  %vm2675_vm13 = vweird.f32 %v3583_v22  ;;  %v3585_v20 = vpop.eup %3584  ;;  %v5037_v41 = vpop.f32.mrf.mxu0 }
0x154f   :  { %vm2676_vm15 = vmor %vm2674_vm14, %vm2675_vm13  ;;  %v2718_v0 = vmul.f32 %v3585_v20, %v2715_v35  ;;  %v3587_v31 = vpop.eup %3586 }
0x1550   :  { %v2639_v60 = vadd.f32 %v3581_v36, %v2638_v17  ;;  %v2671_v61 = vsub.f32 1.0, %v2670_v19  ;;  %v2722_v9 = vmul.f32 %v3587_v31, %v2719_v1  ;;  %v3777_v19 = vld [vmem:[#allocation7 + $0x1] ss:$0 sm:$0xff] }
0x1552   :  { %v2643_v15 = vsel %vm2642_vm11, %v3581_v36, %v2639_v60  ;;  %v2672_v6 = vmul.f32 %v3583_v22, %v2671_v61 }
0x1553   :  { %v2648_v21 = vsel %vm2645_vm12, %v2647_v62, %v2643_v15 }
0x1554   :  { %v2686_v33 = vmul.f32 2.0, %v2648_v21  ;;  %v2673_v55 = vadd.f32 %v3583_v22, %v2672_v6  ;;  %v2684_v44 = vmul.f32 %v2648_v21, %v2648_v21 }
0x1556   :  { %v3323_v25 = vadd.f32 -1.0, %v2686_v33  ;;  %v2677_v48 = vsel %vm2676_vm15, %v3583_v22, %v2673_v55 }
0x1557   :  { %v2682_v49 = vsel %vm2679_vm3, %v2681_v24, %v2677_v48 }
0x1558   :  { %2690 = vrot.lane.b32.xlu2 %v3323_v25, %s3885_s23  ;;  %v2685_v39 = vsub.f32 %v2682_v49, %v2684_v44 }
0x155a   :  { %v2688_v45 = vmul.f32 4.0, %v2685_v39 }
0x155c   :  { %2705 = vrot.lane.b32.xlu1 %v2688_v45, %s3885_s23  ;;  %v2697_v5 = vmul.f32 %v2695_v54, %v2688_v45 }
0x155e   :  { %2699 = vrot.lane.b32.xlu0 %v2697_v5, %s3885_s23 }
0x15b2   :  { %v2691_v4 = vpop.permute.xlu2 %2690 }
0x15b3   :  { %v2693_v14 = vmul.f32 %v2691_v4, %v4980_v56 }
0x15ce   :  { %v2706_v53 = vpop.permute.xlu1 %2705 }
0x15cf   :  { %v2709_v8 = vadd.f32 %v2706_v53, %v4980_v56  ;;  %v2708_v32 = vmul.f32 %v2706_v53, %v4980_v56 }
0x15d0   :  { %v2700_v3 = vpop.permute.xlu0 %2699 }
0x15d1   :  { %3588 = vrcp.f32 %v2709_v8  ;;  %v2702_v18 = vadd.f32 %v2700_v3, %v2693_v14 }
0x15d3   :  { %v2703_v38 = vmul.f32 %v4992_v26, %v2702_v18 }
0x15d5   :  { %v5011_v28 = vadd.f32 %v2718_v0, %v2703_v38 }
0x15d7   :  { %v3589_v23 = vpop.eup %3588  ;;  %2846 = vrot.lane.b32.xlu0 %v5011_v28, %s3885_s23  ;;  %v2725_v58 = vmul.f32 %v5011_v28, %v5011_v28 }
0x15d8   :  { %v2711_v59 = vmul.f32 %v3589_v23, %v2708_v32 }
0x15d9   :  { %2731 = vrot.lane.b32.xlu2 %v2725_v58, %s3886_s9 }
0x15da   :  { %v5021_v26 = vadd.f32 %v2722_v9, %v2711_v59 }
0x15dc   :  { %2727 = vrot.lane.b32.xlu1 %v5021_v26, %s3885_s23 }
0x1633   :  { %v2732_v47 = vpop.permute.xlu2 %2731 }
0x1649   :  { %v2847_v56 = vpop.permute.xlu0 %2846 }
0x164a   :  { %v2849_v37 = vsel %vm115_vm0, %v3327_v29, %v2847_v56 }
0x164b   :  { %3328 = vmatmul.msk.f32.vlgmr.msra.gmra.mxu1 %vm128_vm1, %v2849_v37 }
0x164e   :  { %v2728_v40 = vpop.permute.xlu1 %2727 }
0x164f   :  { %v2734_v63 = vsel %vm115_vm0, %v5011_v28, %v2728_v40  ;;  %v2851_v34 = vsel %vm115_vm0, %v2850_v46, %v2728_v40 }
0x1650   :  { %v2735_v36 = vsel %vm128_vm1, %v2734_v63, %v2732_v47  ;;  %v2852_v16 = vsel %vm128_vm1, %v2851_v34, %v2732_v47 }
0x1651   :  { %3324 = vmatmul.msk.f32.vlgmr.msra.gmra.mxu2 %vm155_vm2, %v2735_v36  ;;  %3329 = vmatmul.msk.f32.vlgmr.msrb.gmra.mxu0 %vm155_vm2, %v2852_v16 }
0x16c8   :  { %v2873_v22 = vpop.f32.mrf.mxu1 }
0x16c9   :  { %v5039_v50 = vadd.f32 %v3776_v42, %v2873_v22 }
0x16cb   :  { %2970 = vrot.lane.b32.xlu0 %v5039_v50, %s3887_s25  ;;  %v2933_v51 = vadd.f32 -0.8813736, %v5039_v50 }
0x16cd   :  { %v2934_v53 = vmul.f32 1.1715729, %v2933_v51 }
0x16ce   :  { %v2897_v17 = vpop.f32.mrf.mxu0 }
0x16cf   :  { %v5043_v60 = vadd.f32 %v3777_v19, %v2897_v17 }
0x16d1   :  { %v2901_v61 = vmul.f32 0.3926991, %v5043_v60  ;;  %v2935_v62 = vmul.f32 0.5390121, %v5043_v60  ;;  %2988 = vrot.lane.b32.xlu2 %v5043_v60, %s3887_s25 }
0x16d3   :  { %v2902_v52 = vadd.f32 1.0, %v2901_v61  ;;  %v2936_v15 = vadd.f32 1.0, %v2935_v62 }
0x16d5   :  { %3590 = vrsqrt.f32 %v2902_v52  ;;  %vm2909_vm5 = vweird.f32 %v2902_v52  ;;  %vm2943_vm8 = vweird.f32 %v2936_v15 }
0x16d6   :  { %3592 = vrsqrt.f32 %v2936_v15 }
0x16db   :  { %v3591_v6 = vpop.eup %3590 }
0x16dc   :  { %v2904_v43 = vmul.f32 %v3591_v6, %v2902_v52  ;;  %v3593_v21 = vpop.eup %3592  ;;  %vm2910_vm4 = vweird.f32 %v3591_v6 }
0x16dd   :  { %v2938_v24 = vmul.f32 %v3593_v21, %v2936_v15  ;;  %vm2911_vm6 = vmor %vm2909_vm5, %vm2910_vm4  ;;  %vm2944_vm7 = vweird.f32 %v3593_v21 }
0x16de   :  { %v2905_v33 = vmul.f32 %v3591_v6, %v2904_v43  ;;  %vm2945_vm9 = vmor %vm2943_vm8, %vm2944_vm7 }
0x16df   :  { %v2939_v44 = vmul.f32 %v3593_v21, %v2938_v24 }
0x16e0   :  { %v2906_v55 = vmul.f32 0.5, %v2905_v33 }
0x16e1   :  { %v2940_v54 = vmul.f32 0.5, %v2939_v44 }
0x16e2   :  { %v2907_v25 = vsub.f32 1.5, %v2906_v55 }
0x16e3   :  { %v2941_v5 = vsub.f32 1.5, %v2940_v54 }
0x16e4   :  { %v2908_v48 = vmul.f32 %v3591_v6, %v2907_v25 }
0x16e5   :  { %v2942_v10 = vmul.f32 %v3593_v21, %v2941_v5 }
0x16e6   :  { %v2912_v49 = vsel %vm2911_vm6, %v3591_v6, %v2908_v48 }
0x16e7   :  { %v2913_v39 = vmul.f32 %v2912_v49, %v5039_v50  ;;  %v2946_v7 = vsel %vm2945_vm9, %v3593_v21, %v2942_v10 }
0x16e8   :  { %v2947_v14 = vmul.f32 %v2946_v7, %v2934_v53 }
0x16e9   :  { %v3330_v45 = vmul.f32 -1.442695, %v2913_v39 }
0x16ea   :  { %v3331_v20 = vmul.f32 -1.442695, %v2947_v14 }
0x16eb   :  { %3594 = vpow2.f32 %v3330_v45 }
0x16f1   :  { %v3595_v11 = vpop.eup %3594 }
0x16f2   :  { %v2917_v4 = vadd.f32 1.0, %v3595_v11 }
0x16f4   :  { %3596 = vrcp.f32 %v2917_v4  ;;  %v2929_v35 = vand.u32 2147483648, %v2917_v4  ;;  %v2927_v0 = vand.u32 2147483647, %v2917_v4  ;;  %vm2923_vm11 = vweird.f32 %v2917_v4 }
0x16f5   :  { %3598 = vpow2.f32 %v3331_v20 }
0x16f6   :  { %v2930_v31 = vor.u32 1.1754944e-38, %v2929_v35  ;;  %vm2928_vm13 = vcmp.eq.f32.partialorder %v2927_v0, 8.507059e+37 }
0x16fa   :  { %v3597_v8 = vpop.eup %3596 }
0x16fb   :  { %v2919_v12 = vmul.f32 %v3597_v8, %v2917_v4  ;;  %vm2924_vm10 = vweird.f32 %v3597_v8  ;;  %v3599_v23 = vpop.eup %3598 }
0x16fc   :  { %vm2925_vm12 = vmor %vm2923_vm11, %vm2924_vm10  ;;  %v2951_v58 = vadd.f32 1.0, %v3599_v23 }
0x16fd   :  { %v2920_v3 = vsub.f32 1.0, %v2919_v12 }
0x16fe   :  { %3600 = vrcp.f32 %v2951_v58  ;;  %v2963_v46 = vand.u32 2147483648, %v2951_v58  ;;  %vm2957_vm15 = vweird.f32 %v2951_v58  ;;  %v2961_v40 = vand.u32 2147483647, %v2951_v58 }
0x16ff   :  { %v2921_v18 = vmul.f32 %v3597_v8, %v2920_v3 }
0x1700   :  { %v2964_v34 = vor.u32 1.1754944e-38, %v2963_v46  ;;  %vm2962_vm4 = vcmp.eq.f32.partialorder %v2961_v40, 8.507059e+37 }
0x1701   :  { %v2922_v38 = vadd.f32 %v3597_v8, %v2921_v18 }
0x1703   :  { %v2926_v1 = vsel %vm2925_vm12, %v3597_v8, %v2922_v38 }
0x1704   :  { %v5051_v32 = vsel %vm2928_vm13, %v2930_v31, %v2926_v1  ;;  %v3601_v9 = vpop.eup %3600  ;;  %v5078_v31 = vld [vmem:[%s5502_s7] ss:$0 sm:$0xff]  ;;  %s3888_s7 = smov 120  }
0x1705   :  { %2975 = vrot.lane.b32.xlu1 %v5051_v32, %s3885_s23  ;;  %v2953_v59 = vmul.f32 %v3601_v9, %v2951_v58  ;;  %vm2958_vm14 = vweird.f32 %v3601_v9  ;;  %v2967_v63 = vmul.f32 %v5051_v32, %v5051_v32  ;;  %v5087_v46 = vadd.f32 %v5078_v31, %v4879_v30 }
0x1706   :  { %vm2959_vm3 = vmor %vm2957_vm15, %vm2958_vm14 }
0x1707   :  { %v2954_v29 = vsub.f32 1.0, %v2953_v59 }
0x1709   :  { %v2955_v56 = vmul.f32 %v3601_v9, %v2954_v29 }
0x170b   :  { %v2956_v37 = vadd.f32 %v3601_v9, %v2955_v56 }
0x170d   :  { %v2960_v47 = vsel %vm2959_vm3, %v3601_v9, %v2956_v37  ;;  %v5082_v9 = vadd.f32 %v5078_v31, %v4474_v27 }
0x170e   :  { %v2965_v36 = vsel %vm2962_vm4, %v2964_v34, %v2960_v47  ;;  %v1596_v34 = vmul.f32 0.3926991, %v5087_v46 }
0x170f   :  { %v5057_v16 = vsub.f32 %v2965_v36, %v2967_v63  ;;  %v431_v56 = vmul.f32 0.3926991, %v5082_v9  ;;  %v2756_v36 = vpop.f32.mrf.mxu2 }
0x1711   :  { %v2984_v15 = vadd.f32 %v5057_v16, %v5051_v32  ;;  %v5089_v47 = vadd.f32 1.0, %v431_v56 }
0x172b   :  { %v2989_v22 = vpop.permute.xlu2 %2988 }
0x172c   :  { %v2992_v42 = vadd.f32 %v2989_v22, %v5057_v16  ;;  %v2991_v17 = vmul.f32 %v2989_v22, %v5057_v16 }
0x172e   :  { %3602 = vrcp.f32 %v2992_v42  ;;  %v5093_v42 = vadd.f32 1.0, %v1596_v34 }
0x172f   :  { %3604 = vrcp.f32 %v2984_v15 }
0x1734   :  { %v3603_v19 = vpop.eup %3602 }
0x1735   :  { %v2994_v61 = vmul.f32 %v3603_v19, %v2991_v17  ;;  %v5069_v55 = vpop.eup %3604  ;;  %v5096_v17 = vadd.f32 %v5078_v31, %v2756_v36 }
0x1737   :  { %3001 = vrot.lane.b32.xlu2 %v2994_v61, %s3886_s9 }
0x173d   :  { %v2971_v6 = vpop.permute.xlu0 %2970 }
0x173e   :  { %v2973_v43 = vmul.f32 %v2971_v6, %v5057_v16 }
0x1777   :  { %v2976_v62 = vpop.permute.xlu1 %2975 }
0x1778   :  { %v2978_v52 = vmul.f32 %v2976_v62, %v5043_v60 }
0x177a   :  { %2980 = vrot.lane.b32.xlu1 %v2978_v52, %s3887_s25 }
0x1782   :  { %3082 = vrot.lane.b32.xlu1 %v5051_v32, %s3887_s25 }
0x1791   :  { %v3002_v25 = vpop.permute.xlu2 %3001 }
0x1792   :  { %v3004_v48 = vadd.f32 %v3002_v25, %v5043_v60 }
0x1794   :  { %v3006_v44 = vmul.f32 1.5707964, %v3004_v48  ;;  %v3040_v39 = vmul.f32 2.1560483, %v3004_v48 }
0x1796   :  { %v3007_v49 = vadd.f32 1.0, %v3006_v44  ;;  %v3041_v45 = vadd.f32 1.0, %v3040_v39 }
0x1798   :  { %3606 = vrsqrt.f32 %v3007_v49  ;;  %vm3014_vm6 = vweird.f32 %v3007_v49  ;;  %vm3048_vm9 = vweird.f32 %v3041_v45 }
0x1799   :  { %3608 = vrsqrt.f32 %v3041_v45 }
0x179e   :  { %v3607_v54 = vpop.eup %3606 }
0x179f   :  { %v3009_v5 = vmul.f32 %v3607_v54, %v3007_v49  ;;  %v3609_v11 = vpop.eup %3608  ;;  %vm3015_vm5 = vweird.f32 %v3607_v54 }
0x17a0   :  { %v3043_v51 = vmul.f32 %v3609_v11, %v3041_v45  ;;  %vm3016_vm7 = vmor %vm3014_vm6, %vm3015_vm5  ;;  %vm3049_vm8 = vweird.f32 %v3609_v11  ;;  %v5106_v45 = vadd.f32 %v5078_v31, %v4654_v57 }
0x17a1   :  { %v3010_v10 = vmul.f32 %v3607_v54, %v3009_v5  ;;  %vm3050_vm10 = vmor %vm3048_vm9, %vm3049_vm8 }
0x17a2   :  { %v3044_v7 = vmul.f32 %v3609_v11, %v3043_v51 }
0x17a3   :  { %v3011_v4 = vmul.f32 0.5, %v3010_v10 }
0x17a4   :  { %v3045_v53 = vmul.f32 0.5, %v3044_v7 }
0x17a5   :  { %v3012_v14 = vsub.f32 1.5, %v3011_v4 }
0x17a6   :  { %v3046_v8 = vsub.f32 1.5, %v3045_v53 }
0x17a7   :  { %v3013_v12 = vmul.f32 %v3607_v54, %v3012_v14 }
0x17a8   :  { %v3047_v18 = vmul.f32 %v3609_v11, %v3046_v8 }
0x17a9   :  { %v3017_v35 = vsel %vm3016_vm7, %v3607_v54, %v3013_v12  ;;  %vm439_vm7 = vweird.f32 %v5089_v47 }
0x17aa   :  { %v3051_v58 = vsel %vm3050_vm10, %v3609_v11, %v3047_v18  ;;  %vm1604_vm10 = vweird.f32 %v5093_v42 }
0x17ec   :  { %v2981_v21 = vpop.permute.xlu1 %2980 }
0x17ed   :  { %v2983_v33 = vadd.f32 %v2981_v21, %v2973_v43  ;;  %v2760_v43 = vmul.f32 0.3926991, %v5096_v17 }
0x17ef   :  { %v2986_v24 = vmul.f32 %v5069_v55, %v2983_v33  ;;  %v2761_v5 = vadd.f32 1.0, %v2760_v43 }
0x17f1   :  { %2996 = vrot.lane.b32.xlu0 %v2986_v24, %s3886_s9 }
0x17f4   :  { %v3083_v18 = vpop.permute.xlu1 %3082 }
0x1863   :  { %v2997_v20 = vpop.permute.xlu0 %2996 }
0x1864   :  { %v2999_v60 = vadd.f32 %v2997_v20, %v5039_v50  ;;  %v858_v20 = vmul.f32 0.5390121, %v5106_v45 }
0x1866   :  { %v3005_v3 = vmul.f32 2.0, %v2999_v60 }
0x1868   :  { %v3018_v0 = vmul.f32 %v3017_v35, %v3005_v3  ;;  %v3038_v38 = vadd.f32 -0.8813736, %v3005_v3 }
0x186a   :  { %v3332_v1 = vmul.f32 -1.442695, %v3018_v0  ;;  %v3039_v23 = vmul.f32 1.1715729, %v3038_v38  ;;  %v859_v0 = vadd.f32 1.0, %v858_v20  ;;  %v5114_v38 = vadd.f32 %v5078_v31, %v4963_v13 }
0x186c   :  { %3610 = vpow2.f32 %v3332_v1  ;;  %v3052_v50 = vmul.f32 %v3051_v58, %v3039_v23 }
0x186e   :  { %v3333_v59 = vmul.f32 -1.442695, %v3052_v50 }
0x1870   :  { %3612 = vpow2.f32 %v3333_v59  ;;  %v2022_v59 = vmul.f32 0.5390121, %v5114_v38 }
0x1872   :  { %v3611_v29 = vpop.eup %3610  ;;  %v2023_v13 = vadd.f32 1.0, %v2022_v59 }
0x1873   :  { %v3022_v37 = vadd.f32 1.0, %v3611_v29 }
0x1875   :  { %3614 = vrcp.f32 %v3022_v37  ;;  %v3032_v61 = vand.u32 2147483647, %v3022_v37  ;;  %v3034_v62 = vand.u32 2147483648, %v3022_v37  ;;  %vm3028_vm12 = vweird.f32 %v3022_v37 }
0x1876   :  { %v3613_v40 = vpop.eup %3612 }
0x1877   :  { %v3056_v63 = vadd.f32 1.0, %v3613_v40  ;;  %vm3033_vm14 = vcmp.eq.f32.partialorder %v3032_v61, 8.507059e+37  ;;  %v3035_v24 = vor.u32 1.1754944e-38, %v3034_v62 }
0x1879   :  { %3616 = vrcp.f32 %v3056_v63  ;;  %v3068_v25 = vand.u32 2147483648, %v3056_v63  ;;  %v3066_v39 = vand.u32 2147483647, %v3056_v63  ;;  %vm3062_vm3 = vweird.f32 %v3056_v63 }
0x187a   :  { %3618 = vrsqrt.f32 %v5089_v47 }
0x187b   :  { %v3615_v27 = vpop.eup %3614  ;;  %3620 = vrsqrt.f32 %v5093_v42  ;;  %v3069_v4 = vor.u32 1.1754944e-38, %v3068_v25  ;;  %vm3067_vm5 = vcmp.eq.f32.partialorder %v3066_v39, 8.507059e+37  ;;  %v820_v39 = vmul.f32 0.3926991, %v5106_v45 }
0x187c   :  { %v3024_v22 = vmul.f32 %v3615_v27, %v3022_v37  ;;  %vm3029_vm11 = vweird.f32 %v3615_v27  ;;  %3622 = vrsqrt.f32 %v2761_v5 }
0x187d   :  { %vm3030_vm13 = vmor %vm3028_vm12, %vm3029_vm11  ;;  %3624 = vrsqrt.f32 %v859_v0 }
0x187e   :  { %v3025_v30 = vsub.f32 1.0, %v3024_v22  ;;  %3626 = vrsqrt.f32 %v2023_v13 }
0x187f   :  { %v3617_v19 = vpop.eup %3616 }
0x1880   :  { %v5098_v52 = vpop.eup %3618  ;;  %v3026_v15 = vmul.f32 %v3615_v27, %v3025_v30  ;;  %v3058_v6 = vmul.f32 %v3617_v19, %v3056_v63  ;;  %vm3063_vm15 = vweird.f32 %v3617_v19 }
0x1881   :  { %v434_v48 = vmul.f32 %v5098_v52, %v5089_v47  ;;  %v3621_v51 = vpop.eup %3620  ;;  %vm3064_vm4 = vmor %vm3062_vm3, %vm3063_vm15  ;;  %vm440_vm6 = vweird.f32 %v5098_v52  ;;  %vm866_vm3 = vweird.f32 %v859_v0 }
0x1882   :  { %v3027_v21 = vadd.f32 %v3615_v27, %v3026_v15  ;;  %v3059_v33 = vsub.f32 1.0, %v3058_v6  ;;  %v1599_v3 = vmul.f32 %v3621_v51, %v5093_v42  ;;  %v3623_v50 = vpop.eup %3622  ;;  %vm441_vm8 = vmor %vm439_vm7, %vm440_vm6  ;;  %vm1605_vm9 = vweird.f32 %v3621_v51 }
0x1883   :  { %v435_v7 = vmul.f32 %v5098_v52, %v434_v48  ;;  %v2763_v37 = vmul.f32 %v3623_v50, %v2761_v5  ;;  %vm1606_vm11 = vmor %vm1604_vm10, %vm1605_vm9  ;;  %vm2769_vm12 = vweird.f32 %v3623_v50  ;;  %vm2030_vm6 = vweird.f32 %v2023_v13 }
0x1884   :  { %v3031_v44 = vsel %vm3030_vm13, %v3615_v27, %v3027_v21  ;;  %v3060_v49 = vmul.f32 %v3617_v19, %v3059_v33  ;;  %v1600_v58 = vmul.f32 %v3621_v51, %v1599_v3  ;;  %v3625_v27 = vpop.eup %3624  ;;  %vm2768_vm13 = vweird.f32 %v2761_v5 }
0x1885   :  { %v3036_v54 = vsel %vm3033_vm14, %v3035_v24, %v3031_v44  ;;  %v436_v60 = vmul.f32 0.5, %v435_v7  ;;  %v2764_v34 = vmul.f32 %v3623_v50, %v2763_v37  ;;  %v861_v30 = vmul.f32 %v3625_v27, %v859_v0  ;;  %v3627_v62 = vpop.eup %3626  ;;  %vm2770_vm14 = vmor %vm2768_vm13, %vm2769_vm12 }
0x1886   :  { %v3074_v11 = vmul.f32 2.0, %v3036_v54  ;;  %v3061_v10 = vadd.f32 %v3617_v19, %v3060_v49  ;;  %v3072_v8 = vmul.f32 %v3036_v54, %v3036_v54  ;;  %v1601_v56 = vmul.f32 0.5, %v1600_v58 }
0x1887   :  { %v437_v23 = vsub.f32 1.5, %v436_v60  ;;  %v2765_v22 = vmul.f32 0.5, %v2764_v34  ;;  %v862_v61 = vmul.f32 %v3625_v27, %v861_v30  ;;  %v2025_v6 = vmul.f32 %v3627_v62, %v2023_v13 }
0x1888   :  { %v3334_v53 = vadd.f32 -1.0, %v3074_v11  ;;  %v3065_v14 = vsel %vm3064_vm4, %v3617_v19, %v3061_v10  ;;  %v1602_v63 = vsub.f32 1.5, %v1601_v56  ;;  %vm867_vm15 = vweird.f32 %v3625_v27 }
0x1889   :  { %v3070_v12 = vsel %vm3067_vm5, %v3069_v4, %v3065_v14  ;;  %v438_v29 = vmul.f32 %v5098_v52, %v437_v23  ;;  %v2766_v47 = vsub.f32 1.5, %v2765_v22  ;;  %v863_v15 = vmul.f32 0.5, %v862_v61  ;;  %vm868_vm4 = vmor %vm866_vm3, %vm867_vm15 }
0x188a   :  { %3078 = vrot.lane.b32.xlu0 %v3334_v53, %s3885_s23  ;;  %v3073_v57 = vsub.f32 %v3070_v12, %v3072_v8  ;;  %v1603_v36 = vmul.f32 %v3621_v51, %v1602_v63  ;;  %v2026_v33 = vmul.f32 %v3627_v62, %v2025_v6  ;;  %vm2031_vm5 = vweird.f32 %v3627_v62 }
0x188b   :  { %v442_v40 = vsel %vm441_vm8, %v5098_v52, %v438_v29  ;;  %v2767_v52 = vmul.f32 %v3623_v50, %v2766_v47  ;;  %v864_v21 = vsub.f32 1.5, %v863_v15  ;;  %vm2032_vm7 = vmor %vm2030_vm6, %vm2031_vm5  ;;  %v821_v54 = vadd.f32 1.0, %v820_v39 }
0x188c   :  { %v3076_v35 = vmul.f32 4.0, %v3073_v57  ;;  %v1607_v19 = vsel %vm1606_vm11, %v3621_v51, %v1603_v36  ;;  %v2027_v42 = vmul.f32 0.5, %v2026_v33  ;;  %v1984_v5 = vmul.f32 0.3926991, %v5114_v38 }
0x188d   :  { %v2771_v43 = vsel %vm2770_vm14, %v3623_v50, %v2767_v52  ;;  %v865_v24 = vmul.f32 %v3625_v27, %v864_v21  ;;  %3628 = vrsqrt.f32 %v821_v54  ;;  %v5133_v11 = vadd.f32 %v5078_v31, %v4784_v2 }
0x188e   :  { %3093 = vrot.lane.b32.xlu2 %v3076_v35, %s3885_s23  ;;  %v3085_v1 = vmul.f32 %v3083_v18, %v3076_v35  ;;  %v2028_v48 = vsub.f32 1.5, %v2027_v42  ;;  %v5135_v10 = vadd.f32 1.0, %v1984_v5  ;;  %v3108_v51 = vadd.f32 %v5057_v16, %v5021_v26 }
0x188f   :  { %v869_v25 = vsel %vm868_vm4, %v3625_v27, %v865_v24  ;;  %v1246_v7 = vmul.f32 0.5390121, %v5133_v11  ;;  %v1208_v2 = vmul.f32 0.3926991, %v5133_v11  ;;  %v3107_v35 = vmul.f32 %v5057_v16, %v5021_v26 }
0x1890   :  { %3087 = vrot.lane.b32.xlu1 %v3085_v1, %s3885_s23  ;;  %v2029_v44 = vmul.f32 %v3627_v62, %v2028_v48  ;;  %3630 = vrsqrt.f32 %v5135_v10  ;;  %v5153_v1 = vadd.f32 %v5078_v31, %v5037_v41  ;;  %v3100_v63 = vsub.f32 1.0, %v5051_v32 }
0x1891   :  { %3632 = vrcp.f32 %v3108_v51  ;;  %v5142_v12 = vadd.f32 1.0, %v1246_v7  ;;  %v5149_v0 = vadd.f32 1.0, %v1208_v2  ;;  %vm828_vm9 = vweird.f32 %v821_v54 }
0x1892   :  { %v2033_v49 = vsel %vm2032_vm7, %v3627_v62, %v2029_v44  ;;  %v2372_v37 = vmul.f32 0.3926991, %v5153_v1  ;;  %v3104_v41 = vadd.f32 %v3100_v63, %v5057_v16  ;;  %v3101_v15 = vmul.f32 %v5057_v16, %v5011_v28 }
0x1893   :  { %v3629_v4 = vpop.eup %3628  ;;  %v3102_v33 = vmul.f32 %v3100_v63, %v5021_v26  ;;  %vm1992_vm12 = vweird.f32 %v5135_v10  ;;  %vm1254_vm15 = vweird.f32 %v5142_v12  ;;  %vm1216_vm5 = vweird.f32 %v5149_v0 }
0x1894   :  { %v823_v8 = vmul.f32 %v3629_v4, %v821_v54  ;;  %v5165_v27 = vadd.f32 1.0, %v2372_v37  ;;  %vm829_vm8 = vweird.f32 %v3629_v4  ;;  %v1634_v54 = vmul.f32 0.5390121, %v5087_v46 }
0x1895   :  { %vm830_vm10 = vmor %vm828_vm9, %vm829_vm8 }
0x1896   :  { %v824_v20 = vmul.f32 %v3629_v4, %v823_v8  ;;  %v3631_v57 = vpop.eup %3630  ;;  %vm2380_vm8 = vweird.f32 %v5165_v27 }
0x1897   :  { %v3633_v60 = vpop.eup %3632  ;;  %v1987_v58 = vmul.f32 %v3631_v57, %v5135_v10  ;;  %vm1993_vm11 = vweird.f32 %v3631_v57 }
0x1898   :  { %444 = vrot.lane.b32.xlu1 %v442_v40, %s3888_s7  ;;  %v825_v23 = vmul.f32 0.5, %v824_v20  ;;  %v3110_v59 = vmul.f32 %v3633_v60, %v3107_v35  ;;  %vm1994_vm13 = vmor %vm1992_vm12, %vm1993_vm11 }
0x1899   :  { %v1988_v40 = vmul.f32 %v3631_v57, %v1987_v58 }
0x189a   :  { %v826_v13 = vsub.f32 1.5, %v825_v23 }
0x189b   :  { %v1989_v22 = vmul.f32 0.5, %v1988_v40 }
0x189c   :  { %v827_v36 = vmul.f32 %v3629_v4, %v826_v13 }
0x189d   :  { %v1990_v61 = vsub.f32 1.5, %v1989_v22 }
0x189e   :  { %v831_v47 = vsel %vm830_vm10, %v3629_v4, %v827_v36 }
0x189f   :  { %v1991_v24 = vmul.f32 %v3631_v57, %v1990_v61 }
0x18a0   :  { %1609 = vrot.lane.b32.xlu1 %v1607_v19, %s3888_s7  ;;  %v469_v19 = vmul.f32 0.5390121, %v5082_v9 }
0x18a1   :  { %v1995_v26 = vsel %vm1994_vm13, %v3631_v57, %v1991_v24 }
0x18a2   :  { %v5174_v6 = vadd.f32 1.0, %v469_v19 }
0x18a4   :  { %vm477_vm11 = vweird.f32 %v5174_v6 }
0x18a8   :  { %2773 = vrot.lane.b32.xlu1 %v2771_v43, %s3888_s7 }
0x18b0   :  { %871 = vrot.lane.b32.xlu1 %v869_v25, %s3888_s7 }
0x18b8   :  { %2035 = vrot.lane.b32.xlu1 %v2033_v49, %s3888_s7  ;;  %v3103_v49 = vadd.f32 %v3102_v33, %v3101_v15 }
0x18e8   :  { %v3094_v53 = vpop.permute.xlu2 %3093 }
0x18e9   :  { %v3097_v14 = vadd.f32 %v3094_v53, %v5057_v16  ;;  %v3096_v3 = vmul.f32 %v3094_v53, %v5057_v16  ;;  %v1635_v53 = vadd.f32 1.0, %v1634_v54 }
0x18eb   :  { %3634 = vrcp.f32 %v3097_v14 }
0x18ec   :  { %3636 = vrsqrt.f32 %v5142_v12 }
0x18ed   :  { %3638 = vrsqrt.f32 %v5149_v0 }
0x18ee   :  { %3640 = vrcp.f32 %v3104_v41 }
0x18ef   :  { %3642 = vrsqrt.f32 %v5165_v27 }
0x18f0   :  { %3644 = vrsqrt.f32 %v5174_v6 }
0x18f1   :  { %v3635_v18 = vpop.eup %3634  ;;  %3646 = vrsqrt.f32 %v1635_v53 }
0x18f2   :  { %v3099_v50 = vmul.f32 %v3635_v18, %v3096_v3  ;;  %v5156_v56 = vpop.eup %3636 }
0x18f3   :  { %v1249_v34 = vmul.f32 %v5156_v56, %v5142_v12  ;;  %v3639_v30 = vpop.eup %3638  ;;  %vm1255_vm14 = vweird.f32 %v5156_v56 }
0x18f4   :  { %v3112_v29 = vadd.f32 %v3110_v59, %v3099_v50  ;;  %v1211_v52 = vmul.f32 %v3639_v30, %v5149_v0  ;;  %v3641_v42 = vpop.eup %3640  ;;  %vm1256_vm3 = vmor %vm1254_vm15, %vm1255_vm14  ;;  %vm1217_vm4 = vweird.f32 %v3639_v30  ;;  %vm1642_vm14 = vweird.f32 %v1635_v53 }
0x18f5   :  { %v1250_v32 = vmul.f32 %v5156_v56, %v1249_v34  ;;  %v3643_v44 = vpop.eup %3642  ;;  %v3106_v5 = vmul.f32 %v3641_v42, %v3103_v49  ;;  %vm1218_vm6 = vmor %vm1216_vm5, %vm1217_vm4  ;;  %v2020_v42 = vadd.f32 -0.8813736, %v5114_v38 }
0x18f6   :  { %3115 = vrot.lane.b32.xlu2 %v3112_v29, %s3885_s23  ;;  %v1212_v48 = vmul.f32 %v3639_v30, %v1211_v52  ;;  %v2375_v4 = vmul.f32 %v3643_v44, %v5165_v27  ;;  %v3645_v8 = vpop.eup %3644  ;;  %vm2381_vm7 = vweird.f32 %v3643_v44 }
0x18f7   :  { %v1251_v43 = vmul.f32 0.5, %v1250_v32  ;;  %v472_v35 = vmul.f32 %v3645_v8, %v5174_v6  ;;  %v3647_v50 = vpop.eup %3646  ;;  %vm2382_vm9 = vmor %vm2380_vm8, %vm2381_vm7  ;;  %vm478_vm10 = vweird.f32 %v3645_v8 }
0x18f8   :  { %v1213_v51 = vmul.f32 0.5, %v1212_v48  ;;  %v2376_v20 = vmul.f32 %v3643_v44, %v2375_v4  ;;  %vm479_vm12 = vmor %vm477_vm11, %vm478_vm10  ;;  %vm1643_vm13 = vweird.f32 %v3647_v50 }
0x18f9   :  { %v1252_v28 = vsub.f32 1.5, %v1251_v43  ;;  %v473_v12 = vmul.f32 %v3645_v8, %v472_v35  ;;  %vm1644_vm15 = vmor %vm1642_vm14, %vm1643_vm13  ;;  %v856_v43 = vadd.f32 -0.8813736, %v5106_v45 }
0x18fa   :  { %v1214_v2 = vsub.f32 1.5, %v1213_v51  ;;  %v2377_v3 = vmul.f32 0.5, %v2376_v20 }
0x18fb   :  { %v1253_v14 = vmul.f32 %v5156_v56, %v1252_v28  ;;  %v474_v29 = vmul.f32 0.5, %v473_v12  ;;  %v857_v33 = vmul.f32 1.1715729, %v856_v43 }
0x18fc   :  { %v3079_v62 = vpop.permute.xlu0 %3078  ;;  %v1215_v60 = vmul.f32 %v3639_v30, %v1214_v2  ;;  %v2378_v58 = vsub.f32 1.5, %v2377_v3 }
0x18fd   :  { %v3081_v21 = vmul.f32 %v3079_v62, %v5057_v16  ;;  %v1257_v57 = vsel %vm1256_vm3, %v5156_v56, %v1253_v14  ;;  %v1637_v56 = vmul.f32 %v3647_v50, %v1635_v53  ;;  %v475_v13 = vsub.f32 1.5, %v474_v29 }
0x18fe   :  { %833 = vrot.lane.b32.xlu2 %v831_v47, %s3888_s7  ;;  %v1219_v23 = vsel %vm1218_vm6, %v3639_v30, %v1215_v60  ;;  %v2379_v59 = vmul.f32 %v3643_v44, %v2378_v58 }
0x18ff   :  { %v1638_v40 = vmul.f32 %v3647_v50, %v1637_v56  ;;  %v476_v63 = vmul.f32 %v3645_v8, %v475_v13 }
0x1900   :  { %v2383_v37 = vsel %vm2382_vm9, %v3643_v44, %v2379_v59  ;;  %v2021_v44 = vmul.f32 1.1715729, %v2020_v42 }
0x1901   :  { %v1639_v41 = vmul.f32 0.5, %v1638_v40  ;;  %v480_v36 = vsel %vm479_vm12, %v3645_v8, %v476_v63 }
0x1902   :  { %v3088_v25 = vpop.permute.xlu1 %3087 }
0x1903   :  { %v3090_v39 = vadd.f32 %v3088_v25, %v3081_v21  ;;  %v1640_v22 = vsub.f32 1.5, %v1639_v41 }
0x1905   :  { %v3091_v16 = vmul.f32 %v5069_v55, %v3090_v39  ;;  %v2798_v55 = vmul.f32 0.5390121, %v5096_v17  ;;  %v1641_v27 = vmul.f32 %v3647_v50, %v1640_v22 }
0x1906   :  { %1997 = vrot.lane.b32.xlu2 %v1995_v26, %s3888_s7 }
0x1907   :  { %v5184_v7 = vadd.f32 %v3106_v5, %v3091_v16  ;;  %v2799_v18 = vadd.f32 1.0, %v2798_v55  ;;  %v1645_v47 = vsel %vm1644_vm15, %v3647_v50, %v1641_v27 }
0x1909   :  { %v3113_v10 = vmul.f32 %v5184_v7, %v5184_v7  ;;  %3648 = vrsqrt.f32 %v2799_v18  ;;  %vm2806_vm4 = vweird.f32 %v2799_v18 }
0x190a   :  { %v5201_v19 = vpop.permute.xlu1 %444 }
0x190b   :  { %3119 = vrot.lane.b32.xlu0 %v3113_v10, %s3886_s9  ;;  %s3889_s9 = smov [#allocation8]  }
0x190c   :  { %s3235_s22 = sshll.u32 %s3889_s9, 4  ;;  %s3236_s22 = int_to_ptr.vmem [resolvable:$true] %s3235_s22 }
0x190e   :  { %1259 = vrot.lane.b32.xlu2 %v1257_v57, %s3888_s7 }
0x190f   :  { %v3649_v0 = vpop.eup %3648 }
0x1910   :  { %v2801_v34 = vmul.f32 %v3649_v0, %v2799_v18  ;;  %vm2807_vm3 = vweird.f32 %v3649_v0 }
0x1911   :  { %vm2808_vm5 = vmor %vm2806_vm4, %vm2807_vm3 }
0x1912   :  { %v2802_v30 = vmul.f32 %v3649_v0, %v2801_v34  ;;  %v5205_v62 = vpop.permute.xlu1 %1609 }
0x1913   :  { %1221 = vrot.lane.b32.xlu0 %v1219_v23, %s3888_s7 }
0x1914   :  { %v2803_v32 = vmul.f32 0.5, %v2802_v30 }
0x1916   :  { %v2804_v61 = vsub.f32 1.5, %v2803_v32 }
0x1918   :  { %v2805_v52 = vmul.f32 %v3649_v0, %v2804_v61 }
0x191a   :  { %v2809_v15 = vsel %vm2808_vm5, %v3649_v0, %v2805_v52  ;;  %v5208_v6 = vpop.permute.xlu1 %2773 }
0x191b   :  { %2385 = vrot.lane.b32.xlu0 %v2383_v37, %s3888_s7 }
0x1922   :  { %v872_v21 = vpop.permute.xlu1 %871 }
0x1923   :  { %482 = vrot.lane.b32.xlu0 %v480_v36, %s3888_s7  ;;  %v874_v24 = vmul.f32 %v872_v21, %v857_v33 }
0x1925   :  { %v3271_v25 = vmul.f32 -1.442695, %v874_v24 }
0x1927   :  { %3650 = vpow2.f32 %v3271_v25 }
0x192a   :  { %v2036_v48 = vpop.permute.xlu1 %2035 }
0x192b   :  { %1647 = vrot.lane.b32.xlu0 %v1645_v47, %s3888_s7  ;;  %v2038_v49 = vmul.f32 %v2036_v48, %v2021_v44 }
0x192d   :  { %v3304_v28 = vmul.f32 -1.442695, %v2038_v49  ;;  %v3651_v54 = vpop.eup %3650 }
0x192e   :  { %v878_v5 = vadd.f32 1.0, %v3651_v54 }
0x192f   :  { %3652 = vpow2.f32 %v3304_v28 }
0x1930   :  { %3654 = vrcp.f32 %v878_v5  ;;  %vm884_vm8 = vweird.f32 %v878_v5  ;;  %v890_v13 = vand.u32 2147483648, %v878_v5  ;;  %v888_v63 = vand.u32 2147483647, %v878_v5 }
0x1932   :  { %v891_v47 = vor.u32 1.1754944e-38, %v890_v13  ;;  %vm889_vm13 = vcmp.eq.f32.partialorder %v888_v63, 8.507059e+37 }
0x1933   :  { %2811 = vrot.lane.b32.xlu0 %v2809_v15, %s3888_s7 }
0x1935   :  { %v3653_v4 = vpop.eup %3652 }
0x1936   :  { %v5215_v53 = vadd.f32 1.0, %v3653_v4  ;;  %v3655_v8 = vpop.eup %3654 }
0x1937   :  { %v880_v57 = vmul.f32 %v3655_v8, %v878_v5  ;;  %vm885_vm6 = vweird.f32 %v3655_v8 }
0x1938   :  { %vm5223_vm10 = vmor %vm884_vm8, %vm885_vm6  ;;  %vm2048_vm3 = vweird.f32 %v5215_v53  ;;  %v2054_v25 = vand.u32 2147483648, %v5215_v53  ;;  %v2052_v49 = vand.u32 2147483647, %v5215_v53 }
0x193a   :  { %vm2053_vm8 = vcmp.eq.f32.partialorder %v2052_v49, 8.507059e+37 }
0x1950   :  { %v5212_v39 = vpop.permute.xlu2 %3115 }
0x1951   :  { %v3122_v54 = vsel %vm115_vm0, %v5184_v7, %v5212_v39  ;;  %vm511_vm0 = vcmask 64512  }
0x1958   :  { %v834_v16 = vpop.permute.xlu2 %833 }
0x1959   :  { %v836_v26 = vmul.f32 %v834_v16, %v5106_v45  ;;  %v881_v45 = vsub.f32 1.0, %v880_v57  ;;  %v1244_v57 = vadd.f32 -0.8813736, %v5133_v11 }
0x195b   :  { %v3270_v51 = vmul.f32 -1.442695, %v836_v26 }
0x195d   :  { %3656 = vpow2.f32 %v3270_v51 }
0x195e   :  { %3658 = vrcp.f32 %v5215_v53 }
0x1960   :  { %v1998_v10 = vpop.permute.xlu2 %1997 }
0x1961   :  { %v2000_v14 = vmul.f32 %v1998_v10, %v5114_v38  ;;  %v882_v38 = vmul.f32 %v3655_v8, %v881_v45  ;;  %v2055_v10 = vor.u32 1.1754944e-38, %v2054_v25 }
0x1963   :  { %v3657_v2 = vpop.eup %3656  ;;  %v3303_v20 = vmul.f32 -1.442695, %v2000_v14  ;;  %v883_v37 = vadd.f32 %v3655_v8, %v882_v38 }
0x1964   :  { %v840_v55 = vadd.f32 1.0, %v3657_v2  ;;  %v5219_v60 = vpop.eup %3658 }
0x1965   :  { %3660 = vpow2.f32 %v3303_v20  ;;  %v2044_v23 = vmul.f32 %v5219_v60, %v5215_v53  ;;  %v887_v30 = vsel %vm5223_vm10, %v3655_v8, %v883_v37  ;;  %vm2049_vm14 = vweird.f32 %v5219_v60 }
0x1966   :  { %3662 = vrcp.f32 %v840_v55  ;;  %v852_v50 = vand.u32 2147483648, %v840_v55  ;;  %v850_v56 = vand.u32 2147483647, %v840_v55  ;;  %vm846_vm9 = vweird.f32 %v840_v55  ;;  %vm5235_vm5 = vmor %vm2048_vm3, %vm2049_vm14 }
0x1967   :  { %v2045_v59 = vsub.f32 1.0, %v2044_v23  ;;  %v892_v15 = vsel %vm889_vm13, %v891_v47, %v887_v30 }
0x1968   :  { %v853_v34 = vor.u32 1.1754944e-38, %v852_v50  ;;  %vm851_vm12 = vcmp.eq.f32.partialorder %v850_v56, 8.507059e+37  ;;  %v1260_v45 = vpop.permute.xlu2 %1259  ;;  %v2410_v56 = vmul.f32 0.5390121, %v5153_v1 }
0x1969   :  { %v2046_v36 = vmul.f32 %v5219_v60, %v2045_v59 }
0x196a   :  { %v5264_v63 = vadd.f32 1.0, %v2410_v56 }
0x196b   :  { %v3661_v3 = vpop.eup %3660  ;;  %v2047_v21 = vadd.f32 %v5219_v60, %v2046_v36 }
0x196c   :  { %v3663_v35 = vpop.eup %3662  ;;  %v2004_v18 = vadd.f32 1.0, %v3661_v3  ;;  %v447_v3 = vmul.f32 %v5201_v19, %v5082_v9  ;;  %v1612_v19 = vmul.f32 %v5205_v62, %v5087_v46 }
0x196d   :  { %v842_v58 = vmul.f32 %v3663_v35, %v840_v55  ;;  %vm847_vm7 = vweird.f32 %v3663_v35  ;;  %v2051_v26 = vsel %vm5235_vm5, %v5219_v60, %v2047_v21 }
0x196e   :  { %3664 = vrcp.f32 %v2004_v18  ;;  %vm848_vm11 = vmor %vm846_vm9, %vm847_vm7  ;;  %v2016_v43 = vand.u32 2147483648, %v2004_v18  ;;  %v2014_v42 = vand.u32 2147483647, %v2004_v18  ;;  %vm2010_vm4 = vweird.f32 %v2004_v18 }
0x196f   :  { %v843_v12 = vsub.f32 1.0, %v842_v58  ;;  %v2056_v14 = vsel %vm2053_vm8, %v2055_v10, %v2051_v26  ;;  %v3259_v50 = vmul.f32 -1.442695, %v447_v3  ;;  %vm2418_vm8 = vweird.f32 %v5264_v63 }
0x1970   :  { %v2017_v28 = vor.u32 1.1754944e-38, %v2016_v43  ;;  %vm2015_vm7 = vcmp.eq.f32.partialorder %v2014_v42, 8.507059e+37 }
0x1971   :  { %v844_v29 = vmul.f32 %v3663_v35, %v843_v12 }
0x1973   :  { %v845_v40 = vadd.f32 %v3663_v35, %v844_v29 }
0x1974   :  { %v3665_v41 = vpop.eup %3664 }
0x1975   :  { %v849_v22 = vsel %vm848_vm11, %v3663_v35, %v845_v40  ;;  %v2006_v27 = vmul.f32 %v3665_v41, %v2004_v18  ;;  %vm2011_vm15 = vweird.f32 %v3665_v41  ;;  %v1245_v35 = vmul.f32 1.1715729, %v1244_v57 }
0x1976   :  { %v854_v32 = vsel %vm851_vm12, %v853_v34, %v849_v22  ;;  %vm2012_vm6 = vmor %vm2010_vm4, %vm2011_vm15  ;;  %v467_v18 = vadd.f32 -0.8813736, %v5082_v9  ;;  %v1632_v40 = vadd.f32 -0.8813736, %v5087_v46  ;;  %v2776_v46 = vmul.f32 %v5208_v6, %v5096_v17 }
0x1977   :  { %v894_v61 = vmul.f32 %v854_v32, %v854_v32  ;;  %v2007_v52 = vsub.f32 1.0, %v2006_v27  ;;  %v1262_v12 = vmul.f32 %v1260_v45, %v1245_v35 }
0x1978   :  { %v468_v59 = vmul.f32 1.1715729, %v467_v18  ;;  %v1633_v22 = vmul.f32 1.1715729, %v1632_v40  ;;  %v3325_v21 = vmul.f32 -1.442695, %v2776_v46 }
0x1979   :  { %v895_v33 = vsub.f32 %v892_v15, %v894_v61  ;;  %v2008_v24 = vmul.f32 %v3665_v41, %v2007_v52 }
0x197b   :  { %897 = vrot.lane.b32.xlu0 %v895_v33, %s3882_s14  ;;  %v2009_v48 = vadd.f32 %v3665_v41, %v2008_v24 }
0x197d   :  { %v3120_v5 = vpop.permute.xlu0 %3119  ;;  %v2013_v16 = vsel %vm2012_vm6, %v3665_v41, %v2009_v48  ;;  %v3292_v41 = vmul.f32 -1.442695, %v1612_v19 }
0x197e   :  { %v3123_v51 = vsel %vm128_vm1, %v3122_v54, %v3120_v5  ;;  %v2018_v4 = vsel %vm2015_vm7, %v2017_v28, %v2013_v16  ;;  %vm513_vm1 = vcmask 123904  }
0x197f   :  { %3335 = vmatmul.msk.f32.vlgmr.msrb.gmra.mxu3 %vm155_vm2, %v3123_v51  ;;  %v2058_v53 = vmul.f32 %v2018_v4, %v2018_v4 }
0x1981   :  { %v2059_v8 = vsub.f32 %v2056_v14, %v2058_v53 }
0x1983   :  { %2061 = vrot.lane.b32.xlu0 %v2059_v8, %s3882_s14 }
0x1985   :  { %v1222_v7 = vpop.permute.xlu0 %1221 }
0x1986   :  { %v1224_v60 = vmul.f32 %v1222_v7, %v5133_v11  ;;  %v3282_v11 = vmul.f32 -1.442695, %v1262_v12 }
0x1988   :  { %v3281_v58 = vmul.f32 -1.442695, %v1224_v60 }
0x198a   :  { %3666 = vpow2.f32 %v3281_v58 }
0x198b   :  { %3668 = vpow2.f32 %v3259_v50 }
0x198c   :  { %3670 = vpow2.f32 %v3282_v11 }
0x198d   :  { %v5249_v39 = vpop.permute.xlu0 %2385 }
0x1990   :  { %v3667_v0 = vpop.eup %3666 }
0x1991   :  { %v3669_v34 = vpop.eup %3668  ;;  %v5266_v36 = vadd.f32 1.0, %v3667_v0 }
0x1992   :  { %v3671_v30 = vpop.eup %3670  ;;  %v5269_v27 = vadd.f32 1.0, %v3669_v34 }
0x1993   :  { %v5275_v47 = vadd.f32 1.0, %v3671_v30  ;;  %vm1234_vm10 = vweird.f32 %v5266_v36  ;;  %v1240_v40 = vand.u32 2147483648, %v5266_v36 }
0x1995   :  { %v483_v2 = vpop.permute.xlu0 %482  ;;  %vm1272_vm7 = vweird.f32 %v5275_v47 }
0x1996   :  { %v485_v29 = vmul.f32 %v483_v2, %v468_v59 }
0x1998   :  { %v3260_v13 = vmul.f32 -1.442695, %v485_v29 }
0x199a   :  { %3672 = vpow2.f32 %v3260_v13 }
0x199b   :  { %3674 = vrsqrt.f32 %v5264_v63 }
0x199c   :  { %3676 = vpow2.f32 %v3292_v41 }
0x199d   :  { %v1648_v20 = vpop.permute.xlu0 %1647  ;;  %3678 = vrcp.f32 %v5266_v36 }
0x199e   :  { %v1650_v62 = vmul.f32 %v1648_v20, %v1633_v22  ;;  %3680 = vrcp.f32 %v5269_v27  ;;  %v1238_v22 = vand.u32 2147483647, %v5266_v36 }
0x199f   :  { %3682 = vrcp.f32 %v5275_v47 }
0x19a0   :  { %v3673_v61 = vpop.eup %3672  ;;  %v3293_v52 = vmul.f32 -1.442695, %v1650_v62  ;;  %vm1239_vm6 = vcmp.eq.f32.partialorder %v1238_v22, 8.507059e+37 }
0x19a1   :  { %v5278_v43 = vpop.eup %3674  ;;  %v5284_v6 = vadd.f32 1.0, %v3673_v61 }
0x19a2   :  { %v3677_v42 = vpop.eup %3676  ;;  %3684 = vpow2.f32 %v3293_v52  ;;  %v2413_v49 = vmul.f32 %v5278_v43, %v5264_v63 }
0x19a3   :  { %v5292_v28 = vadd.f32 1.0, %v3677_v42  ;;  %3686 = vpow2.f32 %v3325_v21  ;;  %v1241_v21 = vor.u32 1.1754944e-38, %v1240_v40 }
0x19a4   :  { %3688 = vrcp.f32 %v5284_v6 }
0x19a5   :  { %v2812_v55 = vpop.permute.xlu0 %2811 }
0x19ed   :  { %v898_v23 = vpop.permute.xlu0 %897 }
0x19ee   :  { %v900_v38 = vsel %vm511_vm0, %v854_v32, %v898_v23  ;;  %v2796_v32 = vadd.f32 -0.8813736, %v5096_v17  ;;  %v5286_v17 = vpop.eup %3678 }
0x19ef   :  { %902 = vst.msk [vmem:[#allocation8 + $0x2] sm:$0x3] %vm513_vm1, %v900_v38  ;;  %v5296_v5 = vpop.eup %3680  ;;  %v1230_v16 = vmul.f32 %v5286_v17, %v5266_v36  ;;  %vm1235_vm2 = vweird.f32 %v5286_v17 }
0x19f0   :  { %v2797_v33 = vmul.f32 1.1715729, %v2796_v32  ;;  %v5301_v51 = vpop.eup %3682  ;;  %v453_v53 = vmul.f32 %v5296_v5, %v5269_v27  ;;  %vm458_vm9 = vweird.f32 %v5296_v5  ;;  %vm5336_vm13 = vmor %vm1234_vm10, %vm1235_vm2  ;;  %vm2419_vm2 = vweird.f32 %v5278_v43 }
0x19f1   :  { %v3685_v10 = vpop.eup %3684  ;;  %v1231_v14 = vsub.f32 1.0, %v1230_v16  ;;  %v1268_v7 = vmul.f32 %v5301_v51, %v5275_v47  ;;  %vm1273_vm4 = vweird.f32 %v5301_v51 }
0x19f2   :  { %v2814_v25 = vmul.f32 %v2812_v55, %v2797_v33  ;;  %v3687_v8 = vpop.eup %3686  ;;  %v5312_v20 = vadd.f32 1.0, %v3685_v10  ;;  %v454_v60 = vsub.f32 1.0, %v453_v53  ;;  %vm5368_vm10 = vmor %vm1272_vm7, %vm1273_vm4  ;;  %v461_v53 = vand.u32 2147483647, %v5269_v27 }
0x19f3   :  { %v5310_v2 = vpop.eup %3688  ;;  %v1232_v35 = vmul.f32 %v5286_v17, %v1231_v14  ;;  %v1269_v58 = vsub.f32 1.0, %v1268_v7  ;;  %v5319_v59 = vadd.f32 1.0, %v3687_v8  ;;  %v463_v14 = vand.u32 2147483648, %v5269_v27 }
0x19f4   :  { %v3326_v26 = vmul.f32 -1.442695, %v2814_v25  ;;  %v455_v29 = vmul.f32 %v5296_v5, %v454_v60  ;;  %v491_v56 = vmul.f32 %v5310_v2, %v5284_v6  ;;  %vm462_vm4 = vcmp.eq.f32.partialorder %v461_v53, 8.507059e+37 }
0x19f5   :  { %v2062_v37 = vpop.permute.xlu0 %2061  ;;  %v1233_v19 = vadd.f32 %v5286_v17, %v1232_v35  ;;  %v1270_v0 = vmul.f32 %v5301_v51, %v1269_v58  ;;  %v499_v35 = vand.u32 2147483647, %v5284_v6  ;;  %vm1622_vm7 = vweird.f32 %v5292_v28 }
0x19f6   :  { %v2064_v9 = vsel %vm511_vm0, %v2018_v4, %v2062_v37  ;;  %v2414_v4 = vmul.f32 %v5278_v43, %v2413_v49  ;;  %v492_v46 = vsub.f32 1.0, %v491_v56  ;;  %v1276_v49 = vand.u32 2147483647, %v5275_v47 }
0x19f7   :  { %2066 = vst.msk [vmem:[#allocation8 + $0x8] sm:$0x3] %vm513_vm1, %v2064_v9  ;;  %v1237_v52 = vsel %vm5336_vm13, %v5286_v17, %v1233_v19  ;;  %v1271_v42 = vadd.f32 %v5301_v51, %v1270_v0  ;;  %vm496_vm13 = vweird.f32 %v5310_v2  ;;  %v2408_v7 = vadd.f32 -0.8813736, %v5153_v1 }
0x19f8   :  { %v2415_v55 = vmul.f32 0.5, %v2414_v4  ;;  %v5352_v25 = vsel %vm1239_vm6, %v1241_v21, %v1237_v52  ;;  %vm500_vm6 = vcmp.eq.f32.partialorder %v499_v35, 8.507059e+37 }
0x19f9   :  { %v1282_v10 = vmul.f32 %v5352_v25, %v5352_v25 }
0x19fa   :  { %v2416_v12 = vsub.f32 1.5, %v2415_v55 }
0x1a02   :  { %v3144_v15 = vpop.f32.mrf.mxu3 }
0x1a03   :  { %v5281_v24 = vadd.f32 %v5078_v31, %v3144_v15  ;;  %v1278_v15 = vand.u32 2147483648, %v5275_v47  ;;  %v1275_v47 = vsel %vm5368_vm10, %v5301_v51, %v1271_v42  ;;  %vm1660_vm10 = vweird.f32 %v5312_v20 }
0x1a05   :  { %v3148_v48 = vmul.f32 0.3926991, %v5281_v24  ;;  %v3186_v44 = vmul.f32 0.5390121, %v5281_v24  ;;  %v1279_v8 = vor.u32 1.1754944e-38, %v1278_v15 }
0x1a07   :  { %v3149_v31 = vadd.f32 1.0, %v3148_v48  ;;  %v5294_v54 = vadd.f32 1.0, %v3186_v44  ;;  %v493_v48 = vmul.f32 %v5310_v2, %v492_v46 }
0x1a09   :  { %3690 = vrsqrt.f32 %v3149_v31  ;;  %vm3156_vm14 = vweird.f32 %v3149_v31  ;;  %vm3194_vm3 = vweird.f32 %v5294_v54  ;;  %v494_v55 = vadd.f32 %v5310_v2, %v493_v48 }
0x1a0a   :  { %3692 = vrsqrt.f32 %v5294_v54 }
0x1a0b   :  { %3694 = vrcp.f32 %v5292_v28 }
0x1a0c   :  { %3696 = vpow2.f32 %v3326_v26  ;;  %v2417_v26 = vmul.f32 %v5278_v43, %v2416_v12 }
0x1a0d   :  { %3698 = vrcp.f32 %v5312_v20 }
0x1a0e   :  { %3700 = vrcp.f32 %v5319_v59 }
0x1a0f   :  { %v3691_v57 = vpop.eup %3690 }
0x1a10   :  { %v3693_v45 = vpop.eup %3692  ;;  %v3151_v3 = vmul.f32 %v3691_v57, %v3149_v31  ;;  %vm3157_vm11 = vweird.f32 %v3691_v57  ;;  %v456_v31 = vadd.f32 %v5296_v5, %v455_v29 }
0x1a11   :  { %v5315_v18 = vpop.eup %3694  ;;  %v3189_v23 = vmul.f32 %v3693_v45, %v5294_v54  ;;  %vm3195_vm12 = vweird.f32 %v3693_v45  ;;  %vm3158_vm15 = vmor %vm3156_vm14, %vm3157_vm11  ;;  %vm457_vm11 = vweird.f32 %v5269_v27  ;;  %vm1277_vm14 = vcmp.eq.f32.partialorder %v1276_v49, 8.507059e+37 }
0x1a12   :  { %v3152_v38 = vmul.f32 %v3691_v57, %v3151_v3  ;;  %v3697_v50 = vpop.eup %3696  ;;  %v1618_v9 = vmul.f32 %v5315_v18, %v5292_v28  ;;  %vm3196_vm5 = vmor %vm3194_vm3, %vm3195_vm12  ;;  %v501_v27 = vand.u32 2147483648, %v5284_v6  ;;  %v1280_v3 = vsel %vm1277_vm14, %v1279_v8, %v1275_v47 }
0x1a13   :  { %v3190_v11 = vmul.f32 %v3693_v45, %v3189_v23  ;;  %v5332_v41 = vadd.f32 1.0, %v3697_v50  ;;  %v5340_v32 = vpop.eup %3698  ;;  %vm5382_vm12 = vmor %vm457_vm11, %vm458_vm9 }
0x1a14   :  { %v3153_v37 = vmul.f32 0.5, %v3152_v38  ;;  %v1656_v44 = vmul.f32 %v5340_v32, %v5312_v20  ;;  %v1619_v54 = vsub.f32 1.0, %v1618_v9  ;;  %v5361_v16 = vpop.eup %3700  ;;  %v460_v60 = vsel %vm5382_vm12, %v5296_v5, %v456_v31  ;;  %vm2420_vm9 = vmor %vm2418_vm8, %vm2419_vm2 }
0x1a15   :  { %v3191_v13 = vmul.f32 0.5, %v3190_v11  ;;  %3702 = vrcp.f32 %v5332_v41  ;;  %v2782_v23 = vmul.f32 %v5361_v16, %v5319_v59  ;;  %v2421_v58 = vsel %vm2420_vm9, %v5278_v43, %v2417_v26 }
0x1a16   :  { %v3154_v34 = vsub.f32 1.5, %v3153_v37  ;;  %v1283_v5 = vsub.f32 %v1280_v3, %v1282_v10  ;;  %v464_v38 = vor.u32 1.1754944e-38, %v463_v14  ;;  %v502_v43 = vor.u32 1.1754944e-38, %v501_v27 }
0x1a17   :  { %v3192_v30 = vsub.f32 1.5, %v3191_v13  ;;  %v2783_v29 = vsub.f32 1.0, %v2782_v23  ;;  %v1628_v37 = vand.u32 2147483648, %v5292_v28  ;;  %vm1661_vm2 = vweird.f32 %v5340_v32 }
0x1a18   :  { %v3155_v61 = vmul.f32 %v3691_v57, %v3154_v34  ;;  %v5412_v50 = vsel %vm462_vm4, %v464_v38, %v460_v60  ;;  %v1666_v34 = vand.u32 2147483648, %v5312_v20  ;;  %vm1662_vm11 = vmor %vm1660_vm10, %vm1661_vm2  ;;  %vm2787_vm14 = vweird.f32 %v5361_v16 }
0x1a19   :  { %v3193_v36 = vmul.f32 %v3693_v45, %v3192_v30  ;;  %v505_v19 = vmul.f32 %v5412_v50, %v5412_v50  ;;  %v2784_v30 = vmul.f32 %v5361_v16, %v2783_v29  ;;  %v1629_v62 = vor.u32 1.1754944e-38, %v1628_v37 }
0x1a1a   :  { %v3159_v33 = vsel %vm3158_vm15, %v3691_v57, %v3155_v61  ;;  %v1657_v57 = vsub.f32 1.0, %v1656_v44  ;;  %vm495_vm15 = vweird.f32 %v5284_v6  ;;  %vm2786_vm9 = vweird.f32 %v5319_v59 }
0x1a1b   :  { %3161 = vrot.lane.b32.xlu2 %v3159_v33, %s3888_s7  ;;  %v3197_v17 = vsel %vm3196_vm5, %v3693_v45, %v3193_v36  ;;  %v5388_v51 = vpop.eup %3702  ;;  %v1620_v45 = vmul.f32 %v5315_v18, %v1619_v54  ;;  %vm497_vm3 = vmor %vm495_vm15, %vm496_vm13  ;;  %vm1623_vm5 = vweird.f32 %v5315_v18  ;;  %v2785_v15 = vadd.f32 %v5361_v16, %v2784_v30 }
0x1a1c   :  { %3199 = vrot.lane.b32.xlu1 %v3197_v17, %s3888_s7  ;;  %v498_v63 = vsel %vm497_vm3, %v5310_v2, %v494_v55  ;;  %v1658_v12 = vmul.f32 %v5340_v32, %v1657_v57  ;;  %v2820_v6 = vmul.f32 %v5388_v51, %v5332_v41  ;;  %v1626_v2 = vand.u32 2147483647, %v5292_v28  ;;  %vm5421_vm8 = vmor %vm1622_vm7, %vm1623_vm5 }
0x1a1d   :  { %v1621_v11 = vadd.f32 %v5315_v18, %v1620_v45  ;;  %v503_v56 = vsel %vm500_vm6, %v502_v43, %v498_v63  ;;  %v1664_v28 = vand.u32 2147483647, %v5312_v20  ;;  %v2792_v36 = vand.u32 2147483648, %v5319_v59  ;;  %vm2788_vm3 = vmor %vm2786_vm9, %vm2787_vm14 }
0x1a1e   :  { %v1659_v13 = vadd.f32 %v5340_v32, %v1658_v12  ;;  %v2821_v40 = vsub.f32 1.0, %v2820_v6  ;;  %v506_v22 = vsub.f32 %v503_v56, %v505_v19  ;;  %vm1627_vm12 = vcmp.eq.f32.partialorder %v1626_v2, 8.507059e+37 }
0x1a1f   :  { %v1625_v0 = vsel %vm5421_vm8, %v5315_v18, %v1621_v11  ;;  %v1667_v18 = vor.u32 1.1754944e-38, %v1666_v34  ;;  %vm1665_vm13 = vcmp.eq.f32.partialorder %v1664_v28, 8.507059e+37  ;;  %vm2825_vm15 = vweird.f32 %v5388_v51 }
0x1a20   :  { %v1663_v46 = vsel %vm1662_vm11, %v5340_v32, %v1659_v13  ;;  %v2822_v61 = vmul.f32 %v5388_v51, %v2821_v40  ;;  %v5437_v52 = vsel %vm1627_vm12, %v1629_v62, %v1625_v0  ;;  %v2790_v32 = vand.u32 2147483647, %v5319_v59 }
0x1a21   :  { %v1668_v20 = vsel %vm1665_vm13, %v1667_v18, %v1663_v46  ;;  %v1670_v21 = vmul.f32 %v5437_v52, %v5437_v52  ;;  %v2830_v42 = vand.u32 2147483648, %v5332_v41  ;;  %v2789_v48 = vsel %vm2788_vm3, %v5361_v16, %v2785_v15 }
0x1a22   :  { %v2823_v33 = vadd.f32 %v5388_v51, %v2822_v61  ;;  %vm2824_vm4 = vweird.f32 %v5332_v41  ;;  %v2828_v44 = vand.u32 2147483647, %v5332_v41  ;;  %v2793_v49 = vor.u32 1.1754944e-38, %v2792_v36 }
0x1a23   :  { %2423 = vrot.lane.b32.xlu2 %v2421_v58, %s3888_s7  ;;  %v1671_v17 = vsub.f32 %v1668_v20, %v1670_v21  ;;  %vm2826_vm5 = vmor %vm2824_vm4, %vm2825_vm15  ;;  %vm2791_vm6 = vcmp.eq.f32.partialorder %v2790_v32, 8.507059e+37  ;;  %v2831_v54 = vor.u32 1.1754944e-38, %v2830_v42  ;;  %v2388_v16 = vmul.f32 %v5249_v39, %v5153_v1 }
0x1a24   :  { %1285 = vrot.lane.b32.xlu1 %v1283_v5, %s3882_s14  ;;  %v2827_v59 = vsel %vm2826_vm5, %v5388_v51, %v2823_v33  ;;  %v2794_v31 = vsel %vm2791_vm6, %v2793_v49, %v2789_v48  ;;  %vm2829_vm7 = vcmp.eq.f32.partialorder %v2828_v44, 8.507059e+37  ;;  %v2409_v57 = vmul.f32 1.1715729, %v2408_v7 }
0x1a25   :  { %v2832_v26 = vsel %vm2829_vm7, %v2831_v54, %v2827_v59  ;;  %v2834_v4 = vmul.f32 %v2794_v31, %v2794_v31  ;;  %v3314_v10 = vmul.f32 -1.442695, %v2388_v16  ;;  %v3184_v63 = vadd.f32 -0.8813736, %v5281_v24 }
0x1a27   :  { %v2835_v47 = vsub.f32 %v2832_v26, %v2834_v4  ;;  %3704 = vpow2.f32 %v3314_v10  ;;  %v3185_v43 = vmul.f32 1.1715729, %v3184_v63 }
0x1a2b   :  { %508 = vrot.lane.b32.xlu2 %v506_v22, %s3882_s14 }
0x1a2d   :  { %v3705_v41 = vpop.eup %3704 }
0x1a2e   :  { %v2392_v14 = vadd.f32 1.0, %v3705_v41 }
0x1a30   :  { %3706 = vrcp.f32 %v2392_v14  ;;  %v2402_v19 = vand.u32 2147483647, %v2392_v14  ;;  %v2404_v9 = vand.u32 2147483648, %v2392_v14  ;;  %vm2398_vm2 = vweird.f32 %v2392_v14 }
0x1a32   :  { %vm2403_vm11 = vcmp.eq.f32.partialorder %v2402_v19, 8.507059e+37  ;;  %v2405_v28 = vor.u32 1.1754944e-38, %v2404_v9 }
0x1a33   :  { %1673 = vrot.lane.b32.xlu2 %v1671_v17, %s3882_s14 }
0x1a36   :  { %v3707_v45 = vpop.eup %3706 }
0x1a37   :  { %v2394_v3 = vmul.f32 %v3707_v45, %v2392_v14  ;;  %vm2399_vm8 = vweird.f32 %v3707_v45 }
0x1a38   :  { %vm5469_vm10 = vmor %vm2398_vm2, %vm2399_vm8 }
0x1a39   :  { %v2395_v1 = vsub.f32 1.0, %v2394_v3 }
0x1a3b   :  { %2837 = vrot.lane.b32.xlu2 %v2835_v47, %s3882_s14  ;;  %v2396_v12 = vmul.f32 %v3707_v45, %v2395_v1 }
0x1a3d   :  { %v2397_v56 = vadd.f32 %v3707_v45, %v2396_v12 }
0x1a3f   :  { %v2401_v0 = vsel %vm5469_vm10, %v3707_v45, %v2397_v56 }
0x1a40   :  { %v2406_v20 = vsel %vm2403_vm11, %v2405_v28, %v2401_v0 }
0x1a41   :  { %v2446_v48 = vmul.f32 %v2406_v20, %v2406_v20 }
0x1a75   :  { %v3162_v53 = vpop.permute.xlu2 %3161 }
0x1a76   :  { %v3164_v8 = vmul.f32 %v3162_v53, %v5281_v24 }
0x1a78   :  { %v3336_v55 = vmul.f32 -1.442695, %v3164_v8 }
0x1a7a   :  { %3708 = vpow2.f32 %v3336_v55 }
0x1a7d   :  { %v2424_v51 = vpop.permute.xlu2 %2423 }
0x1a7e   :  { %v2426_v60 = vmul.f32 %v2424_v51, %v2409_v57 }
0x1a80   :  { %v3315_v27 = vmul.f32 -1.442695, %v2426_v60  ;;  %v3709_v39 = vpop.eup %3708 }
0x1a81   :  { %v5462_v5 = vadd.f32 1.0, %v3709_v39 }
0x1a82   :  { %3710 = vpow2.f32 %v3315_v27 }
0x1a83   :  { %v3180_v54 = vand.u32 2147483648, %v5462_v5  ;;  %vm3174_vm3 = vweird.f32 %v5462_v5  ;;  %v3178_v26 = vand.u32 2147483647, %v5462_v5 }
0x1a85   :  { %v509_v35 = vpop.permute.xlu2 %508  ;;  %v3181_v10 = vor.u32 1.1754944e-38, %v3180_v54  ;;  %vm3179_vm5 = vcmp.eq.f32.partialorder %v3178_v26, 8.507059e+37 }
0x1a86   :  { %v512_v23 = vsel %vm511_vm0, %v5412_v50, %v509_v35 }
0x1a87   :  { %514 = vst.msk [vmem:[#allocation8] sm:$0x3] %vm513_vm1, %v512_v23 }
0x1a88   :  { %v3711_v58 = vpop.eup %3710 }
0x1a89   :  { %v2430_v38 = vadd.f32 1.0, %v3711_v58 }
0x1a8b   :  { %3712 = vrcp.f32 %v2430_v38  ;;  %v2442_v30 = vand.u32 2147483648, %v2430_v38  ;;  %v2440_v18 = vand.u32 2147483647, %v2430_v38  ;;  %vm2436_vm13 = vweird.f32 %v2430_v38 }
0x1a8c   :  { %3714 = vrcp.f32 %v5462_v5 }
0x1a8d   :  { %v1674_v6 = vpop.permute.xlu2 %1673  ;;  %v2443_v32 = vor.u32 1.1754944e-38, %v2442_v30  ;;  %vm2441_vm9 = vcmp.eq.f32.partialorder %v2440_v18, 8.507059e+37 }
0x1a8e   :  { %v1676_v11 = vsel %vm511_vm0, %v5437_v52, %v1674_v6  ;;  %v3200_v29 = vpop.permute.xlu1 %3199 }
0x1a8f   :  { %1678 = vst.msk [vmem:[#allocation8 + $0x6] sm:$0x3] %vm513_vm1, %v1676_v11  ;;  %v3202_v50 = vmul.f32 %v3200_v29, %v3185_v43 }
0x1a91   :  { %v3713_v2 = vpop.eup %3712  ;;  %v3337_v37 = vmul.f32 -1.442695, %v3202_v50 }
0x1a92   :  { %v3715_v24 = vpop.eup %3714  ;;  %v2432_v13 = vmul.f32 %v3713_v2, %v2430_v38  ;;  %vm2437_vm12 = vweird.f32 %v3713_v2 }
0x1a93   :  { %3716 = vpow2.f32 %v3337_v37  ;;  %v3170_v62 = vmul.f32 %v3715_v24, %v5462_v5  ;;  %vm2438_vm14 = vmor %vm2436_vm13, %vm2437_vm12  ;;  %vm3175_vm15 = vweird.f32 %v3715_v24 }
0x1a94   :  { %v2433_v34 = vsub.f32 1.0, %v2432_v13  ;;  %vm3176_vm4 = vmor %vm3174_vm3, %vm3175_vm15 }
0x1a95   :  { %v2838_v22 = vpop.permute.xlu2 %2837  ;;  %v3171_v33 = vsub.f32 1.0, %v3170_v62 }
0x1a96   :  { %v2840_v46 = vsel %vm511_vm0, %v2794_v31, %v2838_v22  ;;  %v1286_v61 = vpop.permute.xlu1 %1285  ;;  %v2434_v52 = vmul.f32 %v3713_v2, %v2433_v34 }
0x1a97   :  { %2842 = vst.msk [vmem:[#allocation8 + $0xc] sm:$0x3] %vm513_vm1, %v2840_v46  ;;  %v1288_v15 = vsel %vm511_vm0, %v5352_v25, %v1286_v61  ;;  %v3172_v59 = vmul.f32 %v3715_v24, %v3171_v33 }
0x1a98   :  { %1290 = vst.msk [vmem:[#allocation8 + $0x4] sm:$0x3] %vm513_vm1, %v1288_v15  ;;  %v2435_v36 = vadd.f32 %v3713_v2, %v2434_v52 }
0x1a99   :  { %v3717_v21 = vpop.eup %3716  ;;  %v3173_v25 = vadd.f32 %v3715_v24, %v3172_v59 }
0x1a9a   :  { %v3206_v42 = vadd.f32 1.0, %v3717_v21  ;;  %v2439_v17 = vsel %vm2438_vm14, %v3713_v2, %v2435_v36 }
0x1a9b   :  { %v2444_v44 = vsel %vm2441_vm9, %v2443_v32, %v2439_v17  ;;  %v3177_v47 = vsel %vm3176_vm4, %v3715_v24, %v3173_v25 }
0x1a9c   :  { %3718 = vrcp.f32 %v3206_v42  ;;  %v2447_v49 = vsub.f32 %v2444_v44, %v2446_v48  ;;  %v3218_v41 = vand.u32 2147483648, %v3206_v42  ;;  %v3216_v14 = vand.u32 2147483647, %v3206_v42 }
0x1a9d   :  { %v3182_v8 = vsel %vm3179_vm5, %v3181_v10, %v3177_v47  ;;  %vm3212_vm7 = vweird.f32 %v3206_v42 }
0x1a9e   :  { %2449 = vrot.lane.b32.xlu1 %v2447_v49, %s3882_s14  ;;  %v3219_v55 = vor.u32 1.1754944e-38, %v3218_v41  ;;  %vm3217_vm2 = vcmp.eq.f32.partialorder %v3216_v14, 8.507059e+37  ;;  %v3222_v51 = vmul.f32 %v3182_v8, %v3182_v8 }
0x1aa2   :  { %v3719_v31 = vpop.eup %3718 }
0x1aa3   :  { %v3208_v4 = vmul.f32 %v3719_v31, %v3206_v42  ;;  %vm3213_vm6 = vweird.f32 %v3719_v31 }
0x1aa4   :  { %vm3214_vm8 = vmor %vm3212_vm7, %vm3213_vm6 }
0x1aa5   :  { %v3209_v16 = vsub.f32 1.0, %v3208_v4 }
0x1aa7   :  { %v3210_v53 = vmul.f32 %v3719_v31, %v3209_v16 }
0x1aa9   :  { %v3211_v7 = vadd.f32 %v3719_v31, %v3210_v53 }
0x1aab   :  { %v3215_v57 = vsel %vm3214_vm8, %v3719_v31, %v3211_v7 }
0x1aac   :  { %v3220_v60 = vsel %vm3217_vm2, %v3219_v55, %v3215_v57 }
0x1aad   :  { %v3223_v27 = vsub.f32 %v3220_v60, %v3222_v51 }
0x1aaf   :  { %3225 = vrot.lane.b32.xlu0 %v3223_v27, %s3882_s14 }
0x1b10   :  { %v2450_v45 = vpop.permute.xlu1 %2449 }
0x1b11   :  { %v2452_v3 = vsel %vm511_vm0, %v2406_v20, %v2450_v45 }
0x1b12   :  { %2454 = vst.msk [vmem:[#allocation8 + $0xa] sm:$0x3] %vm513_vm1, %v2452_v3 }
0x1b21   :  { %v3226_v39 = vpop.permute.xlu0 %3225 }
0x1b22   :  { %v3228_v35 = vsel %vm511_vm0, %v3182_v8, %v3226_v39 }
0x1b23   :  { %3230 = vst.msk [vmem:[#allocation8 + $0xe] sm:$0x3] %vm513_vm1, %v3228_v35 }
0x1b24   :  { %3243 = dma.vmem_to_hbm [thread:$0]  %s3236_s22, 256, %s3238_s1, [#allocation4], %s3885_s23, %s3885_s23, %s3890_s26  }
0x1b25   :  { %3878 = dma.done.wait [#allocation4], 256  }
0x1b26   :  { %3879 = vsyncadd [#allocation4], 4294967040 }
0x1b27   :  { %3248 = vsyncpa [#allocation3], 1 }
0x1b28   :  { %3249 = vsyncpa [#allocation6], 1 }
0x1b29   :  { %3250 = vsyncpa [#allocation4], 1 }

</bundles_post_ra>
